<compile_context>
chip_gen: v7x
topology: tpu7x:2x2x1
jax: 0.10.0
libtpu: 0.0.40
codegen_flags: <defaults>
</compile_context>

<pallas_src>
import functools

import numpy as np
import jax
import jax.numpy as jnp
from jax.experimental import pallas as pl
from jax.experimental.pallas import tpu as pltpu

EPS = 1e-5


# ---------------------------------------------------------------------------
# Geometry helpers
# ---------------------------------------------------------------------------
def _pad8(c):
    return max(8, -(-c // 8) * 8)


def _geom(N, D, H, W):
    Dp, Hp, Wp = D + 2, H + 2, W + 2
    P = N * Dp * Hp * Wp
    c = Hp * Wp + Wp + 1                    # max |flat tap offset|
    c_al = -(-c // 128) * 128               # lane-aligned flat halo
    Pe = P + 2 * c_al
    return Dp, Hp, Wp, P, c, c_al, Pe


@functools.lru_cache(maxsize=None)
def _interior_mask(N, D, H, W):
    """(1, P) f32: 1.0 on interior (non-halo) padded-flat columns."""
    Dp, Hp, Wp = D + 2, H + 2, W + 2
    m = np.zeros((N, Dp, Hp, Wp), np.float32)
    m[:, 1:1 + D, 1:1 + H, 1:1 + W] = 1.0
    return jnp.asarray(m.reshape(1, -1))


def _full_spec(shape):
    zeros = (0,) * len(shape)
    return pl.BlockSpec(shape, lambda i, _z=zeros: _z)


# ---------------------------------------------------------------------------
# Pallas kernels
# ---------------------------------------------------------------------------
def _offsets(c_al, hpwp, wp):
    return tuple(c_al + (kd - 1) * hpwp + (kh - 1) * wp + (kw - 1)
                 for kd in range(3) for kh in range(3) for kw in range(3))


@functools.lru_cache(maxsize=None)
def _make_residual_kernel(cinb, cmidb, coutb, P, c_al, hpwp, wp, proj):
    """Fully fused stride-1 residual block: conv1+bn1+relu -> conv2+bn2+skip+relu."""
    offs = _offsets(c_al, hpwp, wp)

    def build_and_dot(src_ref, a_ref, w_ref, cin):
        # im2col slab built ONCE (27 aligned copy passes), then one K=27*cin GEMM.
        for t, off in enumerate(offs):
            a_ref[t * cin:(t + 1) * cin, :] = src_ref[:, off:off + P]
        return jnp.dot(w_ref[...], a_ref[...],
                       preferred_element_type=jnp.float32)

    def body(x_ref, w1_ref, b1_ref, w2_ref, b2_ref, ws_ref, mask_ref,
             o_ref, a1_ref, y1_ref, a2_ref):
        m = mask_ref[...]
        # conv1 + bn1 + relu; halo columns forced to zero so conv2 sees padding.
        acc1 = build_and_dot(x_ref, a1_ref, w1_ref, cinb)
        y1 = jnp.maximum(acc1 + b1_ref[...], 0.0) * m
        y1_ref[:, :c_al] = jnp.zeros((cmidb, c_al), jnp.float32)
        y1_ref[:, c_al + P:] = jnp.zeros((cmidb, c_al), jnp.float32)
        y1_ref[:, c_al:c_al + P] = y1
        # conv2 + bn2 + skip + relu
        acc2 = build_and_dot(y1_ref, a2_ref, w2_ref, cmidb) + b2_ref[...]
        xc = x_ref[:, c_al:c_al + P]
        if proj:
            acc2 = acc2 + jnp.dot(ws_ref[...], xc,
                                  preferred_element_type=jnp.float32)
        else:
            acc2 = acc2 + xc
        out = jnp.maximum(acc2, 0.0) * m
        o_ref[:, :c_al] = jnp.zeros((coutb, c_al), jnp.float32)
        o_ref[:, c_al + P:] = jnp.zeros((coutb, c_al), jnp.float32)
        o_ref[:, c_al:c_al + P] = out

    if proj:
        def kernel(x_ref, w1_ref, b1_ref, w2_ref, b2_ref, ws_ref, mask_ref,
                   o_ref, a1_ref, y1_ref, a2_ref):
            body(x_ref, w1_ref, b1_ref, w2_ref, b2_ref, ws_ref, mask_ref,
                 o_ref, a1_ref, y1_ref, a2_ref)
    else:
        def kernel(x_ref, w1_ref, b1_ref, w2_ref, b2_ref, mask_ref,
                   o_ref, a1_ref, y1_ref, a2_ref):
            body(x_ref, w1_ref, b1_ref, w2_ref, b2_ref, None, mask_ref,
                 o_ref, a1_ref, y1_ref, a2_ref)
    return kernel


@functools.lru_cache(maxsize=None)
def _make_conv_kernel(cinb, coutb, P, c_al, hpwp, wp, skip_mode):
    """Single conv3x3x3 + bias (+ optional fused 1x1x1 projected skip) + relu."""
    offs = _offsets(c_al, hpwp, wp)

    def compute(x_ref, w_ref, b_ref, s_ref, ws_ref, mask_ref, o_ref, a_ref):
        for t, off in enumerate(offs):
            a_ref[t * cinb:(t + 1) * cinb, :] = x_ref[:, off:off + P]
        acc = jnp.dot(w_ref[...], a_ref[...],
                      preferred_element_type=jnp.float32) + b_ref[...]
        if skip_mode == "proj":
            acc = acc + jnp.dot(ws_ref[...], s_ref[:, c_al:c_al + P],
                                preferred_element_type=jnp.float32)
        out = jnp.maximum(acc, 0.0) * mask_ref[...]
        o_ref[:, :c_al] = jnp.zeros((coutb, c_al), jnp.float32)
        o_ref[:, c_al + P:] = jnp.zeros((coutb, c_al), jnp.float32)
        o_ref[:, c_al:c_al + P] = out

    if skip_mode == "proj":
        def kernel(x_ref, w_ref, b_ref, s_ref, ws_ref, mask_ref, o_ref, a_ref):
            compute(x_ref, w_ref, b_ref, s_ref, ws_ref, mask_ref, o_ref, a_ref)
    else:
        def kernel(x_ref, w_ref, b_ref, mask_ref, o_ref, a_ref):
            compute(x_ref, w_ref, b_ref, None, None, mask_ref, o_ref, a_ref)
    return kernel


def _add_kernel(a_ref, b_ref, o_ref):
    o_ref[...] = a_ref[...] + b_ref[...]


# ---------------------------------------------------------------------------
# Pallas-call wrappers
# ---------------------------------------------------------------------------
_ARB = pltpu.CompilerParams(dimension_semantics=("arbitrary",))


def residual_fused_call(x_f, p, geom):
    N, D, H, W = geom
    _, Hp, Wp, P, _, c_al, Pe = _geom(N, D, H, W)
    cinb = x_f.shape[0]
    cmidb = p['w1'].shape[0]
    coutb = p['w2'].shape[0]
    proj = 'wskipT' in p
    if not proj:
        assert cinb == coutb
    mask = _interior_mask(N, D, H, W)
    args = [x_f, p['w1'], p['b1'], p['w2'], p['b2']]
    if proj:
        args.append(p['wskipT'])
    args.append(mask)
    kernel = _make_residual_kernel(cinb, cmidb, coutb, P, c_al, Hp * Wp, Wp, proj)
    return pl.pallas_call(
        kernel,
        out_shape=jax.ShapeDtypeStruct((coutb, Pe), jnp.float32),
        grid=(1,),
        in_specs=[_full_spec(a.shape) for a in args],
        out_specs=_full_spec((coutb, Pe)),
        scratch_shapes=[
            pltpu.VMEM((27 * cinb, P), jnp.float32),   # im2col slab for conv1
            pltpu.VMEM((cmidb, Pe), jnp.float32),      # y1 in F format (VMEM only)
            pltpu.VMEM((27 * cmidb, P), jnp.float32),  # im2col slab for conv2
        ],
        compiler_params=_ARB,
    )(*args)


def conv_call(x_f, w, b, geom, *, skip_f=None, wskipT=None):
    N, D, H, W = geom
    _, Hp, Wp, P, _, c_al, Pe = _geom(N, D, H, W)
    cinb = x_f.shape[0]
    coutb = w.shape[0]
    mask = _interior_mask(N, D, H, W)
    skip_mode = None
    args = [x_f, w, b]
    if skip_f is not None:
        skip_mode = "proj"
        args += [skip_f, wskipT]
    args.append(mask)
    kernel = _make_conv_kernel(cinb, coutb, P, c_al, Hp * Wp, Wp, skip_mode)
    return pl.pallas_call(
        kernel,
        out_shape=jax.ShapeDtypeStruct((coutb, Pe), jnp.float32),
        grid=(1,),
        in_specs=[_full_spec(a.shape) for a in args],
        out_specs=_full_spec((coutb, Pe)),
        scratch_shapes=[pltpu.VMEM((27 * cinb, P), jnp.float32)],
        compiler_params=_ARB,
    )(*args)


def add_pallas(a, b):
    """Final up1 + up2 elementwise add, lane-dense (N*D, H*W*C) layout."""
    N, D, H, W, C = a.shape
    a2 = a.reshape(N * D, H * W * C)
    b2 = b.reshape(N * D, H * W * C)
    out = pl.pallas_call(
        _add_kernel,
        out_shape=jax.ShapeDtypeStruct(a2.shape, jnp.float32),
        grid=(1,),
        in_specs=[_full_spec(a2.shape), _full_spec(b2.shape)],
        out_specs=_full_spec(a2.shape),
        compiler_params=_ARB,
    )(a2, b2)
    return out.reshape(a.shape)


# ---------------------------------------------------------------------------
# F-format <-> dense conversion (XLA glue, only at level boundaries)
# ---------------------------------------------------------------------------
def dense_to_f(x, cb=None):
    """NDHWC -> channels-first padded-flat F format (Cb, Pe), zeros in halo."""
    N, D, H, W, C = x.shape
    if cb is None:
        cb = _pad8(C)
    _, _, _, P, _, c_al, _ = _geom(N, D, H, W)
    xp = jnp.pad(x, ((0, 0), (1, 1), (1, 1), (1, 1), (0, cb - C)))
    xf = jnp.transpose(xp, (4, 0, 1, 2, 3)).reshape(cb, P)
    return jnp.pad(xf, ((0, 0), (c_al, c_al)))


def f_to_dense(xf, geom, c_real=None):
    """F format -> NDHWC dense (padded channels kept unless c_real given)."""
    N, D, H, W = geom
    Cb = xf.shape[0]
    Dp, Hp, Wp, P, _, c_al, _ = _geom(N, D, H, W)
    v = xf[:, c_al:c_al + P].reshape(Cb, N, Dp, Hp, Wp)
    v = v[:, :, 1:1 + D, 1:1 + H, 1:1 + W]
    v = jnp.transpose(v, (1, 2, 3, 4, 0))
    if c_real is not None:
        v = v[..., :c_real]
    return v


def _decimate2_f(xf, geom):
    """Stride-2 decimation of an F-format tensor -> F format at half res."""
    dense = f_to_dense(xf, geom)
    dense = dense[:, ::2, ::2, ::2, :]
    return dense_to_f(dense, cb=dense.shape[-1])


def upsample2_nearest(x):
    """nn.Upsample(scale_factor=2), nearest, NDHWC; single broadcast+reshape."""
    # TODO(synk): fuse this x2 nearest upsample into the add kernel via
    # BlockSpec index_map floor-division; the in-lane W/C interleave has no
    # robust Mosaic lowering here, so it stays as XLA-side broadcast glue.
    N, D, H, W, C = x.shape
    x = x[:, :, None, :, None, :, None, :]
    x = jnp.broadcast_to(x, (N, D, 2, H, 2, W, 2, C))
    return x.reshape(N, 2 * D, 2 * H, 2 * W, C)


# ---------------------------------------------------------------------------
# Parameter construction (deterministic, mirrors the PyTorch module shapes)
# ---------------------------------------------------------------------------
def _bn_fold(key, c):
    k1, k2, k3, k4 = jax.random.split(key, 4)
    gamma = 1.0 + 0.1 * jax.random.normal(k1, (c,), jnp.float32)
    beta = 0.1 * jax.random.normal(k2, (c,), jnp.float32)
    mean = 0.1 * jax.random.normal(k3, (c,), jnp.float32)
    var = 1.0 + 0.1 * jax.random.uniform(k4, (c,), jnp.float32)
    scale = gamma / jnp.sqrt(var + EPS)
    bias = beta - mean * scale
    return scale, bias


def _fold_conv_weight(w, scale, cinb, coutb):
    """(3,3,3,Cin,Cout) * per-Cout BN scale -> GEMM weight (Coutb, 27*Cinb)."""
    cin, cout = w.shape[3], w.shape[4]
    wf = (w * scale[None, None, None, None, :]).reshape(27, cin, cout)
    wt = jnp.transpose(wf, (2, 0, 1))                        # (cout, 27, cin)
    full = jnp.zeros((coutb, 27, cinb), jnp.float32).at[:cout, :, :cin].set(wt)
    return full.reshape(coutb, 27 * cinb)


def _pad_bias(b, cb):
    return jnp.zeros((cb, 1), jnp.float32).at[:b.shape[0], 0].set(b)


def init_residual(key, cin, cout, stride=1):
    cinb, coutb = _pad8(cin), _pad8(cout)
    k1, k2, k3, k4, k5, k6 = jax.random.split(key, 6)
    p = {'stride': stride}
    w1 = jax.random.normal(k1, (3, 3, 3, cin, cout), jnp.float32) \
        * (1.0 / np.sqrt(27.0 * cin))
    s1, b1 = _bn_fold(k2, cout)
    p['w1'] = _fold_conv_weight(w1, s1, cinb, coutb)
    p['b1'] = _pad_bias(b1, coutb)
    w2 = jax.random.normal(k3, (3, 3, 3, cout, cout), jnp.float32) \
        * (1.0 / np.sqrt(27.0 * cout))
    s2, b2 = _bn_fold(k4, cout)
    p['w2'] = _fold_conv_weight(w2, s2, coutb, coutb)
    if stride != 1 or cin != cout:
        wskip = jax.random.normal(k5, (cin, cout), jnp.float32) \
            * (1.0 / np.sqrt(cin))
        ss, bs = _bn_fold(k6, cout)
        wsT = jnp.transpose(wskip * ss[None, :])             # (cout, cin)
        p['wskipT'] = jnp.zeros((coutb, cinb), jnp.float32).at[:cout, :cin].set(wsT)
        p['b2'] = _pad_bias(b2 + bs, coutb)                  # bn2 bias + skip bn bias
    else:
        p['b2'] = _pad_bias(b2, coutb)
    return p


def init_make_layer(key, cin, cout, modules):
    keys = jax.random.split(key, modules)
    layers = [init_residual(keys[0], cin, cout, stride=1)]
    for i in range(modules - 1):
        layers.append(init_residual(keys[i + 1], cout, cout, stride=1))
    return layers


def init_make_hg_layer(key, cin, cout, modules):
    keys = jax.random.split(key, modules)
    layers = [init_residual(keys[0], cin, cout, stride=2)]
    for i in range(modules - 1):
        layers.append(init_residual(keys[i + 1], cout, cout, stride=1))
    return layers


def init_make_layer_revr(key, cin, cout, modules):
    keys = jax.random.split(key, modules)
    layers = []
    for i in range(modules - 1):
        layers.append(init_residual(keys[i], cin, cin, stride=1))
    layers.append(init_residual(keys[modules - 1], cin, cout, stride=1))
    return layers


def init_kp_module(key, n, dims, modules):
    curr_mod, next_mod = modules[0], modules[1]
    curr_dim, next_dim = dims[0], dims[1]
    k0, k1, k2, k3, k4 = jax.random.split(key, 5)
    p = {'n': n}
    p['up1'] = init_make_layer(k0, curr_dim, curr_dim, curr_mod)
    p['low1'] = init_make_hg_layer(k1, curr_dim, next_dim, curr_mod)
    if n > 1:
        p['low2'] = init_kp_module(k2, n - 1, dims[1:], modules[1:])
    else:
        p['low2'] = init_make_layer(k2, next_dim, next_dim, next_mod)
    p['low3'] = init_make_layer_revr(k3, next_dim, curr_dim, curr_mod)
    # self.channels = nn.Conv3d(1, 7, kernel_size=1): unused in forward(),
    # parameters kept only for structural fidelity.
    p['channels_w'] = jax.random.normal(k4, (1, 1, 1, 1, 7), jnp.float32)
    p['channels_b'] = jnp.zeros((7,), jnp.float32)
    return p


# ---------------------------------------------------------------------------
# Forward pass (Pallas-backed)
# ---------------------------------------------------------------------------
def residual_forward(x_f, p, geom):
    if p['stride'] == 1:
        return residual_fused_call(x_f, p, geom), geom
    # stride-2 block: conv1 on the stride-1 grid, decimate, conv2 + proj skip.
    # TODO(synk): compute only the strided output columns in-kernel (8x saving).
    N, D, H, W = geom
    assert D % 2 == 0 and H % 2 == 0 and W % 2 == 0
    y1_full = conv_call(x_f, p['w1'], p['b1'], geom)
    geom_half = (N, D // 2, H // 2, W // 2)
    y1_half = _decimate2_f(y1_full, geom)
    x_half = _decimate2_f(x_f, geom)
    out = conv_call(y1_half, p['w2'], p['b2'], geom_half,
                    skip_f=x_half, wskipT=p['wskipT'])
    return out, geom_half


def layer_forward(x_f, layers, geom):
    for rp in layers:
        x_f, geom = residual_forward(x_f, rp, geom)
    return x_f, geom


def kp_forward_f(x_f, p, geom):
    up1_f, _ = layer_forward(x_f, p['up1'], geom)
    low1_f, geom_half = layer_forward(x_f, p['low1'], geom)
    if p['n'] > 1:
        low2_f = kp_forward_f(low1_f, p['low2'], geom_half)
    else:
        low2_f, _ = layer_forward(low1_f, p['low2'], geom_half)
    low3_f, _ = layer_forward(low2_f, p['low3'], geom_half)
    # combine: up1 + nearest-upsample(low3)
    up1 = f_to_dense(up1_f, geom)
    low3 = f_to_dense(low3_f, geom_half)
    up2 = upsample2_nearest(low3)
    out = add_pallas(up1, up2)
    return dense_to_f(out, cb=out.shape[-1])


def kp_forward(x, p):
    """x: NDHWC float32.  Returns NDHWC float32 of the same shape."""
    N, D, H, W, C = x.shape
    geom = (N, D, H, W)
    x_f = dense_to_f(x)
    out_f = kp_forward_f(x_f, p, geom)
    return f_to_dense(out_f, geom, c_real=C)


# ---------------------------------------------------------------------------
if __name__ == "__main__":
    key = jax.random.PRNGKey(0)
    kx, kparam = jax.random.split(key)

    n = 2
    dims = [4, 8, 16]
    modules = [1, 1, 1]

    # Input: NDHWC = (batch=2, D=8, H=8, W=8, C=dims[0]=4)
    # (equivalent to PyTorch NCDHW (2, 4, 8, 8, 8))
    x = jax.random.normal(kx, (2, 8, 8, 8, dims[0]), jnp.float32)

    params = init_kp_module(kparam, n, dims, modules)
    out = kp_forward(x, params)
    out = jax.block_until_ready(out)

    assert out.shape == x.shape, out.shape
    assert jnp.all(jnp.isfinite(out))
    print("KERNEL_OK")
</pallas_src>

<mosaic_0001>
module attributes {stable_mosaic.version = 11 : i64} {
  func.func @kernel(%arg0: i32, %arg1: memref<8x2256xf32, #tpu.memory_space<vmem>>, %arg2: memref<8x216xf32, #tpu.memory_space<vmem>>, %arg3: memref<8x1xf32, #tpu.memory_space<vmem>>, %arg4: memref<8x216xf32, #tpu.memory_space<vmem>>, %arg5: memref<8x1xf32, #tpu.memory_space<vmem>>, %arg6: memref<1x2000xf32, #tpu.memory_space<vmem>>, %arg7: memref<8x2256xf32, #tpu.memory_space<vmem>>, %arg8: memref<216x2000xf32, #tpu.memory_space<vmem>>, %arg9: memref<8x2256xf32, #tpu.memory_space<vmem>>, %arg10: memref<216x2000xf32, #tpu.memory_space<vmem>>) attributes {dimension_semantics = [#tpu.dimension_semantics<arbitrary>], iteration_bounds = array<i64: 1>, scalar_prefetch = 0 : i64, scratch_operands = 3 : i64, tpu.core_type = #tpu.core_type<tc>, window_params = [{pipeline_mode = #tpu.pipeline_mode<synchronous>, transform_indices = @transform_0, window_bounds = array<i64: 8, 2256>}, {pipeline_mode = #tpu.pipeline_mode<synchronous>, transform_indices = @transform_1, window_bounds = array<i64: 8, 216>}, {pipeline_mode = #tpu.pipeline_mode<synchronous>, transform_indices = @transform_2, window_bounds = array<i64: 8, 1>}, {pipeline_mode = #tpu.pipeline_mode<synchronous>, transform_indices = @transform_3, window_bounds = array<i64: 8, 216>}, {pipeline_mode = #tpu.pipeline_mode<synchronous>, transform_indices = @transform_4, window_bounds = array<i64: 8, 1>}, {pipeline_mode = #tpu.pipeline_mode<synchronous>, transform_indices = @transform_5, window_bounds = array<i64: 1, 2000>}, {pipeline_mode = #tpu.pipeline_mode<synchronous>, transform_indices = @transform_6, window_bounds = array<i64: 8, 2256>}]} {
    %c0 = arith.constant 0 : index
    %c0_0 = arith.constant 0 : index
    %0 = vector.load %arg6[%c0, %c0_0] : memref<1x2000xf32, #tpu.memory_space<vmem>>, vector<1x2000xf32>
    %c0_1 = arith.constant 0 : index
    %c17 = arith.constant 17 : index
    %1 = vector.load %arg1[%c0_1, %c17] : memref<8x2256xf32, #tpu.memory_space<vmem>>, vector<8x2000xf32>
    %c0_2 = arith.constant 0 : index
    %c0_3 = arith.constant 0 : index
    %2 = vector.load %arg8[%c0_2, %c0_3] : memref<216x2000xf32, #tpu.memory_space<vmem>>, vector<8x2000xf32>
    tpu.vector_store %arg8[%c0_2, %c0_3], %1 {strides = array<i32>} : memref<216x2000xf32, #tpu.memory_space<vmem>>, vector<8x2000xf32>,
    %c0_4 = arith.constant 0 : index
    %c18 = arith.constant 18 : index
    %3 = vector.load %arg1[%c0_4, %c18] : memref<8x2256xf32, #tpu.memory_space<vmem>>, vector<8x2000xf32>
    %c8 = arith.constant 8 : index
    %c0_5 = arith.constant 0 : index
    %4 = vector.load %arg8[%c8, %c0_5] : memref<216x2000xf32, #tpu.memory_space<vmem>>, vector<8x2000xf32>
    tpu.vector_store %arg8[%c8, %c0_5], %3 {strides = array<i32>} : memref<216x2000xf32, #tpu.memory_space<vmem>>, vector<8x2000xf32>,
    %c0_6 = arith.constant 0 : index
    %c19 = arith.constant 19 : index
    %5 = vector.load %arg1[%c0_6, %c19] : memref<8x2256xf32, #tpu.memory_space<vmem>>, vector<8x2000xf32>
    %c16 = arith.constant 16 : index
    %c0_7 = arith.constant 0 : index
    %6 = vector.load %arg8[%c16, %c0_7] : memref<216x2000xf32, #tpu.memory_space<vmem>>, vector<8x2000xf32>
    tpu.vector_store %arg8[%c16, %c0_7], %5 {strides = array<i32>} : memref<216x2000xf32, #tpu.memory_space<vmem>>, vector<8x2000xf32>,
    %c0_8 = arith.constant 0 : index
    %c27 = arith.constant 27 : index
    %7 = vector.load %arg1[%c0_8, %c27] : memref<8x2256xf32, #tpu.memory_space<vmem>>, vector<8x2000xf32>
    %c24 = arith.constant 24 : index
    %c0_9 = arith.constant 0 : index
    %8 = vector.load %arg8[%c24, %c0_9] : memref<216x2000xf32, #tpu.memory_space<vmem>>, vector<8x2000xf32>
    tpu.vector_store %arg8[%c24, %c0_9], %7 {strides = array<i32>} : memref<216x2000xf32, #tpu.memory_space<vmem>>, vector<8x2000xf32>,
    %c0_10 = arith.constant 0 : index
    %c28 = arith.constant 28 : index
    %9 = vector.load %arg1[%c0_10, %c28] : memref<8x2256xf32, #tpu.memory_space<vmem>>, vector<8x2000xf32>
    %c32 = arith.constant 32 : index
    %c0_11 = arith.constant 0 : index
    %10 = vector.load %arg8[%c32, %c0_11] : memref<216x2000xf32, #tpu.memory_space<vmem>>, vector<8x2000xf32>
    tpu.vector_store %arg8[%c32, %c0_11], %9 {strides = array<i32>} : memref<216x2000xf32, #tpu.memory_space<vmem>>, vector<8x2000xf32>,
    %c0_12 = arith.constant 0 : index
    %c29 = arith.constant 29 : index
    %11 = vector.load %arg1[%c0_12, %c29] : memref<8x2256xf32, #tpu.memory_space<vmem>>, vector<8x2000xf32>
    %c40 = arith.constant 40 : index
    %c0_13 = arith.constant 0 : index
    %12 = vector.load %arg8[%c40, %c0_13] : memref<216x2000xf32, #tpu.memory_space<vmem>>, vector<8x2000xf32>
    tpu.vector_store %arg8[%c40, %c0_13], %11 {strides = array<i32>} : memref<216x2000xf32, #tpu.memory_space<vmem>>, vector<8x2000xf32>,
    %c0_14 = arith.constant 0 : index
    %c37 = arith.constant 37 : index
    %13 = vector.load %arg1[%c0_14, %c37] : memref<8x2256xf32, #tpu.memory_space<vmem>>, vector<8x2000xf32>
    %c48 = arith.constant 48 : index
    %c0_15 = arith.constant 0 : index
    %14 = vector.load %arg8[%c48, %c0_15] : memref<216x2000xf32, #tpu.memory_space<vmem>>, vector<8x2000xf32>
    tpu.vector_store %arg8[%c48, %c0_15], %13 {strides = array<i32>} : memref<216x2000xf32, #tpu.memory_space<vmem>>, vector<8x2000xf32>,
    %c0_16 = arith.constant 0 : index
    %c38 = arith.constant 38 : index
    %15 = vector.load %arg1[%c0_16, %c38] : memref<8x2256xf32, #tpu.memory_space<vmem>>, vector<8x2000xf32>
    %c56 = arith.constant 56 : index
    %c0_17 = arith.constant 0 : index
    %16 = vector.load %arg8[%c56, %c0_17] : memref<216x2000xf32, #tpu.memory_space<vmem>>, vector<8x2000xf32>
    tpu.vector_store %arg8[%c56, %c0_17], %15 {strides = array<i32>} : memref<216x2000xf32, #tpu.memory_space<vmem>>, vector<8x2000xf32>,
    %c0_18 = arith.constant 0 : index
    %c39 = arith.constant 39 : index
    %17 = vector.load %arg1[%c0_18, %c39] : memref<8x2256xf32, #tpu.memory_space<vmem>>, vector<8x2000xf32>
    %c64 = arith.constant 64 : index
    %c0_19 = arith.constant 0 : index
    %18 = vector.load %arg8[%c64, %c0_19] : memref<216x2000xf32, #tpu.memory_space<vmem>>, vector<8x2000xf32>
    tpu.vector_store %arg8[%c64, %c0_19], %17 {strides = array<i32>} : memref<216x2000xf32, #tpu.memory_space<vmem>>, vector<8x2000xf32>,
    %c0_20 = arith.constant 0 : index
    %c117 = arith.constant 117 : index
    %19 = vector.load %arg1[%c0_20, %c117] : memref<8x2256xf32, #tpu.memory_space<vmem>>, vector<8x2000xf32>
    %c72 = arith.constant 72 : index
    %c0_21 = arith.constant 0 : index
    %20 = vector.load %arg8[%c72, %c0_21] : memref<216x2000xf32, #tpu.memory_space<vmem>>, vector<8x2000xf32>
    tpu.vector_store %arg8[%c72, %c0_21], %19 {strides = array<i32>} : memref<216x2000xf32, #tpu.memory_space<vmem>>, vector<8x2000xf32>,
    %c0_22 = arith.constant 0 : index
    %c118 = arith.constant 118 : index
    %21 = vector.load %arg1[%c0_22, %c118] : memref<8x2256xf32, #tpu.memory_space<vmem>>, vector<8x2000xf32>
    %c80 = arith.constant 80 : index
    %c0_23 = arith.constant 0 : index
    %22 = vector.load %arg8[%c80, %c0_23] : memref<216x2000xf32, #tpu.memory_space<vmem>>, vector<8x2000xf32>
    tpu.vector_store %arg8[%c80, %c0_23], %21 {strides = array<i32>} : memref<216x2000xf32, #tpu.memory_space<vmem>>, vector<8x2000xf32>,
    %c0_24 = arith.constant 0 : index
    %c119 = arith.constant 119 : index
    %23 = vector.load %arg1[%c0_24, %c119] : memref<8x2256xf32, #tpu.memory_space<vmem>>, vector<8x2000xf32>
    %c88 = arith.constant 88 : index
    %c0_25 = arith.constant 0 : index
    %24 = vector.load %arg8[%c88, %c0_25] : memref<216x2000xf32, #tpu.memory_space<vmem>>, vector<8x2000xf32>
    tpu.vector_store %arg8[%c88, %c0_25], %23 {strides = array<i32>} : memref<216x2000xf32, #tpu.memory_space<vmem>>, vector<8x2000xf32>,
    %c0_26 = arith.constant 0 : index
    %c127 = arith.constant 127 : index
    %25 = vector.load %arg1[%c0_26, %c127] : memref<8x2256xf32, #tpu.memory_space<vmem>>, vector<8x2000xf32>
    %c96 = arith.constant 96 : index
    %c0_27 = arith.constant 0 : index
    %26 = vector.load %arg8[%c96, %c0_27] : memref<216x2000xf32, #tpu.memory_space<vmem>>, vector<8x2000xf32>
    tpu.vector_store %arg8[%c96, %c0_27], %25 {strides = array<i32>} : memref<216x2000xf32, #tpu.memory_space<vmem>>, vector<8x2000xf32>,
    %c0_28 = arith.constant 0 : index
    %c128 = arith.constant 128 : index
    %27 = vector.load %arg1[%c0_28, %c128] : memref<8x2256xf32, #tpu.memory_space<vmem>>, vector<8x2000xf32>
    %c104 = arith.constant 104 : index
    %c0_29 = arith.constant 0 : index
    %28 = vector.load %arg8[%c104, %c0_29] : memref<216x2000xf32, #tpu.memory_space<vmem>>, vector<8x2000xf32>
    tpu.vector_store %arg8[%c104, %c0_29], %27 {strides = array<i32>} : memref<216x2000xf32, #tpu.memory_space<vmem>>, vector<8x2000xf32>,
    %c0_30 = arith.constant 0 : index
    %c129 = arith.constant 129 : index
    %29 = vector.load %arg1[%c0_30, %c129] : memref<8x2256xf32, #tpu.memory_space<vmem>>, vector<8x2000xf32>
    %c112 = arith.constant 112 : index
    %c0_31 = arith.constant 0 : index
    %30 = vector.load %arg8[%c112, %c0_31] : memref<216x2000xf32, #tpu.memory_space<vmem>>, vector<8x2000xf32>
    tpu.vector_store %arg8[%c112, %c0_31], %29 {strides = array<i32>} : memref<216x2000xf32, #tpu.memory_space<vmem>>, vector<8x2000xf32>,
    %c0_32 = arith.constant 0 : index
    %c137 = arith.constant 137 : index
    %31 = vector.load %arg1[%c0_32, %c137] : memref<8x2256xf32, #tpu.memory_space<vmem>>, vector<8x2000xf32>
    %c120 = arith.constant 120 : index
    %c0_33 = arith.constant 0 : index
    %32 = vector.load %arg8[%c120, %c0_33] : memref<216x2000xf32, #tpu.memory_space<vmem>>, vector<8x2000xf32>
    tpu.vector_store %arg8[%c120, %c0_33], %31 {strides = array<i32>} : memref<216x2000xf32, #tpu.memory_space<vmem>>, vector<8x2000xf32>,
    %c0_34 = arith.constant 0 : index
    %c138 = arith.constant 138 : index
    %33 = vector.load %arg1[%c0_34, %c138] : memref<8x2256xf32, #tpu.memory_space<vmem>>, vector<8x2000xf32>
    %c128_35 = arith.constant 128 : index
    %c0_36 = arith.constant 0 : index
    %34 = vector.load %arg8[%c128_35, %c0_36] : memref<216x2000xf32, #tpu.memory_space<vmem>>, vector<8x2000xf32>
    tpu.vector_store %arg8[%c128_35, %c0_36], %33 {strides = array<i32>} : memref<216x2000xf32, #tpu.memory_space<vmem>>, vector<8x2000xf32>,
    %c0_37 = arith.constant 0 : index
    %c139 = arith.constant 139 : index
    %35 = vector.load %arg1[%c0_37, %c139] : memref<8x2256xf32, #tpu.memory_space<vmem>>, vector<8x2000xf32>
    %c136 = arith.constant 136 : index
    %c0_38 = arith.constant 0 : index
    %36 = vector.load %arg8[%c136, %c0_38] : memref<216x2000xf32, #tpu.memory_space<vmem>>, vector<8x2000xf32>
    tpu.vector_store %arg8[%c136, %c0_38], %35 {strides = array<i32>} : memref<216x2000xf32, #tpu.memory_space<vmem>>, vector<8x2000xf32>,
    %c0_39 = arith.constant 0 : index
    %c217 = arith.constant 217 : index
    %37 = vector.load %arg1[%c0_39, %c217] : memref<8x2256xf32, #tpu.memory_space<vmem>>, vector<8x2000xf32>
    %c144 = arith.constant 144 : index
    %c0_40 = arith.constant 0 : index
    %38 = vector.load %arg8[%c144, %c0_40] : memref<216x2000xf32, #tpu.memory_space<vmem>>, vector<8x2000xf32>
    tpu.vector_store %arg8[%c144, %c0_40], %37 {strides = array<i32>} : memref<216x2000xf32, #tpu.memory_space<vmem>>, vector<8x2000xf32>,
    %c0_41 = arith.constant 0 : index
    %c218 = arith.constant 218 : index
    %39 = vector.load %arg1[%c0_41, %c218] : memref<8x2256xf32, #tpu.memory_space<vmem>>, vector<8x2000xf32>
    %c152 = arith.constant 152 : index
    %c0_42 = arith.constant 0 : index
    %40 = vector.load %arg8[%c152, %c0_42] : memref<216x2000xf32, #tpu.memory_space<vmem>>, vector<8x2000xf32>
    tpu.vector_store %arg8[%c152, %c0_42], %39 {strides = array<i32>} : memref<216x2000xf32, #tpu.memory_space<vmem>>, vector<8x2000xf32>,
    %c0_43 = arith.constant 0 : index
    %c219 = arith.constant 219 : index
    %41 = vector.load %arg1[%c0_43, %c219] : memref<8x2256xf32, #tpu.memory_space<vmem>>, vector<8x2000xf32>
    %c160 = arith.constant 160 : index
    %c0_44 = arith.constant 0 : index
    %42 = vector.load %arg8[%c160, %c0_44] : memref<216x2000xf32, #tpu.memory_space<vmem>>, vector<8x2000xf32>
    tpu.vector_store %arg8[%c160, %c0_44], %41 {strides = array<i32>} : memref<216x2000xf32, #tpu.memory_space<vmem>>, vector<8x2000xf32>,
    %c0_45 = arith.constant 0 : index
    %c227 = arith.constant 227 : index
    %43 = vector.load %arg1[%c0_45, %c227] : memref<8x2256xf32, #tpu.memory_space<vmem>>, vector<8x2000xf32>
    %c168 = arith.constant 168 : index
    %c0_46 = arith.constant 0 : index
    %44 = vector.load %arg8[%c168, %c0_46] : memref<216x2000xf32, #tpu.memory_space<vmem>>, vector<8x2000xf32>
    tpu.vector_store %arg8[%c168, %c0_46], %43 {strides = array<i32>} : memref<216x2000xf32, #tpu.memory_space<vmem>>, vector<8x2000xf32>,
    %c0_47 = arith.constant 0 : index
    %c228 = arith.constant 228 : index
    %45 = vector.load %arg1[%c0_47, %c228] : memref<8x2256xf32, #tpu.memory_space<vmem>>, vector<8x2000xf32>
    %c176 = arith.constant 176 : index
    %c0_48 = arith.constant 0 : index
    %46 = vector.load %arg8[%c176, %c0_48] : memref<216x2000xf32, #tpu.memory_space<vmem>>, vector<8x2000xf32>
    tpu.vector_store %arg8[%c176, %c0_48], %45 {strides = array<i32>} : memref<216x2000xf32, #tpu.memory_space<vmem>>, vector<8x2000xf32>,
    %c0_49 = arith.constant 0 : index
    %c229 = arith.constant 229 : index
    %47 = vector.load %arg1[%c0_49, %c229] : memref<8x2256xf32, #tpu.memory_space<vmem>>, vector<8x2000xf32>
    %c184 = arith.constant 184 : index
    %c0_50 = arith.constant 0 : index
    %48 = vector.load %arg8[%c184, %c0_50] : memref<216x2000xf32, #tpu.memory_space<vmem>>, vector<8x2000xf32>
    tpu.vector_store %arg8[%c184, %c0_50], %47 {strides = array<i32>} : memref<216x2000xf32, #tpu.memory_space<vmem>>, vector<8x2000xf32>,
    %c0_51 = arith.constant 0 : index
    %c237 = arith.constant 237 : index
    %49 = vector.load %arg1[%c0_51, %c237] : memref<8x2256xf32, #tpu.memory_space<vmem>>, vector<8x2000xf32>
    %c192 = arith.constant 192 : index
    %c0_52 = arith.constant 0 : index
    %50 = vector.load %arg8[%c192, %c0_52] : memref<216x2000xf32, #tpu.memory_space<vmem>>, vector<8x2000xf32>
    tpu.vector_store %arg8[%c192, %c0_52], %49 {strides = array<i32>} : memref<216x2000xf32, #tpu.memory_space<vmem>>, vector<8x2000xf32>,
    %c0_53 = arith.constant 0 : index
    %c238 = arith.constant 238 : index
    %51 = vector.load %arg1[%c0_53, %c238] : memref<8x2256xf32, #tpu.memory_space<vmem>>, vector<8x2000xf32>
    %c200 = arith.constant 200 : index
    %c0_54 = arith.constant 0 : index
    %52 = vector.load %arg8[%c200, %c0_54] : memref<216x2000xf32, #tpu.memory_space<vmem>>, vector<8x2000xf32>
    tpu.vector_store %arg8[%c200, %c0_54], %51 {strides = array<i32>} : memref<216x2000xf32, #tpu.memory_space<vmem>>, vector<8x2000xf32>,
    %c0_55 = arith.constant 0 : index
    %c239 = arith.constant 239 : index
    %53 = vector.load %arg1[%c0_55, %c239] : memref<8x2256xf32, #tpu.memory_space<vmem>>, vector<8x2000xf32>
    %c208 = arith.constant 208 : index
    %c0_56 = arith.constant 0 : index
    %54 = vector.load %arg8[%c208, %c0_56] : memref<216x2000xf32, #tpu.memory_space<vmem>>, vector<8x2000xf32>
    tpu.vector_store %arg8[%c208, %c0_56], %53 {strides = array<i32>} : memref<216x2000xf32, #tpu.memory_space<vmem>>, vector<8x2000xf32>,
    %c0_57 = arith.constant 0 : index
    %c0_58 = arith.constant 0 : index
    %55 = vector.load %arg2[%c0_57, %c0_58] : memref<8x216xf32, #tpu.memory_space<vmem>>, vector<8x216xf32>
    %c0_59 = arith.constant 0 : index
    %c0_60 = arith.constant 0 : index
    %56 = vector.load %arg8[%c0_59, %c0_60] : memref<216x2000xf32, #tpu.memory_space<vmem>>, vector<216x2000xf32>
    %cst = arith.constant dense<0.000000e+00> : vector<8x2000xf32>
    %57 = tpu.matmul %55, %56, %cst {dimension_numbers = #tpu.dot_dimension_numbers<[1], [0], [0], [1], [0, 0, 1, 1], [], []>} : vector<8x216xf32>, vector<216x2000xf32>, vector<8x2000xf32> -> vector<8x2000xf32>
    %c0_61 = arith.constant 0 : index
    %c0_62 = arith.constant 0 : index
    %58 = vector.load %arg3[%c0_61, %c0_62] : memref<8x1xf32, #tpu.memory_space<vmem>>, vector<8x1xf32>
    %59 = vector.broadcast %58 : vector<8x1xf32> to vector<8x2000xf32>
    %60 = arith.addf %57, %59 : vector<8x2000xf32>
    %cst_63 = arith.constant 0.000000e+00 : f32
    %61 = vector.broadcast %cst_63 : f32 to vector<8x2000xf32>
    %62 = arith.maximumf %60, %61 : vector<8x2000xf32>
    %63 = vector.broadcast %0 : vector<1x2000xf32> to vector<8x2000xf32>
    %64 = arith.mulf %62, %63 : vector<8x2000xf32>
    %cst_64 = arith.constant 0.000000e+00 : f32
    %65 = vector.broadcast %cst_64 : f32 to vector<8x128xf32>
    %c0_65 = arith.constant 0 : index
    %c0_66 = arith.constant 0 : index
    %66 = vector.load %arg9[%c0_65, %c0_66] : memref<8x2256xf32, #tpu.memory_space<vmem>>, vector<8x128xf32>
    tpu.vector_store %arg9[%c0_65, %c0_66], %65 {strides = array<i32>} : memref<8x2256xf32, #tpu.memory_space<vmem>>, vector<8x128xf32>,
    %cst_67 = arith.constant 0.000000e+00 : f32
    %67 = vector.broadcast %cst_67 : f32 to vector<8x128xf32>
    %c0_68 = arith.constant 0 : index
    %c2128 = arith.constant 2128 : index
    %68 = vector.load %arg9[%c0_68, %c2128] : memref<8x2256xf32, #tpu.memory_space<vmem>>, vector<8x128xf32>
    tpu.vector_store %arg9[%c0_68, %c2128], %67 {strides = array<i32>} : memref<8x2256xf32, #tpu.memory_space<vmem>>, vector<8x128xf32>,
    %c0_69 = arith.constant 0 : index
    %c128_70 = arith.constant 128 : index
    %69 = vector.load %arg9[%c0_69, %c128_70] : memref<8x2256xf32, #tpu.memory_space<vmem>>, vector<8x2000xf32>
    tpu.vector_store %arg9[%c0_69, %c128_70], %64 {strides = array<i32>} : memref<8x2256xf32, #tpu.memory_space<vmem>>, vector<8x2000xf32>,
    %c0_71 = arith.constant 0 : index
    %c17_72 = arith.constant 17 : index
    %70 = vector.load %arg9[%c0_71, %c17_72] : memref<8x2256xf32, #tpu.memory_space<vmem>>, vector<8x2000xf32>
    %c0_73 = arith.constant 0 : index
    %c0_74 = arith.constant 0 : index
    %71 = vector.load %arg10[%c0_73, %c0_74] : memref<216x2000xf32, #tpu.memory_space<vmem>>, vector<8x2000xf32>
    tpu.vector_store %arg10[%c0_73, %c0_74], %70 {strides = array<i32>} : memref<216x2000xf32, #tpu.memory_space<vmem>>, vector<8x2000xf32>,
    %c0_75 = arith.constant 0 : index
    %c18_76 = arith.constant 18 : index
    %72 = vector.load %arg9[%c0_75, %c18_76] : memref<8x2256xf32, #tpu.memory_space<vmem>>, vector<8x2000xf32>
    %c8_77 = arith.constant 8 : index
    %c0_78 = arith.constant 0 : index
    %73 = vector.load %arg10[%c8_77, %c0_78] : memref<216x2000xf32, #tpu.memory_space<vmem>>, vector<8x2000xf32>
    tpu.vector_store %arg10[%c8_77, %c0_78], %72 {strides = array<i32>} : memref<216x2000xf32, #tpu.memory_space<vmem>>, vector<8x2000xf32>,
    %c0_79 = arith.constant 0 : index
    %c19_80 = arith.constant 19 : index
    %74 = vector.load %arg9[%c0_79, %c19_80] : memref<8x2256xf32, #tpu.memory_space<vmem>>, vector<8x2000xf32>
    %c16_81 = arith.constant 16 : index
    %c0_82 = arith.constant 0 : index
    %75 = vector.load %arg10[%c16_81, %c0_82] : memref<216x2000xf32, #tpu.memory_space<vmem>>, vector<8x2000xf32>
    tpu.vector_store %arg10[%c16_81, %c0_82], %74 {strides = array<i32>} : memref<216x2000xf32, #tpu.memory_space<vmem>>, vector<8x2000xf32>,
    %c0_83 = arith.constant 0 : index
    %c27_84 = arith.constant 27 : index
    %76 = vector.load %arg9[%c0_83, %c27_84] : memref<8x2256xf32, #tpu.memory_space<vmem>>, vector<8x2000xf32>
    %c24_85 = arith.constant 24 : index
    %c0_86 = arith.constant 0 : index
    %77 = vector.load %arg10[%c24_85, %c0_86] : memref<216x2000xf32, #tpu.memory_space<vmem>>, vector<8x2000xf32>
    tpu.vector_store %arg10[%c24_85, %c0_86], %76 {strides = array<i32>} : memref<216x2000xf32, #tpu.memory_space<vmem>>, vector<8x2000xf32>,
    %c0_87 = arith.constant 0 : index
    %c28_88 = arith.constant 28 : index
    %78 = vector.load %arg9[%c0_87, %c28_88] : memref<8x2256xf32, #tpu.memory_space<vmem>>, vector<8x2000xf32>
    %c32_89 = arith.constant 32 : index
    %c0_90 = arith.constant 0 : index
    %79 = vector.load %arg10[%c32_89, %c0_90] : memref<216x2000xf32, #tpu.memory_space<vmem>>, vector<8x2000xf32>
    tpu.vector_store %arg10[%c32_89, %c0_90], %78 {strides = array<i32>} : memref<216x2000xf32, #tpu.memory_space<vmem>>, vector<8x2000xf32>,
    %c0_91 = arith.constant 0 : index
    %c29_92 = arith.constant 29 : index
    %80 = vector.load %arg9[%c0_91, %c29_92] : memref<8x2256xf32, #tpu.memory_space<vmem>>, vector<8x2000xf32>
    %c40_93 = arith.constant 40 : index
    %c0_94 = arith.constant 0 : index
    %81 = vector.load %arg10[%c40_93, %c0_94] : memref<216x2000xf32, #tpu.memory_space<vmem>>, vector<8x2000xf32>
    tpu.vector_store %arg10[%c40_93, %c0_94], %80 {strides = array<i32>} : memref<216x2000xf32, #tpu.memory_space<vmem>>, vector<8x2000xf32>,
    %c0_95 = arith.constant 0 : index
    %c37_96 = arith.constant 37 : index
    %82 = vector.load %arg9[%c0_95, %c37_96] : memref<8x2256xf32, #tpu.memory_space<vmem>>, vector<8x2000xf32>
    %c48_97 = arith.constant 48 : index
    %c0_98 = arith.constant 0 : index
    %83 = vector.load %arg10[%c48_97, %c0_98] : memref<216x2000xf32, #tpu.memory_space<vmem>>, vector<8x2000xf32>
    tpu.vector_store %arg10[%c48_97, %c0_98], %82 {strides = array<i32>} : memref<216x2000xf32, #tpu.memory_space<vmem>>, vector<8x2000xf32>,
    %c0_99 = arith.constant 0 : index
    %c38_100 = arith.constant 38 : index
    %84 = vector.load %arg9[%c0_99, %c38_100] : memref<8x2256xf32, #tpu.memory_space<vmem>>, vector<8x2000xf32>
    %c56_101 = arith.constant 56 : index
    %c0_102 = arith.constant 0 : index
    %85 = vector.load %arg10[%c56_101, %c0_102] : memref<216x2000xf32, #tpu.memory_space<vmem>>, vector<8x2000xf32>
    tpu.vector_store %arg10[%c56_101, %c0_102], %84 {strides = array<i32>} : memref<216x2000xf32, #tpu.memory_space<vmem>>, vector<8x2000xf32>,
    %c0_103 = arith.constant 0 : index
    %c39_104 = arith.constant 39 : index
    %86 = vector.load %arg9[%c0_103, %c39_104] : memref<8x2256xf32, #tpu.memory_space<vmem>>, vector<8x2000xf32>
    %c64_105 = arith.constant 64 : index
    %c0_106 = arith.constant 0 : index
    %87 = vector.load %arg10[%c64_105, %c0_106] : memref<216x2000xf32, #tpu.memory_space<vmem>>, vector<8x2000xf32>
    tpu.vector_store %arg10[%c64_105, %c0_106], %86 {strides = array<i32>} : memref<216x2000xf32, #tpu.memory_space<vmem>>, vector<8x2000xf32>,
    %c0_107 = arith.constant 0 : index
    %c117_108 = arith.constant 117 : index
    %88 = vector.load %arg9[%c0_107, %c117_108] : memref<8x2256xf32, #tpu.memory_space<vmem>>, vector<8x2000xf32>
    %c72_109 = arith.constant 72 : index
    %c0_110 = arith.constant 0 : index
    %89 = vector.load %arg10[%c72_109, %c0_110] : memref<216x2000xf32, #tpu.memory_space<vmem>>, vector<8x2000xf32>
    tpu.vector_store %arg10[%c72_109, %c0_110], %88 {strides = array<i32>} : memref<216x2000xf32, #tpu.memory_space<vmem>>, vector<8x2000xf32>,
    %c0_111 = arith.constant 0 : index
    %c118_112 = arith.constant 118 : index
    %90 = vector.load %arg9[%c0_111, %c118_112] : memref<8x2256xf32, #tpu.memory_space<vmem>>, vector<8x2000xf32>
    %c80_113 = arith.constant 80 : index
    %c0_114 = arith.constant 0 : index
    %91 = vector.load %arg10[%c80_113, %c0_114] : memref<216x2000xf32, #tpu.memory_space<vmem>>, vector<8x2000xf32>
    tpu.vector_store %arg10[%c80_113, %c0_114], %90 {strides = array<i32>} : memref<216x2000xf32, #tpu.memory_space<vmem>>, vector<8x2000xf32>,
    %c0_115 = arith.constant 0 : index
    %c119_116 = arith.constant 119 : index
    %92 = vector.load %arg9[%c0_115, %c119_116] : memref<8x2256xf32, #tpu.memory_space<vmem>>, vector<8x2000xf32>
    %c88_117 = arith.constant 88 : index
    %c0_118 = arith.constant 0 : index
    %93 = vector.load %arg10[%c88_117, %c0_118] : memref<216x2000xf32, #tpu.memory_space<vmem>>, vector<8x2000xf32>
    tpu.vector_store %arg10[%c88_117, %c0_118], %92 {strides = array<i32>} : memref<216x2000xf32, #tpu.memory_space<vmem>>, vector<8x2000xf32>,
    %c0_119 = arith.constant 0 : index
    %c127_120 = arith.constant 127 : index
    %94 = vector.load %arg9[%c0_119, %c127_120] : memref<8x2256xf32, #tpu.memory_space<vmem>>, vector<8x2000xf32>
    %c96_121 = arith.constant 96 : index
    %c0_122 = arith.constant 0 : index
    %95 = vector.load %arg10[%c96_121, %c0_122] : memref<216x2000xf32, #tpu.memory_space<vmem>>, vector<8x2000xf32>
    tpu.vector_store %arg10[%c96_121, %c0_122], %94 {strides = array<i32>} : memref<216x2000xf32, #tpu.memory_space<vmem>>, vector<8x2000xf32>,
    %c0_123 = arith.constant 0 : index
    %c128_124 = arith.constant 128 : index
    %96 = vector.load %arg9[%c0_123, %c128_124] : memref<8x2256xf32, #tpu.memory_space<vmem>>, vector<8x2000xf32>
    %c104_125 = arith.constant 104 : index
    %c0_126 = arith.constant 0 : index
    %97 = vector.load %arg10[%c104_125, %c0_126] : memref<216x2000xf32, #tpu.memory_space<vmem>>, vector<8x2000xf32>
    tpu.vector_store %arg10[%c104_125, %c0_126], %96 {strides = array<i32>} : memref<216x2000xf32, #tpu.memory_space<vmem>>, vector<8x2000xf32>,
    %c0_127 = arith.constant 0 : index
    %c129_128 = arith.constant 129 : index
    %98 = vector.load %arg9[%c0_127, %c129_128] : memref<8x2256xf32, #tpu.memory_space<vmem>>, vector<8x2000xf32>
    %c112_129 = arith.constant 112 : index
    %c0_130 = arith.constant 0 : index
    %99 = vector.load %arg10[%c112_129, %c0_130] : memref<216x2000xf32, #tpu.memory_space<vmem>>, vector<8x2000xf32>
    tpu.vector_store %arg10[%c112_129, %c0_130], %98 {strides = array<i32>} : memref<216x2000xf32, #tpu.memory_space<vmem>>, vector<8x2000xf32>,
    %c0_131 = arith.constant 0 : index
    %c137_132 = arith.constant 137 : index
    %100 = vector.load %arg9[%c0_131, %c137_132] : memref<8x2256xf32, #tpu.memory_space<vmem>>, vector<8x2000xf32>
    %c120_133 = arith.constant 120 : index
    %c0_134 = arith.constant 0 : index
    %101 = vector.load %arg10[%c120_133, %c0_134] : memref<216x2000xf32, #tpu.memory_space<vmem>>, vector<8x2000xf32>
    tpu.vector_store %arg10[%c120_133, %c0_134], %100 {strides = array<i32>} : memref<216x2000xf32, #tpu.memory_space<vmem>>, vector<8x2000xf32>,
    %c0_135 = arith.constant 0 : index
    %c138_136 = arith.constant 138 : index
    %102 = vector.load %arg9[%c0_135, %c138_136] : memref<8x2256xf32, #tpu.memory_space<vmem>>, vector<8x2000xf32>
    %c128_137 = arith.constant 128 : index
    %c0_138 = arith.constant 0 : index
    %103 = vector.load %arg10[%c128_137, %c0_138] : memref<216x2000xf32, #tpu.memory_space<vmem>>, vector<8x2000xf32>
    tpu.vector_store %arg10[%c128_137, %c0_138], %102 {strides = array<i32>} : memref<216x2000xf32, #tpu.memory_space<vmem>>, vector<8x2000xf32>,
    %c0_139 = arith.constant 0 : index
    %c139_140 = arith.constant 139 : index
    %104 = vector.load %arg9[%c0_139, %c139_140] : memref<8x2256xf32, #tpu.memory_space<vmem>>, vector<8x2000xf32>
    %c136_141 = arith.constant 136 : index
    %c0_142 = arith.constant 0 : index
    %105 = vector.load %arg10[%c136_141, %c0_142] : memref<216x2000xf32, #tpu.memory_space<vmem>>, vector<8x2000xf32>
    tpu.vector_store %arg10[%c136_141, %c0_142], %104 {strides = array<i32>} : memref<216x2000xf32, #tpu.memory_space<vmem>>, vector<8x2000xf32>,
    %c0_143 = arith.constant 0 : index
    %c217_144 = arith.constant 217 : index
    %106 = vector.load %arg9[%c0_143, %c217_144] : memref<8x2256xf32, #tpu.memory_space<vmem>>, vector<8x2000xf32>
    %c144_145 = arith.constant 144 : index
    %c0_146 = arith.constant 0 : index
    %107 = vector.load %arg10[%c144_145, %c0_146] : memref<216x2000xf32, #tpu.memory_space<vmem>>, vector<8x2000xf32>
    tpu.vector_store %arg10[%c144_145, %c0_146], %106 {strides = array<i32>} : memref<216x2000xf32, #tpu.memory_space<vmem>>, vector<8x2000xf32>,
    %c0_147 = arith.constant 0 : index
    %c218_148 = arith.constant 218 : index
    %108 = vector.load %arg9[%c0_147, %c218_148] : memref<8x2256xf32, #tpu.memory_space<vmem>>, vector<8x2000xf32>
    %c152_149 = arith.constant 152 : index
    %c0_150 = arith.constant 0 : index
    %109 = vector.load %arg10[%c152_149, %c0_150] : memref<216x2000xf32, #tpu.memory_space<vmem>>, vector<8x2000xf32>
    tpu.vector_store %arg10[%c152_149, %c0_150], %108 {strides = array<i32>} : memref<216x2000xf32, #tpu.memory_space<vmem>>, vector<8x2000xf32>,
    %c0_151 = arith.constant 0 : index
    %c219_152 = arith.constant 219 : index
    %110 = vector.load %arg9[%c0_151, %c219_152] : memref<8x2256xf32, #tpu.memory_space<vmem>>, vector<8x2000xf32>
    %c160_153 = arith.constant 160 : index
    %c0_154 = arith.constant 0 : index
    %111 = vector.load %arg10[%c160_153, %c0_154] : memref<216x2000xf32, #tpu.memory_space<vmem>>, vector<8x2000xf32>
    tpu.vector_store %arg10[%c160_153, %c0_154], %110 {strides = array<i32>} : memref<216x2000xf32, #tpu.memory_space<vmem>>, vector<8x2000xf32>,
    %c0_155 = arith.constant 0 : index
    %c227_156 = arith.constant 227 : index
    %112 = vector.load %arg9[%c0_155, %c227_156] : memref<8x2256xf32, #tpu.memory_space<vmem>>, vector<8x2000xf32>
    %c168_157 = arith.constant 168 : index
    %c0_158 = arith.constant 0 : index
    %113 = vector.load %arg10[%c168_157, %c0_158] : memref<216x2000xf32, #tpu.memory_space<vmem>>, vector<8x2000xf32>
    tpu.vector_store %arg10[%c168_157, %c0_158], %112 {strides = array<i32>} : memref<216x2000xf32, #tpu.memory_space<vmem>>, vector<8x2000xf32>,
    %c0_159 = arith.constant 0 : index
    %c228_160 = arith.constant 228 : index
    %114 = vector.load %arg9[%c0_159, %c228_160] : memref<8x2256xf32, #tpu.memory_space<vmem>>, vector<8x2000xf32>
    %c176_161 = arith.constant 176 : index
    %c0_162 = arith.constant 0 : index
    %115 = vector.load %arg10[%c176_161, %c0_162] : memref<216x2000xf32, #tpu.memory_space<vmem>>, vector<8x2000xf32>
    tpu.vector_store %arg10[%c176_161, %c0_162], %114 {strides = array<i32>} : memref<216x2000xf32, #tpu.memory_space<vmem>>, vector<8x2000xf32>,
    %c0_163 = arith.constant 0 : index
    %c229_164 = arith.constant 229 : index
    %116 = vector.load %arg9[%c0_163, %c229_164] : memref<8x2256xf32, #tpu.memory_space<vmem>>, vector<8x2000xf32>
    %c184_165 = arith.constant 184 : index
    %c0_166 = arith.constant 0 : index
    %117 = vector.load %arg10[%c184_165, %c0_166] : memref<216x2000xf32, #tpu.memory_space<vmem>>, vector<8x2000xf32>
    tpu.vector_store %arg10[%c184_165, %c0_166], %116 {strides = array<i32>} : memref<216x2000xf32, #tpu.memory_space<vmem>>, vector<8x2000xf32>,
    %c0_167 = arith.constant 0 : index
    %c237_168 = arith.constant 237 : index
    %118 = vector.load %arg9[%c0_167, %c237_168] : memref<8x2256xf32, #tpu.memory_space<vmem>>, vector<8x2000xf32>
    %c192_169 = arith.constant 192 : index
    %c0_170 = arith.constant 0 : index
    %119 = vector.load %arg10[%c192_169, %c0_170] : memref<216x2000xf32, #tpu.memory_space<vmem>>, vector<8x2000xf32>
    tpu.vector_store %arg10[%c192_169, %c0_170], %118 {strides = array<i32>} : memref<216x2000xf32, #tpu.memory_space<vmem>>, vector<8x2000xf32>,
    %c0_171 = arith.constant 0 : index
    %c238_172 = arith.constant 238 : index
    %120 = vector.load %arg9[%c0_171, %c238_172] : memref<8x2256xf32, #tpu.memory_space<vmem>>, vector<8x2000xf32>
    %c200_173 = arith.constant 200 : index
    %c0_174 = arith.constant 0 : index
    %121 = vector.load %arg10[%c200_173, %c0_174] : memref<216x2000xf32, #tpu.memory_space<vmem>>, vector<8x2000xf32>
    tpu.vector_store %arg10[%c200_173, %c0_174], %120 {strides = array<i32>} : memref<216x2000xf32, #tpu.memory_space<vmem>>, vector<8x2000xf32>,
    %c0_175 = arith.constant 0 : index
    %c239_176 = arith.constant 239 : index
    %122 = vector.load %arg9[%c0_175, %c239_176] : memref<8x2256xf32, #tpu.memory_space<vmem>>, vector<8x2000xf32>
    %c208_177 = arith.constant 208 : index
    %c0_178 = arith.constant 0 : index
    %123 = vector.load %arg10[%c208_177, %c0_178] : memref<216x2000xf32, #tpu.memory_space<vmem>>, vector<8x2000xf32>
    tpu.vector_store %arg10[%c208_177, %c0_178], %122 {strides = array<i32>} : memref<216x2000xf32, #tpu.memory_space<vmem>>, vector<8x2000xf32>,
    %c0_179 = arith.constant 0 : index
    %c0_180 = arith.constant 0 : index
    %124 = vector.load %arg4[%c0_179, %c0_180] : memref<8x216xf32, #tpu.memory_space<vmem>>, vector<8x216xf32>
    %c0_181 = arith.constant 0 : index
    %c0_182 = arith.constant 0 : index
    %125 = vector.load %arg10[%c0_181, %c0_182] : memref<216x2000xf32, #tpu.memory_space<vmem>>, vector<216x2000xf32>
    %cst_183 = arith.constant dense<0.000000e+00> : vector<8x2000xf32>
    %126 = tpu.matmul %124, %125, %cst_183 {dimension_numbers = #tpu.dot_dimension_numbers<[1], [0], [0], [1], [0, 0, 1, 1], [], []>} : vector<8x216xf32>, vector<216x2000xf32>, vector<8x2000xf32> -> vector<8x2000xf32>
    %c0_184 = arith.constant 0 : index
    %c0_185 = arith.constant 0 : index
    %127 = vector.load %arg5[%c0_184, %c0_185] : memref<8x1xf32, #tpu.memory_space<vmem>>, vector<8x1xf32>
    %128 = vector.broadcast %127 : vector<8x1xf32> to vector<8x2000xf32>
    %129 = arith.addf %126, %128 : vector<8x2000xf32>
    %c0_186 = arith.constant 0 : index
    %c128_187 = arith.constant 128 : index
    %130 = vector.load %arg1[%c0_186, %c128_187] : memref<8x2256xf32, #tpu.memory_space<vmem>>, vector<8x2000xf32>
    %131 = arith.addf %129, %130 : vector<8x2000xf32>
    %cst_188 = arith.constant 0.000000e+00 : f32
    %132 = vector.broadcast %cst_188 : f32 to vector<8x2000xf32>
    %133 = arith.maximumf %131, %132 : vector<8x2000xf32>
    %134 = vector.broadcast %0 : vector<1x2000xf32> to vector<8x2000xf32>
    %135 = arith.mulf %133, %134 : vector<8x2000xf32>
    %cst_189 = arith.constant 0.000000e+00 : f32
    %136 = vector.broadcast %cst_189 : f32 to vector<8x128xf32>
    %c0_190 = arith.constant 0 : index
    %c0_191 = arith.constant 0 : index
    %137 = vector.load %arg7[%c0_190, %c0_191] : memref<8x2256xf32, #tpu.memory_space<vmem>>, vector<8x128xf32>
    tpu.vector_store %arg7[%c0_190, %c0_191], %136 {strides = array<i32>} : memref<8x2256xf32, #tpu.memory_space<vmem>>, vector<8x128xf32>,
    %cst_192 = arith.constant 0.000000e+00 : f32
    %138 = vector.broadcast %cst_192 : f32 to vector<8x128xf32>
    %c0_193 = arith.constant 0 : index
    %c2128_194 = arith.constant 2128 : index
    %139 = vector.load %arg7[%c0_193, %c2128_194] : memref<8x2256xf32, #tpu.memory_space<vmem>>, vector<8x128xf32>
    tpu.vector_store %arg7[%c0_193, %c2128_194], %138 {strides = array<i32>} : memref<8x2256xf32, #tpu.memory_space<vmem>>, vector<8x128xf32>,
    %c0_195 = arith.constant 0 : index
    %c128_196 = arith.constant 128 : index
    %140 = vector.load %arg7[%c0_195, %c128_196] : memref<8x2256xf32, #tpu.memory_space<vmem>>, vector<8x2000xf32>
    tpu.vector_store %arg7[%c0_195, %c128_196], %135 {strides = array<i32>} : memref<8x2256xf32, #tpu.memory_space<vmem>>, vector<8x2000xf32>,
    return
  }
  func.func @transform_0(%arg0: i32) -> (i32, i32) {
    %c0_i32 = arith.constant 0 : i32
    %c0_i32_0 = arith.constant 0 : i32
    %c0_i32_1 = arith.constant 0 : i32
    return %c0_i32, %c0_i32_0 : i32, i32
  }
  func.func @transform_1(%arg0: i32) -> (i32, i32) {
    %c0_i32 = arith.constant 0 : i32
    %c0_i32_0 = arith.constant 0 : i32
    %c0_i32_1 = arith.constant 0 : i32
    return %c0_i32, %c0_i32_0 : i32, i32
  }
  func.func @transform_2(%arg0: i32) -> (i32, i32) {
    %c0_i32 = arith.constant 0 : i32
    %c0_i32_0 = arith.constant 0 : i32
    %c0_i32_1 = arith.constant 0 : i32
    return %c0_i32, %c0_i32_0 : i32, i32
  }
  func.func @transform_3(%arg0: i32) -> (i32, i32) {
    %c0_i32 = arith.constant 0 : i32
    %c0_i32_0 = arith.constant 0 : i32
    %c0_i32_1 = arith.constant 0 : i32
    return %c0_i32, %c0_i32_0 : i32, i32
  }
  func.func @transform_4(%arg0: i32) -> (i32, i32) {
    %c0_i32 = arith.constant 0 : i32
    %c0_i32_0 = arith.constant 0 : i32
    %c0_i32_1 = arith.constant 0 : i32
    return %c0_i32, %c0_i32_0 : i32, i32
  }
  func.func @transform_5(%arg0: i32) -> (i32, i32) {
    %c0_i32 = arith.constant 0 : i32
    %c0_i32_0 = arith.constant 0 : i32
    %c0_i32_1 = arith.constant 0 : i32
    return %c0_i32, %c0_i32_0 : i32, i32
  }
  func.func @transform_6(%arg0: i32) -> (i32, i32) {
    %c0_i32 = arith.constant 0 : i32
    %c0_i32_0 = arith.constant 0 : i32
    %c0_i32_1 = arith.constant 0 : i32
    return %c0_i32, %c0_i32_0 : i32, i32
  }
}

</mosaic_0001>

<bundles_post_ra>
// kernel: tpu_custom_call.1
= control target key start
LH: loop header
LB: loop body
LE: loop exit
PB: predicated region body
PF: predicated region fallthrough
CT: control target
= control target key end

     0   :  { %11 = vsyncpa [#allocation6], 0  ;;  %s13023_s0 = inlined_call_operand.hbm [shape: f32[8,2256], index: 0, kind: input, shape index: {}]   ;;  %s13024_s1 = inlined_call_operand.vmem [shape: f32[8,216], index: 1, kind: input, shape index: {}]   ;;  %s13025_s2 = inlined_call_operand.vmem [shape: f32[8,1], index: 2, kind: input, shape index: {}]   ;;  %s13026_s3 = inlined_call_operand.hbm [shape: f32[8,216], index: 3, kind: input, shape index: {}]   ;;  %s13027_s4 = inlined_call_operand.vmem [shape: f32[8,1], index: 4, kind: input, shape index: {}]   ;;  %s13028_s5 = inlined_call_operand.vmem [shape: f32[1,2000], index: 5, kind: input, shape index: {}]   ;;  %s13029_s6 = inlined_call_operand.hbm [shape: f32[8,2256], index: 6, kind: output, shape index: {}]  }
   0x1   :  { %12 = vsyncpa [#allocation9], 0 }
   0x2   :  { %13 = vsyncpa [#allocation7], 0  ;;  %s9279_s21 = smov [#allocation5]   ;;  %s9280_s23 = smov [#allocation8]  }
   0x3   :  { %s20_s22 = sshll.u32 %s9279_s21, 4  ;;  %s34_s24 = sshll.u32 %s9280_s23, 4  ;;  %s21_s22 = int_to_ptr.vmem [resolvable:$true] %s20_s22  ;;  %s35_s24 = int_to_ptr.vmem [resolvable:$true] %s34_s24 }
   0x4   :  { %s9207_s27 = scalar_lea.hbm %s13023_s0, 2304 }
   0x5   :  { %p9208_p0 = scmp.ne.s32.totalorder %s13023_s0, %s9207_s27  ;;  %p9211_p1 = scmp.lt.u32.totalorder %s9207_s27, %s13023_s0 }
   0x7   :  { %p9213_p2 = pnand %p9211_p1, %p9208_p0 }
   0x9   :  { %9216 = shalt.err (!%p9213_p2)
}
   0xa   :  { %s9217_s8 = scalar_lea.vmem %s21_s22, 2304  ;;  %p9222_p4 = scmp.lt.s32.totalorder %s21_s22, %s21_s22 }
   0xb   :  { %p9218_p3 = scmp.ne.s32.totalorder %s21_s22, %s9217_s8  ;;  %p9223_p5 = scmp.lt.s32.totalorder %s9217_s8, %s9217_s8 }
   0xd   :  { %p9224_p6 = por %p9223_p5, %p9222_p4 }
   0xf   :  { %p9225_p7 = pnand %p9224_p6, %p9218_p3 }
  0x11   :  { %9228 = shalt.err (!%p9225_p7)
}
  0x12   :  { %23 = dma.hbm_to_vmem [thread:$0]  %s13023_s0, 2304, %s21_s22, [#allocation6]  }
  0x13   :  { %s9229_s13 = scalar_lea.hbm %s13026_s3, 256 }
  0x14   :  { %p9230_p8 = scmp.ne.s32.totalorder %s13026_s3, %s9229_s13  ;;  %p9233_p9 = scmp.lt.u32.totalorder %s9229_s13, %s13026_s3 }
  0x16   :  { %p9235_p10 = pnand %p9233_p9, %p9230_p8 }
  0x18   :  { %9238 = shalt.err (!%p9235_p10)
}
  0x19   :  { %s9239_s18 = scalar_lea.vmem %s35_s24, 256  ;;  %p9244_p12 = scmp.lt.s32.totalorder %s35_s24, %s35_s24 }
  0x1a   :  { %p9240_p11 = scmp.ne.s32.totalorder %s35_s24, %s9239_s18  ;;  %p9245_p13 = scmp.lt.s32.totalorder %s9239_s18, %s9239_s18 }
  0x1c   :  { %p9246_p0 = por %p9245_p13, %p9244_p12 }
  0x1e   :  { %p9247_p1 = pnand %p9246_p0, %p9240_p11 }
  0x20   :  { %9250 = shalt.err (!%p9247_p1)
}
  0x21   :  { %37 = dma.hbm_to_vmem [thread:$0]  %s13026_s3, 256, %s35_s24, [#allocation9]  }
  0x22   :  { %9273 = dma.done.wait [#allocation6], 2304  }
  0x23   :  { %9274 = vsyncadd [#allocation6], 4294964992 }
  0x24   :  { %9275 = dma.done.wait [#allocation9], 256  }
  0x25   :  { %9276 = vsyncadd [#allocation9], 4294967040  ;;  %v9369_v0 = vld [vmem:[#allocation5 + $0x10] sm:$0xff]  ;;  %v9371_v1 = vld [vmem:[#allocation5] sm:$0xff]  ;;  %s9281_s20 = smov 111   ;;  %s9282_s3 = smov 110  }
  0x26   :  { %86 = vrot.lane.b32.xlu1 %v9369_v0, %s9281_s20  ;;  %82 = vrot.lane.b32.xlu0 %v9371_v1, %s9281_s20  ;;  %v9377_v2 = vld [vmem:[#allocation5 + $0x18] sm:$0xff]  ;;  %v9379_v3 = vld [vmem:[#allocation5 + $0x8] sm:$0xff]  ;;  %v9387_v5 = vld [vmem:[#allocation5 + $0x20] sm:$0xff]  ;;  %s9283_s21 = smov 109   ;;  %s9284_s22 = smov 101   ;;  %vm114_vm0 = vcmask 908288  }
  0x27   :  { %v9385_v4 = vld [vmem:[#allocation5 + $0x28] sm:$0xff]  ;;  %v9393_v6 = vld [vmem:[#allocation5 + $0x38] sm:$0xff]  ;;  %v9395_v7 = vld [vmem:[#allocation5 + $0x30] sm:$0xff]  ;;  %s9285_s23 = smov 100   ;;  %vm161_vm1 = vcmask 654336   ;;  %vm227_vm2 = vcmask 900096  }
  0x28   :  { %v9401_v8 = vld [vmem:[#allocation5 + $0x48] sm:$0xff]  ;;  %v9403_v9 = vld [vmem:[#allocation5 + $0x40] sm:$0xff]  ;;  %v9409_v10 = vld [vmem:[#allocation5 + $0x58] sm:$0xff]  ;;  %s9286_s24 = smov 99   ;;  %vm339_vm3 = vcmask 891904   ;;  %s9287_s25 = smov 91  }
  0x29   :  { %v9411_v11 = vld [vmem:[#allocation5 + $0x50] sm:$0xff]  ;;  %v9417_v12 = vld [vmem:[#allocation5 + $0x68] sm:$0xff]  ;;  %v9419_v13 = vld [vmem:[#allocation5 + $0x60] sm:$0xff]  ;;  %vm451_vm4 = vcmask 826368   ;;  %s9288_s26 = smov 90   ;;  %vm563_vm5 = vcmask 818176  }
  0x2a   :  { %88 = vrot.lane.b32.xlu1 %v9377_v2, %s9281_s20  ;;  %84 = vrot.lane.b32.xlu0 %v9379_v3, %s9281_s20  ;;  %v9425_v14 = vld [vmem:[#allocation5 + $0x78] sm:$0xff]  ;;  %v9427_v15 = vld [vmem:[#allocation5 + $0x70] sm:$0xff]  ;;  %s9289_s27 = smov 89   ;;  %vm675_vm6 = vcmask 809984   ;;  %s9290_s28 = smov 11   ;;  %vm787_vm7 = vcmask 744448  }
  0x2b   :  { %s9291_s29 = smov 10   ;;  %vm899_vm8 = vcmask 736256   ;;  %s9292_s30 = smov 9   ;;  %vm1011_vm9 = vcmask 728064   ;;  %vm1127_vm10 = vcmask 89088   ;;  %vm1244_vm11 = vcmask 80896  }
  0x2c   :  { %s9293_s7 = smov 1   ;;  %s9294_s8 = smov 127   ;;  %vm1361_vm12 = vcmask 72704   ;;  %vm13040_vm13 = vcmask 7168   ;;  %vm13030_vm14 = vcmask 1039360   ;;  %vm13031_vm15 = vcmask 973824  }
  0x2d   :  { %s9295_s9 = smov 119   ;;  %s9296_s10 = smov 118  }
  0x2e   :  { %92 = vrot.lane.b32.xlu1 %v9385_v4, %s9281_s20  ;;  %90 = vrot.lane.b32.xlu0 %v9387_v5, %s9281_s20  ;;  %s9297_s11 = smov 117   ;;  %s9298_s12 = smov 39  }
  0x2f   :  { %s9299_s13 = smov 38   ;;  %s9300_s14 = smov 37  }
  0x30   :  { %s9301_s15 = smov 29   ;;  %s9302_s16 = smov 28  }
  0x31   :  { %s9303_s17 = smov 27   ;;  %s13037_s18 = smov 19  }
  0x32   :  { %96 = vrot.lane.b32.xlu1 %v9393_v6, %s9281_s20  ;;  %94 = vrot.lane.b32.xlu0 %v9395_v7, %s9281_s20  ;;  %s13046_s0 = smov 18  }
  0x36   :  { %100 = vrot.lane.b32.xlu1 %v9401_v8, %s9281_s20  ;;  %98 = vrot.lane.b32.xlu0 %v9403_v9, %s9281_s20 }
  0x3a   :  { %104 = vrot.lane.b32.xlu1 %v9409_v10, %s9281_s20  ;;  %102 = vrot.lane.b32.xlu0 %v9411_v11, %s9281_s20 }
  0x3e   :  { %108 = vrot.lane.b32.xlu1 %v9417_v12, %s9281_s20  ;;  %106 = vrot.lane.b32.xlu0 %v9419_v13, %s9281_s20 }
  0x42   :  { %112 = vrot.lane.b32.xlu1 %v9425_v14, %s9281_s20  ;;  %110 = vrot.lane.b32.xlu0 %v9427_v15, %s9281_s20 }
  0x46   :  { %197 = vrot.lane.b32.xlu1 %v9379_v3, %s9282_s3  ;;  %195 = vrot.lane.b32.xlu0 %v9371_v1, %s9282_s3 }
  0x4a   :  { %201 = vrot.lane.b32.xlu1 %v9377_v2, %s9282_s3  ;;  %199 = vrot.lane.b32.xlu0 %v9369_v0, %s9282_s3 }
  0x4e   :  { %205 = vrot.lane.b32.xlu1 %v9385_v4, %s9282_s3  ;;  %203 = vrot.lane.b32.xlu0 %v9387_v5, %s9282_s3 }
  0x52   :  { %209 = vrot.lane.b32.xlu1 %v9393_v6, %s9282_s3  ;;  %207 = vrot.lane.b32.xlu0 %v9395_v7, %s9282_s3 }
  0x56   :  { %213 = vrot.lane.b32.xlu1 %v9401_v8, %s9282_s3  ;;  %211 = vrot.lane.b32.xlu0 %v9403_v9, %s9282_s3 }
  0x5a   :  { %217 = vrot.lane.b32.xlu1 %v9409_v10, %s9282_s3  ;;  %215 = vrot.lane.b32.xlu0 %v9411_v11, %s9282_s3 }
  0x5e   :  { %221 = vrot.lane.b32.xlu1 %v9417_v12, %s9282_s3  ;;  %219 = vrot.lane.b32.xlu0 %v9419_v13, %s9282_s3 }
  0x62   :  { %225 = vrot.lane.b32.xlu1 %v9425_v14, %s9282_s3  ;;  %223 = vrot.lane.b32.xlu0 %v9427_v15, %s9282_s3 }
  0x66   :  { %309 = vrot.lane.b32.xlu1 %v9379_v3, %s9283_s21  ;;  %307 = vrot.lane.b32.xlu0 %v9371_v1, %s9283_s21 }
  0x6a   :  { %313 = vrot.lane.b32.xlu1 %v9377_v2, %s9283_s21  ;;  %311 = vrot.lane.b32.xlu0 %v9369_v0, %s9283_s21 }
  0x6e   :  { %317 = vrot.lane.b32.xlu1 %v9385_v4, %s9283_s21  ;;  %315 = vrot.lane.b32.xlu0 %v9387_v5, %s9283_s21 }
  0x72   :  { %321 = vrot.lane.b32.xlu1 %v9393_v6, %s9283_s21  ;;  %319 = vrot.lane.b32.xlu0 %v9395_v7, %s9283_s21 }
  0x76   :  { %325 = vrot.lane.b32.xlu1 %v9401_v8, %s9283_s21  ;;  %323 = vrot.lane.b32.xlu0 %v9403_v9, %s9283_s21 }
  0x7a   :  { %329 = vrot.lane.b32.xlu1 %v9409_v10, %s9283_s21  ;;  %327 = vrot.lane.b32.xlu0 %v9411_v11, %s9283_s21 }
  0x7e   :  { %333 = vrot.lane.b32.xlu1 %v9417_v12, %s9283_s21  ;;  %331 = vrot.lane.b32.xlu0 %v9419_v13, %s9283_s21 }
  0x82   :  { %337 = vrot.lane.b32.xlu1 %v9425_v14, %s9283_s21  ;;  %335 = vrot.lane.b32.xlu0 %v9427_v15, %s9283_s21 }
  0x86   :  { %421 = vrot.lane.b32.xlu1 %v9379_v3, %s9284_s22  ;;  %419 = vrot.lane.b32.xlu0 %v9371_v1, %s9284_s22 }
  0x8a   :  { %425 = vrot.lane.b32.xlu1 %v9377_v2, %s9284_s22  ;;  %423 = vrot.lane.b32.xlu0 %v9369_v0, %s9284_s22 }
  0x8e   :  { %429 = vrot.lane.b32.xlu1 %v9385_v4, %s9284_s22  ;;  %427 = vrot.lane.b32.xlu0 %v9387_v5, %s9284_s22 }
  0x92   :  { %433 = vrot.lane.b32.xlu1 %v9393_v6, %s9284_s22  ;;  %431 = vrot.lane.b32.xlu0 %v9395_v7, %s9284_s22 }
  0x96   :  { %437 = vrot.lane.b32.xlu1 %v9401_v8, %s9284_s22  ;;  %435 = vrot.lane.b32.xlu0 %v9403_v9, %s9284_s22 }
  0x98   :  { %v87_v16 = vpop.permute.xlu1 %86  ;;  %v83_v17 = vpop.permute.xlu0 %82 }
  0x9a   :  { %441 = vrot.lane.b32.xlu1 %v9409_v10, %s9284_s22  ;;  %439 = vrot.lane.b32.xlu0 %v9411_v11, %s9284_s22 }
  0x9c   :  { %v89_v18 = vpop.permute.xlu1 %88  ;;  %v85_v19 = vpop.permute.xlu0 %84 }
  0x9d   :  { %v9522_v20 = vsel %vm114_vm0, %v87_v16, %v89_v18  ;;  %v9525_v21 = vsel %vm114_vm0, %v83_v17, %v85_v19  ;;  %v9528_v22 = vsel %vm114_vm0, %v85_v19, %v87_v16 }
  0x9e   :  { %445 = vrot.lane.b32.xlu1 %v9417_v12, %s9284_s22  ;;  %443 = vrot.lane.b32.xlu0 %v9419_v13, %s9284_s22 }
  0xa0   :  { %v93_v23 = vpop.permute.xlu1 %92  ;;  %v91_v24 = vpop.permute.xlu0 %90 }
  0xa1   :  { %v9535_v25 = vsel %vm114_vm0, %v89_v18, %v91_v24  ;;  %v119_v26 = vsel %vm114_vm0, %v91_v24, %v93_v23 }
  0xa2   :  { %150 = vst [vmem:[#allocation2 + $0x20] sm:$0xff] %v119_v26  ;;  %449 = vrot.lane.b32.xlu1 %v9425_v14, %s9284_s22  ;;  %447 = vrot.lane.b32.xlu0 %v9427_v15, %s9284_s22 }
  0xa4   :  { %v97_v27 = vpop.permute.xlu1 %96  ;;  %v95_v28 = vpop.permute.xlu0 %94 }
  0xa5   :  { %v120_v29 = vsel %vm114_vm0, %v93_v23, %v95_v28  ;;  %v121_v30 = vsel %vm114_vm0, %v95_v28, %v97_v27 }
  0xa6   :  { %151 = vst [vmem:[#allocation2 + $0x28] sm:$0xff] %v120_v29  ;;  %152 = vst [vmem:[#allocation2 + $0x30] sm:$0xff] %v121_v30  ;;  %533 = vrot.lane.b32.xlu1 %v9379_v3, %s9285_s23  ;;  %531 = vrot.lane.b32.xlu0 %v9371_v1, %s9285_s23 }
  0xa8   :  { %v101_v31 = vpop.permute.xlu1 %100  ;;  %v99_v32 = vpop.permute.xlu0 %98 }
  0xa9   :  { %v122_v33 = vsel %vm114_vm0, %v97_v27, %v99_v32  ;;  %v123_v34 = vsel %vm114_vm0, %v99_v32, %v101_v31 }
  0xaa   :  { %153 = vst [vmem:[#allocation2 + $0x38] sm:$0xff] %v122_v33  ;;  %154 = vst [vmem:[#allocation2 + $0x40] sm:$0xff] %v123_v34  ;;  %537 = vrot.lane.b32.xlu1 %v9377_v2, %s9285_s23  ;;  %535 = vrot.lane.b32.xlu0 %v9369_v0, %s9285_s23 }
  0xac   :  { %v105_v35 = vpop.permute.xlu1 %104  ;;  %v103_v36 = vpop.permute.xlu0 %102 }
  0xad   :  { %v124_v37 = vsel %vm114_vm0, %v101_v31, %v103_v36  ;;  %v125_v38 = vsel %vm114_vm0, %v103_v36, %v105_v35 }
  0xae   :  { %155 = vst [vmem:[#allocation2 + $0x48] sm:$0xff] %v124_v37  ;;  %156 = vst [vmem:[#allocation2 + $0x50] sm:$0xff] %v125_v38  ;;  %541 = vrot.lane.b32.xlu1 %v9385_v4, %s9285_s23  ;;  %539 = vrot.lane.b32.xlu0 %v9387_v5, %s9285_s23 }
  0xb0   :  { %v109_v39 = vpop.permute.xlu1 %108  ;;  %v107_v40 = vpop.permute.xlu0 %106 }
  0xb1   :  { %v126_v41 = vsel %vm114_vm0, %v105_v35, %v107_v40  ;;  %v127_v42 = vsel %vm114_vm0, %v107_v40, %v109_v39 }
  0xb2   :  { %157 = vst [vmem:[#allocation2 + $0x58] sm:$0xff] %v126_v41  ;;  %158 = vst [vmem:[#allocation2 + $0x60] sm:$0xff] %v127_v42  ;;  %545 = vrot.lane.b32.xlu1 %v9393_v6, %s9285_s23  ;;  %543 = vrot.lane.b32.xlu0 %v9395_v7, %s9285_s23 }
  0xb4   :  { %v113_v43 = vpop.permute.xlu1 %112  ;;  %v111_v44 = vpop.permute.xlu0 %110 }
  0xb5   :  { %162 = vst.msk [vmem:[#allocation2 + $0x78] sm:$0xff] %vm161_vm1, %v113_v43  ;;  %v128_v45 = vsel %vm114_vm0, %v109_v39, %v111_v44  ;;  %v129_v46 = vsel %vm114_vm0, %v111_v44, %v113_v43 }
  0xb6   :  { %159 = vst [vmem:[#allocation2 + $0x68] sm:$0xff] %v128_v45  ;;  %160 = vst [vmem:[#allocation2 + $0x70] sm:$0xff] %v129_v46  ;;  %549 = vrot.lane.b32.xlu1 %v9401_v8, %s9285_s23  ;;  %547 = vrot.lane.b32.xlu0 %v9403_v9, %s9285_s23 }
  0xb8   :  { %v198_v47 = vpop.permute.xlu1 %197  ;;  %v196_v48 = vpop.permute.xlu0 %195 }
  0xb9   :  { %v228_v49 = vsel %vm227_vm2, %v196_v48, %v198_v47 }
  0xba   :  { %553 = vrot.lane.b32.xlu1 %v9409_v10, %s9285_s23  ;;  %551 = vrot.lane.b32.xlu0 %v9411_v11, %s9285_s23  ;;  %v8317_v55 = vpack.c.bf16 %v228_v49, %v9525_v21 }
  0xbc   :  { %v202_v50 = vpop.permute.xlu1 %201  ;;  %v200_v51 = vpop.permute.xlu0 %199 }
  0xbd   :  { %v229_v52 = vsel %vm227_vm2, %v198_v47, %v200_v51  ;;  %v230_v53 = vsel %vm227_vm2, %v200_v51, %v202_v50 }
  0xbe   :  { %557 = vrot.lane.b32.xlu1 %v9417_v12, %s9285_s23  ;;  %555 = vrot.lane.b32.xlu0 %v9419_v13, %s9285_s23  ;;  %v8315_v54 = vpack.c.bf16 %v229_v52, %v9528_v22  ;;  %v8369_v61 = vpack.c.bf16 %v230_v53, %v9522_v20 }
  0xc0   :  { %v206_v56 = vpop.permute.xlu1 %205  ;;  %v204_v57 = vpop.permute.xlu0 %203  ;;  %8316 = vmatprep.subr.bf16.mxu0 %v8315_v54 }
  0xc1   :  { %v231_v58 = vsel %vm227_vm2, %v202_v50, %v204_v57  ;;  %v232_v59 = vsel %vm227_vm2, %v204_v57, %v206_v56  ;;  %8318 = vmatpush1.bf16.msra.mxu0 %v8317_v55 }
  0xc2   :  { %263 = vst [vmem:[#allocation2 + $0xa0] sm:$0xff] %v232_v59  ;;  %561 = vrot.lane.b32.xlu1 %v9425_v14, %s9285_s23  ;;  %559 = vrot.lane.b32.xlu0 %v9427_v15, %s9285_s23  ;;  %v8367_v60 = vpack.c.bf16 %v231_v58, %v9535_v25 }
  0xc4   :  { %v210_v62 = vpop.permute.xlu1 %209  ;;  %v208_v63 = vpop.permute.xlu0 %207  ;;  %8368 = vmatprep.subr.bf16.mxu1 %v8367_v60 }
  0xc5   :  { %v233_v16 = vsel %vm227_vm2, %v206_v56, %v208_v63  ;;  %v234_v17 = vsel %vm227_vm2, %v208_v63, %v210_v62  ;;  %8370 = vmatpush1.bf16.msra.mxu1 %v8369_v61 }
  0xc6   :  { %264 = vst [vmem:[#allocation2 + $0xa8] sm:$0xff] %v233_v16  ;;  %265 = vst [vmem:[#allocation2 + $0xb0] sm:$0xff] %v234_v17  ;;  %645 = vrot.lane.b32.xlu1 %v9379_v3, %s9286_s24  ;;  %643 = vrot.lane.b32.xlu0 %v9371_v1, %s9286_s24 }
  0xc8   :  { %v214_v18 = vpop.permute.xlu1 %213  ;;  %v212_v19 = vpop.permute.xlu0 %211 }
  0xc9   :  { %v235_v20 = vsel %vm227_vm2, %v210_v62, %v212_v19  ;;  %v236_v21 = vsel %vm227_vm2, %v212_v19, %v214_v18 }
  0xca   :  { %266 = vst [vmem:[#allocation2 + $0xb8] sm:$0xff] %v235_v20  ;;  %267 = vst [vmem:[#allocation2 + $0xc0] sm:$0xff] %v236_v21  ;;  %649 = vrot.lane.b32.xlu1 %v9377_v2, %s9286_s24  ;;  %647 = vrot.lane.b32.xlu0 %v9369_v0, %s9286_s24 }
  0xcc   :  { %v218_v22 = vpop.permute.xlu1 %217  ;;  %v216_v23 = vpop.permute.xlu0 %215 }
  0xcd   :  { %v237_v24 = vsel %vm227_vm2, %v214_v18, %v216_v23  ;;  %v238_v25 = vsel %vm227_vm2, %v216_v23, %v218_v22 }
  0xce   :  { %268 = vst [vmem:[#allocation2 + $0xc8] sm:$0xff] %v237_v24  ;;  %269 = vst [vmem:[#allocation2 + $0xd0] sm:$0xff] %v238_v25  ;;  %653 = vrot.lane.b32.xlu1 %v9385_v4, %s9286_s24  ;;  %651 = vrot.lane.b32.xlu0 %v9387_v5, %s9286_s24 }
  0xd0   :  { %v222_v26 = vpop.permute.xlu1 %221  ;;  %v220_v27 = vpop.permute.xlu0 %219 }
  0xd1   :  { %v239_v28 = vsel %vm227_vm2, %v218_v22, %v220_v27  ;;  %v240_v29 = vsel %vm227_vm2, %v220_v27, %v222_v26 }
  0xd2   :  { %270 = vst [vmem:[#allocation2 + $0xd8] sm:$0xff] %v239_v28  ;;  %271 = vst [vmem:[#allocation2 + $0xe0] sm:$0xff] %v240_v29  ;;  %657 = vrot.lane.b32.xlu1 %v9393_v6, %s9286_s24  ;;  %655 = vrot.lane.b32.xlu0 %v9395_v7, %s9286_s24 }
  0xd4   :  { %v226_v30 = vpop.permute.xlu1 %225  ;;  %v224_v31 = vpop.permute.xlu0 %223 }
  0xd5   :  { %274 = vst.msk [vmem:[#allocation2 + $0xf8] sm:$0xff] %vm161_vm1, %v226_v30  ;;  %v241_v32 = vsel %vm227_vm2, %v222_v26, %v224_v31  ;;  %v242_v33 = vsel %vm227_vm2, %v224_v31, %v226_v30 }
  0xd6   :  { %272 = vst [vmem:[#allocation2 + $0xe8] sm:$0xff] %v241_v32  ;;  %273 = vst [vmem:[#allocation2 + $0xf0] sm:$0xff] %v242_v33  ;;  %661 = vrot.lane.b32.xlu1 %v9401_v8, %s9286_s24  ;;  %659 = vrot.lane.b32.xlu0 %v9403_v9, %s9286_s24 }
  0xd8   :  { %v310_v34 = vpop.permute.xlu1 %309  ;;  %v308_v35 = vpop.permute.xlu0 %307 }
  0xd9   :  { %v9626_v36 = vsel %vm339_vm3, %v308_v35, %v310_v34 }
  0xda   :  { %665 = vrot.lane.b32.xlu1 %v9409_v10, %s9286_s24  ;;  %663 = vrot.lane.b32.xlu0 %v9411_v11, %s9286_s24 }
  0xdc   :  { %v314_v37 = vpop.permute.xlu1 %313  ;;  %v312_v38 = vpop.permute.xlu0 %311 }
  0xdd   :  { %v9633_v39 = vsel %vm339_vm3, %v310_v34, %v312_v38  ;;  %v9636_v40 = vsel %vm339_vm3, %v312_v38, %v314_v37 }
  0xde   :  { %669 = vrot.lane.b32.xlu1 %v9417_v12, %s9286_s24  ;;  %667 = vrot.lane.b32.xlu0 %v9419_v13, %s9286_s24 }
  0xe0   :  { %v318_v41 = vpop.permute.xlu1 %317  ;;  %v316_v42 = vpop.permute.xlu0 %315 }
  0xe1   :  { %v9643_v43 = vsel %vm339_vm3, %v314_v37, %v316_v42  ;;  %v344_v44 = vsel %vm339_vm3, %v316_v42, %v318_v41 }
  0xe2   :  { %375 = vst [vmem:[#allocation2 + $0x120] sm:$0xff] %v344_v44  ;;  %673 = vrot.lane.b32.xlu1 %v9425_v14, %s9286_s24  ;;  %671 = vrot.lane.b32.xlu0 %v9427_v15, %s9286_s24 }
  0xe4   :  { %v322_v45 = vpop.permute.xlu1 %321  ;;  %v320_v46 = vpop.permute.xlu0 %319 }
  0xe5   :  { %v345_v47 = vsel %vm339_vm3, %v318_v41, %v320_v46  ;;  %v346_v48 = vsel %vm339_vm3, %v320_v46, %v322_v45 }
  0xe6   :  { %376 = vst [vmem:[#allocation2 + $0x128] sm:$0xff] %v345_v47  ;;  %377 = vst [vmem:[#allocation2 + $0x130] sm:$0xff] %v346_v48  ;;  %757 = vrot.lane.b32.xlu1 %v9379_v3, %s9287_s25  ;;  %755 = vrot.lane.b32.xlu0 %v9371_v1, %s9287_s25 }
  0xe8   :  { %v326_v49 = vpop.permute.xlu1 %325  ;;  %v324_v50 = vpop.permute.xlu0 %323 }
  0xe9   :  { %v347_v51 = vsel %vm339_vm3, %v322_v45, %v324_v50  ;;  %v348_v52 = vsel %vm339_vm3, %v324_v50, %v326_v49 }
  0xea   :  { %378 = vst [vmem:[#allocation2 + $0x138] sm:$0xff] %v347_v51  ;;  %379 = vst [vmem:[#allocation2 + $0x140] sm:$0xff] %v348_v52  ;;  %761 = vrot.lane.b32.xlu1 %v9377_v2, %s9287_s25  ;;  %759 = vrot.lane.b32.xlu0 %v9369_v0, %s9287_s25 }
  0xec   :  { %v330_v53 = vpop.permute.xlu1 %329  ;;  %v328_v54 = vpop.permute.xlu0 %327 }
  0xed   :  { %v349_v55 = vsel %vm339_vm3, %v326_v49, %v328_v54  ;;  %v350_v56 = vsel %vm339_vm3, %v328_v54, %v330_v53 }
  0xee   :  { %380 = vst [vmem:[#allocation2 + $0x148] sm:$0xff] %v349_v55  ;;  %381 = vst [vmem:[#allocation2 + $0x150] sm:$0xff] %v350_v56  ;;  %765 = vrot.lane.b32.xlu1 %v9385_v4, %s9287_s25  ;;  %763 = vrot.lane.b32.xlu0 %v9387_v5, %s9287_s25  ;;  %v9764_v55 = vld [vmem:[#allocation5 + $0x18] sm:$0xff] }
  0xf0   :  { %v334_v57 = vpop.permute.xlu1 %333  ;;  %v332_v58 = vpop.permute.xlu0 %331 }
  0xf1   :  { %v351_v59 = vsel %vm339_vm3, %v330_v53, %v332_v58  ;;  %v352_v60 = vsel %vm339_vm3, %v332_v58, %v334_v57 }
  0xf2   :  { %382 = vst [vmem:[#allocation2 + $0x158] sm:$0xff] %v351_v59  ;;  %383 = vst [vmem:[#allocation2 + $0x160] sm:$0xff] %v352_v60  ;;  %769 = vrot.lane.b32.xlu1 %v9393_v6, %s9287_s25  ;;  %767 = vrot.lane.b32.xlu0 %v9395_v7, %s9287_s25 }
  0xf4   :  { %v338_v61 = vpop.permute.xlu1 %337  ;;  %v336_v62 = vpop.permute.xlu0 %335 }
  0xf5   :  { %386 = vst.msk [vmem:[#allocation2 + $0x178] sm:$0xff] %vm161_vm1, %v338_v61  ;;  %v353_v63 = vsel %vm339_vm3, %v334_v57, %v336_v62  ;;  %v354_v16 = vsel %vm339_vm3, %v336_v62, %v338_v61 }
  0xf6   :  { %384 = vst [vmem:[#allocation2 + $0x168] sm:$0xff] %v353_v63  ;;  %385 = vst [vmem:[#allocation2 + $0x170] sm:$0xff] %v354_v16  ;;  %773 = vrot.lane.b32.xlu1 %v9401_v8, %s9287_s25  ;;  %771 = vrot.lane.b32.xlu0 %v9403_v9, %s9287_s25  ;;  %v9784_v63 = vld [vmem:[#allocation5 + $0x38] sm:$0xff]  ;;  %v9786_v16 = vld [vmem:[#allocation5 + $0x30] sm:$0xff] }
  0xf8   :  { %v422_v17 = vpop.permute.xlu1 %421  ;;  %v420_v18 = vpop.permute.xlu0 %419 }
  0xf9   :  { %v452_v19 = vsel %vm451_vm4, %v420_v18, %v422_v17 }
  0xfa   :  { %777 = vrot.lane.b32.xlu1 %v9409_v10, %s9287_s25  ;;  %775 = vrot.lane.b32.xlu0 %v9411_v11, %s9287_s25  ;;  %v8321_v25 = vpack.c.bf16 %v452_v19, %v9626_v36 }
  0xfc   :  { %v426_v20 = vpop.permute.xlu1 %425  ;;  %v424_v21 = vpop.permute.xlu0 %423 }
  0xfd   :  { %v453_v22 = vsel %vm451_vm4, %v422_v17, %v424_v21  ;;  %v454_v23 = vsel %vm451_vm4, %v424_v21, %v426_v20  ;;  %v9794_v21 = vld [vmem:[#allocation5 + $0x48] sm:$0xff] }
  0xfe   :  { %781 = vrot.lane.b32.xlu1 %v9417_v12, %s9287_s25  ;;  %779 = vrot.lane.b32.xlu0 %v9419_v13, %s9287_s25  ;;  %v8319_v24 = vpack.c.bf16 %v453_v22, %v9633_v39  ;;  %v8373_v31 = vpack.c.bf16 %v454_v23, %v9636_v40  ;;  %v9796_v22 = vld [vmem:[#allocation5 + $0x40] sm:$0xff] }
 0x100   :  { %v430_v26 = vpop.permute.xlu1 %429  ;;  %v428_v27 = vpop.permute.xlu0 %427  ;;  %8320 = vmatprep.subr.bf16.mxu0 %v8319_v24 }
 0x101   :  { %v455_v28 = vsel %vm451_vm4, %v426_v20, %v428_v27  ;;  %v456_v29 = vsel %vm451_vm4, %v428_v27, %v430_v26  ;;  %8322 = vmatpush1.bf16.msra.mxu0 %v8321_v25  ;;  %v9805_v27 = vld [vmem:[#allocation5 + $0x58] sm:$0xff] }
 0x102   :  { %487 = vst [vmem:[#allocation2 + $0x1a0] sm:$0xff] %v456_v29  ;;  %785 = vrot.lane.b32.xlu1 %v9425_v14, %s9287_s25  ;;  %783 = vrot.lane.b32.xlu0 %v9427_v15, %s9287_s25  ;;  %v8371_v30 = vpack.c.bf16 %v455_v28, %v9643_v43  ;;  %v9807_v28 = vld [vmem:[#allocation5 + $0x50] sm:$0xff] }
 0x104   :  { %v434_v32 = vpop.permute.xlu1 %433  ;;  %v432_v33 = vpop.permute.xlu0 %431  ;;  %8372 = vmatprep.subr.bf16.mxu1 %v8371_v30 }
 0x105   :  { %v457_v34 = vsel %vm451_vm4, %v430_v26, %v432_v33  ;;  %v458_v35 = vsel %vm451_vm4, %v432_v33, %v434_v32  ;;  %8374 = vmatpush1.bf16.msra.mxu1 %v8373_v31  ;;  %v9816_v33 = vld [vmem:[#allocation5 + $0x60] sm:$0xff] }
 0x106   :  { %488 = vst [vmem:[#allocation2 + $0x1a8] sm:$0xff] %v457_v34  ;;  %489 = vst [vmem:[#allocation2 + $0x1b0] sm:$0xff] %v458_v35  ;;  %869 = vrot.lane.b32.xlu1 %v9379_v3, %s9288_s26  ;;  %867 = vrot.lane.b32.xlu0 %v9371_v1, %s9288_s26 }
 0x108   :  { %v438_v36 = vpop.permute.xlu1 %437  ;;  %v436_v37 = vpop.permute.xlu0 %435 }
 0x109   :  { %v459_v38 = vsel %vm451_vm4, %v434_v32, %v436_v37  ;;  %v460_v39 = vsel %vm451_vm4, %v436_v37, %v438_v36  ;;  %v9814_v32 = vld [vmem:[#allocation5 + $0x68] sm:$0xff] }
 0x10a   :  { %490 = vst [vmem:[#allocation2 + $0x1b8] sm:$0xff] %v459_v38  ;;  %491 = vst [vmem:[#allocation2 + $0x1c0] sm:$0xff] %v460_v39  ;;  %873 = vrot.lane.b32.xlu1 %v9377_v2, %s9288_s26  ;;  %871 = vrot.lane.b32.xlu0 %v9369_v0, %s9288_s26  ;;  %v9825_v39 = vld [vmem:[#allocation5 + $0x78] sm:$0xff] }
 0x10c   :  { %v442_v40 = vpop.permute.xlu1 %441  ;;  %v440_v41 = vpop.permute.xlu0 %439 }
 0x10d   :  { %v461_v42 = vsel %vm451_vm4, %v438_v36, %v440_v41  ;;  %v462_v43 = vsel %vm451_vm4, %v440_v41, %v442_v40 }
 0x10e   :  { %492 = vst [vmem:[#allocation2 + $0x1c8] sm:$0xff] %v461_v42  ;;  %493 = vst [vmem:[#allocation2 + $0x1d0] sm:$0xff] %v462_v43  ;;  %877 = vrot.lane.b32.xlu1 %v9385_v4, %s9288_s26  ;;  %875 = vrot.lane.b32.xlu0 %v9387_v5, %s9288_s26 }
 0x110   :  { %v446_v44 = vpop.permute.xlu1 %445  ;;  %v444_v45 = vpop.permute.xlu0 %443 }
 0x111   :  { %v463_v2 = vsel %vm451_vm4, %v442_v40, %v444_v45  ;;  %v464_v0 = vsel %vm451_vm4, %v444_v45, %v446_v44  ;;  %v9827_v40 = vld [vmem:[#allocation5 + $0x70] sm:$0xff] }
 0x112   :  { %494 = vst [vmem:[#allocation2 + $0x1d8] sm:$0xff] %v463_v2  ;;  %495 = vst [vmem:[#allocation2 + $0x1e0] sm:$0xff] %v464_v0  ;;  %881 = vrot.lane.b32.xlu1 %v9393_v6, %s9288_s26  ;;  %879 = vrot.lane.b32.xlu0 %v9395_v7, %s9288_s26  ;;  %v9837_v0 = vld [vmem:[#allocation5 + $0x8] sm:$0xff] }
 0x114   :  { %v450_v46 = vpop.permute.xlu1 %449  ;;  %v448_v47 = vpop.permute.xlu0 %447 }
 0x115   :  { %498 = vst.msk [vmem:[#allocation2 + $0x1f8] sm:$0xff] %vm161_vm1, %v450_v46  ;;  %v465_v4 = vsel %vm451_vm4, %v446_v44, %v448_v47  ;;  %v466_v5 = vsel %vm451_vm4, %v448_v47, %v450_v46  ;;  %v9839_v46 = vld [vmem:[#allocation5] sm:$0xff] }
 0x116   :  { %496 = vst [vmem:[#allocation2 + $0x1e8] sm:$0xff] %v465_v4  ;;  %497 = vst [vmem:[#allocation2 + $0x1f0] sm:$0xff] %v466_v5  ;;  %885 = vrot.lane.b32.xlu1 %v9401_v8, %s9288_s26  ;;  %883 = vrot.lane.b32.xlu0 %v9403_v9, %s9288_s26 }
 0x118   :  { %v534_v6 = vpop.permute.xlu1 %533  ;;  %v532_v48 = vpop.permute.xlu0 %531 }
 0x119   :  { %v9734_v7 = vsel %vm563_vm5, %v532_v48, %v534_v6 }
 0x11a   :  { %889 = vrot.lane.b32.xlu1 %v9409_v10, %s9288_s26  ;;  %887 = vrot.lane.b32.xlu0 %v9411_v11, %s9288_s26 }
 0x11c   :  { %v538_v49 = vpop.permute.xlu1 %537  ;;  %v536_v50 = vpop.permute.xlu0 %535 }
 0x11d   :  { %v9741_v51 = vsel %vm563_vm5, %v534_v6, %v536_v50  ;;  %v9744_v8 = vsel %vm563_vm5, %v536_v50, %v538_v49 }
 0x11e   :  { %893 = vrot.lane.b32.xlu1 %v9417_v12, %s9288_s26  ;;  %891 = vrot.lane.b32.xlu0 %v9419_v13, %s9288_s26 }
 0x120   :  { %v542_v9 = vpop.permute.xlu1 %541  ;;  %v540_v52 = vpop.permute.xlu0 %539 }
 0x121   :  { %v9751_v10 = vsel %vm563_vm5, %v538_v49, %v540_v52  ;;  %v568_v11 = vsel %vm563_vm5, %v540_v52, %v542_v9 }
 0x122   :  { %599 = vst [vmem:[#allocation2 + $0x220] sm:$0xff] %v568_v11  ;;  %897 = vrot.lane.b32.xlu1 %v9425_v14, %s9288_s26  ;;  %895 = vrot.lane.b32.xlu0 %v9427_v15, %s9288_s26  ;;  %v9766_v14 = vld [vmem:[#allocation5 + $0x10] sm:$0xff] }
 0x124   :  { %v546_v53 = vpop.permute.xlu1 %545  ;;  %v544_v54 = vpop.permute.xlu0 %543 }
 0x125   :  { %v569_v12 = vsel %vm563_vm5, %v542_v9, %v544_v54  ;;  %v570_v13 = vsel %vm563_vm5, %v544_v54, %v546_v53 }
 0x126   :  { %600 = vst [vmem:[#allocation2 + $0x228] sm:$0xff] %v569_v12  ;;  %601 = vst [vmem:[#allocation2 + $0x230] sm:$0xff] %v570_v13  ;;  %981 = vrot.lane.b32.xlu1 %v9379_v3, %s9289_s27  ;;  %979 = vrot.lane.b32.xlu0 %v9371_v1, %s9289_s27  ;;  %v9774_v3 = vld [vmem:[#allocation5 + $0x28] sm:$0xff]  ;;  %v9776_v1 = vld [vmem:[#allocation5 + $0x20] sm:$0xff] }
 0x128   :  { %v550_v15 = vpop.permute.xlu1 %549  ;;  %v548_v56 = vpop.permute.xlu0 %547 }
 0x129   :  { %v571_v57 = vsel %vm563_vm5, %v546_v53, %v548_v56  ;;  %v572_v58 = vsel %vm563_vm5, %v548_v56, %v550_v15 }
 0x12a   :  { %602 = vst [vmem:[#allocation2 + $0x238] sm:$0xff] %v571_v57  ;;  %603 = vst [vmem:[#allocation2 + $0x240] sm:$0xff] %v572_v58  ;;  %985 = vrot.lane.b32.xlu1 %v9764_v55, %s9289_s27  ;;  %983 = vrot.lane.b32.xlu0 %v9766_v14, %s9289_s27 }
 0x12c   :  { %v554_v59 = vpop.permute.xlu1 %553  ;;  %v552_v60 = vpop.permute.xlu0 %551 }
 0x12d   :  { %v573_v61 = vsel %vm563_vm5, %v550_v15, %v552_v60  ;;  %v574_v62 = vsel %vm563_vm5, %v552_v60, %v554_v59 }
 0x12e   :  { %604 = vst [vmem:[#allocation2 + $0x248] sm:$0xff] %v573_v61  ;;  %605 = vst [vmem:[#allocation2 + $0x250] sm:$0xff] %v574_v62  ;;  %989 = vrot.lane.b32.xlu1 %v9774_v3, %s9289_s27  ;;  %987 = vrot.lane.b32.xlu0 %v9776_v1, %s9289_s27 }
 0x130   :  { %v558_v17 = vpop.permute.xlu1 %557  ;;  %v556_v18 = vpop.permute.xlu0 %555 }
 0x131   :  { %v575_v19 = vsel %vm563_vm5, %v554_v59, %v556_v18  ;;  %v576_v20 = vsel %vm563_vm5, %v556_v18, %v558_v17 }
 0x132   :  { %606 = vst [vmem:[#allocation2 + $0x258] sm:$0xff] %v575_v19  ;;  %607 = vst [vmem:[#allocation2 + $0x260] sm:$0xff] %v576_v20  ;;  %993 = vrot.lane.b32.xlu1 %v9784_v63, %s9289_s27  ;;  %991 = vrot.lane.b32.xlu0 %v9786_v16, %s9289_s27 }
 0x134   :  { %v562_v23 = vpop.permute.xlu1 %561  ;;  %v560_v24 = vpop.permute.xlu0 %559 }
 0x135   :  { %610 = vst.msk [vmem:[#allocation2 + $0x278] sm:$0xff] %vm161_vm1, %v562_v23  ;;  %v577_v25 = vsel %vm563_vm5, %v558_v17, %v560_v24  ;;  %v578_v26 = vsel %vm563_vm5, %v560_v24, %v562_v23 }
 0x136   :  { %608 = vst [vmem:[#allocation2 + $0x268] sm:$0xff] %v577_v25  ;;  %609 = vst [vmem:[#allocation2 + $0x270] sm:$0xff] %v578_v26  ;;  %997 = vrot.lane.b32.xlu1 %v9794_v21, %s9289_s27  ;;  %995 = vrot.lane.b32.xlu0 %v9796_v22, %s9289_s27  ;;  %v9898_v25 = vld [vmem:[#allocation5 + $0x80] sm:$0xff] }
 0x138   :  { %v646_v29 = vpop.permute.xlu1 %645  ;;  %v644_v30 = vpop.permute.xlu0 %643 }
 0x139   :  { %v676_v31 = vsel %vm675_vm6, %v644_v30, %v646_v29 }
 0x13a   :  { %1001 = vrot.lane.b32.xlu1 %v9805_v27, %s9289_s27  ;;  %999 = vrot.lane.b32.xlu0 %v9807_v28, %s9289_s27  ;;  %v8325_v41 = vpack.c.bf16 %v676_v31, %v9734_v7 }
 0x13c   :  { %v650_v34 = vpop.permute.xlu1 %649  ;;  %v648_v35 = vpop.permute.xlu0 %647 }
 0x13d   :  { %v677_v36 = vsel %vm675_vm6, %v646_v29, %v648_v35  ;;  %v678_v37 = vsel %vm675_vm6, %v648_v35, %v650_v34 }
 0x13e   :  { %1005 = vrot.lane.b32.xlu1 %v9814_v32, %s9289_s27  ;;  %1003 = vrot.lane.b32.xlu0 %v9816_v33, %s9289_s27  ;;  %v8323_v38 = vpack.c.bf16 %v677_v36, %v9741_v51  ;;  %v8377_v47 = vpack.c.bf16 %v678_v37, %v9744_v8 }
 0x140   :  { %v654_v42 = vpop.permute.xlu1 %653  ;;  %v652_v43 = vpop.permute.xlu0 %651  ;;  %8324 = vmatprep.subr.bf16.mxu0 %v8323_v38 }
 0x141   :  { %v679_v44 = vsel %vm675_vm6, %v650_v34, %v652_v43  ;;  %v680_v45 = vsel %vm675_vm6, %v652_v43, %v654_v42  ;;  %8326 = vmatpush1.bf16.msra.mxu0 %v8325_v41 }
 0x142   :  { %711 = vst [vmem:[#allocation2 + $0x2a0] sm:$0xff] %v680_v45  ;;  %1009 = vrot.lane.b32.xlu1 %v9825_v39, %s9289_s27  ;;  %1007 = vrot.lane.b32.xlu0 %v9827_v40, %s9289_s27  ;;  %v8375_v2 = vpack.c.bf16 %v679_v44, %v9751_v10  ;;  %v9914_v44 = vld [vmem:[#allocation5 + $0x10] sm:$0xff] }
 0x143   :  { %1544 = vst [vmem:[#allocation2 + $0x688] sm:$0xff] %v9914_v44 }
 0x144   :  { %v658_v4 = vpop.permute.xlu1 %657  ;;  %v656_v5 = vpop.permute.xlu0 %655  ;;  %8376 = vmatprep.subr.bf16.mxu1 %v8375_v2 }
 0x145   :  { %v681_v6 = vsel %vm675_vm6, %v654_v42, %v656_v5  ;;  %v682_v48 = vsel %vm675_vm6, %v656_v5, %v658_v4  ;;  %8378 = vmatpush1.bf16.msra.mxu1 %v8377_v47  ;;  %v9923_v5 = vld [vmem:[#allocation5 + $0x20] sm:$0xff] }
 0x146   :  { %712 = vst [vmem:[#allocation2 + $0x2a8] sm:$0xff] %v681_v6  ;;  %713 = vst [vmem:[#allocation2 + $0x2b0] sm:$0xff] %v682_v48  ;;  %1095 = vrot.lane.b32.xlu1 %v9837_v0, %s9290_s28  ;;  %1093 = vrot.lane.b32.xlu0 %v9839_v46, %s9290_s28  ;;  %v9925_v6 = vld [vmem:[#allocation5 + $0x18] sm:$0xff] }
 0x147   :  { %1546 = vst [vmem:[#allocation2 + $0x698] sm:$0xff] %v9923_v5  ;;  %1545 = vst [vmem:[#allocation2 + $0x690] sm:$0xff] %v9925_v6 }
 0x148   :  { %v662_v7 = vpop.permute.xlu1 %661  ;;  %v660_v49 = vpop.permute.xlu0 %659 }
 0x149   :  { %v683_v50 = vsel %vm675_vm6, %v658_v4, %v660_v49  ;;  %v684_v51 = vsel %vm675_vm6, %v660_v49, %v662_v7 }
 0x14a   :  { %714 = vst [vmem:[#allocation2 + $0x2b8] sm:$0xff] %v683_v50  ;;  %715 = vst [vmem:[#allocation2 + $0x2c0] sm:$0xff] %v684_v51  ;;  %1099 = vrot.lane.b32.xlu1 %v9764_v55, %s9290_s28  ;;  %1097 = vrot.lane.b32.xlu0 %v9766_v14, %s9290_s28 }
 0x14c   :  { %v666_v8 = vpop.permute.xlu1 %665  ;;  %v664_v9 = vpop.permute.xlu0 %663 }
 0x14d   :  { %v685_v52 = vsel %vm675_vm6, %v662_v7, %v664_v9  ;;  %v686_v10 = vsel %vm675_vm6, %v664_v9, %v666_v8 }
 0x14e   :  { %716 = vst [vmem:[#allocation2 + $0x2c8] sm:$0xff] %v685_v52  ;;  %717 = vst [vmem:[#allocation2 + $0x2d0] sm:$0xff] %v686_v10  ;;  %1103 = vrot.lane.b32.xlu1 %v9774_v3, %s9290_s28  ;;  %1101 = vrot.lane.b32.xlu0 %v9776_v1, %s9290_s28 }
 0x150   :  { %v670_v11 = vpop.permute.xlu1 %669  ;;  %v668_v53 = vpop.permute.xlu0 %667 }
 0x151   :  { %v687_v54 = vsel %vm675_vm6, %v666_v8, %v668_v53  ;;  %v688_v12 = vsel %vm675_vm6, %v668_v53, %v670_v11 }
 0x152   :  { %718 = vst [vmem:[#allocation2 + $0x2d8] sm:$0xff] %v687_v54  ;;  %719 = vst [vmem:[#allocation2 + $0x2e0] sm:$0xff] %v688_v12  ;;  %1107 = vrot.lane.b32.xlu1 %v9784_v63, %s9290_s28  ;;  %1105 = vrot.lane.b32.xlu0 %v9786_v16, %s9290_s28 }
 0x154   :  { %v674_v13 = vpop.permute.xlu1 %673  ;;  %v672_v15 = vpop.permute.xlu0 %671 }
 0x155   :  { %722 = vst.msk [vmem:[#allocation2 + $0x2f8] sm:$0xff] %vm161_vm1, %v674_v13  ;;  %v689_v56 = vsel %vm675_vm6, %v670_v11, %v672_v15  ;;  %v690_v57 = vsel %vm675_vm6, %v672_v15, %v674_v13 }
 0x156   :  { %720 = vst [vmem:[#allocation2 + $0x2e8] sm:$0xff] %v689_v56  ;;  %721 = vst [vmem:[#allocation2 + $0x2f0] sm:$0xff] %v690_v57  ;;  %1111 = vrot.lane.b32.xlu1 %v9794_v21, %s9290_s28  ;;  %1109 = vrot.lane.b32.xlu0 %v9796_v22, %s9290_s28 }
 0x158   :  { %v758_v58 = vpop.permute.xlu1 %757  ;;  %v756_v59 = vpop.permute.xlu0 %755 }
 0x159   :  { %v9874_v60 = vsel %vm787_vm7, %v756_v59, %v758_v58 }
 0x15a   :  { %1115 = vrot.lane.b32.xlu1 %v9805_v27, %s9290_s28  ;;  %1113 = vrot.lane.b32.xlu0 %v9807_v28, %s9290_s28 }
 0x15c   :  { %v762_v61 = vpop.permute.xlu1 %761  ;;  %v760_v62 = vpop.permute.xlu0 %759 }
 0x15d   :  { %v9881_v17 = vsel %vm787_vm7, %v758_v58, %v760_v62  ;;  %v9884_v18 = vsel %vm787_vm7, %v760_v62, %v762_v61 }
 0x15e   :  { %1119 = vrot.lane.b32.xlu1 %v9814_v32, %s9290_s28  ;;  %1117 = vrot.lane.b32.xlu0 %v9816_v33, %s9290_s28 }
 0x160   :  { %v766_v19 = vpop.permute.xlu1 %765  ;;  %v764_v20 = vpop.permute.xlu0 %763 }
 0x161   :  { %v9891_v23 = vsel %vm787_vm7, %v762_v61, %v764_v20  ;;  %v792_v24 = vsel %vm787_vm7, %v764_v20, %v766_v19 }
 0x162   :  { %823 = vst [vmem:[#allocation2 + $0x320] sm:$0xff] %v792_v24  ;;  %1123 = vrot.lane.b32.xlu1 %v9825_v39, %s9290_s28  ;;  %1121 = vrot.lane.b32.xlu0 %v9827_v40, %s9290_s28 }
 0x164   :  { %v770_v26 = vpop.permute.xlu1 %769  ;;  %v768_v29 = vpop.permute.xlu0 %767 }
 0x165   :  { %v793_v30 = vsel %vm787_vm7, %v766_v19, %v768_v29  ;;  %v794_v31 = vsel %vm787_vm7, %v768_v29, %v770_v26 }
 0x166   :  { %824 = vst [vmem:[#allocation2 + $0x328] sm:$0xff] %v793_v30  ;;  %825 = vst [vmem:[#allocation2 + $0x330] sm:$0xff] %v794_v31  ;;  %1210 = vrot.lane.b32.xlu1 %v9839_v46, %s9291_s29  ;;  %1125 = vrot.lane.b32.xlu0 %v9898_v25, %s9290_s28  ;;  %v9975_v31 = vld [vmem:[#allocation5 + $0x8] sm:$0xff] }
 0x167   :  { %1543 = vst [vmem:[#allocation2 + $0x680] sm:$0xff] %v9975_v31 }
 0x168   :  { %v774_v34 = vpop.permute.xlu1 %773  ;;  %v772_v35 = vpop.permute.xlu0 %771 }
 0x169   :  { %v795_v36 = vsel %vm787_vm7, %v770_v26, %v772_v35  ;;  %v796_v37 = vsel %vm787_vm7, %v772_v35, %v774_v34 }
 0x16a   :  { %826 = vst [vmem:[#allocation2 + $0x338] sm:$0xff] %v795_v36  ;;  %827 = vst [vmem:[#allocation2 + $0x340] sm:$0xff] %v796_v37  ;;  %1214 = vrot.lane.b32.xlu1 %v9766_v14, %s9291_s29  ;;  %1212 = vrot.lane.b32.xlu0 %v9837_v0, %s9291_s29 }
 0x16c   :  { %v778_v38 = vpop.permute.xlu1 %777  ;;  %v776_v41 = vpop.permute.xlu0 %775 }
 0x16d   :  { %v797_v42 = vsel %vm787_vm7, %v774_v34, %v776_v41  ;;  %v798_v43 = vsel %vm787_vm7, %v776_v41, %v778_v38 }
 0x16e   :  { %828 = vst [vmem:[#allocation2 + $0x348] sm:$0xff] %v797_v42  ;;  %829 = vst [vmem:[#allocation2 + $0x350] sm:$0xff] %v798_v43  ;;  %1218 = vrot.lane.b32.xlu1 %v9776_v1, %s9291_s29  ;;  %1216 = vrot.lane.b32.xlu0 %v9764_v55, %s9291_s29 }
 0x170   :  { %v782_v45 = vpop.permute.xlu1 %781  ;;  %v780_v2 = vpop.permute.xlu0 %779 }
 0x171   :  { %v799_v47 = vsel %vm787_vm7, %v778_v38, %v780_v2  ;;  %v800_v4 = vsel %vm787_vm7, %v780_v2, %v782_v45 }
 0x172   :  { %830 = vst [vmem:[#allocation2 + $0x358] sm:$0xff] %v799_v47  ;;  %831 = vst [vmem:[#allocation2 + $0x360] sm:$0xff] %v800_v4  ;;  %1222 = vrot.lane.b32.xlu1 %v9786_v16, %s9291_s29  ;;  %1220 = vrot.lane.b32.xlu0 %v9774_v3, %s9291_s29 }
 0x174   :  { %v786_v48 = vpop.permute.xlu1 %785  ;;  %v784_v7 = vpop.permute.xlu0 %783 }
 0x175   :  { %834 = vst.msk [vmem:[#allocation2 + $0x378] sm:$0xff] %vm161_vm1, %v786_v48  ;;  %v801_v49 = vsel %vm787_vm7, %v782_v45, %v784_v7  ;;  %v802_v50 = vsel %vm787_vm7, %v784_v7, %v786_v48 }
 0x176   :  { %832 = vst [vmem:[#allocation2 + $0x368] sm:$0xff] %v801_v49  ;;  %833 = vst [vmem:[#allocation2 + $0x370] sm:$0xff] %v802_v50  ;;  %1226 = vrot.lane.b32.xlu1 %v9796_v22, %s9291_s29  ;;  %1224 = vrot.lane.b32.xlu0 %v9784_v63, %s9291_s29 }
 0x178   :  { %v870_v51 = vpop.permute.xlu1 %869  ;;  %v868_v8 = vpop.permute.xlu0 %867 }
 0x179   :  { %v900_v9 = vsel %vm899_vm8, %v868_v8, %v870_v51 }
 0x17a   :  { %1230 = vrot.lane.b32.xlu1 %v9807_v28, %s9291_s29  ;;  %1228 = vrot.lane.b32.xlu0 %v9794_v21, %s9291_s29  ;;  %v8329_v12 = vpack.c.bf16 %v900_v9, %v9874_v60 }
 0x17c   :  { %v874_v52 = vpop.permute.xlu1 %873  ;;  %v872_v10 = vpop.permute.xlu0 %871 }
 0x17d   :  { %v901_v11 = vsel %vm899_vm8, %v870_v51, %v872_v10  ;;  %v902_v53 = vsel %vm899_vm8, %v872_v10, %v874_v52 }
 0x17e   :  { %1234 = vrot.lane.b32.xlu1 %v9816_v33, %s9291_s29  ;;  %1232 = vrot.lane.b32.xlu0 %v9805_v27, %s9291_s29  ;;  %v8327_v54 = vpack.c.bf16 %v901_v11, %v9881_v17  ;;  %v8381_v59 = vpack.c.bf16 %v902_v53, %v9884_v18 }
 0x180   :  { %v878_v13 = vpop.permute.xlu1 %877  ;;  %v876_v15 = vpop.permute.xlu0 %875  ;;  %8328 = vmatprep.subr.bf16.mxu0 %v8327_v54 }
 0x181   :  { %v903_v56 = vsel %vm899_vm8, %v874_v52, %v876_v15  ;;  %v904_v57 = vsel %vm899_vm8, %v876_v15, %v878_v13  ;;  %8330 = vmatpush1.bf16.msra.mxu0 %v8329_v12 }
 0x182   :  { %935 = vst [vmem:[#allocation2 + $0x3a0] sm:$0xff] %v904_v57  ;;  %1238 = vrot.lane.b32.xlu1 %v9827_v40, %s9291_s29  ;;  %1236 = vrot.lane.b32.xlu0 %v9814_v32, %s9291_s29  ;;  %v8379_v58 = vpack.c.bf16 %v903_v56, %v9891_v23 }
 0x184   :  { %v882_v60 = vpop.permute.xlu1 %881  ;;  %v880_v61 = vpop.permute.xlu0 %879  ;;  %8380 = vmatprep.subr.bf16.mxu1 %v8379_v58 }
 0x185   :  { %v905_v62 = vsel %vm899_vm8, %v878_v13, %v880_v61  ;;  %v906_v17 = vsel %vm899_vm8, %v880_v61, %v882_v60  ;;  %8382 = vmatpush1.bf16.msra.mxu1 %v8381_v59 }
 0x186   :  { %936 = vst [vmem:[#allocation2 + $0x3a8] sm:$0xff] %v905_v62  ;;  %937 = vst [vmem:[#allocation2 + $0x3b0] sm:$0xff] %v906_v17  ;;  %1242 = vrot.lane.b32.xlu1 %v9898_v25, %s9291_s29  ;;  %1240 = vrot.lane.b32.xlu0 %v9825_v39, %s9291_s29  ;;  %v1532_v17 = vld [vmem:[#allocation5 + $0x30] sm:$0xff] }
 0x187   :  { %1548 = vst [vmem:[#allocation2 + $0x6a8] sm:$0xff] %v1532_v17 }
 0x188   :  { %v886_v19 = vpop.permute.xlu1 %885  ;;  %v884_v20 = vpop.permute.xlu0 %883 }
 0x189   :  { %v907_v18 = vsel %vm899_vm8, %v882_v60, %v884_v20  ;;  %v908_v23 = vsel %vm899_vm8, %v884_v20, %v886_v19 }
 0x18a   :  { %938 = vst [vmem:[#allocation2 + $0x3b8] sm:$0xff] %v907_v18  ;;  %939 = vst [vmem:[#allocation2 + $0x3c0] sm:$0xff] %v908_v23  ;;  %1329 = vrot.lane.b32.xlu1 %v9837_v0, %s9292_s30  ;;  %1327 = vrot.lane.b32.xlu0 %v9839_v46, %s9292_s30 }
 0x18c   :  { %v890_v24 = vpop.permute.xlu1 %889  ;;  %v888_v26 = vpop.permute.xlu0 %887 }
 0x18d   :  { %v909_v29 = vsel %vm899_vm8, %v886_v19, %v888_v26  ;;  %v910_v30 = vsel %vm899_vm8, %v888_v26, %v890_v24  ;;  %v1531_v19 = vld [vmem:[#allocation5 + $0x28] sm:$0xff]  ;;  %v2950_v26 = vld [vmem:[#allocation5 + $0x40] sm:$0xff] }
 0x18e   :  { %940 = vst [vmem:[#allocation2 + $0x3c8] sm:$0xff] %v909_v29  ;;  %941 = vst [vmem:[#allocation2 + $0x3d0] sm:$0xff] %v910_v30  ;;  %1333 = vrot.lane.b32.xlu1 %v9764_v55, %s9292_s30  ;;  %1331 = vrot.lane.b32.xlu0 %v9766_v14, %s9292_s30  ;;  %v2949_v29 = vld [vmem:[#allocation5 + $0x38] sm:$0xff] }
 0x18f   :  { %1547 = vst [vmem:[#allocation2 + $0x6a0] sm:$0xff] %v1531_v19  ;;  %1550 = vst [vmem:[#allocation2 + $0x6b8] sm:$0xff] %v2950_v26 }
 0x190   :  { %v894_v34 = vpop.permute.xlu1 %893  ;;  %v892_v35 = vpop.permute.xlu0 %891  ;;  %1549 = vst [vmem:[#allocation2 + $0x6b0] sm:$0xff] %v2949_v29 }
 0x191   :  { %v911_v36 = vsel %vm899_vm8, %v890_v24, %v892_v35  ;;  %v912_v37 = vsel %vm899_vm8, %v892_v35, %v894_v34 }
 0x192   :  { %942 = vst [vmem:[#allocation2 + $0x3d8] sm:$0xff] %v911_v36  ;;  %943 = vst [vmem:[#allocation2 + $0x3e0] sm:$0xff] %v912_v37  ;;  %1337 = vrot.lane.b32.xlu1 %v9774_v3, %s9292_s30  ;;  %1335 = vrot.lane.b32.xlu0 %v9776_v1, %s9292_s30  ;;  %v2951_v36 = vld [vmem:[#allocation5 + $0x48] sm:$0xff]  ;;  %v2952_v37 = vld [vmem:[#allocation5 + $0x50] sm:$0xff] }
 0x193   :  { %1552 = vst [vmem:[#allocation2 + $0x6c8] sm:$0xff] %v2952_v37  ;;  %1551 = vst [vmem:[#allocation2 + $0x6c0] sm:$0xff] %v2951_v36 }
 0x194   :  { %v898_v38 = vpop.permute.xlu1 %897  ;;  %v896_v41 = vpop.permute.xlu0 %895 }
 0x195   :  { %946 = vst.msk [vmem:[#allocation2 + $0x3f8] sm:$0xff] %vm161_vm1, %v898_v38  ;;  %v913_v42 = vsel %vm899_vm8, %v894_v34, %v896_v41  ;;  %v914_v43 = vsel %vm899_vm8, %v896_v41, %v898_v38 }
 0x196   :  { %944 = vst [vmem:[#allocation2 + $0x3e8] sm:$0xff] %v913_v42  ;;  %945 = vst [vmem:[#allocation2 + $0x3f0] sm:$0xff] %v914_v43  ;;  %1341 = vrot.lane.b32.xlu1 %v9784_v63, %s9292_s30  ;;  %1339 = vrot.lane.b32.xlu0 %v9786_v16, %s9292_s30 }
 0x198   :  { %v982_v45 = vpop.permute.xlu1 %981  ;;  %v980_v2 = vpop.permute.xlu0 %979 }
 0x199   :  { %v9996_v47 = vsel %vm1011_vm9, %v980_v2, %v982_v45  ;;  %v2953_v2 = vld [vmem:[#allocation5 + $0x58] sm:$0xff] }
 0x19a   :  { %1345 = vrot.lane.b32.xlu1 %v9794_v21, %s9292_s30  ;;  %1343 = vrot.lane.b32.xlu0 %v9796_v22, %s9292_s30  ;;  %1553 = vst [vmem:[#allocation2 + $0x6d0] sm:$0xff] %v2953_v2 }
 0x19c   :  { %v986_v4 = vpop.permute.xlu1 %985  ;;  %v984_v48 = vpop.permute.xlu0 %983 }
 0x19d   :  { %v10003_v7 = vsel %vm1011_vm9, %v982_v45, %v984_v48  ;;  %v10006_v49 = vsel %vm1011_vm9, %v984_v48, %v986_v4  ;;  %v2954_v45 = vld [vmem:[#allocation5 + $0x60] sm:$0xff] }
 0x19e   :  { %1349 = vrot.lane.b32.xlu1 %v9805_v27, %s9292_s30  ;;  %1347 = vrot.lane.b32.xlu0 %v9807_v28, %s9292_s30  ;;  %v10063_v48 = vld [vmem:[#allocation5 + $0x80] sm:$0xff]  ;;  %1554 = vst [vmem:[#allocation2 + $0x6d8] sm:$0xff] %v2954_v45 }
 0x19f   :  { %1558 = vst.msk [vmem:[#allocation2 + $0x6f8] sm:$0xff] %vm161_vm1, %v10063_v48 }
 0x1a0   :  { %v990_v50 = vpop.permute.xlu1 %989  ;;  %v988_v51 = vpop.permute.xlu0 %987 }
 0x1a1   :  { %v10013_v8 = vsel %vm1011_vm9, %v986_v4, %v988_v51  ;;  %v1016_v9 = vsel %vm1011_vm9, %v988_v51, %v990_v50 }
 0x1a2   :  { %1047 = vst [vmem:[#allocation2 + $0x420] sm:$0xff] %v1016_v9  ;;  %1353 = vrot.lane.b32.xlu1 %v9814_v32, %s9292_s30  ;;  %1351 = vrot.lane.b32.xlu0 %v9816_v33, %s9292_s30 }
 0x1a4   :  { %v994_v52 = vpop.permute.xlu1 %993  ;;  %v992_v10 = vpop.permute.xlu0 %991 }
 0x1a5   :  { %v1017_v11 = vsel %vm1011_vm9, %v990_v50, %v992_v10  ;;  %v1018_v53 = vsel %vm1011_vm9, %v992_v10, %v994_v52 }
 0x1a6   :  { %1048 = vst [vmem:[#allocation2 + $0x428] sm:$0xff] %v1017_v11  ;;  %1049 = vst [vmem:[#allocation2 + $0x430] sm:$0xff] %v1018_v53  ;;  %1357 = vrot.lane.b32.xlu1 %v9825_v39, %s9292_s30  ;;  %1355 = vrot.lane.b32.xlu0 %v9827_v40, %s9292_s30  ;;  %v1539_v11 = vld [vmem:[#allocation5 + $0x68] sm:$0xff] }
 0x1a7   :  { %1555 = vst [vmem:[#allocation2 + $0x6e0] sm:$0xff] %v1539_v11 }
 0x1a8   :  { %v998_v54 = vpop.permute.xlu1 %997  ;;  %v996_v12 = vpop.permute.xlu0 %995 }
 0x1a9   :  { %v1019_v13 = vsel %vm1011_vm9, %v994_v52, %v996_v12  ;;  %v1020_v15 = vsel %vm1011_vm9, %v996_v12, %v998_v54 }
 0x1aa   :  { %1050 = vst [vmem:[#allocation2 + $0x438] sm:$0xff] %v1019_v13  ;;  %1051 = vst [vmem:[#allocation2 + $0x440] sm:$0xff] %v1020_v15  ;;  %1444 = vrot.lane.b32.xlu1 %v9839_v46, %s9293_s7  ;;  %1359 = vrot.lane.b32.xlu0 %v9898_v25, %s9292_s30 }
 0x1ac   :  { %v1002_v56 = vpop.permute.xlu1 %1001  ;;  %v1000_v57 = vpop.permute.xlu0 %999 }
 0x1ad   :  { %v1021_v58 = vsel %vm1011_vm9, %v998_v54, %v1000_v57  ;;  %v1022_v59 = vsel %vm1011_vm9, %v1000_v57, %v1002_v56 }
 0x1ae   :  { %1052 = vst [vmem:[#allocation2 + $0x448] sm:$0xff] %v1021_v58  ;;  %1053 = vst [vmem:[#allocation2 + $0x450] sm:$0xff] %v1022_v59  ;;  %1448 = vrot.lane.b32.xlu1 %v9766_v14, %s9293_s7  ;;  %1446 = vrot.lane.b32.xlu0 %v9837_v0, %s9293_s7 }
 0x1b0   :  { %v1006_v60 = vpop.permute.xlu1 %1005  ;;  %v1004_v61 = vpop.permute.xlu0 %1003 }
 0x1b1   :  { %v1023_v46 = vsel %vm1011_vm9, %v1002_v56, %v1004_v61  ;;  %v1024_v62 = vsel %vm1011_vm9, %v1004_v61, %v1006_v60 }
 0x1b2   :  { %1054 = vst [vmem:[#allocation2 + $0x458] sm:$0xff] %v1023_v46  ;;  %1055 = vst [vmem:[#allocation2 + $0x460] sm:$0xff] %v1024_v62  ;;  %1452 = vrot.lane.b32.xlu1 %v9776_v1, %s9293_s7  ;;  %1450 = vrot.lane.b32.xlu0 %v9764_v55, %s9293_s7 }
 0x1b4   :  { %v1010_v20 = vpop.permute.xlu1 %1009  ;;  %v1008_v18 = vpop.permute.xlu0 %1007 }
 0x1b5   :  { %1058 = vst.msk [vmem:[#allocation2 + $0x478] sm:$0xff] %vm161_vm1, %v1010_v20  ;;  %v1025_v23 = vsel %vm1011_vm9, %v1006_v60, %v1008_v18  ;;  %v1026_v24 = vsel %vm1011_vm9, %v1008_v18, %v1010_v20 }
 0x1b6   :  { %1056 = vst [vmem:[#allocation2 + $0x468] sm:$0xff] %v1025_v23  ;;  %1057 = vst [vmem:[#allocation2 + $0x470] sm:$0xff] %v1026_v24  ;;  %1456 = vrot.lane.b32.xlu1 %v9786_v16, %s9293_s7  ;;  %1454 = vrot.lane.b32.xlu0 %v9774_v3, %s9293_s7 }
 0x1b8   :  { %v1096_v30 = vpop.permute.xlu1 %1095  ;;  %v1094_v34 = vpop.permute.xlu0 %1093 }
 0x1b9   :  { %v1128_v35 = vsel %vm1127_vm10, %v1094_v34, %v1096_v30 }
 0x1ba   :  { %1460 = vrot.lane.b32.xlu1 %v9796_v22, %s9293_s7  ;;  %1458 = vrot.lane.b32.xlu0 %v9784_v63, %s9293_s7  ;;  %v8333_v50 = vpack.c.bf16 %v1128_v35, %v9996_v47 }
 0x1bc   :  { %v1100_v38 = vpop.permute.xlu1 %1099  ;;  %v1098_v41 = vpop.permute.xlu0 %1097 }
 0x1bd   :  { %v1129_v42 = vsel %vm1127_vm10, %v1096_v30, %v1098_v41  ;;  %v1130_v43 = vsel %vm1127_vm10, %v1098_v41, %v1100_v38 }
 0x1be   :  { %1464 = vrot.lane.b32.xlu1 %v9807_v28, %s9293_s7  ;;  %1462 = vrot.lane.b32.xlu0 %v9794_v21, %s9293_s7  ;;  %v8331_v4 = vpack.c.bf16 %v1129_v42, %v10003_v7  ;;  %v1540_v7 = vld [vmem:[#allocation5 + $0x70] sm:$0xff]  ;;  %v8385_v53 = vpack.c.bf16 %v1130_v43, %v10006_v49 }
 0x1bf   :  { %1556 = vst [vmem:[#allocation2 + $0x6e8] sm:$0xff] %v1540_v7  ;;  %v10168_v7 = vld [vmem:[#allocation5 + $0x38] sm:$0xff] }
 0x1c0   :  { %v1104_v51 = vpop.permute.xlu1 %1103  ;;  %v1102_v9 = vpop.permute.xlu0 %1101  ;;  %8332 = vmatprep.subr.bf16.mxu0 %v8331_v4 }
 0x1c1   :  { %v1131_v52 = vsel %vm1127_vm10, %v1100_v38, %v1102_v9  ;;  %v1132_v10 = vsel %vm1127_vm10, %v1102_v9, %v1104_v51  ;;  %8334 = vmatpush1.bf16.msra.mxu0 %v8333_v50  ;;  %v10156_v50 = vld [vmem:[#allocation5 + $0x30] sm:$0xff] }
 0x1c2   :  { %1164 = vst [vmem:[#allocation2 + $0x4a0] sm:$0xff] %v1132_v10  ;;  %1468 = vrot.lane.b32.xlu1 %v9816_v33, %s9293_s7  ;;  %1466 = vrot.lane.b32.xlu0 %v9805_v27, %s9293_s7  ;;  %v8383_v47 = vpack.c.bf16 %v1131_v52, %v10013_v8  ;;  %v2957_v8 = vld [vmem:[#allocation5 + $0x78] sm:$0xff] }
 0x1c3   :  { %1557 = vst [vmem:[#allocation2 + $0x6f0] sm:$0xff] %v2957_v8 }
 0x1c4   :  { %v1108_v54 = vpop.permute.xlu1 %1107  ;;  %v1106_v12 = vpop.permute.xlu0 %1105  ;;  %8384 = vmatprep.subr.bf16.mxu1 %v8383_v47  ;;  %v10166_v47 = vld [vmem:[#allocation5 + $0x40] sm:$0xff] }
 0x1c5   :  { %v1133_v13 = vsel %vm1127_vm10, %v1104_v51, %v1106_v12  ;;  %v1134_v15 = vsel %vm1127_vm10, %v1106_v12, %v1108_v54  ;;  %8386 = vmatpush1.bf16.msra.mxu1 %v8385_v53  ;;  %v10158_v51 = vld [vmem:[#allocation5 + $0x28] sm:$0xff] }
 0x1c6   :  { %1165 = vst [vmem:[#allocation2 + $0x4a8] sm:$0xff] %v1133_v13  ;;  %1166 = vst [vmem:[#allocation2 + $0x4b0] sm:$0xff] %v1134_v15  ;;  %1472 = vrot.lane.b32.xlu1 %v9827_v40, %s9293_s7  ;;  %1470 = vrot.lane.b32.xlu0 %v9814_v32, %s9293_s7  ;;  %v10177_v13 = vld [vmem:[#allocation5 + $0x50] sm:$0xff]  ;;  %v10179_v15 = vld [vmem:[#allocation5 + $0x48] sm:$0xff] }
 0x1c8   :  { %v1112_v49 = vpop.permute.xlu1 %1111  ;;  %v1110_v56 = vpop.permute.xlu0 %1109 }
 0x1c9   :  { %v1135_v57 = vsel %vm1127_vm10, %v1108_v54, %v1110_v56  ;;  %v1136_v58 = vsel %vm1127_vm10, %v1110_v56, %v1112_v49 }
 0x1ca   :  { %1167 = vst [vmem:[#allocation2 + $0x4b8] sm:$0xff] %v1135_v57  ;;  %1168 = vst [vmem:[#allocation2 + $0x4c0] sm:$0xff] %v1136_v58  ;;  %1476 = vrot.lane.b32.xlu1 %v9898_v25, %s9293_s7  ;;  %1474 = vrot.lane.b32.xlu0 %v9825_v39, %s9293_s7  ;;  %v10186_v57 = vld [vmem:[#allocation5 + $0x60] sm:$0xff]  ;;  %v10188_v58 = vld [vmem:[#allocation5 + $0x58] sm:$0xff] }
 0x1cc   :  { %v1116_v59 = vpop.permute.xlu1 %1115  ;;  %v1114_v60 = vpop.permute.xlu0 %1113 }
 0x1cd   :  { %v1137_v61 = vsel %vm1127_vm10, %v1112_v49, %v1114_v60  ;;  %v1138_v46 = vsel %vm1127_vm10, %v1114_v60, %v1116_v59 }
 0x1ce   :  { %1169 = vst [vmem:[#allocation2 + $0x4c8] sm:$0xff] %v1137_v61  ;;  %1170 = vst [vmem:[#allocation2 + $0x4d0] sm:$0xff] %v1138_v46  ;;  %1593 = vrot.lane.b32.xlu1 %v9766_v14, %s9294_s8  ;;  %1591 = vrot.lane.b32.xlu0 %v9837_v0, %s9294_s8 }
 0x1d0   :  { %v1120_v62 = vpop.permute.xlu1 %1119  ;;  %v1118_v17 = vpop.permute.xlu0 %1117 }
 0x1d1   :  { %v1139_v19 = vsel %vm1127_vm10, %v1116_v59, %v1118_v17  ;;  %v1140_v20 = vsel %vm1127_vm10, %v1118_v17, %v1120_v62  ;;  %v10197_v17 = vld [vmem:[#allocation5 + $0x70] sm:$0xff] }
 0x1d2   :  { %1171 = vst [vmem:[#allocation2 + $0x4d8] sm:$0xff] %v1139_v19  ;;  %1172 = vst [vmem:[#allocation2 + $0x4e0] sm:$0xff] %v1140_v20  ;;  %1597 = vrot.lane.b32.xlu1 %v9776_v1, %s9294_s8  ;;  %1595 = vrot.lane.b32.xlu0 %v9764_v55, %s9294_s8  ;;  %v10199_v19 = vld [vmem:[#allocation5 + $0x68] sm:$0xff] }
 0x1d4   :  { %v1124_v18 = vpop.permute.xlu1 %1123  ;;  %v1122_v23 = vpop.permute.xlu0 %1121 }
 0x1d5   :  { %v1141_v14 = vsel %vm1127_vm10, %v1120_v62, %v1122_v23  ;;  %v1142_v24 = vsel %vm1127_vm10, %v1122_v23, %v1124_v18 }
 0x1d6   :  { %1173 = vst [vmem:[#allocation2 + $0x4e8] sm:$0xff] %v1141_v14  ;;  %1174 = vst [vmem:[#allocation2 + $0x4f0] sm:$0xff] %v1142_v24  ;;  %1601 = vrot.lane.b32.xlu1 %v9786_v16, %s9294_s8  ;;  %1599 = vrot.lane.b32.xlu0 %v9774_v3, %s9294_s8 }
 0x1d8   :  { %v1211_v26 = vpop.permute.xlu1 %1210  ;;  %v1126_v29 = vpop.permute.xlu0 %1125 }
 0x1d9   :  { %v1143_v1 = vsel %vm1127_vm10, %v1124_v18, %v1126_v29  ;;  %v10209_v29 = vld [vmem:[#allocation5 + $0x78] sm:$0xff] }
 0x1da   :  { %1175 = vst.msk [vmem:[#allocation2 + $0x4f8] sm:$0xff] %vm161_vm1, %v1143_v1  ;;  %1605 = vrot.lane.b32.xlu1 %v9796_v22, %s9294_s8  ;;  %1603 = vrot.lane.b32.xlu0 %v9784_v63, %s9294_s8 }
 0x1dc   :  { %v1215_v55 = vpop.permute.xlu1 %1214  ;;  %v1213_v30 = vpop.permute.xlu0 %1212 }
 0x1dd   :  { %v10113_v16 = vsel %vm1244_vm11, %v1211_v26, %v1213_v30  ;;  %v10116_v3 = vsel %vm1244_vm11, %v1213_v30, %v1215_v55 }
 0x1de   :  { %1609 = vrot.lane.b32.xlu1 %v9807_v28, %s9294_s8  ;;  %1607 = vrot.lane.b32.xlu0 %v9794_v21, %s9294_s8 }
 0x1e0   :  { %v1219_v34 = vpop.permute.xlu1 %1218  ;;  %v1217_v22 = vpop.permute.xlu0 %1216 }
 0x1e1   :  { %v10123_v35 = vsel %vm1244_vm11, %v1215_v55, %v1217_v22  ;;  %v10126_v63 = vsel %vm1244_vm11, %v1217_v22, %v1219_v34 }
 0x1e2   :  { %1613 = vrot.lane.b32.xlu1 %v9816_v33, %s9294_s8  ;;  %1611 = vrot.lane.b32.xlu0 %v9805_v27, %s9294_s8 }
 0x1e4   :  { %v1223_v36 = vpop.permute.xlu1 %1222  ;;  %v1221_v37 = vpop.permute.xlu0 %1220 }
 0x1e5   :  { %v1249_v28 = vsel %vm1244_vm11, %v1219_v34, %v1221_v37  ;;  %v1250_v21 = vsel %vm1244_vm11, %v1221_v37, %v1223_v36 }
 0x1e6   :  { %1281 = vst [vmem:[#allocation2 + $0x520] sm:$0xff] %v1249_v28  ;;  %1282 = vst [vmem:[#allocation2 + $0x528] sm:$0xff] %v1250_v21  ;;  %1617 = vrot.lane.b32.xlu1 %v9827_v40, %s9294_s8  ;;  %1615 = vrot.lane.b32.xlu0 %v9814_v32, %s9294_s8 }
 0x1e8   :  { %v1227_v38 = vpop.permute.xlu1 %1226  ;;  %v1225_v41 = vpop.permute.xlu0 %1224 }
 0x1e9   :  { %v1251_v33 = vsel %vm1244_vm11, %v1223_v36, %v1225_v41  ;;  %v1252_v27 = vsel %vm1244_vm11, %v1225_v41, %v1227_v38 }
 0x1ea   :  { %1283 = vst [vmem:[#allocation2 + $0x530] sm:$0xff] %v1251_v33  ;;  %1284 = vst [vmem:[#allocation2 + $0x538] sm:$0xff] %v1252_v27  ;;  %1621 = vrot.lane.b32.xlu1 %v9898_v25, %s9294_s8  ;;  %1619 = vrot.lane.b32.xlu0 %v9825_v39, %s9294_s8 }
 0x1ec   :  { %v1231_v42 = vpop.permute.xlu1 %1230  ;;  %v1229_v43 = vpop.permute.xlu0 %1228 }
 0x1ed   :  { %v1253_v40 = vsel %vm1244_vm11, %v1227_v38, %v1229_v43  ;;  %v1254_v32 = vsel %vm1244_vm11, %v1229_v43, %v1231_v42 }
 0x1ee   :  { %1285 = vst [vmem:[#allocation2 + $0x540] sm:$0xff] %v1253_v40  ;;  %1286 = vst [vmem:[#allocation2 + $0x548] sm:$0xff] %v1254_v32  ;;  %1705 = vrot.lane.b32.xlu1 %v9914_v44, %s9295_s9  ;;  %1703 = vrot.lane.b32.xlu0 %v9837_v0, %s9295_s9 }
 0x1f0   :  { %v1235_v45 = vpop.permute.xlu1 %1234  ;;  %v1233_v2 = vpop.permute.xlu0 %1232 }
 0x1f1   :  { %v1255_v4 = vsel %vm1244_vm11, %v1231_v42, %v1233_v2  ;;  %v1256_v39 = vsel %vm1244_vm11, %v1233_v2, %v1235_v45 }
 0x1f2   :  { %1287 = vst [vmem:[#allocation2 + $0x550] sm:$0xff] %v1255_v4  ;;  %1288 = vst [vmem:[#allocation2 + $0x558] sm:$0xff] %v1256_v39  ;;  %1709 = vrot.lane.b32.xlu1 %v9923_v5, %s9295_s9  ;;  %1707 = vrot.lane.b32.xlu0 %v9925_v6, %s9295_s9 }
 0x1f4   :  { %v1239_v9 = vpop.permute.xlu1 %1238  ;;  %v1237_v0 = vpop.permute.xlu0 %1236 }
 0x1f5   :  { %v1257_v52 = vsel %vm1244_vm11, %v1235_v45, %v1237_v0  ;;  %v1258_v10 = vsel %vm1244_vm11, %v1237_v0, %v1239_v9 }
 0x1f6   :  { %1289 = vst [vmem:[#allocation2 + $0x560] sm:$0xff] %v1257_v52  ;;  %1290 = vst [vmem:[#allocation2 + $0x568] sm:$0xff] %v1258_v10  ;;  %1713 = vrot.lane.b32.xlu1 %v10156_v50, %s9295_s9  ;;  %1711 = vrot.lane.b32.xlu0 %v10158_v51, %s9295_s9 }
 0x1f8   :  { %v1243_v11 = vpop.permute.xlu1 %1242  ;;  %v1241_v53 = vpop.permute.xlu0 %1240 }
 0x1f9   :  { %v1259_v54 = vsel %vm1244_vm11, %v1239_v9, %v1241_v53  ;;  %v1260_v12 = vsel %vm1244_vm11, %v1241_v53, %v1243_v11 }
 0x1fa   :  { %1291 = vst [vmem:[#allocation2 + $0x570] sm:$0xff] %v1259_v54  ;;  %1292 = vst.msk [vmem:[#allocation2 + $0x578] sm:$0xff] %vm161_vm1, %v1260_v12  ;;  %1717 = vrot.lane.b32.xlu1 %v10166_v47, %s9295_s9  ;;  %1715 = vrot.lane.b32.xlu0 %v10168_v7, %s9295_s9 }
 0x1fc   :  { %v1330_v8 = vpop.permute.xlu1 %1329  ;;  %v1328_v49 = vpop.permute.xlu0 %1327 }
 0x1fd   :  { %v1362_v56 = vsel %vm1361_vm12, %v1328_v49, %v1330_v8 }
 0x1fe   :  { %1721 = vrot.lane.b32.xlu1 %v10177_v13, %s9295_s9  ;;  %1719 = vrot.lane.b32.xlu0 %v10179_v15, %s9295_s9  ;;  %v8337_v20 = vpack.c.bf16 %v1362_v56, %v10113_v16  ;;  %v10264_v56 = vld [vmem:[#allocation5 + $0x80] sm:$0xff] }
 0x200   :  { %v1334_v59 = vpop.permute.xlu1 %1333  ;;  %v1332_v60 = vpop.permute.xlu0 %1331 }
 0x201   :  { %v1363_v61 = vsel %vm1361_vm12, %v1330_v8, %v1332_v60  ;;  %v1364_v46 = vsel %vm1361_vm12, %v1332_v60, %v1334_v59 }
 0x202   :  { %1725 = vrot.lane.b32.xlu1 %v10186_v57, %s9295_s9  ;;  %1723 = vrot.lane.b32.xlu0 %v10188_v58, %s9295_s9  ;;  %v8335_v62 = vpack.c.bf16 %v1363_v61, %v10116_v3  ;;  %v8389_v1 = vpack.c.bf16 %v1364_v46, %v10123_v35 }
 0x204   :  { %v1338_v18 = vpop.permute.xlu1 %1337  ;;  %v1336_v23 = vpop.permute.xlu0 %1335  ;;  %8336 = vmatprep.subr.bf16.mxu0 %v8335_v62 }
 0x205   :  { %v1365_v14 = vsel %vm1361_vm12, %v1334_v59, %v1336_v23  ;;  %v1366_v24 = vsel %vm1361_vm12, %v1336_v23, %v1338_v18  ;;  %8338 = vmatpush1.bf16.msra.mxu0 %v8337_v20 }
 0x206   :  { %1398 = vst [vmem:[#allocation2 + $0x5a0] sm:$0xff] %v1366_v24  ;;  %1729 = vrot.lane.b32.xlu1 %v10197_v17, %s9295_s9  ;;  %1727 = vrot.lane.b32.xlu0 %v10199_v19, %s9295_s9  ;;  %v8387_v26 = vpack.c.bf16 %v1365_v14, %v10126_v63 }
 0x208   :  { %v1342_v55 = vpop.permute.xlu1 %1341  ;;  %v1340_v30 = vpop.permute.xlu0 %1339  ;;  %8388 = vmatprep.subr.bf16.mxu1 %v8387_v26 }
 0x209   :  { %v1367_v16 = vsel %vm1361_vm12, %v1338_v18, %v1340_v30  ;;  %v1368_v3 = vsel %vm1361_vm12, %v1340_v30, %v1342_v55  ;;  %8390 = vmatpush1.bf16.msra.mxu1 %v8389_v1 }
 0x20a   :  { %1399 = vst [vmem:[#allocation2 + $0x5a8] sm:$0xff] %v1367_v16  ;;  %1400 = vst [vmem:[#allocation2 + $0x5b0] sm:$0xff] %v1368_v3  ;;  %1733 = vrot.lane.b32.xlu1 %v9898_v25, %s9295_s9  ;;  %1731 = vrot.lane.b32.xlu0 %v10209_v29, %s9295_s9 }
 0x20c   :  { %v1346_v34 = vpop.permute.xlu1 %1345  ;;  %v1344_v22 = vpop.permute.xlu0 %1343 }
 0x20d   :  { %v1369_v35 = vsel %vm1361_vm12, %v1342_v55, %v1344_v22  ;;  %v1370_v63 = vsel %vm1361_vm12, %v1344_v22, %v1346_v34 }
 0x20e   :  { %1401 = vst [vmem:[#allocation2 + $0x5b8] sm:$0xff] %v1369_v35  ;;  %1402 = vst [vmem:[#allocation2 + $0x5c0] sm:$0xff] %v1370_v63  ;;  %1817 = vrot.lane.b32.xlu1 %v9914_v44, %s9296_s10  ;;  %1815 = vrot.lane.b32.xlu0 %v9975_v31, %s9296_s10 }
 0x210   :  { %v1350_v36 = vpop.permute.xlu1 %1349  ;;  %v1348_v25 = vpop.permute.xlu0 %1347 }
 0x211   :  { %v1371_v37 = vsel %vm1361_vm12, %v1346_v34, %v1348_v25  ;;  %v1372_v28 = vsel %vm1361_vm12, %v1348_v25, %v1350_v36 }
 0x212   :  { %1403 = vst [vmem:[#allocation2 + $0x5c8] sm:$0xff] %v1371_v37  ;;  %1404 = vst [vmem:[#allocation2 + $0x5d0] sm:$0xff] %v1372_v28  ;;  %1821 = vrot.lane.b32.xlu1 %v9923_v5, %s9296_s10  ;;  %1819 = vrot.lane.b32.xlu0 %v9925_v6, %s9296_s10 }
 0x214   :  { %v1354_v21 = vpop.permute.xlu1 %1353  ;;  %v1352_v38 = vpop.permute.xlu0 %1351 }
 0x215   :  { %v1373_v41 = vsel %vm1361_vm12, %v1350_v36, %v1352_v38  ;;  %v1374_v33 = vsel %vm1361_vm12, %v1352_v38, %v1354_v21 }
 0x216   :  { %1405 = vst [vmem:[#allocation2 + $0x5d8] sm:$0xff] %v1373_v41  ;;  %1406 = vst [vmem:[#allocation2 + $0x5e0] sm:$0xff] %v1374_v33  ;;  %1825 = vrot.lane.b32.xlu1 %v10156_v50, %s9296_s10  ;;  %1823 = vrot.lane.b32.xlu0 %v10158_v51, %s9296_s10 }
 0x218   :  { %v1358_v27 = vpop.permute.xlu1 %1357  ;;  %v1356_v42 = vpop.permute.xlu0 %1355 }
 0x219   :  { %v1375_v43 = vsel %vm1361_vm12, %v1354_v21, %v1356_v42  ;;  %v1376_v40 = vsel %vm1361_vm12, %v1356_v42, %v1358_v27 }
 0x21a   :  { %1407 = vst [vmem:[#allocation2 + $0x5e8] sm:$0xff] %v1375_v43  ;;  %1408 = vst [vmem:[#allocation2 + $0x5f0] sm:$0xff] %v1376_v40  ;;  %1829 = vrot.lane.b32.xlu1 %v10166_v47, %s9296_s10  ;;  %1827 = vrot.lane.b32.xlu0 %v10168_v7, %s9296_s10 }
 0x21c   :  { %v1445_v32 = vpop.permute.xlu1 %1444  ;;  %v1360_v45 = vpop.permute.xlu0 %1359 }
 0x21d   :  { %v1377_v2 = vsel %vm1361_vm12, %v1358_v27, %v1360_v45 }
 0x21e   :  { %1409 = vst.msk [vmem:[#allocation2 + $0x5f8] sm:$0xff] %vm161_vm1, %v1377_v2  ;;  %1833 = vrot.lane.b32.xlu1 %v10177_v13, %s9296_s10  ;;  %1831 = vrot.lane.b32.xlu0 %v10179_v15, %s9296_s10 }
 0x220   :  { %v1449_v4 = vpop.permute.xlu1 %1448  ;;  %v1447_v39 = vpop.permute.xlu0 %1446 }
 0x221   :  { %v1479_v9 = vsel %vm13040_vm13, %v1445_v32, %v1447_v39  ;;  %v1480_v0 = vsel %vm13040_vm13, %v1447_v39, %v1449_v4  ;;  %v10330_v39 = vld [vmem:[#allocation2 + $0x688] sm:$0xff] }
 0x222   :  { %1837 = vrot.lane.b32.xlu1 %v10186_v57, %s9296_s10  ;;  %1835 = vrot.lane.b32.xlu0 %v10188_v58, %s9296_s10  ;;  %v8339_v52 = vpack.c.bf16 %v9914_v44, %v1480_v0  ;;  %v8341_v10 = vpack.c.bf16 %v9975_v31, %v1479_v9 }
 0x224   :  { %v1453_v11 = vpop.permute.xlu1 %1452  ;;  %v1451_v53 = vpop.permute.xlu0 %1450  ;;  %8340 = vmatprep.subr.bf16.mxu0 %v8339_v52 }
 0x225   :  { %v1481_v54 = vsel %vm13040_vm13, %v1449_v4, %v1451_v53  ;;  %v1482_v12 = vsel %vm13040_vm13, %v1451_v53, %v1453_v11  ;;  %8342 = vmatpush1.bf16.msra.mxu0 %v8341_v10  ;;  %v10342_v53 = vld [vmem:[#allocation2 + $0x690] sm:$0xff] }
 0x226   :  { %1841 = vrot.lane.b32.xlu1 %v10197_v17, %s9296_s10  ;;  %1839 = vrot.lane.b32.xlu0 %v10199_v19, %s9296_s10  ;;  %v8391_v8 = vpack.c.bf16 %v9923_v5, %v1482_v12  ;;  %v8393_v49 = vpack.c.bf16 %v9925_v6, %v1481_v54 }
 0x228   :  { %v1457_v59 = vpop.permute.xlu1 %1456  ;;  %v1455_v60 = vpop.permute.xlu0 %1454  ;;  %8392 = vmatprep.subr.bf16.mxu1 %v8391_v8 }
 0x229   :  { %v1483_v61 = vsel %vm13040_vm13, %v1453_v11, %v1455_v60  ;;  %v1484_v46 = vsel %vm13040_vm13, %v1455_v60, %v1457_v59  ;;  %8394 = vmatpush1.bf16.msra.mxu1 %v8393_v49  ;;  %v10338_v11 = vld [vmem:[#allocation2 + $0x698] sm:$0xff] }
 0x22a   :  { %1515 = vst [vmem:[#allocation2 + $0x620] sm:$0xff] %v1483_v61  ;;  %1516 = vst [vmem:[#allocation2 + $0x628] sm:$0xff] %v1484_v46  ;;  %1845 = vrot.lane.b32.xlu1 %v10264_v56, %s9296_s10  ;;  %1843 = vrot.lane.b32.xlu0 %v10209_v29, %s9296_s10 }
 0x22c   :  { %v1461_v62 = vpop.permute.xlu1 %1460  ;;  %v1459_v20 = vpop.permute.xlu0 %1458 }
 0x22d   :  { %v1485_v18 = vsel %vm13040_vm13, %v1457_v59, %v1459_v20  ;;  %v1486_v23 = vsel %vm13040_vm13, %v1459_v20, %v1461_v62 }
 0x22e   :  { %1517 = vst [vmem:[#allocation2 + $0x630] sm:$0xff] %v1485_v18  ;;  %1518 = vst [vmem:[#allocation2 + $0x638] sm:$0xff] %v1486_v23  ;;  %1929 = vrot.lane.b32.xlu1 %v9914_v44, %s9297_s11  ;;  %1927 = vrot.lane.b32.xlu0 %v9975_v31, %s9297_s11 }
 0x230   :  { %v1465_v14 = vpop.permute.xlu1 %1464  ;;  %v1463_v24 = vpop.permute.xlu0 %1462 }
 0x231   :  { %v1487_v26 = vsel %vm13040_vm13, %v1461_v62, %v1463_v24  ;;  %v1488_v1 = vsel %vm13040_vm13, %v1463_v24, %v1465_v14 }
 0x232   :  { %1519 = vst [vmem:[#allocation2 + $0x640] sm:$0xff] %v1487_v26  ;;  %1520 = vst [vmem:[#allocation2 + $0x648] sm:$0xff] %v1488_v1  ;;  %1933 = vrot.lane.b32.xlu1 %v9923_v5, %s9297_s11  ;;  %1931 = vrot.lane.b32.xlu0 %v9925_v6, %s9297_s11 }
 0x234   :  { %v1469_v55 = vpop.permute.xlu1 %1468  ;;  %v1467_v30 = vpop.permute.xlu0 %1466 }
 0x235   :  { %v1489_v44 = vsel %vm13040_vm13, %v1465_v14, %v1467_v30  ;;  %v1490_v16 = vsel %vm13040_vm13, %v1467_v30, %v1469_v55 }
 0x236   :  { %1521 = vst [vmem:[#allocation2 + $0x650] sm:$0xff] %v1489_v44  ;;  %1522 = vst [vmem:[#allocation2 + $0x658] sm:$0xff] %v1490_v16  ;;  %1937 = vrot.lane.b32.xlu1 %v10156_v50, %s9297_s11  ;;  %1935 = vrot.lane.b32.xlu0 %v10158_v51, %s9297_s11 }
 0x238   :  { %v1473_v3 = vpop.permute.xlu1 %1472  ;;  %v1471_v34 = vpop.permute.xlu0 %1470 }
 0x239   :  { %v1491_v5 = vsel %vm13040_vm13, %v1469_v55, %v1471_v34  ;;  %v1492_v6 = vsel %vm13040_vm13, %v1471_v34, %v1473_v3 }
 0x23a   :  { %1523 = vst [vmem:[#allocation2 + $0x660] sm:$0xff] %v1491_v5  ;;  %1524 = vst [vmem:[#allocation2 + $0x668] sm:$0xff] %v1492_v6  ;;  %1941 = vrot.lane.b32.xlu1 %v10166_v47, %s9297_s11  ;;  %1939 = vrot.lane.b32.xlu0 %v10168_v7, %s9297_s11 }
 0x23c   :  { %v1477_v22 = vpop.permute.xlu1 %1476  ;;  %v1475_v35 = vpop.permute.xlu0 %1474 }
 0x23d   :  { %v1493_v63 = vsel %vm13040_vm13, %v1473_v3, %v1475_v35  ;;  %v1494_v36 = vsel %vm13040_vm13, %v1475_v35, %v1477_v22  ;;  %v10385_v35 = vld [vmem:[#allocation5 + $0x88] sm:$0xff]  ;;  %vm13044_vm13 = vcmask 220160  }
 0x23e   :  { %1525 = vst [vmem:[#allocation2 + $0x670] sm:$0xff] %v1493_v63  ;;  %1526 = vst.msk [vmem:[#allocation2 + $0x678] sm:$0xff] %vm161_vm1, %v1494_v36  ;;  %1945 = vrot.lane.b32.xlu1 %v10177_v13, %s9297_s11  ;;  %1943 = vrot.lane.b32.xlu0 %v10179_v15, %s9297_s11 }
 0x240   :  { %v1594_v25 = vpop.permute.xlu1 %1593  ;;  %v1592_v37 = vpop.permute.xlu0 %1591 }
 0x241   :  { %v10304_v28 = vsel %vm13030_vm14, %v1592_v37, %v1594_v25 }
 0x242   :  { %1949 = vrot.lane.b32.xlu1 %v10186_v57, %s9297_s11  ;;  %1947 = vrot.lane.b32.xlu0 %v10188_v58, %s9297_s11 }
 0x244   :  { %v1598_v21 = vpop.permute.xlu1 %1597  ;;  %v1596_v38 = vpop.permute.xlu0 %1595 }
 0x245   :  { %v10311_v41 = vsel %vm13030_vm14, %v1594_v25, %v1596_v38  ;;  %v10314_v33 = vsel %vm13030_vm14, %v1596_v38, %v1598_v21 }
 0x246   :  { %1953 = vrot.lane.b32.xlu1 %v10197_v17, %s9297_s11  ;;  %1951 = vrot.lane.b32.xlu0 %v10199_v19, %s9297_s11 }
 0x248   :  { %v1602_v27 = vpop.permute.xlu1 %1601  ;;  %v1600_v42 = vpop.permute.xlu0 %1599 }
 0x249   :  { %v10321_v43 = vsel %vm13030_vm14, %v1598_v21, %v1600_v42  ;;  %v1628_v40 = vsel %vm13030_vm14, %v1600_v42, %v1602_v27  ;;  %v10390_v21 = vld [vmem:[#allocation2 + $0x680] sm:$0xff] }
 0x24a   :  { %1659 = vst [vmem:[#allocation2 + $0x720] sm:$0xff] %v1628_v40  ;;  %1957 = vrot.lane.b32.xlu1 %v10264_v56, %s9297_s11  ;;  %1955 = vrot.lane.b32.xlu0 %v10209_v29, %s9297_s11 }
 0x24c   :  { %v1606_v32 = vpop.permute.xlu1 %1605  ;;  %v1604_v45 = vpop.permute.xlu0 %1603 }
 0x24d   :  { %v1629_v2 = vsel %vm13030_vm14, %v1602_v27, %v1604_v45  ;;  %v1630_v4 = vsel %vm13030_vm14, %v1604_v45, %v1606_v32 }
 0x24e   :  { %1660 = vst [vmem:[#allocation2 + $0x728] sm:$0xff] %v1629_v2  ;;  %1661 = vst [vmem:[#allocation2 + $0x730] sm:$0xff] %v1630_v4  ;;  %2043 = vrot.lane.b32.xlu1 %v10330_v39, %s9298_s12  ;;  %2041 = vrot.lane.b32.xlu0 %v9975_v31, %s9298_s12 }
 0x250   :  { %v1610_v9 = vpop.permute.xlu1 %1609  ;;  %v1608_v0 = vpop.permute.xlu0 %1607 }
 0x251   :  { %v1631_v52 = vsel %vm13030_vm14, %v1606_v32, %v1608_v0  ;;  %v1632_v10 = vsel %vm13030_vm14, %v1608_v0, %v1610_v9 }
 0x252   :  { %1662 = vst [vmem:[#allocation2 + $0x738] sm:$0xff] %v1631_v52  ;;  %1663 = vst [vmem:[#allocation2 + $0x740] sm:$0xff] %v1632_v10  ;;  %2047 = vrot.lane.b32.xlu1 %v10338_v11, %s9298_s12  ;;  %2045 = vrot.lane.b32.xlu0 %v10342_v53, %s9298_s12 }
 0x254   :  { %v1614_v54 = vpop.permute.xlu1 %1613  ;;  %v1612_v31 = vpop.permute.xlu0 %1611 }
 0x255   :  { %v1633_v12 = vsel %vm13030_vm14, %v1610_v9, %v1612_v31  ;;  %v1634_v8 = vsel %vm13030_vm14, %v1612_v31, %v1614_v54 }
 0x256   :  { %1664 = vst [vmem:[#allocation2 + $0x748] sm:$0xff] %v1633_v12  ;;  %1665 = vst [vmem:[#allocation2 + $0x750] sm:$0xff] %v1634_v8  ;;  %2051 = vrot.lane.b32.xlu1 %v10156_v50, %s9298_s12  ;;  %2049 = vrot.lane.b32.xlu0 %v10158_v51, %s9298_s12 }
 0x258   :  { %v1618_v49 = vpop.permute.xlu1 %1617  ;;  %v1616_v59 = vpop.permute.xlu0 %1615 }
 0x259   :  { %v1635_v60 = vsel %vm13030_vm14, %v1614_v54, %v1616_v59  ;;  %v1636_v61 = vsel %vm13030_vm14, %v1616_v59, %v1618_v49 }
 0x25a   :  { %1666 = vst [vmem:[#allocation2 + $0x758] sm:$0xff] %v1635_v60  ;;  %1667 = vst [vmem:[#allocation2 + $0x760] sm:$0xff] %v1636_v61  ;;  %2055 = vrot.lane.b32.xlu1 %v10166_v47, %s9298_s12  ;;  %2053 = vrot.lane.b32.xlu0 %v10168_v7, %s9298_s12 }
 0x25c   :  { %v1622_v46 = vpop.permute.xlu1 %1621  ;;  %v1620_v62 = vpop.permute.xlu0 %1619 }
 0x25d   :  { %1670 = vst.msk [vmem:[#allocation2 + $0x778] sm:$0xff] %vm161_vm1, %v1622_v46  ;;  %v1637_v20 = vsel %vm13030_vm14, %v1618_v49, %v1620_v62  ;;  %v1638_v18 = vsel %vm13030_vm14, %v1620_v62, %v1622_v46  ;;  %vm13032_vm14 = vcmask 965632  }
 0x25e   :  { %1668 = vst [vmem:[#allocation2 + $0x768] sm:$0xff] %v1637_v20  ;;  %1669 = vst [vmem:[#allocation2 + $0x770] sm:$0xff] %v1638_v18  ;;  %2059 = vrot.lane.b32.xlu1 %v10177_v13, %s9298_s12  ;;  %2057 = vrot.lane.b32.xlu0 %v10179_v15, %s9298_s12 }
 0x260   :  { %v1706_v23 = vpop.permute.xlu1 %1705  ;;  %v1704_v14 = vpop.permute.xlu0 %1703 }
 0x261   :  { %v1736_v24 = vsel %vm13031_vm15, %v1704_v14, %v1706_v23 }
 0x262   :  { %2063 = vrot.lane.b32.xlu1 %v10186_v57, %s9298_s12  ;;  %2061 = vrot.lane.b32.xlu0 %v10188_v58, %s9298_s12  ;;  %v8345_v16 = vpack.c.bf16 %v1736_v24, %v10304_v28 }
 0x264   :  { %v1710_v26 = vpop.permute.xlu1 %1709  ;;  %v1708_v1 = vpop.permute.xlu0 %1707 }
 0x265   :  { %v1737_v55 = vsel %vm13031_vm15, %v1706_v23, %v1708_v1  ;;  %v1738_v30 = vsel %vm13031_vm15, %v1708_v1, %v1710_v26 }
 0x266   :  { %2067 = vrot.lane.b32.xlu1 %v10197_v17, %s9298_s12  ;;  %2065 = vrot.lane.b32.xlu0 %v10199_v19, %s9298_s12  ;;  %v8343_v44 = vpack.c.bf16 %v1737_v55, %v10311_v41  ;;  %v8397_v63 = vpack.c.bf16 %v1738_v30, %v10314_v33 }
 0x268   :  { %v1714_v3 = vpop.permute.xlu1 %1713  ;;  %v1712_v34 = vpop.permute.xlu0 %1711  ;;  %8344 = vmatprep.subr.bf16.mxu0 %v8343_v44 }
 0x269   :  { %v1739_v5 = vsel %vm13031_vm15, %v1710_v26, %v1712_v34  ;;  %v1740_v6 = vsel %vm13031_vm15, %v1712_v34, %v1714_v3  ;;  %8346 = vmatpush1.bf16.msra.mxu0 %v8345_v16 }
 0x26a   :  { %1771 = vst [vmem:[#allocation2 + $0x7a0] sm:$0xff] %v1740_v6  ;;  %2071 = vrot.lane.b32.xlu1 %v10264_v56, %s9298_s12  ;;  %2069 = vrot.lane.b32.xlu0 %v10209_v29, %s9298_s12  ;;  %v8395_v22 = vpack.c.bf16 %v1739_v5, %v10321_v43 }
 0x26c   :  { %v1718_v36 = vpop.permute.xlu1 %1717  ;;  %v1716_v25 = vpop.permute.xlu0 %1715  ;;  %8396 = vmatprep.subr.bf16.mxu1 %v8395_v22 }
 0x26d   :  { %v1741_v37 = vsel %vm13031_vm15, %v1714_v3, %v1716_v25  ;;  %v1742_v28 = vsel %vm13031_vm15, %v1716_v25, %v1718_v36  ;;  %8398 = vmatpush1.bf16.msra.mxu1 %v8397_v63 }
 0x26e   :  { %1772 = vst [vmem:[#allocation2 + $0x7a8] sm:$0xff] %v1741_v37  ;;  %1773 = vst [vmem:[#allocation2 + $0x7b0] sm:$0xff] %v1742_v28  ;;  %2158 = vrot.lane.b32.xlu1 %v10390_v21, %s9299_s13  ;;  %2073 = vrot.lane.b32.xlu0 %v10385_v35, %s9298_s12 }
 0x270   :  { %v1722_v38 = vpop.permute.xlu1 %1721  ;;  %v1720_v41 = vpop.permute.xlu0 %1719 }
 0x271   :  { %v1743_v33 = vsel %vm13031_vm15, %v1718_v36, %v1720_v41  ;;  %v1744_v27 = vsel %vm13031_vm15, %v1720_v41, %v1722_v38 }
 0x272   :  { %1774 = vst [vmem:[#allocation2 + $0x7b8] sm:$0xff] %v1743_v33  ;;  %1775 = vst [vmem:[#allocation2 + $0x7c0] sm:$0xff] %v1744_v27  ;;  %2162 = vrot.lane.b32.xlu1 %v10342_v53, %s9299_s13  ;;  %2160 = vrot.lane.b32.xlu0 %v10330_v39, %s9299_s13 }
 0x274   :  { %v1726_v42 = vpop.permute.xlu1 %1725  ;;  %v1724_v43 = vpop.permute.xlu0 %1723 }
 0x275   :  { %v1745_v40 = vsel %vm13031_vm15, %v1722_v38, %v1724_v43  ;;  %v1746_v32 = vsel %vm13031_vm15, %v1724_v43, %v1726_v42 }
 0x276   :  { %1776 = vst [vmem:[#allocation2 + $0x7c8] sm:$0xff] %v1745_v40  ;;  %1777 = vst [vmem:[#allocation2 + $0x7d0] sm:$0xff] %v1746_v32  ;;  %2166 = vrot.lane.b32.xlu1 %v10158_v51, %s9299_s13  ;;  %2164 = vrot.lane.b32.xlu0 %v10338_v11, %s9299_s13 }
 0x278   :  { %v1730_v45 = vpop.permute.xlu1 %1729  ;;  %v1728_v2 = vpop.permute.xlu0 %1727 }
 0x279   :  { %v1747_v4 = vsel %vm13031_vm15, %v1726_v42, %v1728_v2  ;;  %v1748_v9 = vsel %vm13031_vm15, %v1728_v2, %v1730_v45 }
 0x27a   :  { %1778 = vst [vmem:[#allocation2 + $0x7d8] sm:$0xff] %v1747_v4  ;;  %1779 = vst [vmem:[#allocation2 + $0x7e0] sm:$0xff] %v1748_v9  ;;  %2170 = vrot.lane.b32.xlu1 %v10168_v7, %s9299_s13  ;;  %2168 = vrot.lane.b32.xlu0 %v10156_v50, %s9299_s13  ;;  %v10510_v9 = vld [vmem:[#allocation5 + $0x18] sm:$0xff] }
 0x27c   :  { %v1734_v0 = vpop.permute.xlu1 %1733  ;;  %v1732_v52 = vpop.permute.xlu0 %1731 }
 0x27d   :  { %1782 = vst.msk [vmem:[#allocation2 + $0x7f8] sm:$0xff] %vm161_vm1, %v1734_v0  ;;  %v1749_v10 = vsel %vm13031_vm15, %v1730_v45, %v1732_v52  ;;  %v1750_v54 = vsel %vm13031_vm15, %v1732_v52, %v1734_v0  ;;  %vm13033_vm15 = vcmask 957440   ;;  %v10512_v0 = vld [vmem:[#allocation5 + $0x10] sm:$0xff] }
 0x27e   :  { %1780 = vst [vmem:[#allocation2 + $0x7e8] sm:$0xff] %v1749_v10  ;;  %1781 = vst [vmem:[#allocation2 + $0x7f0] sm:$0xff] %v1750_v54  ;;  %2174 = vrot.lane.b32.xlu1 %v10179_v15, %s9299_s13  ;;  %2172 = vrot.lane.b32.xlu0 %v10166_v47, %s9299_s13 }
 0x280   :  { %v1818_v31 = vpop.permute.xlu1 %1817  ;;  %v1816_v12 = vpop.permute.xlu0 %1815 }
 0x281   :  { %v10422_v8 = vsel %vm13032_vm14, %v1816_v12, %v1818_v31 }
 0x282   :  { %2178 = vrot.lane.b32.xlu1 %v10188_v58, %s9299_s13  ;;  %2176 = vrot.lane.b32.xlu0 %v10177_v13, %s9299_s13 }
 0x284   :  { %v1822_v49 = vpop.permute.xlu1 %1821  ;;  %v1820_v59 = vpop.permute.xlu0 %1819 }
 0x285   :  { %v10429_v60 = vsel %vm13032_vm14, %v1818_v31, %v1820_v59  ;;  %v10432_v61 = vsel %vm13032_vm14, %v1820_v59, %v1822_v49  ;;  %v10522_v31 = vld [vmem:[#allocation5 + $0x20] sm:$0xff] }
 0x286   :  { %2182 = vrot.lane.b32.xlu1 %v10199_v19, %s9299_s13  ;;  %2180 = vrot.lane.b32.xlu0 %v10186_v57, %s9299_s13 }
 0x288   :  { %v1826_v46 = vpop.permute.xlu1 %1825  ;;  %v1824_v62 = vpop.permute.xlu0 %1823 }
 0x289   :  { %v10439_v20 = vsel %vm13032_vm14, %v1822_v49, %v1824_v62  ;;  %v1852_v18 = vsel %vm13032_vm14, %v1824_v62, %v1826_v46 }
 0x28a   :  { %1883 = vst [vmem:[#allocation2 + $0x820] sm:$0xff] %v1852_v18  ;;  %2186 = vrot.lane.b32.xlu1 %v10209_v29, %s9299_s13  ;;  %2184 = vrot.lane.b32.xlu0 %v10197_v17, %s9299_s13 }
 0x28c   :  { %v1830_v23 = vpop.permute.xlu1 %1829  ;;  %v1828_v14 = vpop.permute.xlu0 %1827 }
 0x28d   :  { %v1853_v24 = vsel %vm13032_vm14, %v1826_v46, %v1828_v14  ;;  %v1854_v26 = vsel %vm13032_vm14, %v1828_v14, %v1830_v23  ;;  %v10543_v14 = vld [vmem:[#allocation5 + $0x40] sm:$0xff] }
 0x28e   :  { %1884 = vst [vmem:[#allocation2 + $0x828] sm:$0xff] %v1853_v24  ;;  %1885 = vst [vmem:[#allocation2 + $0x830] sm:$0xff] %v1854_v26  ;;  %2190 = vrot.lane.b32.xlu1 %v10385_v35, %s9299_s13  ;;  %2188 = vrot.lane.b32.xlu0 %v10264_v56, %s9299_s13 }
 0x290   :  { %v1834_v1 = vpop.permute.xlu1 %1833  ;;  %v1832_v55 = vpop.permute.xlu0 %1831 }
 0x291   :  { %v1855_v30 = vsel %vm13032_vm14, %v1830_v23, %v1832_v55  ;;  %v1856_v44 = vsel %vm13032_vm14, %v1832_v55, %v1834_v1  ;;  %v10541_v23 = vld [vmem:[#allocation5 + $0x48] sm:$0xff]  ;;  %v10552_v55 = vld [vmem:[#allocation5 + $0x58] sm:$0xff] }
 0x292   :  { %1886 = vst [vmem:[#allocation2 + $0x838] sm:$0xff] %v1855_v30  ;;  %1887 = vst [vmem:[#allocation2 + $0x840] sm:$0xff] %v1856_v44  ;;  %2277 = vrot.lane.b32.xlu1 %v10330_v39, %s9300_s14  ;;  %2275 = vrot.lane.b32.xlu0 %v10390_v21, %s9300_s14  ;;  %v10554_v30 = vld [vmem:[#allocation5 + $0x50] sm:$0xff] }
 0x294   :  { %v1838_v16 = vpop.permute.xlu1 %1837  ;;  %v1836_v3 = vpop.permute.xlu0 %1835 }
 0x295   :  { %v1857_v34 = vsel %vm13032_vm14, %v1834_v1, %v1836_v3  ;;  %v1858_v5 = vsel %vm13032_vm14, %v1836_v3, %v1838_v16 }
 0x296   :  { %1888 = vst [vmem:[#allocation2 + $0x848] sm:$0xff] %v1857_v34  ;;  %1889 = vst [vmem:[#allocation2 + $0x850] sm:$0xff] %v1858_v5  ;;  %2281 = vrot.lane.b32.xlu1 %v10338_v11, %s9300_s14  ;;  %2279 = vrot.lane.b32.xlu0 %v10342_v53, %s9300_s14  ;;  %v10566_v5 = vld [vmem:[#allocation5 + $0x68] sm:$0xff] }
 0x298   :  { %v1842_v6 = vpop.permute.xlu1 %1841  ;;  %v1840_v22 = vpop.permute.xlu0 %1839 }
 0x299   :  { %v1859_v39 = vsel %vm13032_vm14, %v1838_v16, %v1840_v22  ;;  %v1860_v63 = vsel %vm13032_vm14, %v1840_v22, %v1842_v6 }
 0x29a   :  { %1890 = vst [vmem:[#allocation2 + $0x858] sm:$0xff] %v1859_v39  ;;  %1891 = vst [vmem:[#allocation2 + $0x860] sm:$0xff] %v1860_v63  ;;  %2285 = vrot.lane.b32.xlu1 %v10156_v50, %s9300_s14  ;;  %2283 = vrot.lane.b32.xlu0 %v10158_v51, %s9300_s14 }
 0x29c   :  { %v1846_v36 = vpop.permute.xlu1 %1845  ;;  %v1844_v25 = vpop.permute.xlu0 %1843 }
 0x29d   :  { %1894 = vst.msk [vmem:[#allocation2 + $0x878] sm:$0xff] %vm161_vm1, %v1846_v36  ;;  %v1861_v11 = vsel %vm13032_vm14, %v1842_v6, %v1844_v25  ;;  %v1862_v53 = vsel %vm13032_vm14, %v1844_v25, %v1846_v36  ;;  %vm13034_vm14 = vcmask 318464   ;;  %v10568_v6 = vld [vmem:[#allocation5 + $0x60] sm:$0xff]  ;;  %v10578_v25 = vld [vmem:[#allocation5 + $0x78] sm:$0xff] }
 0x29e   :  { %1892 = vst [vmem:[#allocation2 + $0x868] sm:$0xff] %v1861_v11  ;;  %1893 = vst [vmem:[#allocation2 + $0x870] sm:$0xff] %v1862_v53  ;;  %2289 = vrot.lane.b32.xlu1 %v10166_v47, %s9300_s14  ;;  %2287 = vrot.lane.b32.xlu0 %v10168_v7, %s9300_s14  ;;  %v10580_v11 = vld [vmem:[#allocation5 + $0x70] sm:$0xff] }
 0x2a0   :  { %v1930_v50 = vpop.permute.xlu1 %1929  ;;  %v1928_v37 = vpop.permute.xlu0 %1927 }
 0x2a1   :  { %v1960_v51 = vsel %vm13033_vm15, %v1928_v37, %v1930_v50 }
 0x2a2   :  { %2293 = vrot.lane.b32.xlu1 %v10177_v13, %s9300_s14  ;;  %2291 = vrot.lane.b32.xlu0 %v10179_v15, %s9300_s14  ;;  %v8349_v33 = vpack.c.bf16 %v1960_v51, %v10422_v8 }
 0x2a4   :  { %v1934_v28 = vpop.permute.xlu1 %1933  ;;  %v1932_v38 = vpop.permute.xlu0 %1931 }
 0x2a5   :  { %v1961_v41 = vsel %vm13033_vm15, %v1930_v50, %v1932_v38  ;;  %v1962_v47 = vsel %vm13033_vm15, %v1932_v38, %v1934_v28 }
 0x2a6   :  { %2297 = vrot.lane.b32.xlu1 %v10186_v57, %s9300_s14  ;;  %2295 = vrot.lane.b32.xlu0 %v10188_v58, %s9300_s14  ;;  %v8347_v7 = vpack.c.bf16 %v1961_v41, %v10429_v60  ;;  %v8401_v58 = vpack.c.bf16 %v1962_v47, %v10432_v61  ;;  %v10530_v60 = vld [vmem:[#allocation5 + $0x38] sm:$0xff]  ;;  %v10532_v61 = vld [vmem:[#allocation5 + $0x30] sm:$0xff] }
 0x2a8   :  { %v1938_v13 = vpop.permute.xlu1 %1937  ;;  %v1936_v27 = vpop.permute.xlu0 %1935  ;;  %8348 = vmatprep.subr.bf16.mxu0 %v8347_v7  ;;  %v10594_v7 = vld [vmem:[#allocation5 + $0x8] sm:$0xff] }
 0x2a9   :  { %v1963_v15 = vsel %vm13033_vm15, %v1934_v28, %v1936_v27  ;;  %v1964_v42 = vsel %vm13033_vm15, %v1936_v27, %v1938_v13  ;;  %8350 = vmatpush1.bf16.msra.mxu0 %v8349_v33 }
 0x2aa   :  { %1995 = vst [vmem:[#allocation2 + $0x8a0] sm:$0xff] %v1964_v42  ;;  %2301 = vrot.lane.b32.xlu1 %v10197_v17, %s9300_s14  ;;  %2299 = vrot.lane.b32.xlu0 %v10199_v19, %s9300_s14  ;;  %v8399_v57 = vpack.c.bf16 %v1963_v15, %v10439_v20 }
 0x2ac   :  { %v1942_v43 = vpop.permute.xlu1 %1941  ;;  %v1940_v40 = vpop.permute.xlu0 %1939  ;;  %8400 = vmatprep.subr.bf16.mxu1 %v8399_v57 }
 0x2ad   :  { %v1965_v32 = vsel %vm13033_vm15, %v1938_v13, %v1940_v40  ;;  %v1966_v45 = vsel %vm13033_vm15, %v1940_v40, %v1942_v43  ;;  %8402 = vmatpush1.bf16.msra.mxu1 %v8401_v58 }
 0x2ae   :  { %1996 = vst [vmem:[#allocation2 + $0x8a8] sm:$0xff] %v1965_v32  ;;  %1997 = vst [vmem:[#allocation2 + $0x8b0] sm:$0xff] %v1966_v45  ;;  %2305 = vrot.lane.b32.xlu1 %v10264_v56, %s9300_s14  ;;  %2303 = vrot.lane.b32.xlu0 %v10209_v29, %s9300_s14 }
 0x2b0   :  { %v1946_v17 = vpop.permute.xlu1 %1945  ;;  %v1944_v19 = vpop.permute.xlu0 %1943 }
 0x2b1   :  { %v1967_v2 = vsel %vm13033_vm15, %v1942_v43, %v1944_v19  ;;  %v1968_v4 = vsel %vm13033_vm15, %v1944_v19, %v1946_v17 }
 0x2b2   :  { %1998 = vst [vmem:[#allocation2 + $0x8b8] sm:$0xff] %v1967_v2  ;;  %1999 = vst [vmem:[#allocation2 + $0x8c0] sm:$0xff] %v1968_v4  ;;  %2392 = vrot.lane.b32.xlu1 %v10390_v21, %s9301_s15  ;;  %2307 = vrot.lane.b32.xlu0 %v10385_v35, %s9300_s14  ;;  %v10520_v21 = vld [vmem:[#allocation5 + $0x28] sm:$0xff] }
 0x2b4   :  { %v1950_v29 = vpop.permute.xlu1 %1949  ;;  %v1948_v52 = vpop.permute.xlu0 %1947 }
 0x2b5   :  { %v1969_v10 = vsel %vm13033_vm15, %v1946_v17, %v1948_v52  ;;  %v1970_v54 = vsel %vm13033_vm15, %v1948_v52, %v1950_v29 }
 0x2b6   :  { %2000 = vst [vmem:[#allocation2 + $0x8c8] sm:$0xff] %v1969_v10  ;;  %2001 = vst [vmem:[#allocation2 + $0x8d0] sm:$0xff] %v1970_v54  ;;  %2396 = vrot.lane.b32.xlu1 %v10510_v9, %s9301_s15  ;;  %2394 = vrot.lane.b32.xlu0 %v10512_v0, %s9301_s15 }
 0x2b8   :  { %v1954_v12 = vpop.permute.xlu1 %1953  ;;  %v1952_v8 = vpop.permute.xlu0 %1951 }
 0x2b9   :  { %v1971_v49 = vsel %vm13033_vm15, %v1950_v29, %v1952_v8  ;;  %v1972_v59 = vsel %vm13033_vm15, %v1952_v8, %v1954_v12 }
 0x2ba   :  { %2002 = vst [vmem:[#allocation2 + $0x8d8] sm:$0xff] %v1971_v49  ;;  %2003 = vst [vmem:[#allocation2 + $0x8e0] sm:$0xff] %v1972_v59  ;;  %2400 = vrot.lane.b32.xlu1 %v10520_v21, %s9301_s15  ;;  %2398 = vrot.lane.b32.xlu0 %v10522_v31, %s9301_s15 }
 0x2bc   :  { %v1958_v46 = vpop.permute.xlu1 %1957  ;;  %v1956_v62 = vpop.permute.xlu0 %1955 }
 0x2bd   :  { %2006 = vst.msk [vmem:[#allocation2 + $0x8f8] sm:$0xff] %vm161_vm1, %v1958_v46  ;;  %v1973_v20 = vsel %vm13033_vm15, %v1954_v12, %v1956_v62  ;;  %v1974_v18 = vsel %vm13033_vm15, %v1956_v62, %v1958_v46  ;;  %vm13035_vm15 = vcmask 310272  }
 0x2be   :  { %2004 = vst [vmem:[#allocation2 + $0x8e8] sm:$0xff] %v1973_v20  ;;  %2005 = vst [vmem:[#allocation2 + $0x8f0] sm:$0xff] %v1974_v18  ;;  %2404 = vrot.lane.b32.xlu1 %v10530_v60, %s9301_s15  ;;  %2402 = vrot.lane.b32.xlu0 %v10532_v61, %s9301_s15 }
 0x2c0   :  { %v2044_v24 = vpop.permute.xlu1 %2043  ;;  %v2042_v26 = vpop.permute.xlu0 %2041 }
 0x2c1   :  { %v10546_v1 = vsel %vm13034_vm14, %v2042_v26, %v2044_v24 }
 0x2c2   :  { %2408 = vrot.lane.b32.xlu1 %v10541_v23, %s9301_s15  ;;  %2406 = vrot.lane.b32.xlu0 %v10543_v14, %s9301_s15 }
 0x2c4   :  { %v2048_v44 = vpop.permute.xlu1 %2047  ;;  %v2046_v16 = vpop.permute.xlu0 %2045 }
 0x2c5   :  { %v10557_v3 = vsel %vm13034_vm14, %v2044_v24, %v2046_v16  ;;  %v10560_v34 = vsel %vm13034_vm14, %v2046_v16, %v2048_v44 }
 0x2c6   :  { %2412 = vrot.lane.b32.xlu1 %v10552_v55, %s9301_s15  ;;  %2410 = vrot.lane.b32.xlu0 %v10554_v30, %s9301_s15 }
 0x2c8   :  { %v2052_v22 = vpop.permute.xlu1 %2051  ;;  %v2050_v39 = vpop.permute.xlu0 %2049 }
 0x2c9   :  { %v10571_v63 = vsel %vm13034_vm14, %v2048_v44, %v2050_v39  ;;  %v2080_v36 = vsel %vm13034_vm14, %v2050_v39, %v2052_v22  ;;  %v10642_v44 = vld [vmem:[#allocation5 + $0x80] sm:$0xff] }
 0x2ca   :  { %2112 = vst [vmem:[#allocation2 + $0x920] sm:$0xff] %v2080_v36  ;;  %2416 = vrot.lane.b32.xlu1 %v10566_v5, %s9301_s15  ;;  %2414 = vrot.lane.b32.xlu0 %v10568_v6, %s9301_s15 }
 0x2cc   :  { %v2056_v53 = vpop.permute.xlu1 %2055  ;;  %v2054_v50 = vpop.permute.xlu0 %2053 }
 0x2cd   :  { %v2081_v37 = vsel %vm13034_vm14, %v2052_v22, %v2054_v50  ;;  %v2082_v51 = vsel %vm13034_vm14, %v2054_v50, %v2056_v53 }
 0x2ce   :  { %2113 = vst [vmem:[#allocation2 + $0x928] sm:$0xff] %v2081_v37  ;;  %2114 = vst [vmem:[#allocation2 + $0x930] sm:$0xff] %v2082_v51  ;;  %2420 = vrot.lane.b32.xlu1 %v10578_v25, %s9301_s15  ;;  %2418 = vrot.lane.b32.xlu0 %v10580_v11, %s9301_s15 }
 0x2d0   :  { %v2060_v28 = vpop.permute.xlu1 %2059  ;;  %v2058_v38 = vpop.permute.xlu0 %2057 }
 0x2d1   :  { %v2083_v41 = vsel %vm13034_vm14, %v2056_v53, %v2058_v38  ;;  %v2084_v47 = vsel %vm13034_vm14, %v2058_v38, %v2060_v28 }
 0x2d2   :  { %2115 = vst [vmem:[#allocation2 + $0x938] sm:$0xff] %v2083_v41  ;;  %2116 = vst [vmem:[#allocation2 + $0x940] sm:$0xff] %v2084_v47  ;;  %2424 = vrot.lane.b32.xlu1 %v10385_v35, %s9301_s15  ;;  %2422 = vrot.lane.b32.xlu0 %v10264_v56, %s9301_s15 }
 0x2d4   :  { %v2064_v33 = vpop.permute.xlu1 %2063  ;;  %v2062_v13 = vpop.permute.xlu0 %2061 }
 0x2d5   :  { %v2085_v27 = vsel %vm13034_vm14, %v2060_v28, %v2062_v13  ;;  %v2086_v15 = vsel %vm13034_vm14, %v2062_v13, %v2064_v33 }
 0x2d6   :  { %2117 = vst [vmem:[#allocation2 + $0x948] sm:$0xff] %v2085_v27  ;;  %2118 = vst [vmem:[#allocation2 + $0x950] sm:$0xff] %v2086_v15  ;;  %2511 = vrot.lane.b32.xlu1 %v10512_v0, %s9302_s16  ;;  %2509 = vrot.lane.b32.xlu0 %v10594_v7, %s9302_s16 }
 0x2d8   :  { %v2068_v42 = vpop.permute.xlu1 %2067  ;;  %v2066_v57 = vpop.permute.xlu0 %2065 }
 0x2d9   :  { %v2087_v56 = vsel %vm13034_vm14, %v2064_v33, %v2066_v57  ;;  %v2088_v58 = vsel %vm13034_vm14, %v2066_v57, %v2068_v42 }
 0x2da   :  { %2119 = vst [vmem:[#allocation2 + $0x958] sm:$0xff] %v2087_v56  ;;  %2120 = vst [vmem:[#allocation2 + $0x960] sm:$0xff] %v2088_v58  ;;  %2515 = vrot.lane.b32.xlu1 %v10522_v31, %s9302_s16  ;;  %2513 = vrot.lane.b32.xlu0 %v10510_v9, %s9302_s16 }
 0x2dc   :  { %v2072_v43 = vpop.permute.xlu1 %2071  ;;  %v2070_v40 = vpop.permute.xlu0 %2069 }
 0x2dd   :  { %v2089_v32 = vsel %vm13034_vm14, %v2068_v42, %v2070_v40  ;;  %v2090_v45 = vsel %vm13034_vm14, %v2070_v40, %v2072_v43 }
 0x2de   :  { %2121 = vst [vmem:[#allocation2 + $0x968] sm:$0xff] %v2089_v32  ;;  %2122 = vst [vmem:[#allocation2 + $0x970] sm:$0xff] %v2090_v45  ;;  %2519 = vrot.lane.b32.xlu1 %v10532_v61, %s9302_s16  ;;  %2517 = vrot.lane.b32.xlu0 %v10520_v21, %s9302_s16 }
 0x2e0   :  { %v2159_v17 = vpop.permute.xlu1 %2158  ;;  %v2074_v19 = vpop.permute.xlu0 %2073 }
 0x2e1   :  { %v2091_v2 = vsel %vm13034_vm14, %v2072_v43, %v2074_v19  ;;  %vm13036_vm14 = vcmask 302080  }
 0x2e2   :  { %2123 = vst.msk [vmem:[#allocation2 + $0x978] sm:$0xff] %vm161_vm1, %v2091_v2  ;;  %2523 = vrot.lane.b32.xlu1 %v10543_v14, %s9302_s16  ;;  %2521 = vrot.lane.b32.xlu0 %v10530_v60, %s9302_s16 }
 0x2e4   :  { %v2163_v4 = vpop.permute.xlu1 %2162  ;;  %v2161_v29 = vpop.permute.xlu0 %2160 }
 0x2e5   :  { %v2193_v52 = vsel %vm13035_vm15, %v2159_v17, %v2161_v29  ;;  %v2194_v10 = vsel %vm13035_vm15, %v2161_v29, %v2163_v4 }
 0x2e6   :  { %2527 = vrot.lane.b32.xlu1 %v10554_v30, %s9302_s16  ;;  %2525 = vrot.lane.b32.xlu0 %v10541_v23, %s9302_s16  ;;  %v8351_v54 = vpack.c.bf16 %v2194_v10, %v10557_v3  ;;  %v8353_v12 = vpack.c.bf16 %v2193_v52, %v10546_v1 }
 0x2e8   :  { %v2167_v8 = vpop.permute.xlu1 %2166  ;;  %v2165_v49 = vpop.permute.xlu0 %2164  ;;  %8352 = vmatprep.subr.bf16.mxu0 %v8351_v54 }
 0x2e9   :  { %v2195_v59 = vsel %vm13035_vm15, %v2163_v4, %v2165_v49  ;;  %v2196_v46 = vsel %vm13035_vm15, %v2165_v49, %v2167_v8  ;;  %8354 = vmatpush1.bf16.msra.mxu0 %v8353_v12 }
 0x2ea   :  { %2531 = vrot.lane.b32.xlu1 %v10568_v6, %s9302_s16  ;;  %2529 = vrot.lane.b32.xlu0 %v10552_v55, %s9302_s16  ;;  %v8403_v62 = vpack.c.bf16 %v2196_v46, %v10571_v63  ;;  %v8405_v20 = vpack.c.bf16 %v2195_v59, %v10560_v34 }
 0x2ec   :  { %v2171_v18 = vpop.permute.xlu1 %2170  ;;  %v2169_v24 = vpop.permute.xlu0 %2168  ;;  %8404 = vmatprep.subr.bf16.mxu1 %v8403_v62 }
 0x2ed   :  { %v2197_v26 = vsel %vm13035_vm15, %v2167_v8, %v2169_v24  ;;  %v2198_v1 = vsel %vm13035_vm15, %v2169_v24, %v2171_v18  ;;  %8406 = vmatpush1.bf16.msra.mxu1 %v8405_v20 }
 0x2ee   :  { %2229 = vst [vmem:[#allocation2 + $0x9a0] sm:$0xff] %v2197_v26  ;;  %2230 = vst [vmem:[#allocation2 + $0x9a8] sm:$0xff] %v2198_v1  ;;  %2535 = vrot.lane.b32.xlu1 %v10580_v11, %s9302_s16  ;;  %2533 = vrot.lane.b32.xlu0 %v10566_v5, %s9302_s16 }
 0x2f0   :  { %v2175_v16 = vpop.permute.xlu1 %2174  ;;  %v2173_v3 = vpop.permute.xlu0 %2172 }
 0x2f1   :  { %v2199_v34 = vsel %vm13035_vm15, %v2171_v18, %v2173_v3  ;;  %v2200_v22 = vsel %vm13035_vm15, %v2173_v3, %v2175_v16 }
 0x2f2   :  { %2231 = vst [vmem:[#allocation2 + $0x9b0] sm:$0xff] %v2199_v34  ;;  %2232 = vst [vmem:[#allocation2 + $0x9b8] sm:$0xff] %v2200_v22  ;;  %2539 = vrot.lane.b32.xlu1 %v10642_v44, %s9302_s16  ;;  %2537 = vrot.lane.b32.xlu0 %v10578_v25, %s9302_s16 }
 0x2f4   :  { %v2179_v39 = vpop.permute.xlu1 %2178  ;;  %v2177_v63 = vpop.permute.xlu0 %2176 }
 0x2f5   :  { %v2201_v36 = vsel %vm13035_vm15, %v2175_v16, %v2177_v63  ;;  %v2202_v53 = vsel %vm13035_vm15, %v2177_v63, %v2179_v39 }
 0x2f6   :  { %2233 = vst [vmem:[#allocation2 + $0x9c0] sm:$0xff] %v2201_v36  ;;  %2234 = vst [vmem:[#allocation2 + $0x9c8] sm:$0xff] %v2202_v53  ;;  %2626 = vrot.lane.b32.xlu1 %v10594_v7, %s9303_s17  ;;  %2541 = vrot.lane.b32.xlu0 %v10385_v35, %s9302_s16 }
 0x2f8   :  { %v2183_v50 = vpop.permute.xlu1 %2182  ;;  %v2181_v37 = vpop.permute.xlu0 %2180 }
 0x2f9   :  { %v2203_v51 = vsel %vm13035_vm15, %v2179_v39, %v2181_v37  ;;  %v2204_v28 = vsel %vm13035_vm15, %v2181_v37, %v2183_v50 }
 0x2fa   :  { %2235 = vst [vmem:[#allocation2 + $0x9d0] sm:$0xff] %v2203_v51  ;;  %2236 = vst [vmem:[#allocation2 + $0x9d8] sm:$0xff] %v2204_v28  ;;  %2630 = vrot.lane.b32.xlu1 %v10510_v9, %s9303_s17  ;;  %2628 = vrot.lane.b32.xlu0 %v10512_v0, %s9303_s17 }
 0x2fc   :  { %v2187_v38 = vpop.permute.xlu1 %2186  ;;  %v2185_v41 = vpop.permute.xlu0 %2184 }
 0x2fd   :  { %v2205_v47 = vsel %vm13035_vm15, %v2183_v50, %v2185_v41  ;;  %v2206_v33 = vsel %vm13035_vm15, %v2185_v41, %v2187_v38 }
 0x2fe   :  { %2237 = vst [vmem:[#allocation2 + $0x9e0] sm:$0xff] %v2205_v47  ;;  %2238 = vst [vmem:[#allocation2 + $0x9e8] sm:$0xff] %v2206_v33  ;;  %2634 = vrot.lane.b32.xlu1 %v10520_v21, %s9303_s17  ;;  %2632 = vrot.lane.b32.xlu0 %v10522_v31, %s9303_s17 }
 0x300   :  { %v2191_v13 = vpop.permute.xlu1 %2190  ;;  %v2189_v27 = vpop.permute.xlu0 %2188 }
 0x301   :  { %v2207_v15 = vsel %vm13035_vm15, %v2187_v38, %v2189_v27  ;;  %v2208_v42 = vsel %vm13035_vm15, %v2189_v27, %v2191_v13  ;;  %vm13039_vm15 = vcmask 236544  }
 0x302   :  { %2239 = vst [vmem:[#allocation2 + $0x9f0] sm:$0xff] %v2207_v15  ;;  %2240 = vst.msk [vmem:[#allocation2 + $0x9f8] sm:$0xff] %vm161_vm1, %v2208_v42  ;;  %2638 = vrot.lane.b32.xlu1 %v10530_v60, %s9303_s17  ;;  %2636 = vrot.lane.b32.xlu0 %v10532_v61, %s9303_s17 }
 0x304   :  { %v2278_v57 = vpop.permute.xlu1 %2277  ;;  %v2276_v56 = vpop.permute.xlu0 %2275 }
 0x305   :  { %v10676_v58 = vsel %vm13036_vm14, %v2276_v56, %v2278_v57 }
 0x306   :  { %2642 = vrot.lane.b32.xlu1 %v10541_v23, %s9303_s17  ;;  %2640 = vrot.lane.b32.xlu0 %v10543_v14, %s9303_s17 }
 0x308   :  { %v2282_v43 = vpop.permute.xlu1 %2281  ;;  %v2280_v40 = vpop.permute.xlu0 %2279 }
 0x309   :  { %v10683_v32 = vsel %vm13036_vm14, %v2278_v57, %v2280_v40  ;;  %v10686_v45 = vsel %vm13036_vm14, %v2280_v40, %v2282_v43 }
 0x30a   :  { %2646 = vrot.lane.b32.xlu1 %v10552_v55, %s9303_s17  ;;  %2644 = vrot.lane.b32.xlu0 %v10554_v30, %s9303_s17 }
 0x30c   :  { %v2286_v17 = vpop.permute.xlu1 %2285  ;;  %v2284_v19 = vpop.permute.xlu0 %2283 }
 0x30d   :  { %v10693_v2 = vsel %vm13036_vm14, %v2282_v43, %v2284_v19  ;;  %v2314_v4 = vsel %vm13036_vm14, %v2284_v19, %v2286_v17 }
 0x30e   :  { %2346 = vst [vmem:[#allocation2 + $0xa20] sm:$0xff] %v2314_v4  ;;  %2650 = vrot.lane.b32.xlu1 %v10566_v5, %s9303_s17  ;;  %2648 = vrot.lane.b32.xlu0 %v10568_v6, %s9303_s17 }
 0x310   :  { %v2290_v29 = vpop.permute.xlu1 %2289  ;;  %v2288_v52 = vpop.permute.xlu0 %2287 }
 0x311   :  { %v2315_v10 = vsel %vm13036_vm14, %v2286_v17, %v2288_v52  ;;  %v2316_v54 = vsel %vm13036_vm14, %v2288_v52, %v2290_v29  ;;  %v10764_v17 = vld [vmem:[#allocation5 + $0x88] sm:$0xff] }
 0x312   :  { %2347 = vst [vmem:[#allocation2 + $0xa28] sm:$0xff] %v2315_v10  ;;  %2348 = vst [vmem:[#allocation2 + $0xa30] sm:$0xff] %v2316_v54  ;;  %2654 = vrot.lane.b32.xlu1 %v10578_v25, %s9303_s17  ;;  %2652 = vrot.lane.b32.xlu0 %v10580_v11, %s9303_s17 }
 0x314   :  { %v2294_v12 = vpop.permute.xlu1 %2293  ;;  %v2292_v8 = vpop.permute.xlu0 %2291 }
 0x315   :  { %v2317_v49 = vsel %vm13036_vm14, %v2290_v29, %v2292_v8  ;;  %v2318_v59 = vsel %vm13036_vm14, %v2292_v8, %v2294_v12 }
 0x316   :  { %2349 = vst [vmem:[#allocation2 + $0xa38] sm:$0xff] %v2317_v49  ;;  %2350 = vst [vmem:[#allocation2 + $0xa40] sm:$0xff] %v2318_v59  ;;  %2658 = vrot.lane.b32.xlu1 %v10385_v35, %s9303_s17  ;;  %2656 = vrot.lane.b32.xlu0 %v10642_v44, %s9303_s17 }
 0x318   :  { %v2298_v46 = vpop.permute.xlu1 %2297  ;;  %v2296_v62 = vpop.permute.xlu0 %2295 }
 0x319   :  { %v2319_v20 = vsel %vm13036_vm14, %v2294_v12, %v2296_v62  ;;  %v2320_v18 = vsel %vm13036_vm14, %v2296_v62, %v2298_v46 }
 0x31a   :  { %2351 = vst [vmem:[#allocation2 + $0xa48] sm:$0xff] %v2319_v20  ;;  %2352 = vst [vmem:[#allocation2 + $0xa50] sm:$0xff] %v2320_v18  ;;  %2745 = vrot.lane.b32.xlu1 %v10512_v0, %s13037_s18  ;;  %2743 = vrot.lane.b32.xlu0 %v10594_v7, %s13037_s18 }
 0x31c   :  { %v2302_v24 = vpop.permute.xlu1 %2301  ;;  %v2300_v35 = vpop.permute.xlu0 %2299 }
 0x31d   :  { %v2321_v26 = vsel %vm13036_vm14, %v2298_v46, %v2300_v35  ;;  %v2322_v1 = vsel %vm13036_vm14, %v2300_v35, %v2302_v24 }
 0x31e   :  { %2353 = vst [vmem:[#allocation2 + $0xa58] sm:$0xff] %v2321_v26  ;;  %2354 = vst [vmem:[#allocation2 + $0xa60] sm:$0xff] %v2322_v1  ;;  %2749 = vrot.lane.b32.xlu1 %v10522_v31, %s13037_s18  ;;  %2747 = vrot.lane.b32.xlu0 %v10510_v9, %s13037_s18 }
 0x320   :  { %v2306_v16 = vpop.permute.xlu1 %2305  ;;  %v2304_v3 = vpop.permute.xlu0 %2303 }
 0x321   :  { %v2323_v34 = vsel %vm13036_vm14, %v2302_v24, %v2304_v3  ;;  %v2324_v22 = vsel %vm13036_vm14, %v2304_v3, %v2306_v16 }
 0x322   :  { %2355 = vst [vmem:[#allocation2 + $0xa68] sm:$0xff] %v2323_v34  ;;  %2356 = vst [vmem:[#allocation2 + $0xa70] sm:$0xff] %v2324_v22  ;;  %2753 = vrot.lane.b32.xlu1 %v10532_v61, %s13037_s18  ;;  %2751 = vrot.lane.b32.xlu0 %v10520_v21, %s13037_s18 }
 0x324   :  { %v2393_v39 = vpop.permute.xlu1 %2392  ;;  %v2308_v63 = vpop.permute.xlu0 %2307 }
 0x325   :  { %v2325_v36 = vsel %vm13036_vm14, %v2306_v16, %v2308_v63  ;;  %vm13041_vm14 = vcmask 228352  }
 0x326   :  { %2357 = vst.msk [vmem:[#allocation2 + $0xa78] sm:$0xff] %vm161_vm1, %v2325_v36  ;;  %2757 = vrot.lane.b32.xlu1 %v10543_v14, %s13037_s18  ;;  %2755 = vrot.lane.b32.xlu0 %v10530_v60, %s13037_s18 }
 0x328   :  { %v2397_v53 = vpop.permute.xlu1 %2396  ;;  %v2395_v50 = vpop.permute.xlu0 %2394 }
 0x329   :  { %v2427_v37 = vsel %vm13039_vm15, %v2393_v39, %v2395_v50  ;;  %v2428_v51 = vsel %vm13039_vm15, %v2395_v50, %v2397_v53 }
 0x32a   :  { %2761 = vrot.lane.b32.xlu1 %v10554_v30, %s13037_s18  ;;  %2759 = vrot.lane.b32.xlu0 %v10541_v23, %s13037_s18  ;;  %v8355_v28 = vpack.c.bf16 %v2428_v51, %v10683_v32  ;;  %v8357_v38 = vpack.c.bf16 %v2427_v37, %v10676_v58 }
 0x32c   :  { %v2401_v41 = vpop.permute.xlu1 %2400  ;;  %v2399_v47 = vpop.permute.xlu0 %2398  ;;  %8356 = vmatprep.subr.bf16.mxu0 %v8355_v28 }
 0x32d   :  { %v2429_v33 = vsel %vm13039_vm15, %v2397_v53, %v2399_v47  ;;  %v2430_v13 = vsel %vm13039_vm15, %v2399_v47, %v2401_v41  ;;  %8358 = vmatpush1.bf16.msra.mxu0 %v8357_v38 }
 0x32e   :  { %2765 = vrot.lane.b32.xlu1 %v10568_v6, %s13037_s18  ;;  %2763 = vrot.lane.b32.xlu0 %v10552_v55, %s13037_s18  ;;  %v8407_v27 = vpack.c.bf16 %v2430_v13, %v10693_v2  ;;  %v8409_v15 = vpack.c.bf16 %v2429_v33, %v10686_v45 }
 0x330   :  { %v2405_v42 = vpop.permute.xlu1 %2404  ;;  %v2403_v57 = vpop.permute.xlu0 %2402  ;;  %8408 = vmatprep.subr.bf16.mxu1 %v8407_v27 }
 0x331   :  { %v2431_v56 = vsel %vm13039_vm15, %v2401_v41, %v2403_v57  ;;  %v2432_v58 = vsel %vm13039_vm15, %v2403_v57, %v2405_v42  ;;  %8410 = vmatpush1.bf16.msra.mxu1 %v8409_v15 }
 0x332   :  { %2463 = vst [vmem:[#allocation2 + $0xaa0] sm:$0xff] %v2431_v56  ;;  %2464 = vst [vmem:[#allocation2 + $0xaa8] sm:$0xff] %v2432_v58  ;;  %2769 = vrot.lane.b32.xlu1 %v10580_v11, %s13037_s18  ;;  %2767 = vrot.lane.b32.xlu0 %v10566_v5, %s13037_s18 }
 0x334   :  { %v2409_v43 = vpop.permute.xlu1 %2408  ;;  %v2407_v40 = vpop.permute.xlu0 %2406 }
 0x335   :  { %v2433_v32 = vsel %vm13039_vm15, %v2405_v42, %v2407_v40  ;;  %v2434_v45 = vsel %vm13039_vm15, %v2407_v40, %v2409_v43  ;;  %v10869_v42 = vld [vmem:[#allocation2 + $0x6b0] sm:$0xff]  ;;  %v9186_v40 = vld [vmem:[#allocation2 + $0x6c0] sm:$0xff] }
 0x336   :  { %2465 = vst [vmem:[#allocation2 + $0xab0] sm:$0xff] %v2433_v32  ;;  %2466 = vst [vmem:[#allocation2 + $0xab8] sm:$0xff] %v2434_v45  ;;  %2773 = vrot.lane.b32.xlu1 %v10642_v44, %s13037_s18  ;;  %2771 = vrot.lane.b32.xlu0 %v10578_v25, %s13037_s18  ;;  %v9187_v32 = vld [vmem:[#allocation2 + $0x6c8] sm:$0xff] }
 0x338   :  { %v2413_v19 = vpop.permute.xlu1 %2412  ;;  %v2411_v2 = vpop.permute.xlu0 %2410 }
 0x339   :  { %v2435_v4 = vsel %vm13039_vm15, %v2409_v43, %v2411_v2  ;;  %v2436_v29 = vsel %vm13039_vm15, %v2411_v2, %v2413_v19 }
 0x33a   :  { %2467 = vst [vmem:[#allocation2 + $0xac0] sm:$0xff] %v2435_v4  ;;  %2468 = vst [vmem:[#allocation2 + $0xac8] sm:$0xff] %v2436_v29  ;;  %2860 = vrot.lane.b32.xlu1 %v10594_v7, %s13046_s0  ;;  %2775 = vrot.lane.b32.xlu0 %v10764_v17, %s13037_s18  ;;  %s13042_s18 = smov 17  }
 0x33c   :  { %v2417_v52 = vpop.permute.xlu1 %2416  ;;  %v2415_v10 = vpop.permute.xlu0 %2414 }
 0x33d   :  { %v2437_v54 = vsel %vm13039_vm15, %v2413_v19, %v2415_v10  ;;  %v2438_v12 = vsel %vm13039_vm15, %v2415_v10, %v2417_v52  ;;  %v9189_v10 = vld [vmem:[#allocation2 + $0x6d0] sm:$0xff] }
 0x33e   :  { %2469 = vst [vmem:[#allocation2 + $0xad0] sm:$0xff] %v2437_v54  ;;  %2470 = vst [vmem:[#allocation2 + $0xad8] sm:$0xff] %v2438_v12  ;;  %2864 = vrot.lane.b32.xlu1 %v10510_v9, %s13046_s0  ;;  %2862 = vrot.lane.b32.xlu0 %v10512_v0, %s13046_s0  ;;  %v2955_v54 = vld [vmem:[#allocation5 + $0x68] sm:$0xff]  ;;  %v2956_v12 = vld [vmem:[#allocation5 + $0x70] sm:$0xff] }
 0x340   :  { %v2421_v8 = vpop.permute.xlu1 %2420  ;;  %v2419_v49 = vpop.permute.xlu0 %2418 }
 0x341   :  { %v2439_v59 = vsel %vm13039_vm15, %v2417_v52, %v2419_v49  ;;  %v2440_v46 = vsel %vm13039_vm15, %v2419_v49, %v2421_v8  ;;  %v9188_v52 = vld [vmem:[#allocation2 + $0x6d8] sm:$0xff] }
 0x342   :  { %2471 = vst [vmem:[#allocation2 + $0xae0] sm:$0xff] %v2439_v59  ;;  %2472 = vst [vmem:[#allocation2 + $0xae8] sm:$0xff] %v2440_v46  ;;  %2868 = vrot.lane.b32.xlu1 %v10520_v21, %s13046_s0  ;;  %2866 = vrot.lane.b32.xlu0 %v10522_v31, %s13046_s0 }
 0x344   :  { %v2425_v62 = vpop.permute.xlu1 %2424  ;;  %v2423_v20 = vpop.permute.xlu0 %2422 }
 0x345   :  { %v2441_v18 = vsel %vm13039_vm15, %v2421_v8, %v2423_v20  ;;  %v2442_v24 = vsel %vm13039_vm15, %v2423_v20, %v2425_v62  ;;  %vm3500_vm15 = vcmask 719872  }
 0x346   :  { %2473 = vst [vmem:[#allocation2 + $0xaf0] sm:$0xff] %v2441_v18  ;;  %2474 = vst.msk [vmem:[#allocation2 + $0xaf8] sm:$0xff] %vm161_vm1, %v2442_v24  ;;  %2872 = vrot.lane.b32.xlu1 %v10530_v60, %s13046_s0  ;;  %2870 = vrot.lane.b32.xlu0 %v10532_v61, %s13046_s0 }
 0x348   :  { %v2512_v35 = vpop.permute.xlu1 %2511  ;;  %v2510_v26 = vpop.permute.xlu0 %2509 }
 0x349   :  { %v10792_v1 = vsel %vm13041_vm14, %v2510_v26, %v2512_v35 }
 0x34a   :  { %2876 = vrot.lane.b32.xlu1 %v10541_v23, %s13046_s0  ;;  %2874 = vrot.lane.b32.xlu0 %v10543_v14, %s13046_s0 }
 0x34c   :  { %v2516_v16 = vpop.permute.xlu1 %2515  ;;  %v2514_v3 = vpop.permute.xlu0 %2513 }
 0x34d   :  { %v10799_v34 = vsel %vm13041_vm14, %v2512_v35, %v2514_v3  ;;  %v10802_v60 = vsel %vm13041_vm14, %v2514_v3, %v2516_v16 }
 0x34e   :  { %2880 = vrot.lane.b32.xlu1 %v10552_v55, %s13046_s0  ;;  %2878 = vrot.lane.b32.xlu0 %v10554_v30, %s13046_s0 }
 0x350   :  { %v2520_v22 = vpop.permute.xlu1 %2519  ;;  %v2518_v39 = vpop.permute.xlu0 %2517 }
 0x351   :  { %v10809_v23 = vsel %vm13041_vm14, %v2516_v16, %v2518_v39  ;;  %v10812_v14 = vsel %vm13041_vm14, %v2518_v39, %v2520_v22 }
 0x352   :  { %2884 = vrot.lane.b32.xlu1 %v10566_v5, %s13046_s0  ;;  %2882 = vrot.lane.b32.xlu0 %v10568_v6, %s13046_s0  ;;  %v10831_v5 = vld [vmem:[%s13024_s1 + $0x8] sm:$0xff] }
 0x353   :  { %8299 = vmatprep.mubr.msk.f32.mxu0 %vm3500_vm15, %v10831_v5  ;;  %8300 = vmatprep.mubr.msk.f32.mxu1 %vm3500_vm15, %v10831_v5 }
 0x354   :  { %v2524_v63 = vpop.permute.xlu1 %2523  ;;  %v2522_v36 = vpop.permute.xlu0 %2521 }
 0x355   :  { %v10819_v55 = vsel %vm13041_vm14, %v2520_v22, %v2522_v36  ;;  %v10822_v30 = vsel %vm13041_vm14, %v2522_v36, %v2524_v63 }
 0x356   :  { %2888 = vrot.lane.b32.xlu1 %v10578_v25, %s13046_s0  ;;  %2886 = vrot.lane.b32.xlu0 %v10580_v11, %s13046_s0 }
 0x358   :  { %v2528_v6 = vpop.permute.xlu1 %2527  ;;  %v2526_v53 = vpop.permute.xlu0 %2525 }
 0x359   :  { %v10838_v50 = vsel %vm13041_vm14, %v2524_v63, %v2526_v53  ;;  %v2552_v25 = vsel %vm13041_vm14, %v2526_v53, %v2528_v6 }
 0x35a   :  { %2584 = vst [vmem:[#allocation2 + $0xb40] sm:$0xff] %v2552_v25  ;;  %2892 = vrot.lane.b32.xlu1 %v10764_v17, %s13046_s0  ;;  %2890 = vrot.lane.b32.xlu0 %v10642_v44, %s13046_s0 }
 0x35c   :  { %v2532_v11 = vpop.permute.xlu1 %2531  ;;  %v2530_v37 = vpop.permute.xlu0 %2529 }
 0x35d   :  { %v2553_v51 = vsel %vm13041_vm14, %v2528_v6, %v2530_v37  ;;  %v2554_v28 = vsel %vm13041_vm14, %v2530_v37, %v2532_v11 }
 0x35e   :  { %2585 = vst [vmem:[#allocation2 + $0xb48] sm:$0xff] %v2553_v51  ;;  %2586 = vst [vmem:[#allocation2 + $0xb50] sm:$0xff] %v2554_v28  ;;  %2979 = vrot.lane.b32.xlu1 %v10512_v0, %s13042_s18  ;;  %2977 = vrot.lane.b32.xlu0 %v10594_v7, %s13042_s18 }
 0x360   :  { %v2536_v38 = vpop.permute.xlu1 %2535  ;;  %v2534_v41 = vpop.permute.xlu0 %2533 }
 0x361   :  { %v2555_v47 = vsel %vm13041_vm14, %v2532_v11, %v2534_v41  ;;  %v2556_v44 = vsel %vm13041_vm14, %v2534_v41, %v2536_v38 }
 0x362   :  { %2587 = vst [vmem:[#allocation2 + $0xb58] sm:$0xff] %v2555_v47  ;;  %2588 = vst [vmem:[#allocation2 + $0xb60] sm:$0xff] %v2556_v44  ;;  %2983 = vrot.lane.b32.xlu1 %v10522_v31, %s13042_s18  ;;  %2981 = vrot.lane.b32.xlu0 %v10510_v9, %s13042_s18  ;;  %v10865_v9 = vld [vmem:[#allocation2 + $0x6b8] sm:$0xff] }
 0x364   :  { %v2540_v33 = vpop.permute.xlu1 %2539  ;;  %v2538_v13 = vpop.permute.xlu0 %2537 }
 0x365   :  { %v2557_v0 = vsel %vm13041_vm14, %v2536_v38, %v2538_v13  ;;  %v2558_v7 = vsel %vm13041_vm14, %v2538_v13, %v2540_v33 }
 0x366   :  { %2589 = vst [vmem:[#allocation2 + $0xb68] sm:$0xff] %v2557_v0  ;;  %2590 = vst [vmem:[#allocation2 + $0xb70] sm:$0xff] %v2558_v7  ;;  %2985 = vrot.lane.b32.xlu0 %v10520_v21, %s13042_s18  ;;  %2987 = vrot.lane.b32.xlu1 %v10532_v61, %s13042_s18 }
 0x368   :  { %v2627_v27 = vpop.permute.xlu1 %2626  ;;  %v2542_v15 = vpop.permute.xlu0 %2541 }
 0x369   :  { %v2559_v31 = vsel %vm13041_vm14, %v2540_v33, %v2542_v15  ;;  %vm13045_vm14 = vcmask 154624  }
 0x36a   :  { %2591 = vst.msk [vmem:[#allocation2 + $0xb78] sm:$0xff] %vm161_vm1, %v2559_v31  ;;  %2991 = vrot.lane.b32.xlu1 %v10865_v9, %s13042_s18  ;;  %2989 = vrot.lane.b32.xlu0 %v10869_v42, %s13042_s18 }
 0x36c   :  { %v2631_v21 = vpop.permute.xlu1 %2630  ;;  %v2629_v57 = vpop.permute.xlu0 %2628 }
 0x36d   :  { %v2661_v61 = vsel %vm13044_vm13, %v2627_v27, %v2629_v57  ;;  %v2662_v56 = vsel %vm13044_vm13, %v2629_v57, %v2631_v21 }
 0x36e   :  { %v8359_v58 = vpack.c.bf16 %v2662_v56, %v10799_v34  ;;  %v8361_v43 = vpack.c.bf16 %v2661_v61, %v10792_v1  ;;  %2993 = vrot.lane.b32.xlu0 %v9186_v40, %s13042_s18  ;;  %2995 = vrot.lane.b32.xlu1 %v9187_v32, %s13042_s18  ;;  %v9190_v1 = vld [vmem:[#allocation2 + $0x6f0] sm:$0xff] }
 0x370   :  { %v2635_v45 = vpop.permute.xlu1 %2634  ;;  %v2633_v17 = vpop.permute.xlu0 %2632  ;;  %8360 = vmatprep.subr.bf16.mxu0 %v8359_v58 }
 0x371   :  { %v2663_v19 = vsel %vm13044_vm13, %v2631_v21, %v2633_v17  ;;  %v2664_v2 = vsel %vm13044_vm13, %v2633_v17, %v2635_v45  ;;  %8362 = vmatpush1.bf16.msra.mxu0 %v8361_v43 }
 0x372   :  { %v8411_v4 = vpack.c.bf16 %v2664_v2, %v10809_v23  ;;  %v8413_v29 = vpack.c.bf16 %v2663_v19, %v10802_v60  ;;  %2999 = vrot.lane.b32.xlu1 %v9188_v52, %s13042_s18  ;;  %2997 = vrot.lane.b32.xlu0 %v9189_v10, %s13042_s18  ;;  %v2959_v23 = vld [vmem:[#allocation5 + $0x88] sm:$0xff] }
 0x374   :  { %v2639_v8 = vpop.permute.xlu1 %2638  ;;  %v2637_v49 = vpop.permute.xlu0 %2636  ;;  %8412 = vmatprep.subr.bf16.mxu1 %v8411_v4 }
 0x375   :  { %v10886_v59 = vsel %vm13044_vm13, %v2635_v45, %v2637_v49  ;;  %v10889_v46 = vsel %vm13044_vm13, %v2637_v49, %v2639_v8  ;;  %8414 = vmatpush1.bf16.msra.mxu1 %v8413_v29 }
 0x376   :  { %3001 = vrot.lane.b32.xlu0 %v2955_v54, %s13042_s18  ;;  %3003 = vrot.lane.b32.xlu1 %v2956_v12, %s13042_s18  ;;  %v8463_v62 = vpack.c.bf16 %v10889_v46, %v10819_v55  ;;  %v8465_v20 = vpack.c.bf16 %v10886_v59, %v10812_v14  ;;  %v3087_v55 = vld [vmem:[#allocation2 + $0xc8] sm:$0xff]  ;;  %v3086_v14 = vld [vmem:[#allocation2 + $0xc0] sm:$0xff] }
 0x377   :  { %v3071_v59 = vld [vmem:[#allocation2 + $0x48] sm:$0xff] }
 0x378   :  { %v2643_v18 = vpop.permute.xlu1 %2642  ;;  %v2641_v24 = vpop.permute.xlu0 %2640  ;;  %v3119_v46 = vld [vmem:[#allocation2 + $0x1c8] sm:$0xff] }
 0x379   :  { %v10898_v35 = vsel %vm13044_vm13, %v2639_v8, %v2641_v24  ;;  %v10901_v26 = vsel %vm13044_vm13, %v2641_v24, %v2643_v18 }
 0x37a   :  { %3007 = vrot.lane.b32.xlu1 %v10063_v48, %s13042_s18  ;;  %3005 = vrot.lane.b32.xlu0 %v9190_v1, %s13042_s18  ;;  %v8515_v16 = vpack.c.bf16 %v10901_v26, %v10838_v50  ;;  %v8517_v3 = vpack.c.bf16 %v10898_v35, %v10822_v30  ;;  %v9307_v1 = vmov 0   ;;  %v8523_v50 = vpack.c.bf16 %v3087_v55, %v3071_v59  ;;  %v3089_v35 = vld [vmem:[#allocation2 + $0xd8] sm:$0xff]  ;;  %v3231_v55 = vld [vmem:[#allocation2 + $0x548] sm:$0xff] }
 0x37b   :  { %9178 = vset.pattern.permute.xlu1 %v9307_v1  ;;  %9179 = vset.pattern.permute.xlu0 %v9307_v1 }
 0x37c   :  { %v2647_v34 = vpop.permute.xlu1 %2646  ;;  %v2645_v60 = vpop.permute.xlu0 %2644 }
 0x37d   :  { %v2669_v22 = vsel %vm13044_vm13, %v2643_v18, %v2645_v60  ;;  %v2670_v39 = vsel %vm13044_vm13, %v2645_v60, %v2647_v34 }
 0x37e   :  { %2701 = vst [vmem:[#allocation2 + $0xbc0] sm:$0xff] %v2669_v22  ;;  %2702 = vst [vmem:[#allocation2 + $0xbc8] sm:$0xff] %v2670_v39  ;;  %3009 = vrot.lane.b32.xlu0 %v2959_v23, %s13042_s18 }
 0x380   :  { %v2651_v48 = vpop.permute.xlu1 %2650  ;;  %v2649_v63 = vpop.permute.xlu0 %2648 }
 0x381   :  { %v2671_v36 = vsel %vm13044_vm13, %v2647_v34, %v2649_v63  ;;  %v2672_v6 = vsel %vm13044_vm13, %v2649_v63, %v2651_v48  ;;  %v3494_v34 = vld [vmem:[%s13025_s2] sm:$0xff] }
 0x382   :  { %2703 = vst [vmem:[#allocation2 + $0xbd0] sm:$0xff] %v2671_v36  ;;  %2704 = vst [vmem:[#allocation2 + $0xbd8] sm:$0xff] %v2672_v6  ;;  %3497 = vperm.xlu1 %9178, %v3494_v34  }
 0x384   :  { %v2655_v53 = vpop.permute.xlu1 %2654  ;;  %v2653_v25 = vpop.permute.xlu0 %2652 }
 0x385   :  { %v2673_v11 = vsel %vm13044_vm13, %v2651_v48, %v2653_v25  ;;  %v2674_v37 = vsel %vm13044_vm13, %v2653_v25, %v2655_v53 }
 0x386   :  { %2705 = vst [vmem:[#allocation2 + $0xbe0] sm:$0xff] %v2673_v11  ;;  %2706 = vst [vmem:[#allocation2 + $0xbe8] sm:$0xff] %v2674_v37 }
 0x388   :  { %v2659_v51 = vpop.permute.xlu1 %2658  ;;  %v2657_v28 = vpop.permute.xlu0 %2656 }
 0x389   :  { %v2675_v38 = vsel %vm13044_vm13, %v2655_v53, %v2657_v28  ;;  %v2676_v41 = vsel %vm13044_vm13, %v2657_v28, %v2659_v51  ;;  %vm2894_vm13 = vcmask 146432  }
 0x38a   :  { %2707 = vst [vmem:[#allocation2 + $0xbf0] sm:$0xff] %v2675_v38  ;;  %2708 = vst.msk [vmem:[#allocation2 + $0xbf8] sm:$0xff] %vm161_vm1, %v2676_v41 }
 0x38c   :  { %v2746_v47 = vpop.permute.xlu1 %2745  ;;  %v2744_v44 = vpop.permute.xlu0 %2743 }
 0x38d   :  { %v2778_v33 = vsel %vm13045_vm14, %v2744_v44, %v2746_v47 }
 0x390   :  { %v2750_v13 = vpop.permute.xlu1 %2749  ;;  %v2748_v0 = vpop.permute.xlu0 %2747 }
 0x391   :  { %v2779_v7 = vsel %vm13045_vm14, %v2746_v47, %v2748_v0  ;;  %v2780_v27 = vsel %vm13045_vm14, %v2748_v0, %v2750_v13 }
 0x394   :  { %v2754_v15 = vpop.permute.xlu1 %2753  ;;  %v2752_v31 = vpop.permute.xlu0 %2751 }
 0x395   :  { %v2781_v21 = vsel %vm13045_vm14, %v2750_v13, %v2752_v31  ;;  %v10925_v57 = vsel %vm13045_vm14, %v2752_v31, %v2754_v15 }
 0x398   :  { %v2758_v61 = vpop.permute.xlu1 %2757  ;;  %v2756_v56 = vpop.permute.xlu0 %2755 }
 0x399   :  { %v10928_v58 = vsel %vm13045_vm14, %v2754_v15, %v2756_v56  ;;  %v10931_v43 = vsel %vm13045_vm14, %v2756_v56, %v2758_v61 }
 0x39c   :  { %v2762_v40 = vpop.permute.xlu1 %2761  ;;  %v2760_v32 = vpop.permute.xlu0 %2759 }
 0x39d   :  { %v10934_v45 = vsel %vm13045_vm14, %v2758_v61, %v2760_v32  ;;  %v2786_v17 = vsel %vm13045_vm14, %v2760_v32, %v2762_v40 }
 0x39e   :  { %2818 = vst [vmem:[#allocation2 + $0xc40] sm:$0xff] %v2786_v17 }
 0x3a0   :  { %v2766_v19 = vpop.permute.xlu1 %2765  ;;  %v2764_v2 = vpop.permute.xlu0 %2763 }
 0x3a1   :  { %v2787_v4 = vsel %vm13045_vm14, %v2762_v40, %v2764_v2  ;;  %v2788_v29 = vsel %vm13045_vm14, %v2764_v2, %v2766_v19 }
 0x3a2   :  { %2819 = vst [vmem:[#allocation2 + $0xc48] sm:$0xff] %v2787_v4  ;;  %2820 = vst [vmem:[#allocation2 + $0xc50] sm:$0xff] %v2788_v29 }
 0x3a4   :  { %v2770_v52 = vpop.permute.xlu1 %2769  ;;  %v2768_v10 = vpop.permute.xlu0 %2767 }
 0x3a5   :  { %v2789_v54 = vsel %vm13045_vm14, %v2766_v19, %v2768_v10  ;;  %v2790_v12 = vsel %vm13045_vm14, %v2768_v10, %v2770_v52 }
 0x3a6   :  { %2821 = vst [vmem:[#allocation2 + $0xc58] sm:$0xff] %v2789_v54  ;;  %2822 = vst [vmem:[#allocation2 + $0xc60] sm:$0xff] %v2790_v12 }
 0x3a8   :  { %v2774_v8 = vpop.permute.xlu1 %2773  ;;  %v2772_v49 = vpop.permute.xlu0 %2771 }
 0x3a9   :  { %v2791_v18 = vsel %vm13045_vm14, %v2770_v52, %v2772_v49  ;;  %v2792_v24 = vsel %vm13045_vm14, %v2772_v49, %v2774_v8 }
 0x3aa   :  { %2823 = vst [vmem:[#allocation2 + $0xc68] sm:$0xff] %v2791_v18  ;;  %2824 = vst [vmem:[#allocation2 + $0xc70] sm:$0xff] %v2792_v24 }
 0x3ac   :  { %v2861_v60 = vpop.permute.xlu1 %2860  ;;  %v2776_v22 = vpop.permute.xlu0 %2775 }
 0x3ad   :  { %v2793_v39 = vsel %vm13045_vm14, %v2774_v8, %v2776_v22  ;;  %vm13048_vm14 = vcmask 138240   ;;  %v3083_v22 = vld [vmem:[#allocation2 + $0xa8] sm:$0xff] }
 0x3ae   :  { %2825 = vst.msk [vmem:[#allocation2 + $0xc78] sm:$0xff] %vm161_vm1, %v2793_v39 }
 0x3b0   :  { %v2865_v23 = vpop.permute.xlu1 %2864  ;;  %v2863_v48 = vpop.permute.xlu0 %2862 }
 0x3b1   :  { %v2895_v63 = vsel %vm2894_vm13, %v2861_v60, %v2863_v48  ;;  %v2896_v36 = vsel %vm2894_vm13, %v2863_v48, %v2865_v23  ;;  %v3082_v48 = vld [vmem:[#allocation2 + $0xa0] sm:$0xff] }
 0x3b2   :  { %v8363_v6 = vpack.c.bf16 %v2896_v36, %v2779_v7  ;;  %v8365_v53 = vpack.c.bf16 %v2895_v63, %v2778_v33 }
 0x3b4   :  { %v2869_v25 = vpop.permute.xlu1 %2868  ;;  %v2867_v11 = vpop.permute.xlu0 %2866  ;;  %8364 = vmatprep.subr.bf16.mxu0 %v8363_v6  ;;  %v10989_v6 = vld [vmem:[%s13024_s1] sm:$0xff] }
 0x3b5   :  { %v2897_v37 = vsel %vm2894_vm13, %v2865_v23, %v2867_v11  ;;  %v2898_v51 = vsel %vm2894_vm13, %v2867_v11, %v2869_v25  ;;  %8366 = vmatpush1.bf16.msra.mxu0 %v8365_v53  ;;  %v3067_v53 = vld [vmem:[#allocation2 + $0x28] sm:$0xff] }
 0x3b6   :  { %v8415_v28 = vpack.c.bf16 %v2898_v51, %v2781_v21  ;;  %v8417_v38 = vpack.c.bf16 %v2897_v37, %v2780_v27  ;;  %v8419_v11 = vpack.c.bf16 %v3083_v22, %v3067_v53  ;;  %v3066_v37 = vld [vmem:[#allocation2 + $0x20] sm:$0xff]  ;;  %v3100_v53 = vld [vmem:[#allocation2 + $0x130] sm:$0xff] }
 0x3b7   :  { %v8421_v51 = vpack.c.bf16 %v3082_v48, %v3066_v37  ;;  %v3163_v37 = vld [vmem:[#allocation2 + $0x328] sm:$0xff] }
 0x3b8   :  { %v2873_v41 = vpop.permute.xlu1 %2872  ;;  %v2871_v47 = vpop.permute.xlu0 %2870  ;;  %8416 = vmatprep.subr.bf16.mxu1 %v8415_v28  ;;  %v3099_v28 = vld [vmem:[#allocation2 + $0x128] sm:$0xff] }
 0x3b9   :  { %v10953_v44 = vsel %vm2894_vm13, %v2869_v25, %v2871_v47  ;;  %v10956_v13 = vsel %vm2894_vm13, %v2871_v47, %v2873_v41  ;;  %8418 = vmatpush1.bf16.msra.mxu1 %v8417_v38  ;;  %v3115_v25 = vld [vmem:[#allocation2 + $0x1a8] sm:$0xff]  ;;  %v3085_v38 = vld [vmem:[#allocation2 + $0xb8] sm:$0xff] }
 0x3ba   :  { %v8467_v33 = vpack.c.bf16 %v10956_v13, %v10928_v58  ;;  %v8469_v0 = vpack.c.bf16 %v10953_v44, %v10925_v57  ;;  %v3073_v57 = vld [vmem:[#allocation2 + $0x58] sm:$0xff]  ;;  %v3151_v58 = vld [vmem:[#allocation2 + $0x2c8] sm:$0xff]  ;;  %v3102_v13 = vld [vmem:[#allocation2 + $0x140] sm:$0xff] }
 0x3bb   :  { %v8575_v44 = vpack.c.bf16 %v3089_v35, %v3073_v57  ;;  %v3230_v35 = vld [vmem:[#allocation2 + $0x540] sm:$0xff]  ;;  %v3233_v57 = vld [vmem:[#allocation2 + $0x558] sm:$0xff] }
 0x3bc   :  { %v2877_v7 = vpop.permute.xlu1 %2876  ;;  %v2875_v15 = vpop.permute.xlu0 %2874 }
 0x3bd   :  { %v10963_v27 = vsel %vm2894_vm13, %v2873_v41, %v2875_v15  ;;  %v10966_v31 = vsel %vm2894_vm13, %v2875_v15, %v2877_v7  ;;  %v3114_v15 = vld [vmem:[#allocation2 + $0x1a0] sm:$0xff] }
 0x3be   :  { %v8519_v21 = vpack.c.bf16 %v10966_v31, %v10934_v45  ;;  %v8521_v61 = vpack.c.bf16 %v10963_v27, %v10931_v43  ;;  %v3121_v45 = vld [vmem:[#allocation2 + $0x1d8] sm:$0xff]  ;;  %v3072_v43 = vld [vmem:[#allocation2 + $0x50] sm:$0xff]  ;;  %v3135_v27 = vld [vmem:[#allocation2 + $0x248] sm:$0xff] }
 0x3bf   :  { %v3105_v31 = vld [vmem:[#allocation2 + $0x158] sm:$0xff] }
 0x3c0   :  { %v2881_v56 = vpop.permute.xlu1 %2880  ;;  %v2879_v40 = vpop.permute.xlu0 %2878 }
 0x3c1   :  { %v2903_v32 = vsel %vm2894_vm13, %v2877_v7, %v2879_v40  ;;  %v10974_v17 = vsel %vm2894_vm13, %v2879_v40, %v2881_v56  ;;  %v8423_v7 = vpack.c.bf16 %v3115_v25, %v3099_v28 }
 0x3c2   :  { %2935 = vst [vmem:[#allocation2 + $0xcc0] sm:$0xff] %v2903_v32 }
 0x3c4   :  { %v2885_v19 = vpop.permute.xlu1 %2884  ;;  %v2883_v2 = vpop.permute.xlu0 %2882 }
 0x3c5   :  { %v2905_v4 = vsel %vm2894_vm13, %v2881_v56, %v2883_v2  ;;  %v2906_v29 = vsel %vm2894_vm13, %v2883_v2, %v2885_v19  ;;  %v3084_v56 = vld [vmem:[#allocation2 + $0xb0] sm:$0xff]  ;;  %v3147_v2 = vld [vmem:[#allocation2 + $0x2a8] sm:$0xff] }
 0x3c6   :  { %2937 = vst [vmem:[#allocation2 + $0xcd0] sm:$0xff] %v2905_v4  ;;  %2938 = vst [vmem:[#allocation2 + $0xcd8] sm:$0xff] %v2906_v29  ;;  %v3117_v4 = vld [vmem:[#allocation2 + $0x1b8] sm:$0xff] }
 0x3c8   :  { %v2889_v52 = vpop.permute.xlu1 %2888  ;;  %v2887_v10 = vpop.permute.xlu0 %2886 }
 0x3c9   :  { %v2907_v54 = vsel %vm2894_vm13, %v2885_v19, %v2887_v10  ;;  %v2908_v12 = vsel %vm2894_vm13, %v2887_v10, %v2889_v52  ;;  %v3069_v19 = vld [vmem:[#allocation2 + $0x38] sm:$0xff]  ;;  %v3068_v10 = vld [vmem:[#allocation2 + $0x30] sm:$0xff] }
 0x3ca   :  { %2939 = vst [vmem:[#allocation2 + $0xce0] sm:$0xff] %v2907_v54  ;;  %2940 = vst [vmem:[#allocation2 + $0xce8] sm:$0xff] %v2908_v12  ;;  %v8471_v29 = vpack.c.bf16 %v3085_v38, %v3069_v19  ;;  %v8473_v12 = vpack.c.bf16 %v3084_v56, %v3068_v10  ;;  %v3211_v56 = vld [vmem:[#allocation2 + $0x4a8] sm:$0xff] }
 0x3cc   :  { %v2893_v8 = vpop.permute.xlu1 %2892  ;;  %v2891_v49 = vpop.permute.xlu0 %2890 }
 0x3cd   :  { %v2909_v18 = vsel %vm2894_vm13, %v2889_v52, %v2891_v49  ;;  %v2910_v24 = vsel %vm2894_vm13, %v2891_v49, %v2893_v8  ;;  %v3098_v52 = vld [vmem:[#allocation2 + $0x120] sm:$0xff]  ;;  %v3131_v8 = vld [vmem:[#allocation2 + $0x228] sm:$0xff]  ;;  %v3101_v49 = vld [vmem:[#allocation2 + $0x138] sm:$0xff] }
 0x3ce   :  { %2941 = vst [vmem:[#allocation2 + $0xcf0] sm:$0xff] %v2909_v18  ;;  %2942 = vst.msk [vmem:[#allocation2 + $0xcf8] sm:$0xff] %vm161_vm1, %v2910_v24  ;;  %v8425_v54 = vpack.c.bf16 %v3114_v15, %v3098_v52  ;;  %v8427_v18 = vpack.c.bf16 %v3147_v2, %v3131_v8  ;;  %v8475_v24 = vpack.c.bf16 %v3117_v4, %v3101_v49  ;;  %v3162_v4 = vld [vmem:[#allocation2 + $0x320] sm:$0xff] }
 0x3d0   :  { %v2980_v1 = vpop.permute.xlu1 %2979  ;;  %v2978_v34 = vpop.permute.xlu0 %2977 }
 0x3d1   :  { %v3012_v60 = vsel %vm13048_vm14, %v2978_v34, %v2980_v1  ;;  %v3116_v34 = vld [vmem:[#allocation2 + $0x1b0] sm:$0xff] }
 0x3d4   :  { %v2984_v39 = vpop.permute.xlu1 %2983  ;;  %v2982_v23 = vpop.permute.xlu0 %2981 }
 0x3d5   :  { %v3013_v63 = vsel %vm13048_vm14, %v2980_v1, %v2982_v23  ;;  %v3014_v36 = vsel %vm13048_vm14, %v2982_v23, %v2984_v39  ;;  %v3146_v1 = vld [vmem:[#allocation2 + $0x2a0] sm:$0xff]  ;;  %v3149_v23 = vld [vmem:[#allocation2 + $0x2b8] sm:$0xff] }
 0x3d6   :  { %3556 = vmatprep.subr.mxu0 %v3013_v63 }
 0x3d7   :  { %3557 = vmatpush1.msra.mxu0 %v3012_v60 }
 0x3d8   :  { %v2986_v41 = vpop.permute.xlu0 %2985  ;;  %v2988_v47 = vpop.permute.xlu1 %2987  ;;  %3569 = vmatmul.mubr.f32.vlgmr.msra.gmra.mrb[0].mxu0 %v10989_v6  ;;  %8420 = vmatprep.subr.bf16.mxu0 %v8419_v11  ;;  %v8477_v11 = vpack.c.bf16 %v3116_v34, %v3100_v53  ;;  %v3164_v53 = vld [vmem:[#allocation2 + $0x330] sm:$0xff] }
 0x3d9   :  { %v3015_v40 = vsel %vm13048_vm14, %v2984_v39, %v2986_v41  ;;  %v10994_v32 = vsel %vm13048_vm14, %v2986_v41, %v2988_v47  ;;  %8422 = vmatpush1.bf16.msra.mxu0 %v8421_v51  ;;  %8301 = vmatprep.mubr.msk.f32.mxu0 %vm3500_vm15, %v10831_v5  ;;  %v3179_v39 = vld [vmem:[#allocation2 + $0x3a8] sm:$0xff]  ;;  %v3133_v51 = vld [vmem:[#allocation2 + $0x238] sm:$0xff]  ;;  %v3178_v41 = vld [vmem:[#allocation2 + $0x3a0] sm:$0xff] }
 0x3da   :  { %3627 = vmatprep.subr.mxu1 %v3015_v40  ;;  %8424 = vmatprep.subr.bf16.mxu0 %v8423_v7  ;;  %v8431_v28 = vpack.c.bf16 %v3179_v39, %v3163_v37  ;;  %v8479_v38 = vpack.c.bf16 %v3149_v23, %v3133_v51  ;;  %v3148_v7 = vld [vmem:[#allocation2 + $0x2b0] sm:$0xff]  ;;  %v3181_v40 = vld [vmem:[#allocation2 + $0x3b8] sm:$0xff]  ;;  %v8433_v52 = vpack.c.bf16 %v3178_v41, %v3162_v4  ;;  %v3227_v37 = vld [vmem:[#allocation2 + $0x528] sm:$0xff] }
 0x3db   :  { %3628 = vmatpush1.msra.mxu1 %v3014_v36  ;;  %v3130_v36 = vld [vmem:[#allocation2 + $0x220] sm:$0xff]  ;;  %v3197_v51 = vld [vmem:[#allocation2 + $0x438] sm:$0xff] }
 0x3dc   :  { %3640 = vmatmul.mubr.f32.vlgmr.msra.gmra.mrb[0].mxu1 %v10989_v6  ;;  %8472 = vmatprep.subr.bf16.mxu1 %v8471_v29  ;;  %v2992_v60 = vpop.permute.xlu1 %2991  ;;  %v2990_v22 = vpop.permute.xlu0 %2989  ;;  %v8429_v25 = vpack.c.bf16 %v3146_v1, %v3130_v36  ;;  %v3132_v29 = vld [vmem:[#allocation2 + $0x230] sm:$0xff]  ;;  %v3194_v36 = vld [vmem:[#allocation2 + $0x420] sm:$0xff] }
 0x3dd   :  { %8426 = vmatpush1.bf16.msra.mxu0 %v8425_v54  ;;  %8474 = vmatpush1.bf16.msra.mxu1 %v8473_v12  ;;  %v11000_v48 = vsel %vm13048_vm14, %v2988_v47, %v2990_v22  ;;  %v11003_v63 = vsel %vm13048_vm14, %v2990_v22, %v2992_v60  ;;  %v8481_v10 = vpack.c.bf16 %v3148_v7, %v3132_v29  ;;  %v3195_v54 = vld [vmem:[#allocation2 + $0x428] sm:$0xff]  ;;  %v3165_v12 = vld [vmem:[#allocation2 + $0x338] sm:$0xff]  ;;  %v3242_v41 = vld [vmem:[#allocation2 + $0x5a0] sm:$0xff] }
 0x3de   :  { %8428 = vmatprep.subr.bf16.mxu0 %v8427_v18  ;;  %8476 = vmatprep.subr.bf16.mxu1 %v8475_v24  ;;  %v8435_v8 = vpack.c.bf16 %v3211_v56, %v3195_v54  ;;  %v8483_v49 = vpack.c.bf16 %v3181_v40, %v3165_v12  ;;  %v3210_v18 = vld [vmem:[#allocation2 + $0x4a0] sm:$0xff]  ;;  %v3180_v24 = vld [vmem:[#allocation2 + $0x3b0] sm:$0xff]  ;;  %v3213_v22 = vld [vmem:[#allocation2 + $0x4b8] sm:$0xff] }
 0x3df   :  { %8302 = vmatprep.mubr.msk.f32.mxu1 %vm3500_vm15, %v10831_v5  ;;  %v3212_v7 = vld [vmem:[#allocation2 + $0x4b0] sm:$0xff]  ;;  %v3245_v40 = vld [vmem:[#allocation2 + $0x5b8] sm:$0xff] }
 0x3e0   :  { %v2994_v47 = vpop.permute.xlu0 %2993  ;;  %v2996_v15 = vpop.permute.xlu1 %2995 }
 0x3e1   :  { %8430 = vmatpush1.bf16.msra.mxu0 %v8429_v25  ;;  %8478 = vmatpush1.bf16.msra.mxu1 %v8477_v11  ;;  %v11008_v19 = vsel %vm13048_vm14, %v2992_v60, %v2994_v47  ;;  %v11011_v2 = vsel %vm13048_vm14, %v2994_v47, %v2996_v15  ;;  %v3243_v60 = vld [vmem:[#allocation2 + $0x5a8] sm:$0xff]  ;;  %v8437_v25 = vpack.c.bf16 %v3210_v18, %v3194_v36 }
 0x3e2   :  { %8432 = vmatprep.subr.bf16.mxu0 %v8431_v28  ;;  %8480 = vmatprep.subr.bf16.mxu1 %v8479_v38  ;;  %v8485_v11 = vpack.c.bf16 %v3180_v24, %v3164_v53  ;;  %v8439_v28 = vpack.c.bf16 %v3243_v60, %v3227_v37  ;;  %v8487_v38 = vpack.c.bf16 %v3213_v22, %v3197_v51  ;;  %v3244_v60 = vld [vmem:[#allocation2 + $0x5b0] sm:$0xff]  ;;  %v3307_v22 = vld [vmem:[#allocation2 + $0x7a8] sm:$0xff] }
 0x3e3   :  { %v3228_v53 = vld [vmem:[#allocation2 + $0x530] sm:$0xff] }
 0x3e4   :  { %v3000_v1 = vpop.permute.xlu1 %2999  ;;  %v2998_v34 = vpop.permute.xlu0 %2997  ;;  %v8493_v51 = vpack.c.bf16 %v3244_v60, %v3228_v53  ;;  %v3308_v60 = vld [vmem:[#allocation2 + $0x7b0] sm:$0xff]  ;;  %v3322_v53 = vld [vmem:[#allocation2 + $0x820] sm:$0xff] }
 0x3e5   :  { %8434 = vmatpush1.bf16.msra.mxu0 %v8433_v52  ;;  %8482 = vmatpush1.bf16.msra.mxu1 %v8481_v10  ;;  %v11014_v39 = vsel %vm13048_vm14, %v2996_v15, %v2998_v34  ;;  %v11017_v23 = vsel %vm13048_vm14, %v2998_v34, %v3000_v1  ;;  %v3259_v15 = vld [vmem:[#allocation2 + $0x628] sm:$0xff]  ;;  %v3226_v52 = vld [vmem:[#allocation2 + $0x520] sm:$0xff]  ;;  %v3196_v10 = vld [vmem:[#allocation2 + $0x430] sm:$0xff] }
 0x3e6   :  { %8436 = vmatprep.subr.bf16.mxu0 %v8435_v8  ;;  %8484 = vmatprep.subr.bf16.mxu1 %v8483_v49  ;;  %v8441_v54 = vpack.c.bf16 %v3242_v41, %v3226_v52  ;;  %v8489_v12 = vpack.c.bf16 %v3212_v7, %v3196_v10  ;;  %v3229_v8 = vld [vmem:[#allocation2 + $0x538] sm:$0xff]  ;;  %v9191_v49 = vld [vmem:[#allocation2 + $0x6a8] sm:$0xff]  ;;  %v3258_v34 = vld [vmem:[#allocation2 + $0x620] sm:$0xff] }
 0x3e7   :  { %v8443_v18 = vpack.c.bf16 %v9191_v49, %v3259_v15  ;;  %v8491_v24 = vpack.c.bf16 %v3245_v40, %v3229_v8  ;;  %v3306_v15 = vld [vmem:[#allocation2 + $0x7a0] sm:$0xff]  ;;  %v3260_v40 = vld [vmem:[#allocation2 + $0x630] sm:$0xff]  ;;  %v3309_v52 = vld [vmem:[#allocation2 + $0x7b8] sm:$0xff] }
 0x3e8   :  { %v3002_v47 = vpop.permute.xlu0 %3001  ;;  %v3004_v56 = vpop.permute.xlu1 %3003  ;;  %v3290_v10 = vld [vmem:[#allocation2 + $0x720] sm:$0xff]  ;;  %v3323_v8 = vld [vmem:[#allocation2 + $0x828] sm:$0xff]  ;;  %v3293_v49 = vld [vmem:[#allocation2 + $0x738] sm:$0xff] }
 0x3e9   :  { %8438 = vmatpush1.bf16.msra.mxu0 %v8437_v25  ;;  %8486 = vmatpush1.bf16.msra.mxu1 %v8485_v11  ;;  %v11020_v4 = vsel %vm13048_vm14, %v3000_v1, %v3002_v47  ;;  %v3024_v29 = vsel %vm13048_vm14, %v3002_v47, %v3004_v56  ;;  %v3261_v1 = vld [vmem:[#allocation2 + $0x638] sm:$0xff]  ;;  %v9192_v11 = vld [vmem:[#allocation2 + $0x6a0] sm:$0xff] }
 0x3ea   :  { %8440 = vmatprep.subr.bf16.mxu0 %v8439_v28  ;;  %8488 = vmatprep.subr.bf16.mxu1 %v8487_v38  ;;  %3056 = vst [vmem:[#allocation2 + $0xd60] sm:$0xff] %v3024_v29  ;;  %v8445_v37 = vpack.c.bf16 %v9192_v11, %v3258_v34  ;;  %v3291_v28 = vld [vmem:[#allocation2 + $0x728] sm:$0xff]  ;;  %v8495_v47 = vpack.c.bf16 %v10865_v9, %v3261_v1  ;;  %v3338_v34 = vld [vmem:[#allocation2 + $0x8a0] sm:$0xff]  ;;  %v3341_v1 = vld [vmem:[#allocation2 + $0x8b8] sm:$0xff] }
 0x3eb   :  { %v8447_v7 = vpack.c.bf16 %v3307_v22, %v3291_v28  ;;  %v3339_v29 = vld [vmem:[#allocation2 + $0x8a8] sm:$0xff]  ;;  %v8499_v9 = vpack.c.bf16 %v3309_v52, %v3293_v49  ;;  %v8453_v11 = vpack.c.bf16 %v3338_v34, %v3322_v53  ;;  %v3402_v49 = vld [vmem:[#allocation2 + $0xaa0] sm:$0xff]  ;;  %v3356_v34 = vld [vmem:[#allocation2 + $0x930] sm:$0xff] }
 0x3ec   :  { %v3008_v36 = vpop.permute.xlu1 %3007  ;;  %v3006_v25 = vpop.permute.xlu0 %3005  ;;  %v3371_v22 = vld [vmem:[#allocation2 + $0x9a8] sm:$0xff] }
 0x3ed   :  { %8442 = vmatpush1.bf16.msra.mxu0 %v8441_v54  ;;  %8490 = vmatpush1.bf16.msra.mxu1 %v8489_v12  ;;  %v11024_v38 = vsel %vm13048_vm14, %v3004_v56, %v3006_v25  ;;  %v3026_v41 = vsel %vm13048_vm14, %v3006_v25, %v3008_v36  ;;  %v8449_v12 = vpack.c.bf16 %v3306_v15, %v3290_v10  ;;  %v3292_v25 = vld [vmem:[#allocation2 + $0x730] sm:$0xff]  ;;  %v3373_v15 = vld [vmem:[#allocation2 + $0x9b8] sm:$0xff] }
 0x3ee   :  { %8444 = vmatprep.subr.bf16.mxu0 %v8443_v18  ;;  %8492 = vmatprep.subr.bf16.mxu1 %v8491_v24  ;;  %3058 = vst [vmem:[#allocation2 + $0xd70] sm:$0xff] %v3026_v41  ;;  %v8497_v56 = vpack.c.bf16 %v10869_v42, %v3260_v40  ;;  %v8451_v24 = vpack.c.bf16 %v3339_v29, %v3323_v8  ;;  %v3370_v41 = vld [vmem:[#allocation2 + $0x9a0] sm:$0xff]  ;;  %v3324_v29 = vld [vmem:[#allocation2 + $0x830] sm:$0xff] }
 0x3ef   :  { %v8501_v42 = vpack.c.bf16 %v3308_v60, %v3292_v25  ;;  %v3354_v40 = vld [vmem:[#allocation2 + $0x920] sm:$0xff]  ;;  %v3404_v25 = vld [vmem:[#allocation2 + $0xab0] sm:$0xff] }
 0x3f0   :  { %v3010_v54 = vpop.permute.xlu0 %3009  ;;  %v8457_v52 = vpack.c.bf16 %v3370_v41, %v3354_v40  ;;  %v3137_v41 = vld [vmem:[#allocation2 + $0x258] sm:$0xff]  ;;  %v3182_v40 = vld [vmem:[#allocation2 + $0x3c0] sm:$0xff] }
 0x3f1   :  { %8446 = vmatpush1.bf16.msra.mxu0 %v8445_v37  ;;  %8494 = vmatpush1.bf16.msra.mxu1 %v8493_v51  ;;  %v3027_v18 = vsel %vm13048_vm14, %v3008_v36, %v3010_v54  ;;  %v3355_v37 = vld [vmem:[#allocation2 + $0x928] sm:$0xff]  ;;  %v3325_v51 = vld [vmem:[#allocation2 + $0x838] sm:$0xff]  ;;  %vm4187_vm14 = vcmask 1048192  }
 0x3f2   :  { %8448 = vmatprep.subr.bf16.mxu0 %v8447_v7  ;;  %8496 = vmatprep.subr.bf16.mxu1 %v8495_v47  ;;  %3059 = vst.msk [vmem:[#allocation2 + $0xd78] sm:$0xff] %vm161_vm1, %v3027_v18  ;;  %v8455_v28 = vpack.c.bf16 %v3371_v22, %v3355_v37  ;;  %v8503_v36 = vpack.c.bf16 %v3341_v1, %v3325_v51  ;;  %v3340_v7 = vld [vmem:[#allocation2 + $0x8b0] sm:$0xff]  ;;  %v3403_v47 = vld [vmem:[#allocation2 + $0xaa8] sm:$0xff]  ;;  %v3389_v1 = vld [vmem:[#allocation2 + $0xa38] sm:$0xff] }
 0x3f3   :  { %v8505_v10 = vpack.c.bf16 %v3340_v7, %v3324_v29  ;;  %v3387_v54 = vld [vmem:[#allocation2 + $0xa28] sm:$0xff]  ;;  %v3372_v18 = vld [vmem:[#allocation2 + $0x9b0] sm:$0xff]  ;;  %v3153_v37 = vld [vmem:[#allocation2 + $0x2d8] sm:$0xff] }
 0x3f4   :  { %v8509_v22 = vpack.c.bf16 %v3372_v18, %v3356_v34  ;;  %v3104_v51 = vld [vmem:[#allocation2 + $0x150] sm:$0xff]  ;;  %v11066_v7 = vld [vmem:[%s13024_s1 + $0x8] sm:$0xff]  ;;  %v3169_v18 = vld [vmem:[#allocation2 + $0x358] sm:$0xff] }
 0x3f5   :  { %8450 = vmatpush1.bf16.msra.mxu0 %v8449_v12  ;;  %8498 = vmatpush1.bf16.msra.mxu1 %v8497_v56  ;;  %v3357_v12 = vld [vmem:[#allocation2 + $0x938] sm:$0xff]  ;;  %v8459_v56 = vpack.c.bf16 %v3403_v47, %v3387_v54  ;;  %v3152_v29 = vld [vmem:[#allocation2 + $0x2d0] sm:$0xff]  ;;  %v3166_v54 = vld [vmem:[#allocation2 + $0x340] sm:$0xff] }
 0x3f6   :  { %8452 = vmatprep.subr.bf16.mxu0 %v8451_v24  ;;  %8500 = vmatprep.subr.bf16.mxu1 %v8499_v9  ;;  %v8507_v8 = vpack.c.bf16 %v3373_v15, %v3357_v12  ;;  %v3405_v24 = vld [vmem:[#allocation2 + $0xab8] sm:$0xff]  ;;  %v3386_v9 = vld [vmem:[#allocation2 + $0xa20] sm:$0xff]  ;;  %v8583_v15 = vpack.c.bf16 %v3153_v37, %v3137_v41  ;;  %v3136_v12 = vld [vmem:[#allocation2 + $0x250] sm:$0xff] }
 0x3f7   :  { %v8461_v60 = vpack.c.bf16 %v3402_v49, %v3386_v9  ;;  %v8511_v53 = vpack.c.bf16 %v3405_v24, %v3389_v1  ;;  %v3199_v49 = vld [vmem:[#allocation2 + $0x448] sm:$0xff]  ;;  %v3214_v34 = vld [vmem:[#allocation2 + $0x4c0] sm:$0xff]  ;;  %v3217_v1 = vld [vmem:[#allocation2 + $0x4d8] sm:$0xff] }
 0x3f9   :  { %8454 = vmatpush1.bf16.msra.mxu0 %v8453_v11  ;;  %8502 = vmatpush1.bf16.msra.mxu1 %v8501_v42  ;;  %v3388_v11 = vld [vmem:[#allocation2 + $0xa30] sm:$0xff] }
 0x3fa   :  { %8456 = vmatprep.subr.bf16.mxu0 %v8455_v28  ;;  %8504 = vmatprep.subr.bf16.mxu1 %v8503_v36  ;;  %v8513_v42 = vpack.c.bf16 %v3404_v25, %v3388_v11  ;;  %v3167_v36 = vld [vmem:[#allocation2 + $0x348] sm:$0xff]  ;;  %v3168_v25 = vld [vmem:[#allocation2 + $0x350] sm:$0xff] }
 0x3fd   :  { %8458 = vmatpush1.bf16.msra.mxu0 %v8457_v52  ;;  %8506 = vmatpush1.bf16.msra.mxu1 %v8505_v10  ;;  %v3215_v52 = vld [vmem:[#allocation2 + $0x4c8] sm:$0xff]  ;;  %v3185_v10 = vld [vmem:[#allocation2 + $0x3d8] sm:$0xff] }
 0x3fe   :  { %8460 = vmatprep.subr.bf16.mxu0 %v8459_v56  ;;  %8508 = vmatprep.subr.bf16.mxu1 %v8507_v8  ;;  %v8537_v56 = vpack.c.bf16 %v3182_v40, %v3166_v54  ;;  %v8585_v8 = vpack.c.bf16 %v3152_v29, %v3136_v12  ;;  %v8539_v24 = vpack.c.bf16 %v3215_v52, %v3199_v49  ;;  %v3327_v40 = vld [vmem:[#allocation2 + $0x848] sm:$0xff]  ;;  %v3297_v29 = vld [vmem:[#allocation2 + $0x758] sm:$0xff]  ;;  %v3342_v54 = vld [vmem:[#allocation2 + $0x8c0] sm:$0xff] }
 0x3ff   :  { %v8587_v9 = vpack.c.bf16 %v3185_v10, %v3169_v18  ;;  %v3312_v12 = vld [vmem:[#allocation2 + $0x7d0] sm:$0xff]  ;;  %v3326_v49 = vld [vmem:[#allocation2 + $0x840] sm:$0xff] }
 0x400   :  { %v3296_v18 = vld [vmem:[#allocation2 + $0x750] sm:$0xff] }
 0x401   :  { %8462 = vmatpush1.bf16.msra.mxu0 %v8461_v60  ;;  %8510 = vmatpush1.bf16.msra.mxu1 %v8509_v22  ;;  %v3184_v60 = vld [vmem:[#allocation2 + $0x3d0] sm:$0xff]  ;;  %v3247_v22 = vld [vmem:[#allocation2 + $0x5c8] sm:$0xff] }
 0x402   :  { %8464 = vmatprep.subr.bf16.mxu0 %v8463_v62  ;;  %8512 = vmatprep.subr.bf16.mxu1 %v8511_v53  ;;  %v3070_v62 = vld [vmem:[#allocation2 + $0x40] sm:$0xff]  ;;  %v8543_v59 = vpack.c.bf16 %v3247_v22, %v3231_v55 }
 0x403   :  { %v8525_v30 = vpack.c.bf16 %v3086_v14, %v3070_v62  ;;  %v3198_v53 = vld [vmem:[#allocation2 + $0x440] sm:$0xff]  ;;  %v3201_v14 = vld [vmem:[#allocation2 + $0x458] sm:$0xff]  ;;  %v3216_v62 = vld [vmem:[#allocation2 + $0x4d0] sm:$0xff] }
 0x404   :  { %v8541_v11 = vpack.c.bf16 %v3214_v34, %v3198_v53  ;;  %v3359_v34 = vld [vmem:[#allocation2 + $0x948] sm:$0xff]  ;;  %v3374_v53 = vld [vmem:[#allocation2 + $0x9c0] sm:$0xff] }
 0x405   :  { %8466 = vmatpush1.bf16.msra.mxu0 %v8465_v20  ;;  %8514 = vmatpush1.bf16.msra.mxu1 %v8513_v42  ;;  %v3103_v20 = vld [vmem:[#allocation2 + $0x148] sm:$0xff]  ;;  %v8589_v42 = vpack.c.bf16 %v3184_v60, %v3168_v25  ;;  %v3329_v60 = vld [vmem:[#allocation2 + $0x858] sm:$0xff]  ;;  %v3344_v25 = vld [vmem:[#allocation2 + $0x8d0] sm:$0xff] }
 0x406   :  { %8468 = vmatprep.subr.bf16.mxu0 %v8467_v33  ;;  %8516 = vmatprep.subr.bf16.mxu1 %v8515_v16  ;;  %v8527_v26 = vpack.c.bf16 %v3119_v46, %v3103_v20  ;;  %v3118_v16 = vld [vmem:[#allocation2 + $0x1c0] sm:$0xff]  ;;  %v8591_v46 = vpack.c.bf16 %v3217_v1, %v3201_v14  ;;  %v3249_v20 = vld [vmem:[#allocation2 + $0x5d8] sm:$0xff]  ;;  %v3328_v14 = vld [vmem:[#allocation2 + $0x850] sm:$0xff] }
 0x407   :  { %v8529_v33 = vpack.c.bf16 %v3118_v16, %v3102_v13  ;;  %v3262_v13 = vld [vmem:[#allocation2 + $0x640] sm:$0xff] }
 0x408   :  { %v3358_v55 = vld [vmem:[#allocation2 + $0x940] sm:$0xff] }
 0x409   :  { %8470 = vmatpush1.bf16.msra.mxu0 %v8469_v0  ;;  %8518 = vmatpush1.bf16.msra.mxu1 %v8517_v3  ;;  %v3088_v3 = vld [vmem:[#allocation2 + $0xd0] sm:$0xff] }
 0x40a   :  { %8520 = vmatprep.subr.bf16.mxu1 %v8519_v21  ;;  %3698 = vmatprep.subr.mxu0 %v11000_v48  ;;  %v8577_v0 = vpack.c.bf16 %v3088_v3, %v3072_v43  ;;  %v8531_v21 = vpack.c.bf16 %v3151_v58, %v3135_v27  ;;  %v3120_v48 = vld [vmem:[#allocation2 + $0x1d0] sm:$0xff]  ;;  %v9194_v58 = vld [vmem:[#allocation2 + $0x6c8] sm:$0xff] }
 0x40b   :  { %v8581_v28 = vpack.c.bf16 %v3120_v48, %v3104_v51  ;;  %v3248_v43 = vld [vmem:[#allocation2 + $0x5d0] sm:$0xff] }
 0x40c   :  { %v3232_v27 = vld [vmem:[#allocation2 + $0x550] sm:$0xff] }
 0x40d   :  { %3699 = vmatpush1.msra.mxu0 %v10994_v32  ;;  %8522 = vmatpush1.bf16.msra.mxu1 %v8521_v61  ;;  %v8579_v61 = vpack.c.bf16 %v3121_v45, %v3105_v31  ;;  %v3150_v32 = vld [vmem:[#allocation2 + $0x2c0] sm:$0xff]  ;;  %v3264_v51 = vld [vmem:[#allocation2 + $0x650] sm:$0xff] }
 0x40e   :  { %3711 = vmatmul.mubr.f32.vlgmr.msra.gmra.mrb[2].mxu0 %v10989_v6  ;;  %8524 = vmatprep.subr.bf16.mxu0 %v8523_v50  ;;  %v3246_v50 = vld [vmem:[#allocation2 + $0x5c0] sm:$0xff] }
 0x40f   :  { %8526 = vmatpush1.bf16.msra.mxu0 %v8525_v30  ;;  %3769 = vmatprep.subr.mxu1 %v11008_v19  ;;  %v3183_v19 = vld [vmem:[#allocation2 + $0x3c8] sm:$0xff]  ;;  %v8545_v16 = vpack.c.bf16 %v3246_v50, %v3230_v35  ;;  %v9195_v31 = vld [vmem:[#allocation2 + $0x6c0] sm:$0xff]  ;;  %v8609_v50 = vpack.c.bf16 %v3344_v25, %v3328_v14 }
 0x410   :  { %8528 = vmatprep.subr.bf16.mxu0 %v8527_v26  ;;  %8303 = vmatprep.mubr.msk.f32.mxu0 %vm3500_vm15, %v10831_v5  ;;  %v3134_v5 = vld [vmem:[#allocation2 + $0x240] sm:$0xff]  ;;  %v8535_v47 = vpack.c.bf16 %v3183_v19, %v3167_v36  ;;  %v3263_v30 = vld [vmem:[#allocation2 + $0x648] sm:$0xff]  ;;  %v3200_v26 = vld [vmem:[#allocation2 + $0x450] sm:$0xff] }
 0x411   :  { %3770 = vmatpush1.msra.mxu1 %v11003_v63  ;;  %v8533_v63 = vpack.c.bf16 %v3150_v32, %v3134_v5  ;;  %v8593_v3 = vpack.c.bf16 %v3216_v62, %v3200_v26  ;;  %v8547_v45 = vpack.c.bf16 %v9194_v58, %v3263_v30  ;;  %v3295_v32 = vld [vmem:[#allocation2 + $0x748] sm:$0xff]  ;;  %v9196_v19 = vld [vmem:[#allocation2 + $0x6d8] sm:$0xff]  ;;  %v3310_v5 = vld [vmem:[#allocation2 + $0x7c0] sm:$0xff] }
 0x412   :  { %3782 = vmatmul.mubr.f32.vlgmr.msra.gmra.mrb[2].mxu1 %v10989_v6  ;;  %8576 = vmatprep.subr.bf16.mxu1 %v8575_v44  ;;  %v8595_v44 = vpack.c.bf16 %v3249_v20, %v3233_v57  ;;  %v3294_v36 = vld [vmem:[#allocation2 + $0x740] sm:$0xff]  ;;  %v3391_v62 = vld [vmem:[#allocation2 + $0xa48] sm:$0xff]  ;;  %v3361_v30 = vld [vmem:[#allocation2 + $0x958] sm:$0xff] }
 0x413   :  { %8530 = vmatpush1.bf16.msra.mxu0 %v8529_v33  ;;  %8578 = vmatpush1.bf16.msra.mxu1 %v8577_v0  ;;  %v3311_v33 = vld [vmem:[#allocation2 + $0x7c8] sm:$0xff]  ;;  %v3265_v0 = vld [vmem:[#allocation2 + $0x658] sm:$0xff]  ;;  %v8553_v41 = vpack.c.bf16 %v3310_v5, %v3294_v36  ;;  %v3406_v26 = vld [vmem:[#allocation2 + $0xac0] sm:$0xff] }
 0x414   :  { %8532 = vmatprep.subr.bf16.mxu0 %v8531_v21  ;;  %8580 = vmatprep.subr.bf16.mxu1 %v8579_v61  ;;  %v8549_v21 = vpack.c.bf16 %v9195_v31, %v3262_v13  ;;  %v8597_v61 = vpack.c.bf16 %v3248_v43, %v3232_v27  ;;  %v8551_v48 = vpack.c.bf16 %v3311_v33, %v3295_v32  ;;  %v3409_v57 = vld [vmem:[#allocation2 + $0xad8] sm:$0xff]  ;;  %v3390_v58 = vld [vmem:[#allocation2 + $0xa40] sm:$0xff]  ;;  %v3423_v43 = vld [vmem:[#allocation2 + $0xb48] sm:$0xff] }
 0x415   :  { %8304 = vmatprep.mubr.msk.f32.mxu1 %vm3500_vm15, %v11066_v7  ;;  %v8599_v37 = vpack.c.bf16 %v9196_v19, %v3265_v0  ;;  %v3393_v33 = vld [vmem:[#allocation2 + $0xa58] sm:$0xff]  ;;  %v3438_v31 = vld [vmem:[#allocation2 + $0xbc0] sm:$0xff]  ;;  %v3455_v5 = vld [vmem:[#allocation2 + $0xc48] sm:$0xff] }
 0x416   :  { %v8615_v27 = vpack.c.bf16 %v3409_v57, %v3393_v33  ;;  %v3422_v32 = vld [vmem:[#allocation2 + $0xb40] sm:$0xff]  ;;  %v3157_v57 = vld [vmem:[#allocation2 + $0x2f8] sm:$0xff] }
 0x417   :  { %8534 = vmatpush1.bf16.msra.mxu0 %v8533_v63  ;;  %8582 = vmatpush1.bf16.msra.mxu1 %v8581_v28  ;;  %v3343_v63 = vld [vmem:[#allocation2 + $0x8c8] sm:$0xff]  ;;  %v3313_v28 = vld [vmem:[#allocation2 + $0x7d8] sm:$0xff]  ;;  %v8569_v19 = vpack.c.bf16 %v3438_v31, %v3422_v32  ;;  %v3470_v36 = vld [vmem:[#allocation2 + $0xcc0] sm:$0xff] }
 0x418   :  { %8536 = vmatprep.subr.bf16.mxu0 %v8535_v47  ;;  %8584 = vmatprep.subr.bf16.mxu1 %v8583_v15  ;;  %v9197_v47 = vld [vmem:[#allocation2 + $0x6d0] sm:$0xff]  ;;  %v8555_v52 = vpack.c.bf16 %v3343_v63, %v3327_v40  ;;  %v8603_v10 = vpack.c.bf16 %v3313_v28, %v3297_v29  ;;  %v8571_v63 = vpack.c.bf16 %v10974_v17, %v3455_v5  ;;  %v3122_v25 = vld [vmem:[#allocation2 + $0x1e0] sm:$0xff]  ;;  %v3219_v31 = vld [vmem:[#allocation2 + $0x4e8] sm:$0xff] }
 0x419   :  { %v8601_v15 = vpack.c.bf16 %v9197_v47, %v3264_v51  ;;  %v3425_v51 = vld [vmem:[#allocation2 + $0xb58] sm:$0xff]  ;;  %v3424_v40 = vld [vmem:[#allocation2 + $0xb50] sm:$0xff] }
 0x41a   :  { %v3473_v47 = vld [vmem:[#allocation2 + $0xcd8] sm:$0xff]  ;;  %v3456_v17 = vld [vmem:[#allocation2 + $0xc50] sm:$0xff] }
 0x41b   :  { %8538 = vmatpush1.bf16.msra.mxu0 %v8537_v56  ;;  %8586 = vmatpush1.bf16.msra.mxu1 %v8585_v8  ;;  %v3375_v56 = vld [vmem:[#allocation2 + $0x9c8] sm:$0xff]  ;;  %v3345_v8 = vld [vmem:[#allocation2 + $0x8d8] sm:$0xff]  ;;  %v3140_v32 = vld [vmem:[#allocation2 + $0x270] sm:$0xff] }
 0x41c   :  { %8540 = vmatprep.subr.bf16.mxu0 %v8539_v24  ;;  %8588 = vmatprep.subr.bf16.mxu1 %v8587_v9  ;;  %v8557_v24 = vpack.c.bf16 %v3342_v54, %v3326_v49  ;;  %v8605_v9 = vpack.c.bf16 %v3312_v12, %v3296_v18  ;;  %v8559_v22 = vpack.c.bf16 %v3375_v56, %v3359_v34  ;;  %v3472_v12 = vld [vmem:[#allocation2 + $0xcd0] sm:$0xff]  ;;  %v3091_v56 = vld [vmem:[#allocation2 + $0xe8] sm:$0xff]  ;;  %v3074_v34 = vld [vmem:[#allocation2 + $0x60] sm:$0xff] }
 0x41d   :  { %v8607_v1 = vpack.c.bf16 %v3345_v8, %v3329_v60  ;;  %v3090_v8 = vld [vmem:[#allocation2 + $0xe0] sm:$0xff]  ;;  %v8625_v49 = vpack.c.bf16 %v3472_v12, %v3456_v17  ;;  %v3075_v18 = vld [vmem:[#allocation2 + $0x68] sm:$0xff]  ;;  %v3173_v5 = vld [vmem:[#allocation2 + $0x378] sm:$0xff] }
 0x41e   :  { %v8629_v60 = vpack.c.bf16 %v3090_v8, %v3074_v34  ;;  %v3220_v17 = vld [vmem:[#allocation2 + $0x4f0] sm:$0xff]  ;;  %v3267_v8 = vld [vmem:[#allocation2 + $0x668] sm:$0xff] }
 0x41f   :  { %8542 = vmatpush1.bf16.msra.mxu0 %v8541_v11  ;;  %8590 = vmatpush1.bf16.msra.mxu1 %v8589_v42  ;;  %v3407_v11 = vld [vmem:[#allocation2 + $0xac8] sm:$0xff]  ;;  %v3377_v42 = vld [vmem:[#allocation2 + $0x9d8] sm:$0xff] }
 0x420   :  { %8544 = vmatprep.subr.bf16.mxu0 %v8543_v59  ;;  %8592 = vmatprep.subr.bf16.mxu1 %v8591_v46  ;;  %v9308_v59 = vmov 0.0   ;;  %v8561_v46 = vpack.c.bf16 %v3374_v53, %v3358_v55  ;;  %v8563_v20 = vpack.c.bf16 %v3407_v11, %v3391_v62  ;;  %v8611_v35 = vpack.c.bf16 %v3377_v42, %v3361_v30  ;;  %v3092_v11 = vld [vmem:[#allocation2 + $0xf0] sm:$0xff]  ;;  %v3155_v42 = vld [vmem:[#allocation2 + $0x2e8] sm:$0xff]  ;;  %v3125_v55 = vld [vmem:[#allocation2 + $0x1f8] sm:$0xff] }
 0x421   :  { %4186 = vst [vmem:[#allocation3] sm:$0xff] %v9308_v59  ;;  %8264 = vst [vmem:[#allocation10] sm:$0xff] %v9308_v59  ;;  %4238 = vrot.lane.b32.xlu0 %v9308_v59, %s9281_s20  ;;  %v3139_v30 = vld [vmem:[#allocation2 + $0x268] sm:$0xff] }
 0x422   :  { %8266 = vst.msk [vmem:[#allocation10 + $0x88] sm:$0xff] %vm161_vm1, %v9308_v59  ;;  %4189 = vst.msk [vmem:[#allocation3 + $0x88] sm:$0xff] %vm161_vm1, %v9308_v59 }
 0x423   :  { %8546 = vmatpush1.bf16.msra.mxu0 %v8545_v16  ;;  %8594 = vmatpush1.bf16.msra.mxu1 %v8593_v3  ;;  %v3376_v16 = vld [vmem:[#allocation2 + $0x9d0] sm:$0xff]  ;;  %v3439_v3 = vld [vmem:[#allocation2 + $0xbc8] sm:$0xff]  ;;  %4188 = vst.msk [vmem:[#allocation3 + $0x80] sm:$0xff] %vm4187_vm14, %v9308_v59  ;;  %8265 = vst.msk [vmem:[#allocation10 + $0x80] sm:$0xff] %vm4187_vm14, %v9308_v59 }
 0x424   :  { %8548 = vmatprep.subr.bf16.mxu0 %v8547_v45  ;;  %8596 = vmatprep.subr.bf16.mxu1 %v8595_v44  ;;  %v3360_v45 = vld [vmem:[#allocation2 + $0x950] sm:$0xff]  ;;  %v8565_v44 = vpack.c.bf16 %v3406_v26, %v3390_v58  ;;  %v8567_v0 = vpack.c.bf16 %v3439_v3, %v3423_v43  ;;  %v3154_v26 = vld [vmem:[#allocation2 + $0x2e0] sm:$0xff]  ;;  %v3187_v3 = vld [vmem:[#allocation2 + $0x3e8] sm:$0xff] }
 0x425   :  { %v8613_v13 = vpack.c.bf16 %v3376_v16, %v3360_v45  ;;  %v3124_v16 = vld [vmem:[#allocation2 + $0x1f0] sm:$0xff]  ;;  %v3138_v58 = vld [vmem:[#allocation2 + $0x260] sm:$0xff]  ;;  %v3141_v43 = vld [vmem:[#allocation2 + $0x278] sm:$0xff] }
 0x426   :  { %v3108_v45 = vld [vmem:[#allocation2 + $0x170] sm:$0xff]  ;;  %v8687_v33 = vpack.c.bf16 %v3157_v57, %v3141_v43 }
 0x427   :  { %8550 = vmatpush1.bf16.msra.mxu0 %v8549_v21  ;;  %8598 = vmatpush1.bf16.msra.mxu1 %v8597_v61  ;;  %v3408_v21 = vld [vmem:[#allocation2 + $0xad0] sm:$0xff]  ;;  %v3441_v61 = vld [vmem:[#allocation2 + $0xbd8] sm:$0xff] }
 0x428   :  { %8552 = vmatprep.subr.bf16.mxu0 %v8551_v48  ;;  %8600 = vmatprep.subr.bf16.mxu1 %v8599_v37  ;;  %v3392_v48 = vld [vmem:[#allocation2 + $0xa50] sm:$0xff]  ;;  %v8619_v28 = vpack.c.bf16 %v3441_v61, %v3425_v51  ;;  %v3170_v61 = vld [vmem:[#allocation2 + $0x360] sm:$0xff] }
 0x429   :  { %v8617_v37 = vpack.c.bf16 %v3408_v21, %v3392_v48  ;;  %v3189_v21 = vld [vmem:[#allocation2 + $0x3f8] sm:$0xff] }
 0x42b   :  { %8554 = vmatpush1.bf16.msra.mxu0 %v8553_v41  ;;  %8602 = vmatpush1.bf16.msra.mxu1 %v8601_v15  ;;  %v3440_v41 = vld [vmem:[#allocation2 + $0xbd0] sm:$0xff]  ;;  %v3454_v15 = vld [vmem:[#allocation2 + $0xc40] sm:$0xff] }
 0x42c   :  { %8556 = vmatprep.subr.bf16.mxu0 %v8555_v52  ;;  %8604 = vmatprep.subr.bf16.mxu1 %v8603_v10  ;;  %v8573_v29 = vpack.c.bf16 %v3470_v36, %v3454_v15  ;;  %v8621_v52 = vpack.c.bf16 %v3440_v41, %v3424_v40  ;;  %v3457_v10 = vld [vmem:[#allocation2 + $0xc58] sm:$0xff]  ;;  %v3251_v36 = vld [vmem:[#allocation2 + $0x5e8] sm:$0xff]  ;;  %v3172_v15 = vld [vmem:[#allocation2 + $0x370] sm:$0xff] }
 0x42d   :  { %v8623_v54 = vpack.c.bf16 %v3473_v47, %v3457_v10  ;;  %v3221_v41 = vld [vmem:[#allocation2 + $0x4f8] sm:$0xff]  ;;  %v3202_v47 = vld [vmem:[#allocation2 + $0x460] sm:$0xff] }
 0x42e   :  { %v3205_v10 = vld [vmem:[#allocation2 + $0x478] sm:$0xff] }
 0x42f   :  { %8558 = vmatpush1.bf16.msra.mxu0 %v8557_v24  ;;  %8606 = vmatpush1.bf16.msra.mxu1 %v8605_v9  ;;  %v3123_v24 = vld [vmem:[#allocation2 + $0x1e8] sm:$0xff]  ;;  %v8627_v9 = vpack.c.bf16 %v3091_v56, %v3075_v18  ;;  %v8695_v12 = vpack.c.bf16 %v3221_v41, %v3205_v10  ;;  %v3250_v56 = vld [vmem:[#allocation2 + $0x5e0] sm:$0xff]  ;;  %v3332_v41 = vld [vmem:[#allocation2 + $0x870] sm:$0xff] }
 0x430   :  { %8560 = vmatprep.subr.bf16.mxu0 %v8559_v22  ;;  %8608 = vmatprep.subr.bf16.mxu1 %v8607_v1  ;;  %v3107_v22 = vld [vmem:[#allocation2 + $0x168] sm:$0xff]  ;;  %v3093_v1 = vld [vmem:[#allocation2 + $0xf8] sm:$0xff]  ;;  %v3234_v18 = vld [vmem:[#allocation2 + $0x560] sm:$0xff] }
 0x431   :  { %v8631_v53 = vpack.c.bf16 %v3123_v24, %v3107_v22  ;;  %v3204_v24 = vld [vmem:[#allocation2 + $0x470] sm:$0xff]  ;;  %v9198_v22 = vld [vmem:[#allocation2 + $0x6e8] sm:$0xff] }
 0x432   :  { %v8697_v34 = vpack.c.bf16 %v3220_v17, %v3204_v24  ;;  %v3413_v17 = vld [vmem:[#allocation2 + $0xaf8] sm:$0xff] }
 0x433   :  { %8562 = vmatpush1.bf16.msra.mxu0 %v8561_v46  ;;  %8610 = vmatpush1.bf16.msra.mxu1 %v8609_v50  ;;  %v3106_v46 = vld [vmem:[#allocation2 + $0x160] sm:$0xff] }
 0x434   :  { %8564 = vmatprep.subr.bf16.mxu0 %v8563_v20  ;;  %8612 = vmatprep.subr.bf16.mxu1 %v8611_v35  ;;  %v8633_v50 = vpack.c.bf16 %v3122_v25, %v3106_v46  ;;  %v3109_v20 = vld [vmem:[#allocation2 + $0x178] sm:$0xff]  ;;  %v3266_v25 = vld [vmem:[#allocation2 + $0x660] sm:$0xff] }
 0x435   :  { %v8683_v35 = vpack.c.bf16 %v3125_v55, %v3109_v20  ;;  %v3285_v55 = vld [vmem:[#allocation2 + $0x6f8] sm:$0xff]  ;;  %v9199_v46 = vld [vmem:[#allocation2 + $0x6e0] sm:$0xff] }
 0x437   :  { %8566 = vmatpush1.bf16.msra.mxu0 %v8565_v44  ;;  %8614 = vmatpush1.bf16.msra.mxu1 %v8613_v13  ;;  %v8685_v44 = vpack.c.bf16 %v3124_v16, %v3108_v45  ;;  %v3171_v13 = vld [vmem:[#allocation2 + $0x368] sm:$0xff]  ;;  %v3317_v16 = vld [vmem:[#allocation2 + $0x7f8] sm:$0xff] }
 0x438   :  { %8568 = vmatprep.subr.bf16.mxu0 %v8567_v0  ;;  %8616 = vmatprep.subr.bf16.mxu1 %v8615_v27  ;;  %v3186_v0 = vld [vmem:[#allocation2 + $0x3e0] sm:$0xff]  ;;  %v3156_v27 = vld [vmem:[#allocation2 + $0x2f0] sm:$0xff] }
 0x439   :  { %v8641_v48 = vpack.c.bf16 %v3186_v0, %v3170_v61  ;;  %v3379_v0 = vld [vmem:[#allocation2 + $0x9e8] sm:$0xff] }
 0x43b   :  { %8570 = vmatpush1.bf16.msra.mxu0 %v8569_v19  ;;  %8618 = vmatpush1.bf16.msra.mxu1 %v8617_v37  ;;  %v8689_v19 = vpack.c.bf16 %v3156_v27, %v3140_v32  ;;  %v3203_v37 = vld [vmem:[#allocation2 + $0x468] sm:$0xff]  ;;  %v3349_v27 = vld [vmem:[#allocation2 + $0x8f8] sm:$0xff] }
 0x43c   :  { %8572 = vmatprep.subr.bf16.mxu0 %v8571_v63  ;;  %8620 = vmatprep.subr.bf16.mxu1 %v8619_v28  ;;  %v8643_v51 = vpack.c.bf16 %v3219_v31, %v3203_v37  ;;  %v8691_v63 = vpack.c.bf16 %v3189_v21, %v3173_v5  ;;  %v3218_v28 = vld [vmem:[#allocation2 + $0x4e0] sm:$0xff]  ;;  %v3300_v21 = vld [vmem:[#allocation2 + $0x770] sm:$0xff] }
 0x43d   :  { %v8645_v40 = vpack.c.bf16 %v3218_v28, %v3202_v47  ;;  %v3330_v31 = vld [vmem:[#allocation2 + $0x860] sm:$0xff]  ;;  %v3411_v28 = vld [vmem:[#allocation2 + $0xae8] sm:$0xff] }
 0x43f   :  { %8574 = vmatpush1.bf16.msra.mxu0 %v8573_v29  ;;  %8622 = vmatpush1.bf16.msra.mxu1 %v8621_v52  ;;  %v3235_v52 = vld [vmem:[#allocation2 + $0x568] sm:$0xff] }
 0x440   :  { %8624 = vmatprep.subr.bf16.mxu1 %v8623_v54  ;;  %3840 = vmatprep.subr.mxu0 %v11014_v39  ;;  %v3077_v39 = vld [vmem:[#allocation2 + $0x78] sm:$0xff]  ;;  %v8647_v54 = vpack.c.bf16 %v3251_v36, %v3235_v52  ;;  %v3362_v36 = vld [vmem:[#allocation2 + $0x960] sm:$0xff] }
 0x441   :  { %v8679_v14 = vpack.c.bf16 %v3093_v1, %v3077_v39  ;;  %v8651_v1 = vpack.c.bf16 %v9198_v22, %v3267_v8  ;;  %v3315_v39 = vld [vmem:[#allocation2 + $0x7e8] sm:$0xff]  ;;  %v3394_v8 = vld [vmem:[#allocation2 + $0xa60] sm:$0xff] }
 0x443   :  { %3841 = vmatpush1.msra.mxu0 %v11011_v2  ;;  %8626 = vmatpush1.bf16.msra.mxu1 %v8625_v49  ;;  %v3076_v2 = vld [vmem:[#allocation2 + $0x70] sm:$0xff]  ;;  %v3253_v49 = vld [vmem:[#allocation2 + $0x5f8] sm:$0xff] }
 0x444   :  { %3853 = vmatmul.mubr.f32.vlgmr.msra.gmra.mrb[4].mxu0 %v10989_v6  ;;  %8628 = vmatprep.subr.bf16.mxu0 %v8627_v9  ;;  %v8681_v62 = vpack.c.bf16 %v3092_v11, %v3076_v2  ;;  %v8649_v9 = vpack.c.bf16 %v3250_v56, %v3234_v18  ;;  %v3252_v11 = vld [vmem:[#allocation2 + $0x5f0] sm:$0xff]  ;;  %v8653_v2 = vpack.c.bf16 %v9199_v46, %v3266_v25  ;;  %v3443_v56 = vld [vmem:[#allocation2 + $0xbe8] sm:$0xff] }
 0x445   :  { %8630 = vmatpush1.bf16.msra.mxu0 %v8629_v60  ;;  %3911 = vmatprep.subr.mxu1 %v11020_v4  ;;  %v8635_v4 = vpack.c.bf16 %v3155_v42, %v3139_v30  ;;  %v3237_v60 = vld [vmem:[#allocation2 + $0x578] sm:$0xff]  ;;  %v3475_v25 = vld [vmem:[#allocation2 + $0xce8] sm:$0xff] }
 0x446   :  { %8632 = vmatprep.subr.bf16.mxu0 %v8631_v53  ;;  %8305 = vmatprep.mubr.msk.f32.mxu0 %vm3500_vm15, %v11066_v7  ;;  %v8699_v53 = vpack.c.bf16 %v3253_v49, %v3237_v60  ;;  %v3269_v42 = vld [vmem:[#allocation2 + $0x678] sm:$0xff]  ;;  %v3364_v49 = vld [vmem:[#allocation2 + $0x970] sm:$0xff]  ;;  %v3459_v46 = vld [vmem:[#allocation2 + $0xc68] sm:$0xff] }
 0x447   :  { %3912 = vmatpush1.msra.mxu1 %v11017_v23  ;;  %v8637_v23 = vpack.c.bf16 %v3154_v26, %v3138_v58  ;;  %v8703_v20 = vpack.c.bf16 %v3285_v55, %v3269_v42  ;;  %v3347_v26 = vld [vmem:[#allocation2 + $0x8e8] sm:$0xff]  ;;  %v9200_v58 = vld [vmem:[#allocation2 + $0x6f0] sm:$0xff] }
 0x448   :  { %3924 = vmatmul.mubr.f32.vlgmr.msra.gmra.mrb[4].mxu1 %v10989_v6  ;;  %8680 = vmatprep.subr.bf16.mxu1 %v8679_v14  ;;  %v8639_v6 = vpack.c.bf16 %v3187_v3, %v3171_v13  ;;  %v3236_v14 = vld [vmem:[#allocation2 + $0x570] sm:$0xff]  ;;  %v3298_v3 = vld [vmem:[#allocation2 + $0x760] sm:$0xff] }
 0x449   :  { %8634 = vmatpush1.bf16.msra.mxu0 %v8633_v50  ;;  %8682 = vmatpush1.bf16.msra.mxu1 %v8681_v62  ;;  %v8701_v50 = vpack.c.bf16 %v3252_v11, %v3236_v14  ;;  %v3299_v62 = vld [vmem:[#allocation2 + $0x768] sm:$0xff]  ;;  %v3445_v11 = vld [vmem:[#allocation2 + $0xbf8] sm:$0xff]  ;;  %v3396_v42 = vld [vmem:[#allocation2 + $0xa70] sm:$0xff] }
 0x44a   :  { %8636 = vmatprep.subr.bf16.mxu0 %v8635_v4  ;;  %8684 = vmatprep.subr.bf16.mxu1 %v8683_v35  ;;  %v8655_v30 = vpack.c.bf16 %v3315_v39, %v3299_v62  ;;  %v3314_v4 = vld [vmem:[#allocation2 + $0x7e0] sm:$0xff]  ;;  %v3268_v35 = vld [vmem:[#allocation2 + $0x670] sm:$0xff] }
 0x44b   :  { %8306 = vmatprep.mubr.msk.f32.mxu1 %vm3500_vm15, %v11066_v7  ;;  %v3188_v7 = vld [vmem:[#allocation2 + $0x3f0] sm:$0xff]  ;;  %v8657_v57 = vpack.c.bf16 %v3314_v4, %v3298_v3  ;;  %v8705_v45 = vpack.c.bf16 %v9200_v58, %v3268_v35  ;;  %v3426_v39 = vld [vmem:[#allocation2 + $0xb60] sm:$0xff]  ;;  %v3477_v4 = vld [vmem:[#allocation2 + $0xcf8] sm:$0xff] }
 0x44c   :  { %v8693_v29 = vpack.c.bf16 %v3188_v7, %v3172_v15  ;;  %v3381_v7 = vld [vmem:[#allocation2 + $0x9f8] sm:$0xff]  ;;  %v3458_v35 = vld [vmem:[#allocation2 + $0xc60] sm:$0xff] }
 0x44d   :  { %8638 = vmatpush1.bf16.msra.mxu0 %v8637_v23  ;;  %8686 = vmatpush1.bf16.msra.mxu1 %v8685_v44  ;;  %v3331_v23 = vld [vmem:[#allocation2 + $0x868] sm:$0xff]  ;;  %v3301_v44 = vld [vmem:[#allocation2 + $0x778] sm:$0xff] }
 0x44e   :  { %8640 = vmatprep.subr.bf16.mxu0 %v8639_v6  ;;  %8688 = vmatprep.subr.bf16.mxu1 %v8687_v33  ;;  %v8659_v13 = vpack.c.bf16 %v3347_v26, %v3331_v23  ;;  %v8707_v43 = vpack.c.bf16 %v3317_v16, %v3301_v44  ;;  %v3346_v6 = vld [vmem:[#allocation2 + $0x8e0] sm:$0xff]  ;;  %v3316_v33 = vld [vmem:[#allocation2 + $0x7f0] sm:$0xff] }
 0x44f   :  { %v8661_v61 = vpack.c.bf16 %v3346_v6, %v3330_v31  ;;  %v8709_v32 = vpack.c.bf16 %v3316_v33, %v3300_v21  ;;  %v3428_v26 = vld [vmem:[#allocation2 + $0xb70] sm:$0xff]  ;;  %v9202_v6 = vld [vmem:[%s13024_s1] sm:$0xff]  ;;  %v11096_v31 = vpop.permute.xlu1 %3497 }
 0x450   :  { %v3460_v23 = vld [vmem:[#allocation2 + $0xc70] sm:$0xff]  ;;  %v48_v21 = vld [vmem:[%s13028_s5] sm:$0xff] }
 0x451   :  { %8642 = vmatpush1.bf16.msra.mxu0 %v8641_v48  ;;  %8690 = vmatpush1.bf16.msra.mxu1 %v8689_v19  ;;  %v3363_v48 = vld [vmem:[#allocation2 + $0x968] sm:$0xff]  ;;  %v3333_v19 = vld [vmem:[#allocation2 + $0x878] sm:$0xff]  ;;  %v9203_v33 = vld [vmem:[#allocation2 + $0xd70] sm:$0xff] }
 0x452   :  { %8644 = vmatprep.subr.bf16.mxu0 %v8643_v51  ;;  %8692 = vmatprep.subr.bf16.mxu1 %v8691_v63  ;;  %v8663_v37 = vpack.c.bf16 %v3379_v0, %v3363_v48  ;;  %v8711_v5 = vpack.c.bf16 %v3349_v27, %v3333_v19  ;;  %v3378_v51 = vld [vmem:[#allocation2 + $0x9e0] sm:$0xff]  ;;  %v3348_v63 = vld [vmem:[#allocation2 + $0x8f0] sm:$0xff]  ;;  %v4090_v0 = vlaneseq }
 0x453   :  { %v8665_v47 = vpack.c.bf16 %v3378_v51, %v3362_v36  ;;  %v8713_v15 = vpack.c.bf16 %v3348_v63, %v3332_v41 }
 0x454   :  { %v11093_v27 = vshrl.u32 %v4090_v0, 7 }
 0x455   :  { %8646 = vmatpush1.bf16.msra.mxu0 %v8645_v40  ;;  %8694 = vmatpush1.bf16.msra.mxu1 %v8693_v29  ;;  %v3395_v40 = vld [vmem:[#allocation2 + $0xa68] sm:$0xff]  ;;  %v3365_v29 = vld [vmem:[#allocation2 + $0x978] sm:$0xff] }
 0x456   :  { %8648 = vmatprep.subr.bf16.mxu0 %v8647_v54  ;;  %8696 = vmatprep.subr.bf16.mxu1 %v8695_v12  ;;  %v8667_v52 = vpack.c.bf16 %v3411_v28, %v3395_v40  ;;  %v8715_v10 = vpack.c.bf16 %v3381_v7, %v3365_v29  ;;  %v3410_v54 = vld [vmem:[#allocation2 + $0xae0] sm:$0xff]  ;;  %v3380_v12 = vld [vmem:[#allocation2 + $0x9f0] sm:$0xff]  ;;  %v4104_v28 = vsub.s32 3, %v11093_v27 }
 0x457   :  { %v8669_v18 = vpack.c.bf16 %v3410_v54, %v3394_v8  ;;  %v8717_v24 = vpack.c.bf16 %v3380_v12, %v3364_v49  ;;  %v4108_v49 = vsub.s32 4, %v11093_v27 }
 0x458   :  { %v11128_v54 = vrot.slane %v48_v21, %v4104_v28 }
 0x459   :  { %8650 = vmatpush1.bf16.msra.mxu0 %v8649_v9  ;;  %8698 = vmatpush1.bf16.msra.mxu1 %v8697_v34  ;;  %v3427_v9 = vld [vmem:[#allocation2 + $0xb68] sm:$0xff]  ;;  %v3397_v34 = vld [vmem:[#allocation2 + $0xa78] sm:$0xff] }
 0x45a   :  { %8652 = vmatprep.subr.bf16.mxu0 %v8651_v1  ;;  %8700 = vmatprep.subr.bf16.mxu1 %v8699_v53  ;;  %v8671_v60 = vpack.c.bf16 %v3443_v56, %v3427_v9  ;;  %v8719_v22 = vpack.c.bf16 %v3413_v17, %v3397_v34  ;;  %v3442_v1 = vld [vmem:[#allocation2 + $0xbe0] sm:$0xff]  ;;  %v3412_v53 = vld [vmem:[#allocation2 + $0xaf0] sm:$0xff]  ;;  %v11159_v34 = vrot.slane %v48_v21, %v4108_v49 }
 0x45b   :  { %v8673_v55 = vpack.c.bf16 %v3442_v1, %v3426_v39  ;;  %v8721_v14 = vpack.c.bf16 %v3412_v53, %v3396_v42 }
 0x45d   :  { %8654 = vmatpush1.bf16.msra.mxu0 %v8653_v2  ;;  %8702 = vmatpush1.bf16.msra.mxu1 %v8701_v50  ;;  %v3429_v2 = vld [vmem:[#allocation2 + $0xb78] sm:$0xff]  ;;  %v8675_v50 = vpack.c.bf16 %v3475_v25, %v3459_v46  ;;  %v4120_v25 = vsub.s32 7, %v11093_v27 }
 0x45e   :  { %8656 = vmatprep.subr.bf16.mxu0 %v8655_v30  ;;  %8704 = vmatprep.subr.bf16.mxu1 %v8703_v20  ;;  %v8723_v62 = vpack.c.bf16 %v3445_v11, %v3429_v2  ;;  %v3474_v30 = vld [vmem:[#allocation2 + $0xce0] sm:$0xff]  ;;  %v3444_v20 = vld [vmem:[#allocation2 + $0xbf0] sm:$0xff] }
 0x45f   :  { %v8677_v16 = vpack.c.bf16 %v3474_v30, %v3458_v35  ;;  %v8725_v3 = vpack.c.bf16 %v3444_v20, %v3428_v26  ;;  %v11182_v30 = vrot.slane %v48_v21, %v4120_v25 }
 0x461   :  { %8658 = vmatpush1.bf16.msra.mxu0 %v8657_v57  ;;  %8706 = vmatpush1.bf16.msra.mxu1 %v8705_v45  ;;  %v3461_v57 = vld [vmem:[#allocation2 + $0xc78] sm:$0xff]  ;;  %v3476_v45 = vld [vmem:[#allocation2 + $0xcf0] sm:$0xff] }
 0x462   :  { %8660 = vmatprep.subr.bf16.mxu0 %v8659_v13  ;;  %8708 = vmatprep.subr.bf16.mxu1 %v8707_v43  ;;  %v8727_v58 = vpack.c.bf16 %v3477_v4, %v3461_v57  ;;  %v8729_v44 = vpack.c.bf16 %v3476_v45, %v3460_v23  ;;  %v3493_v13 = vld [vmem:[#allocation2 + $0xd78] sm:$0xff]  ;;  %v9201_v43 = vld [vmem:[#allocation2 + $0xd60] sm:$0xff] }
 0x465   :  { %8662 = vmatpush1.bf16.msra.mxu0 %v8661_v61  ;;  %8710 = vmatpush1.bf16.msra.mxu1 %v8709_v32  ;;  %v4096_v61 = vsub.s32 1, %v11093_v27 }
 0x466   :  { %8664 = vmatprep.subr.bf16.mxu0 %v8663_v37  ;;  %8712 = vmatprep.subr.bf16.mxu1 %v8711_v5  ;;  %v4100_v5 = vsub.s32 2, %v11093_v27 }
 0x467   :  { %v11111_v63 = vrot.slane %v48_v21, %v4096_v61 }
 0x468   :  { %v11120_v40 = vrot.slane %v48_v21, %v4100_v5 }
 0x469   :  { %8666 = vmatpush1.bf16.msra.mxu0 %v8665_v47  ;;  %8714 = vmatpush1.bf16.msra.mxu1 %v8713_v15 }
 0x46a   :  { %8668 = vmatprep.subr.bf16.mxu0 %v8667_v52  ;;  %8716 = vmatprep.subr.bf16.mxu1 %v8715_v10 }
 0x46d   :  { %8670 = vmatpush1.bf16.msra.mxu0 %v8669_v18  ;;  %8718 = vmatpush1.bf16.msra.mxu1 %v8717_v24  ;;  %v4112_v18 = vsub.s32 5, %v11093_v27 }
 0x46e   :  { %8672 = vmatprep.subr.bf16.mxu0 %v8671_v60  ;;  %8720 = vmatprep.subr.bf16.mxu1 %v8719_v22  ;;  %v4116_v22 = vsub.s32 6, %v11093_v27 }
 0x46f   :  { %v11165_v53 = vrot.slane %v48_v21, %v4112_v18 }
 0x470   :  { %v11174_v46 = vrot.slane %v48_v21, %v4116_v22 }
 0x471   :  { %8674 = vmatpush1.bf16.msra.mxu0 %v8673_v55  ;;  %8722 = vmatpush1.bf16.msra.mxu1 %v8721_v14 }
 0x472   :  { %8676 = vmatprep.subr.bf16.mxu0 %v8675_v50  ;;  %8724 = vmatprep.subr.bf16.mxu1 %v8723_v62 }
 0x475   :  { %8678 = vmatpush1.bf16.msra.mxu0 %v8677_v16  ;;  %8726 = vmatpush1.bf16.msra.mxu1 %v8725_v3  ;;  %v49_v16 = vld [vmem:[%s13028_s5 + $0x8] sm:$0xff]  ;;  %s13049_s5 = smov 19  }
 0x476   :  { %8728 = vmatprep.subr.bf16.mxu1 %v8727_v58  ;;  %3982 = vmatprep.subr.mxu0 %v11024_v38  ;;  %v4092_v38 = vsub.s32 0, %v11093_v27 }
 0x478   :  { %v11105_v19 = vrot.slane %v48_v21, %v4092_v38  ;;  %v11212_v58 = vrot.slane %v49_v16, %v4092_v38  ;;  %v11225_v21 = vrot.slane %v49_v16, %v4100_v5 }
 0x479   :  { %3983 = vmatpush1.msra.mxu0 %v9201_v43  ;;  %8730 = vmatpush1.bf16.msra.mxu1 %v8729_v44  ;;  %v11217_v44 = vrot.slane %v49_v16, %v4096_v61  ;;  %v11233_v61 = vrot.slane %v49_v16, %v4104_v28 }
 0x47a   :  { %3995 = vmatmul.mubr.f32.vlgmr.msra.gmra.mrb[6].mxu0 %v9202_v6  ;;  %4053 = vmatprep.subr.mxu1 %v3493_v13 }
 0x47d   :  { %4054 = vmatpush1.msra.mxu1 %v9203_v33 }
 0x47e   :  { %4066 = vmatmul.mubr.f32.vlgmr.msra.gmra.mrb[6].mxu1 %v9202_v6 }
 0x4ab   :  { %v3570_v32 = vpop.f32.mrb[0].mxu0 }
 0x4ac   :  { %v3571_v48 = vadd.f32 %v3570_v32, %v11096_v31  ;;  %v3572_v37 = vpop.f32.mrb[1].mxu0 }
 0x4ad   :  { %v3573_v51 = vadd.f32 %v3572_v37, %v11096_v31 }
 0x4ae   :  { %v4072_v7 = vmax.f32 %v3571_v48, 0.0 }
 0x4af   :  { %v4073_v36 = vmax.f32 %v3573_v51, 0.0  ;;  %v3641_v41 = vpop.f32.mrb[0].mxu1  ;;  %v4239_v51 = vpop.permute.xlu0 %4238 }
 0x4b0   :  { %v11115_v47 = vmul.f32 %v11105_v19, %v4072_v7  ;;  %v3642_v15 = vadd.f32 %v3641_v41, %v11096_v31  ;;  %v3643_v29 = vpop.f32.mrb[1].mxu1 }
 0x4b1   :  { %v11123_v52 = vmul.f32 %v11111_v63, %v4073_v36  ;;  %v3644_v10 = vadd.f32 %v3643_v29, %v11096_v31 }
 0x4b2   :  { %4190 = vst [vmem:[#allocation3 + $0x8] sm:$0xff] %v11115_v47  ;;  %5685 = vst [vmem:[#allocation4 + $0x680] sm:$0xff] %v11115_v47  ;;  %v4074_v12 = vmax.f32 %v3642_v15, 0.0  ;;  %4240 = vrot.lane.b32.xlu1 %v11115_v47, %s9281_s20 }
 0x4b3   :  { %4191 = vst [vmem:[#allocation3 + $0x10] sm:$0xff] %v11123_v52  ;;  %5686 = vst [vmem:[#allocation4 + $0x688] sm:$0xff] %v11123_v52  ;;  %v4075_v56 = vmax.f32 %v3644_v10, 0.0  ;;  %4242 = vrot.lane.b32.xlu0 %v11123_v52, %s9281_s20 }
 0x4b4   :  { %v11139_v17 = vmul.f32 %v11120_v40, %v4074_v12 }
 0x4b5   :  { %v11142_v8 = vmul.f32 %v11128_v54, %v4075_v56 }
 0x4b6   :  { %4192 = vst [vmem:[#allocation3 + $0x18] sm:$0xff] %v11139_v17  ;;  %5687 = vst [vmem:[#allocation4 + $0x690] sm:$0xff] %v11139_v17  ;;  %4244 = vrot.lane.b32.xlu1 %v11139_v17, %s9281_s20 }
 0x4b7   :  { %4193 = vst [vmem:[#allocation3 + $0x20] sm:$0xff] %v11142_v8  ;;  %5688 = vst [vmem:[#allocation4 + $0x698] sm:$0xff] %v11142_v8  ;;  %4246 = vrot.lane.b32.xlu0 %v11142_v8, %s9281_s20 }
 0x4e1   :  { %v3712_v24 = vpop.f32.mrb[2].mxu0 }
 0x4e2   :  { %v3713_v9 = vadd.f32 %v3712_v24, %v11096_v31  ;;  %v3714_v60 = vpop.f32.mrb[3].mxu0 }
 0x4e3   :  { %v3715_v1 = vadd.f32 %v3714_v60, %v11096_v31 }
 0x4e4   :  { %v4076_v11 = vmax.f32 %v3713_v9, 0.0 }
 0x4e5   :  { %v4077_v39 = vmax.f32 %v3715_v1, 0.0  ;;  %v3783_v42 = vpop.f32.mrb[2].mxu1  ;;  %v11272_v1 = vrot.slane %v49_v16, %v4108_v49 }
 0x4e6   :  { %v11169_v55 = vmul.f32 %v11159_v34, %v4076_v11  ;;  %v3784_v14 = vadd.f32 %v3783_v42, %v11096_v31  ;;  %v3785_v2 = vpop.f32.mrb[3].mxu1  ;;  %v11277_v42 = vrot.slane %v49_v16, %v4112_v18  ;;  %v11293_v18 = vrot.slane %v49_v16, %v4120_v25 }
 0x4e7   :  { %v11177_v50 = vmul.f32 %v11165_v53, %v4077_v39  ;;  %v3786_v62 = vadd.f32 %v3785_v2, %v11096_v31 }
 0x4e8   :  { %4194 = vst [vmem:[#allocation3 + $0x28] sm:$0xff] %v11169_v55  ;;  %5689 = vst [vmem:[#allocation4 + $0x6a0] sm:$0xff] %v11169_v55  ;;  %v4078_v20 = vmax.f32 %v3784_v14, 0.0  ;;  %4248 = vrot.lane.b32.xlu1 %v11169_v55, %s9281_s20 }
 0x4e9   :  { %4195 = vst [vmem:[#allocation3 + $0x30] sm:$0xff] %v11177_v50  ;;  %5690 = vst [vmem:[#allocation4 + $0x6a8] sm:$0xff] %v11177_v50  ;;  %v4079_v4 = vmax.f32 %v3786_v62, 0.0  ;;  %4250 = vrot.lane.b32.xlu0 %v11177_v50, %s9281_s20 }
 0x4ea   :  { %v11193_v35 = vmul.f32 %v11174_v46, %v4078_v20 }
 0x4eb   :  { %v11196_v26 = vmul.f32 %v11182_v30, %v4079_v4 }
 0x4ec   :  { %4196 = vst [vmem:[#allocation3 + $0x38] sm:$0xff] %v11193_v35  ;;  %5691 = vst [vmem:[#allocation4 + $0x6b0] sm:$0xff] %v11193_v35  ;;  %4252 = vrot.lane.b32.xlu1 %v11193_v35, %s9281_s20 }
 0x4ed   :  { %4197 = vst [vmem:[#allocation3 + $0x40] sm:$0xff] %v11196_v26  ;;  %5692 = vst [vmem:[#allocation4 + $0x6b8] sm:$0xff] %v11196_v26  ;;  %4254 = vrot.lane.b32.xlu0 %v11196_v26, %s9281_s20 }
 0x517   :  { %v3854_v3 = vpop.f32.mrb[4].mxu0 }
 0x518   :  { %v3855_v57 = vadd.f32 %v3854_v3, %v11096_v31  ;;  %v3856_v45 = vpop.f32.mrb[5].mxu0  ;;  %v11285_v3 = vrot.slane %v49_v16, %v4116_v22 }
 0x519   :  { %v3857_v23 = vadd.f32 %v3856_v45, %v11096_v31 }
 0x51a   :  { %v4080_v13 = vmax.f32 %v3855_v57, 0.0 }
 0x51b   :  { %v4081_v43 = vmax.f32 %v3857_v23, 0.0  ;;  %v3925_v6 = vpop.f32.mrb[4].mxu1 }
 0x51c   :  { %v11220_v33 = vmul.f32 %v11212_v58, %v4080_v13  ;;  %v3926_v0 = vadd.f32 %v3925_v6, %v11096_v31  ;;  %v3927_v38 = vpop.f32.mrb[5].mxu1 }
 0x51d   :  { %v11228_v32 = vmul.f32 %v11217_v44, %v4081_v43  ;;  %v3928_v48 = vadd.f32 %v3927_v38, %v11096_v31 }
 0x51e   :  { %4198 = vst [vmem:[#allocation3 + $0x48] sm:$0xff] %v11220_v33  ;;  %5693 = vst [vmem:[#allocation4 + $0x6c0] sm:$0xff] %v11220_v33  ;;  %v4082_v37 = vmax.f32 %v3926_v0, 0.0  ;;  %4256 = vrot.lane.b32.xlu1 %v11220_v33, %s9281_s20 }
 0x51f   :  { %4199 = vst [vmem:[#allocation3 + $0x50] sm:$0xff] %v11228_v32  ;;  %5694 = vst [vmem:[#allocation4 + $0x6c8] sm:$0xff] %v11228_v32  ;;  %v4083_v5 = vmax.f32 %v3928_v48, 0.0  ;;  %4258 = vrot.lane.b32.xlu0 %v11228_v32, %s9281_s20 }
 0x520   :  { %v11244_v28 = vmul.f32 %v11225_v21, %v4082_v37 }
 0x521   :  { %v11247_v7 = vmul.f32 %v11233_v61, %v4083_v5 }
 0x522   :  { %4200 = vst [vmem:[#allocation3 + $0x58] sm:$0xff] %v11244_v28  ;;  %5695 = vst [vmem:[#allocation4 + $0x6d0] sm:$0xff] %v11244_v28  ;;  %4260 = vrot.lane.b32.xlu1 %v11244_v28, %s9281_s20 }
 0x523   :  { %4201 = vst [vmem:[#allocation3 + $0x60] sm:$0xff] %v11247_v7  ;;  %5696 = vst [vmem:[#allocation4 + $0x6d8] sm:$0xff] %v11247_v7  ;;  %4262 = vrot.lane.b32.xlu0 %v11247_v7, %s9281_s20 }
 0x524   :  { %v4241_v36 = vpop.permute.xlu1 %4240 }
 0x525   :  { %v11258_v41 = vsel %vm114_vm0, %v4239_v51, %v4241_v36  ;;  %v4243_v15 = vpop.permute.xlu0 %4242 }
 0x526   :  { %v11261_v29 = vsel %vm114_vm0, %v4241_v36, %v4243_v15 }
 0x528   :  { %v4245_v10 = vpop.permute.xlu1 %4244 }
 0x529   :  { %v11264_v12 = vsel %vm114_vm0, %v4243_v15, %v4245_v10  ;;  %v4247_v56 = vpop.permute.xlu0 %4246 }
 0x52a   :  { %v11267_v24 = vsel %vm114_vm0, %v4245_v10, %v4247_v56 }
 0x54d   :  { %v3996_v9 = vpop.f32.mrb[6].mxu0 }
 0x54e   :  { %v3997_v60 = vadd.f32 %v3996_v9, %v11096_v31  ;;  %v3998_v11 = vpop.f32.mrb[7].mxu0 }
 0x54f   :  { %v3999_v39 = vadd.f32 %v3998_v11, %v11096_v31 }
 0x550   :  { %v4084_v14 = vmax.f32 %v3997_v60, 0.0 }
 0x551   :  { %v4085_v2 = vmax.f32 %v3999_v39, 0.0  ;;  %v4067_v62 = vpop.f32.mrb[6].mxu1 }
 0x552   :  { %v11280_v20 = vmul.f32 %v11272_v1, %v4084_v14  ;;  %v4068_v4 = vadd.f32 %v4067_v62, %v11096_v31  ;;  %v4069_v49 = vpop.f32.mrb[7].mxu1 }
 0x553   :  { %v11288_v57 = vmul.f32 %v11277_v42, %v4085_v2  ;;  %v4070_v45 = vadd.f32 %v4069_v49, %v11096_v31 }
 0x554   :  { %4202 = vst [vmem:[#allocation3 + $0x68] sm:$0xff] %v11280_v20  ;;  %5697 = vst [vmem:[#allocation4 + $0x6e0] sm:$0xff] %v11280_v20  ;;  %v4086_v23 = vmax.f32 %v4068_v4, 0.0  ;;  %4264 = vrot.lane.b32.xlu1 %v11280_v20, %s9281_s20 }
 0x555   :  { %4203 = vst [vmem:[#allocation3 + $0x70] sm:$0xff] %v11288_v57  ;;  %5698 = vst [vmem:[#allocation4 + $0x6e8] sm:$0xff] %v11288_v57  ;;  %v4087_v22 = vmax.f32 %v4070_v45, 0.0  ;;  %4266 = vrot.lane.b32.xlu0 %v11288_v57, %s9281_s20 }
 0x556   :  { %v11304_v27 = vmul.f32 %v11285_v3, %v4086_v23 }
 0x557   :  { %v4185_v31 = vmul.f32 %v11293_v18, %v4087_v22 }
 0x558   :  { %4204 = vst [vmem:[#allocation3 + $0x78] sm:$0xff] %v11304_v27  ;;  %5699 = vst [vmem:[#allocation4 + $0x6f0] sm:$0xff] %v11304_v27  ;;  %4268 = vrot.lane.b32.xlu1 %v11304_v27, %s9281_s20  ;;  %s13052_s20 = smov 18  }
 0x559   :  { %4205 = vst.msk [vmem:[#allocation3 + $0x80] sm:$0xff] %vm161_vm1, %v4185_v31  ;;  %4349 = vrot.lane.b32.xlu0 %v9308_v59, %s9282_s3 }
 0x55a   :  { %v4249_v25 = vpop.permute.xlu1 %4248 }
 0x55b   :  { %v4274_v16 = vsel %vm114_vm0, %v4247_v56, %v4249_v25  ;;  %v4251_v13 = vpop.permute.xlu0 %4250 }
 0x55c   :  { %4305 = vst [vmem:[#allocation4 + $0x20] sm:$0xff] %v4274_v16  ;;  %v4275_v43 = vsel %vm114_vm0, %v4249_v25, %v4251_v13  ;;  %4351 = vrot.lane.b32.xlu1 %v11115_v47, %s9282_s3 }
 0x55d   :  { %4306 = vst [vmem:[#allocation4 + $0x28] sm:$0xff] %v4275_v43  ;;  %4353 = vrot.lane.b32.xlu0 %v11123_v52, %s9282_s3 }
 0x55e   :  { %v4253_v6 = vpop.permute.xlu1 %4252 }
 0x55f   :  { %v4276_v0 = vsel %vm114_vm0, %v4251_v13, %v4253_v6  ;;  %v4255_v38 = vpop.permute.xlu0 %4254 }
 0x560   :  { %4307 = vst [vmem:[#allocation4 + $0x30] sm:$0xff] %v4276_v0  ;;  %v4277_v48 = vsel %vm114_vm0, %v4253_v6, %v4255_v38  ;;  %4355 = vrot.lane.b32.xlu1 %v11139_v17, %s9282_s3  ;;  %v5684_v37 = vld [vmem:[#allocation3 + $0x80] sm:$0xff] }
 0x561   :  { %4308 = vst [vmem:[#allocation4 + $0x38] sm:$0xff] %v4277_v48  ;;  %4357 = vrot.lane.b32.xlu0 %v11142_v8, %s9282_s3  ;;  %5700 = vst.msk [vmem:[#allocation4 + $0x6f8] sm:$0xff] %vm161_vm1, %v5684_v37 }
 0x564   :  { %4359 = vrot.lane.b32.xlu1 %v11169_v55, %s9282_s3 }
 0x565   :  { %4361 = vrot.lane.b32.xlu0 %v11177_v50, %s9282_s3 }
 0x568   :  { %4363 = vrot.lane.b32.xlu1 %v11193_v35, %s9282_s3 }
 0x569   :  { %4365 = vrot.lane.b32.xlu0 %v11196_v26, %s9282_s3 }
 0x56c   :  { %4367 = vrot.lane.b32.xlu1 %v11220_v33, %s9282_s3 }
 0x56d   :  { %4369 = vrot.lane.b32.xlu0 %v11228_v32, %s9282_s3 }
 0x570   :  { %4371 = vrot.lane.b32.xlu1 %v11244_v28, %s9282_s3 }
 0x571   :  { %4373 = vrot.lane.b32.xlu0 %v11247_v7, %s9282_s3 }
 0x574   :  { %4375 = vrot.lane.b32.xlu1 %v11280_v20, %s9282_s3 }
 0x575   :  { %4377 = vrot.lane.b32.xlu0 %v11288_v57, %s9282_s3 }
 0x578   :  { %4379 = vrot.lane.b32.xlu1 %v11304_v27, %s9282_s3  ;;  %s13058_s3 = smov 17  }
 0x579   :  { %4460 = vrot.lane.b32.xlu0 %v9308_v59, %s9283_s21 }
 0x57c   :  { %4462 = vrot.lane.b32.xlu1 %v11115_v47, %s9283_s21 }
 0x57d   :  { %4464 = vrot.lane.b32.xlu0 %v11123_v52, %s9283_s21 }
 0x580   :  { %4466 = vrot.lane.b32.xlu1 %v11139_v17, %s9283_s21 }
 0x581   :  { %4468 = vrot.lane.b32.xlu0 %v11142_v8, %s9283_s21 }
 0x584   :  { %4470 = vrot.lane.b32.xlu1 %v11169_v55, %s9283_s21 }
 0x585   :  { %4472 = vrot.lane.b32.xlu0 %v11177_v50, %s9283_s21 }
 0x588   :  { %4474 = vrot.lane.b32.xlu1 %v11193_v35, %s9283_s21 }
 0x589   :  { %4476 = vrot.lane.b32.xlu0 %v11196_v26, %s9283_s21 }
 0x58c   :  { %4478 = vrot.lane.b32.xlu1 %v11220_v33, %s9283_s21 }
 0x58d   :  { %4480 = vrot.lane.b32.xlu0 %v11228_v32, %s9283_s21 }
 0x590   :  { %4482 = vrot.lane.b32.xlu1 %v11244_v28, %s9283_s21  ;;  %v4257_v5 = vpop.permute.xlu1 %4256 }
 0x591   :  { %v4278_v51 = vsel %vm114_vm0, %v4255_v38, %v4257_v5  ;;  %4484 = vrot.lane.b32.xlu0 %v11247_v7, %s9283_s21  ;;  %v4259_v36 = vpop.permute.xlu0 %4258 }
 0x592   :  { %4309 = vst [vmem:[#allocation4 + $0x40] sm:$0xff] %v4278_v51  ;;  %v4279_v15 = vsel %vm114_vm0, %v4257_v5, %v4259_v36  ;;  %v11463_v5 = vld [vmem:[#allocation3] sm:$0xff] }
 0x593   :  { %4310 = vst [vmem:[#allocation4 + $0x48] sm:$0xff] %v4279_v15 }
 0x594   :  { %4486 = vrot.lane.b32.xlu1 %v11280_v20, %s9283_s21  ;;  %v4261_v10 = vpop.permute.xlu1 %4260 }
 0x595   :  { %v4280_v56 = vsel %vm114_vm0, %v4259_v36, %v4261_v10  ;;  %4488 = vrot.lane.b32.xlu0 %v11288_v57, %s9283_s21  ;;  %v4263_v9 = vpop.permute.xlu0 %4262 }
 0x596   :  { %4311 = vst [vmem:[#allocation4 + $0x50] sm:$0xff] %v4280_v56  ;;  %v4281_v60 = vsel %vm114_vm0, %v4261_v10, %v4263_v9 }
 0x597   :  { %4312 = vst [vmem:[#allocation4 + $0x58] sm:$0xff] %v4281_v60 }
 0x598   :  { %4490 = vrot.lane.b32.xlu1 %v11304_v27, %s9283_s21 }
 0x599   :  { %4571 = vrot.lane.b32.xlu0 %v9308_v59, %s9284_s22 }
 0x59c   :  { %4573 = vrot.lane.b32.xlu1 %v11115_v47, %s9284_s22 }
 0x59d   :  { %4575 = vrot.lane.b32.xlu0 %v11123_v52, %s9284_s22 }
 0x5a0   :  { %4577 = vrot.lane.b32.xlu1 %v11139_v17, %s9284_s22 }
 0x5a1   :  { %4579 = vrot.lane.b32.xlu0 %v11142_v8, %s9284_s22 }
 0x5a4   :  { %4581 = vrot.lane.b32.xlu1 %v11169_v55, %s9284_s22 }
 0x5a5   :  { %4583 = vrot.lane.b32.xlu0 %v11177_v50, %s9284_s22 }
 0x5a8   :  { %4585 = vrot.lane.b32.xlu1 %v11193_v35, %s9284_s22 }
 0x5a9   :  { %4587 = vrot.lane.b32.xlu0 %v11196_v26, %s9284_s22 }
 0x5ac   :  { %4589 = vrot.lane.b32.xlu1 %v11220_v33, %s9284_s22 }
 0x5ad   :  { %4591 = vrot.lane.b32.xlu0 %v11228_v32, %s9284_s22 }
 0x5b0   :  { %4593 = vrot.lane.b32.xlu1 %v11244_v28, %s9284_s22 }
 0x5b1   :  { %4595 = vrot.lane.b32.xlu0 %v11247_v7, %s9284_s22 }
 0x5b4   :  { %4597 = vrot.lane.b32.xlu1 %v11280_v20, %s9284_s22 }
 0x5b5   :  { %4599 = vrot.lane.b32.xlu0 %v11288_v57, %s9284_s22 }
 0x5b8   :  { %4601 = vrot.lane.b32.xlu1 %v11304_v27, %s9284_s22 }
 0x5b9   :  { %4682 = vrot.lane.b32.xlu0 %v9308_v59, %s9285_s23 }
 0x5bc   :  { %4684 = vrot.lane.b32.xlu1 %v11115_v47, %s9285_s23 }
 0x5bd   :  { %4686 = vrot.lane.b32.xlu0 %v11123_v52, %s9285_s23 }
 0x5c0   :  { %4688 = vrot.lane.b32.xlu1 %v11139_v17, %s9285_s23 }
 0x5c1   :  { %4690 = vrot.lane.b32.xlu0 %v11142_v8, %s9285_s23 }
 0x5c4   :  { %4692 = vrot.lane.b32.xlu1 %v11169_v55, %s9285_s23 }
 0x5c5   :  { %4694 = vrot.lane.b32.xlu0 %v11177_v50, %s9285_s23 }
 0x5c6   :  { %v4265_v11 = vpop.permute.xlu1 %4264 }
 0x5c7   :  { %v4282_v59 = vsel %vm114_vm0, %v4263_v9, %v4265_v11  ;;  %v4267_v39 = vpop.permute.xlu0 %4266 }
 0x5c8   :  { %4313 = vst [vmem:[#allocation4 + $0x60] sm:$0xff] %v4282_v59  ;;  %v4283_v14 = vsel %vm114_vm0, %v4265_v11, %v4267_v39  ;;  %4696 = vrot.lane.b32.xlu1 %v11193_v35, %s9285_s23 }
 0x5c9   :  { %4314 = vst [vmem:[#allocation4 + $0x68] sm:$0xff] %v4283_v14  ;;  %4698 = vrot.lane.b32.xlu0 %v11196_v26, %s9285_s23 }
 0x5ca   :  { %v4269_v2 = vpop.permute.xlu1 %4268 }
 0x5cb   :  { %v4284_v62 = vsel %vm114_vm0, %v4267_v39, %v4269_v2  ;;  %4316 = vst.msk [vmem:[#allocation4 + $0x78] sm:$0xff] %vm161_vm1, %v4269_v2  ;;  %v4350_v4 = vpop.permute.xlu0 %4349  ;;  %vm13050_vm0 = vcmask 7168  }
 0x5cc   :  { %4315 = vst [vmem:[#allocation4 + $0x70] sm:$0xff] %v4284_v62  ;;  %4700 = vrot.lane.b32.xlu1 %v11220_v33, %s9285_s23 }
 0x5cd   :  { %4702 = vrot.lane.b32.xlu0 %v11228_v32, %s9285_s23 }
 0x5ce   :  { %v4352_v49 = vpop.permute.xlu1 %4351 }
 0x5cf   :  { %v4381_v45 = vsel %vm227_vm2, %v4350_v4, %v4352_v49  ;;  %v4354_v23 = vpop.permute.xlu0 %4353 }
 0x5d0   :  { %v4382_v22 = vsel %vm227_vm2, %v4352_v49, %v4354_v23  ;;  %4704 = vrot.lane.b32.xlu1 %v11244_v28, %s9285_s23  ;;  %v8733_v16 = vpack.c.bf16 %v4381_v45, %v11258_v41 }
 0x5d1   :  { %4706 = vrot.lane.b32.xlu0 %v11247_v7, %s9285_s23  ;;  %v8731_v31 = vpack.c.bf16 %v4382_v22, %v11261_v29 }
 0x5d2   :  { %v4356_v25 = vpop.permute.xlu1 %4355 }
 0x5d3   :  { %v4383_v13 = vsel %vm227_vm2, %v4354_v23, %v4356_v25  ;;  %v4358_v43 = vpop.permute.xlu0 %4357  ;;  %8732 = vmatprep.subr.bf16.mxu0 %v8731_v31 }
 0x5d4   :  { %v4384_v6 = vsel %vm227_vm2, %v4356_v25, %v4358_v43  ;;  %4708 = vrot.lane.b32.xlu1 %v11280_v20, %s9285_s23  ;;  %8734 = vmatpush1.bf16.msra.mxu0 %v8733_v16  ;;  %v8785_v29 = vpack.c.bf16 %v4383_v13, %v11264_v12 }
 0x5d5   :  { %4710 = vrot.lane.b32.xlu0 %v11288_v57, %s9285_s23  ;;  %v8783_v0 = vpack.c.bf16 %v4384_v6, %v11267_v24 }
 0x5d6   :  { %v4360_v38 = vpop.permute.xlu1 %4359 }
 0x5d7   :  { %v4385_v41 = vsel %vm227_vm2, %v4358_v43, %v4360_v38  ;;  %v4362_v48 = vpop.permute.xlu0 %4361  ;;  %8784 = vmatprep.subr.bf16.mxu1 %v8783_v0 }
 0x5d8   :  { %4416 = vst [vmem:[#allocation4 + $0xa0] sm:$0xff] %v4385_v41  ;;  %v4386_v37 = vsel %vm227_vm2, %v4360_v38, %v4362_v48  ;;  %4712 = vrot.lane.b32.xlu1 %v11304_v27, %s9285_s23  ;;  %8786 = vmatpush1.bf16.msra.mxu1 %v8785_v29 }
 0x5d9   :  { %4417 = vst [vmem:[#allocation4 + $0xa8] sm:$0xff] %v4386_v37  ;;  %4793 = vrot.lane.b32.xlu0 %v11463_v5, %s9286_s24 }
 0x5da   :  { %v4364_v24 = vpop.permute.xlu1 %4363 }
 0x5db   :  { %v4387_v12 = vsel %vm227_vm2, %v4362_v48, %v4364_v24  ;;  %v4366_v51 = vpop.permute.xlu0 %4365 }
 0x5dc   :  { %4418 = vst [vmem:[#allocation4 + $0xb0] sm:$0xff] %v4387_v12  ;;  %v4388_v36 = vsel %vm227_vm2, %v4364_v24, %v4366_v51  ;;  %4795 = vrot.lane.b32.xlu1 %v11115_v47, %s9286_s24 }
 0x5dd   :  { %4419 = vst [vmem:[#allocation4 + $0xb8] sm:$0xff] %v4388_v36  ;;  %4797 = vrot.lane.b32.xlu0 %v11123_v52, %s9286_s24 }
 0x5de   :  { %v4368_v15 = vpop.permute.xlu1 %4367 }
 0x5df   :  { %v4389_v10 = vsel %vm227_vm2, %v4366_v51, %v4368_v15  ;;  %v4370_v56 = vpop.permute.xlu0 %4369 }
 0x5e0   :  { %4420 = vst [vmem:[#allocation4 + $0xc0] sm:$0xff] %v4389_v10  ;;  %v4390_v9 = vsel %vm227_vm2, %v4368_v15, %v4370_v56  ;;  %4799 = vrot.lane.b32.xlu1 %v11139_v17, %s9286_s24 }
 0x5e1   :  { %4421 = vst [vmem:[#allocation4 + $0xc8] sm:$0xff] %v4390_v9  ;;  %4801 = vrot.lane.b32.xlu0 %v11142_v8, %s9286_s24 }
 0x5e2   :  { %v4372_v60 = vpop.permute.xlu1 %4371 }
 0x5e3   :  { %v4391_v11 = vsel %vm227_vm2, %v4370_v56, %v4372_v60  ;;  %v4374_v59 = vpop.permute.xlu0 %4373 }
 0x5e4   :  { %4422 = vst [vmem:[#allocation4 + $0xd0] sm:$0xff] %v4391_v11  ;;  %v4392_v39 = vsel %vm227_vm2, %v4372_v60, %v4374_v59  ;;  %4803 = vrot.lane.b32.xlu1 %v11169_v55, %s9286_s24 }
 0x5e5   :  { %4423 = vst [vmem:[#allocation4 + $0xd8] sm:$0xff] %v4392_v39  ;;  %4805 = vrot.lane.b32.xlu0 %v11177_v50, %s9286_s24 }
 0x5e6   :  { %v4376_v14 = vpop.permute.xlu1 %4375 }
 0x5e7   :  { %v4393_v2 = vsel %vm227_vm2, %v4374_v59, %v4376_v14  ;;  %v4378_v62 = vpop.permute.xlu0 %4377 }
 0x5e8   :  { %4424 = vst [vmem:[#allocation4 + $0xe0] sm:$0xff] %v4393_v2  ;;  %v4394_v4 = vsel %vm227_vm2, %v4376_v14, %v4378_v62  ;;  %4807 = vrot.lane.b32.xlu1 %v11193_v35, %s9286_s24 }
 0x5e9   :  { %4425 = vst [vmem:[#allocation4 + $0xe8] sm:$0xff] %v4394_v4  ;;  %4809 = vrot.lane.b32.xlu0 %v11196_v26, %s9286_s24 }
 0x5ea   :  { %v4380_v49 = vpop.permute.xlu1 %4379 }
 0x5eb   :  { %v4395_v45 = vsel %vm227_vm2, %v4378_v62, %v4380_v49  ;;  %4427 = vst.msk [vmem:[#allocation4 + $0xf8] sm:$0xff] %vm161_vm1, %v4380_v49  ;;  %v4461_v23 = vpop.permute.xlu0 %4460  ;;  %vm13051_vm2 = vmmov %vm13050_vm0 }
 0x5ec   :  { %4426 = vst [vmem:[#allocation4 + $0xf0] sm:$0xff] %v4395_v45  ;;  %4811 = vrot.lane.b32.xlu1 %v11220_v33, %s9286_s24 }
 0x5ed   :  { %4813 = vrot.lane.b32.xlu0 %v11228_v32, %s9286_s24 }
 0x5ee   :  { %v4463_v22 = vpop.permute.xlu1 %4462 }
 0x5ef   :  { %v11498_v31 = vsel %vm339_vm3, %v4461_v23, %v4463_v22  ;;  %v4465_v25 = vpop.permute.xlu0 %4464 }
 0x5f0   :  { %v11501_v16 = vsel %vm339_vm3, %v4463_v22, %v4465_v25  ;;  %4815 = vrot.lane.b32.xlu1 %v11244_v28, %s9286_s24 }
 0x5f1   :  { %4817 = vrot.lane.b32.xlu0 %v11247_v7, %s9286_s24 }
 0x5f2   :  { %v4467_v13 = vpop.permute.xlu1 %4466 }
 0x5f3   :  { %v11508_v43 = vsel %vm339_vm3, %v4465_v25, %v4467_v13  ;;  %v4469_v6 = vpop.permute.xlu0 %4468 }
 0x5f4   :  { %v11511_v0 = vsel %vm339_vm3, %v4467_v13, %v4469_v6  ;;  %4819 = vrot.lane.b32.xlu1 %v11280_v20, %s9286_s24 }
 0x5f5   :  { %4821 = vrot.lane.b32.xlu0 %v11288_v57, %s9286_s24 }
 0x5f6   :  { %v4471_v38 = vpop.permute.xlu1 %4470 }
 0x5f7   :  { %v4496_v29 = vsel %vm339_vm3, %v4469_v6, %v4471_v38  ;;  %v4473_v41 = vpop.permute.xlu0 %4472 }
 0x5f8   :  { %4527 = vst [vmem:[#allocation4 + $0x120] sm:$0xff] %v4496_v29  ;;  %v4497_v48 = vsel %vm339_vm3, %v4471_v38, %v4473_v41  ;;  %4823 = vrot.lane.b32.xlu1 %v11304_v27, %s9286_s24 }
 0x5f9   :  { %4528 = vst [vmem:[#allocation4 + $0x128] sm:$0xff] %v4497_v48  ;;  %4904 = vrot.lane.b32.xlu0 %v11463_v5, %s9287_s25 }
 0x5fa   :  { %v4475_v37 = vpop.permute.xlu1 %4474 }
 0x5fb   :  { %v4498_v24 = vsel %vm339_vm3, %v4473_v41, %v4475_v37  ;;  %v4477_v12 = vpop.permute.xlu0 %4476 }
 0x5fc   :  { %4529 = vst [vmem:[#allocation4 + $0x130] sm:$0xff] %v4498_v24  ;;  %v4499_v51 = vsel %vm339_vm3, %v4475_v37, %v4477_v12  ;;  %4906 = vrot.lane.b32.xlu1 %v11115_v47, %s9287_s25  ;;  %v11581_v37 = vld [vmem:[#allocation3 + $0x10] sm:$0xff] }
 0x5fd   :  { %4530 = vst [vmem:[#allocation4 + $0x138] sm:$0xff] %v4499_v51  ;;  %4908 = vrot.lane.b32.xlu0 %v11123_v52, %s9287_s25 }
 0x5fe   :  { %v4479_v36 = vpop.permute.xlu1 %4478 }
 0x5ff   :  { %v4500_v15 = vsel %vm339_vm3, %v4477_v12, %v4479_v36  ;;  %v4481_v10 = vpop.permute.xlu0 %4480 }
 0x600   :  { %4531 = vst [vmem:[#allocation4 + $0x140] sm:$0xff] %v4500_v15  ;;  %v4501_v56 = vsel %vm339_vm3, %v4479_v36, %v4481_v10  ;;  %4910 = vrot.lane.b32.xlu1 %v11139_v17, %s9287_s25  ;;  %v11586_v36 = vld [vmem:[#allocation3 + $0x18] sm:$0xff] }
 0x601   :  { %4532 = vst [vmem:[#allocation4 + $0x148] sm:$0xff] %v4501_v56  ;;  %4912 = vrot.lane.b32.xlu0 %v11142_v8, %s9287_s25 }
 0x602   :  { %v4483_v9 = vpop.permute.xlu1 %4482 }
 0x603   :  { %v4502_v47 = vsel %vm339_vm3, %v4481_v10, %v4483_v9  ;;  %v4485_v60 = vpop.permute.xlu0 %4484  ;;  %v11591_v10 = vld [vmem:[#allocation3 + $0x20] sm:$0xff] }
 0x604   :  { %4533 = vst [vmem:[#allocation4 + $0x150] sm:$0xff] %v4502_v47  ;;  %v4503_v52 = vsel %vm339_vm3, %v4483_v9, %v4485_v60  ;;  %4914 = vrot.lane.b32.xlu1 %v11169_v55, %s9287_s25 }
 0x605   :  { %4534 = vst [vmem:[#allocation4 + $0x158] sm:$0xff] %v4503_v52  ;;  %4916 = vrot.lane.b32.xlu0 %v11177_v50, %s9287_s25 }
 0x606   :  { %v4487_v11 = vpop.permute.xlu1 %4486 }
 0x607   :  { %v4504_v17 = vsel %vm339_vm3, %v4485_v60, %v4487_v11  ;;  %v4489_v59 = vpop.permute.xlu0 %4488  ;;  %v11596_v60 = vld [vmem:[#allocation3 + $0x28] sm:$0xff] }
 0x608   :  { %4535 = vst [vmem:[#allocation4 + $0x160] sm:$0xff] %v4504_v17  ;;  %v4505_v8 = vsel %vm339_vm3, %v4487_v11, %v4489_v59  ;;  %4918 = vrot.lane.b32.xlu1 %v11193_v35, %s9287_s25  ;;  %v11601_v11 = vld [vmem:[#allocation3 + $0x30] sm:$0xff] }
 0x609   :  { %4536 = vst [vmem:[#allocation4 + $0x168] sm:$0xff] %v4505_v8  ;;  %4920 = vrot.lane.b32.xlu0 %v11196_v26, %s9287_s25 }
 0x60a   :  { %v4491_v39 = vpop.permute.xlu1 %4490 }
 0x60b   :  { %v4506_v55 = vsel %vm339_vm3, %v4489_v59, %v4491_v39  ;;  %4538 = vst.msk [vmem:[#allocation4 + $0x178] sm:$0xff] %vm161_vm1, %v4491_v39  ;;  %v4572_v50 = vpop.permute.xlu0 %4571  ;;  %v11606_v39 = vld [vmem:[#allocation3 + $0x38] sm:$0xff]  ;;  %vm13053_vm3 = vmmov %vm13050_vm0 }
 0x60c   :  { %4537 = vst [vmem:[#allocation4 + $0x170] sm:$0xff] %v4506_v55  ;;  %4922 = vrot.lane.b32.xlu1 %v11220_v33, %s9287_s25 }
 0x60d   :  { %4924 = vrot.lane.b32.xlu0 %v11228_v32, %s9287_s25 }
 0x60e   :  { %v4574_v14 = vpop.permute.xlu1 %4573 }
 0x60f   :  { %v4603_v35 = vsel %vm451_vm4, %v4572_v50, %v4574_v14  ;;  %v4576_v2 = vpop.permute.xlu0 %4575  ;;  %v11611_v50 = vld [vmem:[#allocation3 + $0x40] sm:$0xff] }
 0x610   :  { %v4604_v62 = vsel %vm451_vm4, %v4574_v14, %v4576_v2  ;;  %4926 = vrot.lane.b32.xlu1 %v11244_v28, %s9287_s25  ;;  %v8737_v49 = vpack.c.bf16 %v4603_v35, %v11498_v31 }
 0x611   :  { %4928 = vrot.lane.b32.xlu0 %v11247_v7, %s9287_s25  ;;  %v8735_v26 = vpack.c.bf16 %v4604_v62, %v11501_v16 }
 0x612   :  { %v4578_v4 = vpop.permute.xlu1 %4577 }
 0x613   :  { %v4605_v45 = vsel %vm451_vm4, %v4576_v2, %v4578_v4  ;;  %v4580_v23 = vpop.permute.xlu0 %4579  ;;  %8736 = vmatprep.subr.bf16.mxu0 %v8735_v26 }
 0x614   :  { %v4606_v22 = vsel %vm451_vm4, %v4578_v4, %v4580_v23  ;;  %4930 = vrot.lane.b32.xlu1 %v11280_v20, %s9287_s25  ;;  %8738 = vmatpush1.bf16.msra.mxu0 %v8737_v49  ;;  %v8789_v16 = vpack.c.bf16 %v4605_v45, %v11508_v43  ;;  %v11576_v43 = vld [vmem:[#allocation3 + $0x8] sm:$0xff] }
 0x615   :  { %4932 = vrot.lane.b32.xlu0 %v11288_v57, %s9287_s25  ;;  %v8787_v25 = vpack.c.bf16 %v4606_v22, %v11511_v0 }
 0x616   :  { %v4582_v13 = vpop.permute.xlu1 %4581 }
 0x617   :  { %v4607_v31 = vsel %vm451_vm4, %v4580_v23, %v4582_v13  ;;  %v4584_v6 = vpop.permute.xlu0 %4583  ;;  %8788 = vmatprep.subr.bf16.mxu1 %v8787_v25 }
 0x618   :  { %4638 = vst [vmem:[#allocation4 + $0x1a0] sm:$0xff] %v4607_v31  ;;  %v4608_v38 = vsel %vm451_vm4, %v4582_v13, %v4584_v6  ;;  %4934 = vrot.lane.b32.xlu1 %v11304_v27, %s9287_s25  ;;  %8790 = vmatpush1.bf16.msra.mxu1 %v8789_v16 }
 0x619   :  { %4639 = vst [vmem:[#allocation4 + $0x1a8] sm:$0xff] %v4608_v38  ;;  %5015 = vrot.lane.b32.xlu0 %v11463_v5, %s9288_s26 }
 0x61a   :  { %v4586_v29 = vpop.permute.xlu1 %4585 }
 0x61b   :  { %v4609_v0 = vsel %vm451_vm4, %v4584_v6, %v4586_v29  ;;  %v4588_v41 = vpop.permute.xlu0 %4587 }
 0x61c   :  { %4640 = vst [vmem:[#allocation4 + $0x1b0] sm:$0xff] %v4609_v0  ;;  %v4610_v48 = vsel %vm451_vm4, %v4586_v29, %v4588_v41  ;;  %5017 = vrot.lane.b32.xlu1 %v11576_v43, %s9288_s26 }
 0x61d   :  { %4641 = vst [vmem:[#allocation4 + $0x1b8] sm:$0xff] %v4610_v48  ;;  %5019 = vrot.lane.b32.xlu0 %v11581_v37, %s9288_s26 }
 0x61e   :  { %v4590_v24 = vpop.permute.xlu1 %4589 }
 0x61f   :  { %v4611_v12 = vsel %vm451_vm4, %v4588_v41, %v4590_v24  ;;  %v4592_v51 = vpop.permute.xlu0 %4591 }
 0x620   :  { %4642 = vst [vmem:[#allocation4 + $0x1c0] sm:$0xff] %v4611_v12  ;;  %v4612_v15 = vsel %vm451_vm4, %v4590_v24, %v4592_v51  ;;  %5021 = vrot.lane.b32.xlu1 %v11586_v36, %s9288_s26 }
 0x621   :  { %4643 = vst [vmem:[#allocation4 + $0x1c8] sm:$0xff] %v4612_v15  ;;  %5023 = vrot.lane.b32.xlu0 %v11591_v10, %s9288_s26 }
 0x622   :  { %v4594_v56 = vpop.permute.xlu1 %4593 }
 0x623   :  { %v4613_v9 = vsel %vm451_vm4, %v4592_v51, %v4594_v56  ;;  %v4596_v47 = vpop.permute.xlu0 %4595 }
 0x624   :  { %4644 = vst [vmem:[#allocation4 + $0x1d0] sm:$0xff] %v4613_v9  ;;  %v4614_v52 = vsel %vm451_vm4, %v4594_v56, %v4596_v47  ;;  %5025 = vrot.lane.b32.xlu1 %v11596_v60, %s9288_s26 }
 0x625   :  { %4645 = vst [vmem:[#allocation4 + $0x1d8] sm:$0xff] %v4614_v52  ;;  %5027 = vrot.lane.b32.xlu0 %v11601_v11, %s9288_s26  ;;  %v11673_v52 = vld [vmem:[#allocation3 + $0x48] sm:$0xff] }
 0x626   :  { %v4598_v17 = vpop.permute.xlu1 %4597 }
 0x627   :  { %v4615_v59 = vsel %vm451_vm4, %v4596_v47, %v4598_v17  ;;  %v4600_v8 = vpop.permute.xlu0 %4599 }
 0x628   :  { %4646 = vst [vmem:[#allocation4 + $0x1e0] sm:$0xff] %v4615_v59  ;;  %v4616_v55 = vsel %vm451_vm4, %v4598_v17, %v4600_v8  ;;  %5029 = vrot.lane.b32.xlu1 %v11606_v39, %s9288_s26  ;;  %v11677_v17 = vld [vmem:[#allocation3 + $0x50] sm:$0xff] }
 0x629   :  { %4647 = vst [vmem:[#allocation4 + $0x1e8] sm:$0xff] %v4616_v55  ;;  %5031 = vrot.lane.b32.xlu0 %v11611_v50, %s9288_s26 }
 0x62a   :  { %v4602_v14 = vpop.permute.xlu1 %4601 }
 0x62b   :  { %v4617_v35 = vsel %vm451_vm4, %v4600_v8, %v4602_v14  ;;  %4649 = vst.msk [vmem:[#allocation4 + $0x1f8] sm:$0xff] %vm161_vm1, %v4602_v14  ;;  %v4683_v2 = vpop.permute.xlu0 %4682  ;;  %v11682_v14 = vld [vmem:[#allocation3 + $0x58] sm:$0xff]  ;;  %vm13054_vm4 = vmmov %vm13050_vm0 }
 0x62c   :  { %4648 = vst [vmem:[#allocation4 + $0x1f0] sm:$0xff] %v4617_v35  ;;  %5033 = vrot.lane.b32.xlu1 %v11220_v33, %s9288_s26 }
 0x62d   :  { %5035 = vrot.lane.b32.xlu0 %v11228_v32, %s9288_s26 }
 0x62e   :  { %v4685_v62 = vpop.permute.xlu1 %4684 }
 0x62f   :  { %v11622_v26 = vsel %vm563_vm5, %v4683_v2, %v4685_v62  ;;  %v4687_v4 = vpop.permute.xlu0 %4686  ;;  %v11687_v2 = vld [vmem:[#allocation3 + $0x60] sm:$0xff] }
 0x630   :  { %v11625_v49 = vsel %vm563_vm5, %v4685_v62, %v4687_v4  ;;  %5037 = vrot.lane.b32.xlu1 %v11244_v28, %s9288_s26 }
 0x631   :  { %5039 = vrot.lane.b32.xlu0 %v11247_v7, %s9288_s26 }
 0x632   :  { %v4689_v45 = vpop.permute.xlu1 %4688 }
 0x633   :  { %v11632_v33 = vsel %vm563_vm5, %v4687_v4, %v4689_v45  ;;  %v4691_v23 = vpop.permute.xlu0 %4690 }
 0x634   :  { %v11635_v32 = vsel %vm563_vm5, %v4689_v45, %v4691_v23  ;;  %5041 = vrot.lane.b32.xlu1 %v11280_v20, %s9288_s26 }
 0x635   :  { %5043 = vrot.lane.b32.xlu0 %v11288_v57, %s9288_s26 }
 0x636   :  { %v4693_v22 = vpop.permute.xlu1 %4692 }
 0x637   :  { %v4718_v28 = vsel %vm563_vm5, %v4691_v23, %v4693_v22  ;;  %v4695_v25 = vpop.permute.xlu0 %4694 }
 0x638   :  { %4749 = vst [vmem:[#allocation4 + $0x220] sm:$0xff] %v4718_v28  ;;  %v4719_v7 = vsel %vm563_vm5, %v4693_v22, %v4695_v25  ;;  %5045 = vrot.lane.b32.xlu1 %v11304_v27, %s9288_s26  ;;  %v11694_v28 = vld [vmem:[#allocation3 + $0x68] sm:$0xff] }
 0x639   :  { %4750 = vst [vmem:[#allocation4 + $0x228] sm:$0xff] %v4719_v7  ;;  %5126 = vrot.lane.b32.xlu0 %v11463_v5, %s9289_s27  ;;  %v11699_v7 = vld [vmem:[#allocation3 + $0x70] sm:$0xff] }
 0x63a   :  { %v4697_v13 = vpop.permute.xlu1 %4696 }
 0x63b   :  { %v4720_v20 = vsel %vm563_vm5, %v4695_v25, %v4697_v13  ;;  %v4699_v16 = vpop.permute.xlu0 %4698 }
 0x63c   :  { %4751 = vst [vmem:[#allocation4 + $0x230] sm:$0xff] %v4720_v20  ;;  %v4721_v57 = vsel %vm563_vm5, %v4697_v13, %v4699_v16  ;;  %5128 = vrot.lane.b32.xlu1 %v11576_v43, %s9289_s27 }
 0x63d   :  { %4752 = vst [vmem:[#allocation4 + $0x238] sm:$0xff] %v4721_v57  ;;  %5130 = vrot.lane.b32.xlu0 %v11581_v37, %s9289_s27  ;;  %v11706_v57 = vld [vmem:[#allocation3 + $0x78] sm:$0xff] }
 0x63e   :  { %v4701_v31 = vpop.permute.xlu1 %4700 }
 0x63f   :  { %v4722_v27 = vsel %vm563_vm5, %v4699_v16, %v4701_v31  ;;  %v4703_v6 = vpop.permute.xlu0 %4702 }
 0x640   :  { %4753 = vst [vmem:[#allocation4 + $0x240] sm:$0xff] %v4722_v27  ;;  %v4723_v38 = vsel %vm563_vm5, %v4701_v31, %v4703_v6  ;;  %5132 = vrot.lane.b32.xlu1 %v11586_v36, %s9289_s27 }
 0x641   :  { %4754 = vst [vmem:[#allocation4 + $0x248] sm:$0xff] %v4723_v38  ;;  %5134 = vrot.lane.b32.xlu0 %v11591_v10, %s9289_s27 }
 0x642   :  { %v4705_v29 = vpop.permute.xlu1 %4704 }
 0x643   :  { %v4724_v0 = vsel %vm563_vm5, %v4703_v6, %v4705_v29  ;;  %v4707_v41 = vpop.permute.xlu0 %4706 }
 0x644   :  { %4755 = vst [vmem:[#allocation4 + $0x250] sm:$0xff] %v4724_v0  ;;  %v4725_v48 = vsel %vm563_vm5, %v4705_v29, %v4707_v41  ;;  %5136 = vrot.lane.b32.xlu1 %v11596_v60, %s9289_s27 }
 0x645   :  { %4756 = vst [vmem:[#allocation4 + $0x258] sm:$0xff] %v4725_v48  ;;  %5138 = vrot.lane.b32.xlu0 %v11601_v11, %s9289_s27 }
 0x646   :  { %v4709_v24 = vpop.permute.xlu1 %4708 }
 0x647   :  { %v4726_v12 = vsel %vm563_vm5, %v4707_v41, %v4709_v24  ;;  %v4711_v51 = vpop.permute.xlu0 %4710 }
 0x648   :  { %4757 = vst [vmem:[#allocation4 + $0x260] sm:$0xff] %v4726_v12  ;;  %v4727_v15 = vsel %vm563_vm5, %v4709_v24, %v4711_v51  ;;  %5140 = vrot.lane.b32.xlu1 %v11606_v39, %s9289_s27 }
 0x649   :  { %4758 = vst [vmem:[#allocation4 + $0x268] sm:$0xff] %v4727_v15  ;;  %5142 = vrot.lane.b32.xlu0 %v11611_v50, %s9289_s27 }
 0x64a   :  { %v4713_v56 = vpop.permute.xlu1 %4712 }
 0x64b   :  { %v4728_v9 = vsel %vm563_vm5, %v4711_v51, %v4713_v56  ;;  %4760 = vst.msk [vmem:[#allocation4 + $0x278] sm:$0xff] %vm161_vm1, %v4713_v56  ;;  %v4794_v47 = vpop.permute.xlu0 %4793  ;;  %vm13055_vm5 = vcmask 1039360  }
 0x64c   :  { %4759 = vst [vmem:[#allocation4 + $0x270] sm:$0xff] %v4728_v9  ;;  %5144 = vrot.lane.b32.xlu1 %v11673_v52, %s9289_s27 }
 0x64d   :  { %5146 = vrot.lane.b32.xlu0 %v11677_v17, %s9289_s27 }
 0x64e   :  { %v4796_v59 = vpop.permute.xlu1 %4795 }
 0x64f   :  { %v4825_v8 = vsel %vm675_vm6, %v4794_v47, %v4796_v59  ;;  %v4798_v55 = vpop.permute.xlu0 %4797 }
 0x650   :  { %v4826_v35 = vsel %vm675_vm6, %v4796_v59, %v4798_v55  ;;  %5148 = vrot.lane.b32.xlu1 %v11682_v14, %s9289_s27  ;;  %v8741_v45 = vpack.c.bf16 %v4825_v8, %v11622_v26 }
 0x651   :  { %5150 = vrot.lane.b32.xlu0 %v11687_v2, %s9289_s27  ;;  %v8739_v62 = vpack.c.bf16 %v4826_v35, %v11625_v49 }
 0x652   :  { %v4800_v4 = vpop.permute.xlu1 %4799 }
 0x653   :  { %v4827_v23 = vsel %vm675_vm6, %v4798_v55, %v4800_v4  ;;  %v4802_v22 = vpop.permute.xlu0 %4801  ;;  %8740 = vmatprep.subr.bf16.mxu0 %v8739_v62 }
 0x654   :  { %v4828_v25 = vsel %vm675_vm6, %v4800_v4, %v4802_v22  ;;  %5152 = vrot.lane.b32.xlu1 %v11694_v28, %s9289_s27  ;;  %8742 = vmatpush1.bf16.msra.mxu0 %v8741_v45  ;;  %v8793_v13 = vpack.c.bf16 %v4827_v23, %v11632_v33 }
 0x655   :  { %5154 = vrot.lane.b32.xlu0 %v11699_v7, %s9289_s27  ;;  %v8791_v49 = vpack.c.bf16 %v4828_v25, %v11635_v32 }
 0x656   :  { %v4804_v26 = vpop.permute.xlu1 %4803 }
 0x657   :  { %v4829_v20 = vsel %vm675_vm6, %v4802_v22, %v4804_v26  ;;  %v4806_v16 = vpop.permute.xlu0 %4805  ;;  %8792 = vmatprep.subr.bf16.mxu1 %v8791_v49 }
 0x658   :  { %4860 = vst [vmem:[#allocation4 + $0x2a0] sm:$0xff] %v4829_v20  ;;  %v4830_v31 = vsel %vm675_vm6, %v4804_v26, %v4806_v16  ;;  %5156 = vrot.lane.b32.xlu1 %v11706_v57, %s9289_s27  ;;  %8794 = vmatpush1.bf16.msra.mxu1 %v8793_v13 }
 0x659   :  { %4861 = vst [vmem:[#allocation4 + $0x2a8] sm:$0xff] %v4830_v31  ;;  %5239 = vrot.lane.b32.xlu0 %v11463_v5, %s9290_s28  ;;  %v11767_v31 = vld [vmem:[#allocation3 + $0x80] sm:$0xff] }
 0x65a   :  { %v4808_v32 = vpop.permute.xlu1 %4807 }
 0x65b   :  { %v4831_v33 = vsel %vm675_vm6, %v4806_v16, %v4808_v32  ;;  %v4810_v27 = vpop.permute.xlu0 %4809 }
 0x65c   :  { %4862 = vst [vmem:[#allocation4 + $0x2b0] sm:$0xff] %v4831_v33  ;;  %v4832_v6 = vsel %vm675_vm6, %v4808_v32, %v4810_v27  ;;  %5241 = vrot.lane.b32.xlu1 %v11576_v43, %s9290_s28 }
 0x65d   :  { %4863 = vst [vmem:[#allocation4 + $0x2b8] sm:$0xff] %v4832_v6  ;;  %5243 = vrot.lane.b32.xlu0 %v11581_v37, %s9290_s28 }
 0x65e   :  { %v4812_v38 = vpop.permute.xlu1 %4811 }
 0x65f   :  { %v4833_v29 = vsel %vm675_vm6, %v4810_v27, %v4812_v38  ;;  %v4814_v0 = vpop.permute.xlu0 %4813 }
 0x660   :  { %4864 = vst [vmem:[#allocation4 + $0x2c0] sm:$0xff] %v4833_v29  ;;  %v4834_v41 = vsel %vm675_vm6, %v4812_v38, %v4814_v0  ;;  %5245 = vrot.lane.b32.xlu1 %v11586_v36, %s9290_s28 }
 0x661   :  { %4865 = vst [vmem:[#allocation4 + $0x2c8] sm:$0xff] %v4834_v41  ;;  %5247 = vrot.lane.b32.xlu0 %v11591_v10, %s9290_s28 }
 0x662   :  { %v4816_v48 = vpop.permute.xlu1 %4815 }
 0x663   :  { %v4835_v24 = vsel %vm675_vm6, %v4814_v0, %v4816_v48  ;;  %v4818_v12 = vpop.permute.xlu0 %4817 }
 0x664   :  { %4866 = vst [vmem:[#allocation4 + $0x2d0] sm:$0xff] %v4835_v24  ;;  %v4836_v51 = vsel %vm675_vm6, %v4816_v48, %v4818_v12  ;;  %5249 = vrot.lane.b32.xlu1 %v11596_v60, %s9290_s28 }
 0x665   :  { %4867 = vst [vmem:[#allocation4 + $0x2d8] sm:$0xff] %v4836_v51  ;;  %5251 = vrot.lane.b32.xlu0 %v11601_v11, %s9290_s28 }
 0x666   :  { %v4820_v15 = vpop.permute.xlu1 %4819 }
 0x667   :  { %v4837_v56 = vsel %vm675_vm6, %v4818_v12, %v4820_v15  ;;  %v4822_v9 = vpop.permute.xlu0 %4821 }
 0x668   :  { %4868 = vst [vmem:[#allocation4 + $0x2e0] sm:$0xff] %v4837_v56  ;;  %v4838_v47 = vsel %vm675_vm6, %v4820_v15, %v4822_v9  ;;  %5253 = vrot.lane.b32.xlu1 %v11606_v39, %s9290_s28 }
 0x669   :  { %4869 = vst [vmem:[#allocation4 + $0x2e8] sm:$0xff] %v4838_v47  ;;  %5255 = vrot.lane.b32.xlu0 %v11611_v50, %s9290_s28 }
 0x66a   :  { %v4824_v59 = vpop.permute.xlu1 %4823 }
 0x66b   :  { %v4839_v8 = vsel %vm675_vm6, %v4822_v9, %v4824_v59  ;;  %4871 = vst.msk [vmem:[#allocation4 + $0x2f8] sm:$0xff] %vm161_vm1, %v4824_v59  ;;  %v4905_v55 = vpop.permute.xlu0 %4904  ;;  %vm13056_vm6 = vmmov %vm13055_vm5 }
 0x66c   :  { %4870 = vst [vmem:[#allocation4 + $0x2f0] sm:$0xff] %v4839_v8  ;;  %5257 = vrot.lane.b32.xlu1 %v11673_v52, %s9290_s28 }
 0x66d   :  { %5259 = vrot.lane.b32.xlu0 %v11677_v17, %s9290_s28 }
 0x66e   :  { %v4907_v35 = vpop.permute.xlu1 %4906 }
 0x66f   :  { %v11744_v62 = vsel %vm787_vm7, %v4905_v55, %v4907_v35  ;;  %v4909_v4 = vpop.permute.xlu0 %4908 }
 0x670   :  { %v11747_v45 = vsel %vm787_vm7, %v4907_v35, %v4909_v4  ;;  %5261 = vrot.lane.b32.xlu1 %v11682_v14, %s9290_s28 }
 0x671   :  { %5263 = vrot.lane.b32.xlu0 %v11687_v2, %s9290_s28 }
 0x672   :  { %v4911_v23 = vpop.permute.xlu1 %4910 }
 0x673   :  { %v11754_v22 = vsel %vm787_vm7, %v4909_v4, %v4911_v23  ;;  %v4913_v25 = vpop.permute.xlu0 %4912 }
 0x674   :  { %v11757_v49 = vsel %vm787_vm7, %v4911_v23, %v4913_v25  ;;  %5265 = vrot.lane.b32.xlu1 %v11694_v28, %s9290_s28 }
 0x675   :  { %5267 = vrot.lane.b32.xlu0 %v11699_v7, %s9290_s28 }
 0x676   :  { %v4915_v26 = vpop.permute.xlu1 %4914 }
 0x677   :  { %v4940_v13 = vsel %vm787_vm7, %v4913_v25, %v4915_v26  ;;  %v4917_v20 = vpop.permute.xlu0 %4916 }
 0x678   :  { %4971 = vst [vmem:[#allocation4 + $0x320] sm:$0xff] %v4940_v13  ;;  %v4941_v16 = vsel %vm787_vm7, %v4915_v26, %v4917_v20  ;;  %5269 = vrot.lane.b32.xlu1 %v11706_v57, %s9290_s28 }
 0x679   :  { %4972 = vst [vmem:[#allocation4 + $0x328] sm:$0xff] %v4941_v16  ;;  %5271 = vrot.lane.b32.xlu0 %v11767_v31, %s9290_s28 }
 0x67a   :  { %v4919_v32 = vpop.permute.xlu1 %4918 }
 0x67b   :  { %v4942_v33 = vsel %vm787_vm7, %v4917_v20, %v4919_v32  ;;  %v4921_v27 = vpop.permute.xlu0 %4920 }
 0x67c   :  { %4973 = vst [vmem:[#allocation4 + $0x330] sm:$0xff] %v4942_v33  ;;  %v4943_v6 = vsel %vm787_vm7, %v4919_v32, %v4921_v27  ;;  %5355 = vrot.lane.b32.xlu1 %v11463_v5, %s9291_s29 }
 0x67d   :  { %4974 = vst [vmem:[#allocation4 + $0x338] sm:$0xff] %v4943_v6  ;;  %5357 = vrot.lane.b32.xlu0 %v11576_v43, %s9291_s29 }
 0x67e   :  { %v4923_v38 = vpop.permute.xlu1 %4922 }
 0x67f   :  { %v4944_v29 = vsel %vm787_vm7, %v4921_v27, %v4923_v38  ;;  %v4925_v0 = vpop.permute.xlu0 %4924 }
 0x680   :  { %4975 = vst [vmem:[#allocation4 + $0x340] sm:$0xff] %v4944_v29  ;;  %v4945_v41 = vsel %vm787_vm7, %v4923_v38, %v4925_v0  ;;  %5359 = vrot.lane.b32.xlu1 %v11581_v37, %s9291_s29 }
 0x681   :  { %4976 = vst [vmem:[#allocation4 + $0x348] sm:$0xff] %v4945_v41  ;;  %5361 = vrot.lane.b32.xlu0 %v11586_v36, %s9291_s29 }
 0x682   :  { %v4927_v48 = vpop.permute.xlu1 %4926 }
 0x683   :  { %v4946_v24 = vsel %vm787_vm7, %v4925_v0, %v4927_v48  ;;  %v4929_v12 = vpop.permute.xlu0 %4928 }
 0x684   :  { %4977 = vst [vmem:[#allocation4 + $0x350] sm:$0xff] %v4946_v24  ;;  %v4947_v51 = vsel %vm787_vm7, %v4927_v48, %v4929_v12  ;;  %5363 = vrot.lane.b32.xlu1 %v11591_v10, %s9291_s29 }
 0x685   :  { %4978 = vst [vmem:[#allocation4 + $0x358] sm:$0xff] %v4947_v51  ;;  %5365 = vrot.lane.b32.xlu0 %v11596_v60, %s9291_s29 }
 0x686   :  { %v4931_v15 = vpop.permute.xlu1 %4930 }
 0x687   :  { %v4948_v56 = vsel %vm787_vm7, %v4929_v12, %v4931_v15  ;;  %v4933_v9 = vpop.permute.xlu0 %4932 }
 0x688   :  { %4979 = vst [vmem:[#allocation4 + $0x360] sm:$0xff] %v4948_v56  ;;  %v4949_v47 = vsel %vm787_vm7, %v4931_v15, %v4933_v9  ;;  %5367 = vrot.lane.b32.xlu1 %v11601_v11, %s9291_s29 }
 0x689   :  { %4980 = vst [vmem:[#allocation4 + $0x368] sm:$0xff] %v4949_v47  ;;  %5369 = vrot.lane.b32.xlu0 %v11606_v39, %s9291_s29 }
 0x68a   :  { %v4935_v59 = vpop.permute.xlu1 %4934 }
 0x68b   :  { %v4950_v8 = vsel %vm787_vm7, %v4933_v9, %v4935_v59  ;;  %4982 = vst.msk [vmem:[#allocation4 + $0x378] sm:$0xff] %vm161_vm1, %v4935_v59  ;;  %v5016_v55 = vpop.permute.xlu0 %5015  ;;  %vm13057_vm7 = vmmov %vm13055_vm5 }
 0x68c   :  { %4981 = vst [vmem:[#allocation4 + $0x370] sm:$0xff] %v4950_v8  ;;  %5371 = vrot.lane.b32.xlu1 %v11611_v50, %s9291_s29 }
 0x68d   :  { %5373 = vrot.lane.b32.xlu0 %v11673_v52, %s9291_s29 }
 0x68e   :  { %v5018_v35 = vpop.permute.xlu1 %5017 }
 0x68f   :  { %v5047_v4 = vsel %vm899_vm8, %v5016_v55, %v5018_v35  ;;  %v5020_v23 = vpop.permute.xlu0 %5019 }
 0x690   :  { %v5048_v25 = vsel %vm899_vm8, %v5018_v35, %v5020_v23  ;;  %5375 = vrot.lane.b32.xlu1 %v11677_v17, %s9291_s29  ;;  %v8745_v20 = vpack.c.bf16 %v5047_v4, %v11744_v62 }
 0x691   :  { %5377 = vrot.lane.b32.xlu0 %v11682_v14, %s9291_s29  ;;  %v8743_v26 = vpack.c.bf16 %v5048_v25, %v11747_v45 }
 0x692   :  { %v5022_v13 = vpop.permute.xlu1 %5021 }
 0x693   :  { %v5049_v16 = vsel %vm899_vm8, %v5020_v23, %v5022_v13  ;;  %v5024_v32 = vpop.permute.xlu0 %5023  ;;  %8744 = vmatprep.subr.bf16.mxu0 %v8743_v26 }
 0x694   :  { %v5050_v33 = vsel %vm899_vm8, %v5022_v13, %v5024_v32  ;;  %5379 = vrot.lane.b32.xlu1 %v11687_v2, %s9291_s29  ;;  %8746 = vmatpush1.bf16.msra.mxu0 %v8745_v20  ;;  %v8797_v45 = vpack.c.bf16 %v5049_v16, %v11754_v22 }
 0x695   :  { %5381 = vrot.lane.b32.xlu0 %v11694_v28, %s9291_s29  ;;  %v8795_v27 = vpack.c.bf16 %v5050_v33, %v11757_v49 }
 0x696   :  { %v5026_v6 = vpop.permute.xlu1 %5025 }
 0x697   :  { %v5051_v62 = vsel %vm899_vm8, %v5024_v32, %v5026_v6  ;;  %v5028_v38 = vpop.permute.xlu0 %5027  ;;  %8796 = vmatprep.subr.bf16.mxu1 %v8795_v27 }
 0x698   :  { %5082 = vst [vmem:[#allocation4 + $0x3a0] sm:$0xff] %v5051_v62  ;;  %v5052_v29 = vsel %vm899_vm8, %v5026_v6, %v5028_v38  ;;  %5383 = vrot.lane.b32.xlu1 %v11699_v7, %s9291_s29  ;;  %8798 = vmatpush1.bf16.msra.mxu1 %v8797_v45 }
 0x699   :  { %5083 = vst [vmem:[#allocation4 + $0x3a8] sm:$0xff] %v5052_v29  ;;  %5385 = vrot.lane.b32.xlu0 %v11706_v57, %s9291_s29 }
 0x69a   :  { %v5030_v2 = vpop.permute.xlu1 %5029 }
 0x69b   :  { %v5053_v28 = vsel %vm899_vm8, %v5028_v38, %v5030_v2  ;;  %v5032_v49 = vpop.permute.xlu0 %5031 }
 0x69c   :  { %5084 = vst [vmem:[#allocation4 + $0x3b0] sm:$0xff] %v5053_v28  ;;  %v5054_v22 = vsel %vm899_vm8, %v5030_v2, %v5032_v49  ;;  %5387 = vrot.lane.b32.xlu1 %v11767_v31, %s9291_s29 }
 0x69d   :  { %5085 = vst [vmem:[#allocation4 + $0x3b8] sm:$0xff] %v5054_v22  ;;  %5471 = vrot.lane.b32.xlu0 %v11463_v5, %s9292_s30 }
 0x69e   :  { %v5034_v7 = vpop.permute.xlu1 %5033 }
 0x69f   :  { %v5055_v0 = vsel %vm899_vm8, %v5032_v49, %v5034_v7  ;;  %v5036_v41 = vpop.permute.xlu0 %5035 }
 0x6a0   :  { %5086 = vst [vmem:[#allocation4 + $0x3c0] sm:$0xff] %v5055_v0  ;;  %v5056_v57 = vsel %vm899_vm8, %v5034_v7, %v5036_v41  ;;  %5473 = vrot.lane.b32.xlu1 %v11576_v43, %s9292_s30 }
 0x6a1   :  { %5087 = vst [vmem:[#allocation4 + $0x3c8] sm:$0xff] %v5056_v57  ;;  %5475 = vrot.lane.b32.xlu0 %v11581_v37, %s9292_s30 }
 0x6a2   :  { %v5038_v48 = vpop.permute.xlu1 %5037 }
 0x6a3   :  { %v5057_v31 = vsel %vm899_vm8, %v5036_v41, %v5038_v48  ;;  %v5040_v24 = vpop.permute.xlu0 %5039 }
 0x6a4   :  { %5088 = vst [vmem:[#allocation4 + $0x3d0] sm:$0xff] %v5057_v31  ;;  %v5058_v12 = vsel %vm899_vm8, %v5038_v48, %v5040_v24  ;;  %5477 = vrot.lane.b32.xlu1 %v11586_v36, %s9292_s30 }
 0x6a5   :  { %5089 = vst [vmem:[#allocation4 + $0x3d8] sm:$0xff] %v5058_v12  ;;  %5479 = vrot.lane.b32.xlu0 %v11591_v10, %s9292_s30 }
 0x6a6   :  { %v5042_v51 = vpop.permute.xlu1 %5041 }
 0x6a7   :  { %v5059_v15 = vsel %vm899_vm8, %v5040_v24, %v5042_v51  ;;  %v5044_v56 = vpop.permute.xlu0 %5043 }
 0x6a8   :  { %5090 = vst [vmem:[#allocation4 + $0x3e0] sm:$0xff] %v5059_v15  ;;  %v5060_v9 = vsel %vm899_vm8, %v5042_v51, %v5044_v56  ;;  %5481 = vrot.lane.b32.xlu1 %v11596_v60, %s9292_s30 }
 0x6a9   :  { %5091 = vst [vmem:[#allocation4 + $0x3e8] sm:$0xff] %v5060_v9  ;;  %5483 = vrot.lane.b32.xlu0 %v11601_v11, %s9292_s30 }
 0x6aa   :  { %v5046_v47 = vpop.permute.xlu1 %5045 }
 0x6ab   :  { %v5061_v59 = vsel %vm899_vm8, %v5044_v56, %v5046_v47  ;;  %5093 = vst.msk [vmem:[#allocation4 + $0x3f8] sm:$0xff] %vm161_vm1, %v5046_v47  ;;  %v5127_v8 = vpop.permute.xlu0 %5126  ;;  %vm13059_vm8 = vcmask 973824  }
 0x6ac   :  { %5092 = vst [vmem:[#allocation4 + $0x3f0] sm:$0xff] %v5061_v59  ;;  %5485 = vrot.lane.b32.xlu1 %v11606_v39, %s9292_s30  ;;  %vm13063_vm14 = vmmov %vm13059_vm8 }
 0x6ad   :  { %5487 = vrot.lane.b32.xlu0 %v11611_v50, %s9292_s30 }
 0x6ae   :  { %v5129_v55 = vpop.permute.xlu1 %5128 }
 0x6af   :  { %v11854_v35 = vsel %vm1011_vm9, %v5127_v8, %v5129_v55  ;;  %v5131_v4 = vpop.permute.xlu0 %5130 }
 0x6b0   :  { %v11857_v11 = vsel %vm1011_vm9, %v5129_v55, %v5131_v4  ;;  %5489 = vrot.lane.b32.xlu1 %v11673_v52, %s9292_s30 }
 0x6b1   :  { %5491 = vrot.lane.b32.xlu0 %v11677_v17, %s9292_s30 }
 0x6b2   :  { %v5133_v23 = vpop.permute.xlu1 %5132 }
 0x6b3   :  { %v11864_v39 = vsel %vm1011_vm9, %v5131_v4, %v5133_v23  ;;  %v5135_v25 = vpop.permute.xlu0 %5134 }
 0x6b4   :  { %v11867_v50 = vsel %vm1011_vm9, %v5133_v23, %v5135_v25  ;;  %5493 = vrot.lane.b32.xlu1 %v11682_v14, %s9292_s30 }
 0x6b5   :  { %5589 = vrot.lane.b32.xlu0 %v11576_v43, %s9293_s7 }
 0x6b6   :  { %v5137_v26 = vpop.permute.xlu1 %5136 }
 0x6b7   :  { %v5162_v52 = vsel %vm1011_vm9, %v5135_v25, %v5137_v26  ;;  %v5139_v13 = vpop.permute.xlu0 %5138 }
 0x6b8   :  { %5193 = vst [vmem:[#allocation4 + $0x420] sm:$0xff] %v5162_v52  ;;  %v5163_v17 = vsel %vm1011_vm9, %v5137_v26, %v5139_v13  ;;  %5591 = vrot.lane.b32.xlu1 %v11581_v37, %s9293_s7  ;;  %v11940_v26 = vld [vmem:[#allocation3 + $0x20] sm:$0xff] }
 0x6b9   :  { %5194 = vst [vmem:[#allocation4 + $0x428] sm:$0xff] %v5163_v17  ;;  %5593 = vrot.lane.b32.xlu0 %v11586_v36, %s9293_s7 }
 0x6ba   :  { %v5141_v20 = vpop.permute.xlu1 %5140 }
 0x6bb   :  { %v5164_v14 = vsel %vm1011_vm9, %v5139_v13, %v5141_v20  ;;  %v5143_v16 = vpop.permute.xlu0 %5142  ;;  %v11945_v13 = vld [vmem:[#allocation3 + $0x28] sm:$0xff] }
 0x6bc   :  { %5195 = vst [vmem:[#allocation4 + $0x430] sm:$0xff] %v5164_v14  ;;  %v5165_v32 = vsel %vm1011_vm9, %v5141_v20, %v5143_v16  ;;  %5595 = vrot.lane.b32.xlu1 %v11591_v10, %s9293_s7  ;;  %v11950_v14 = vld [vmem:[#allocation3 + $0x8] sm:$0xff] }
 0x6bd   :  { %5196 = vst [vmem:[#allocation4 + $0x438] sm:$0xff] %v5165_v32  ;;  %5587 = vrot.lane.b32.xlu0 %v11463_v5, %s9293_s7 }
 0x6be   :  { %v5145_v33 = vpop.permute.xlu1 %5144 }
 0x6bf   :  { %v5166_v27 = vsel %vm1011_vm9, %v5143_v16, %v5145_v33  ;;  %v5147_v6 = vpop.permute.xlu0 %5146 }
 0x6c0   :  { %5197 = vst [vmem:[#allocation4 + $0x440] sm:$0xff] %v5166_v27  ;;  %v5167_v45 = vsel %vm1011_vm9, %v5145_v33, %v5147_v6  ;;  %5735 = vrot.lane.b32.xlu1 %v11581_v37, %s9294_s8 }
 0x6c1   :  { %5198 = vst [vmem:[#allocation4 + $0x448] sm:$0xff] %v5167_v45  ;;  %5737 = vrot.lane.b32.xlu0 %v11586_v36, %s9294_s8  ;;  %v11961_v45 = vld [vmem:[#allocation3 + $0x18] sm:$0xff] }
 0x6c2   :  { %v5149_v62 = vpop.permute.xlu1 %5148 }
 0x6c3   :  { %v5168_v38 = vsel %vm1011_vm9, %v5147_v6, %v5149_v62  ;;  %v5151_v29 = vpop.permute.xlu0 %5150 }
 0x6c4   :  { %5199 = vst [vmem:[#allocation4 + $0x450] sm:$0xff] %v5168_v38  ;;  %v5169_v5 = vsel %vm1011_vm9, %v5149_v62, %v5151_v29  ;;  %5739 = vrot.lane.b32.xlu1 %v11591_v10, %s9294_s8 }
 0x6c5   :  { %5200 = vst [vmem:[#allocation4 + $0x458] sm:$0xff] %v5169_v5  ;;  %5741 = vrot.lane.b32.xlu0 %v11596_v60, %s9294_s8 }
 0x6c6   :  { %v5153_v2 = vpop.permute.xlu1 %5152 }
 0x6c7   :  { %v5170_v28 = vsel %vm1011_vm9, %v5151_v29, %v5153_v2  ;;  %v5155_v49 = vpop.permute.xlu0 %5154 }
 0x6c8   :  { %5201 = vst [vmem:[#allocation4 + $0x460] sm:$0xff] %v5170_v28  ;;  %v5171_v22 = vsel %vm1011_vm9, %v5153_v2, %v5155_v49  ;;  %5846 = vrot.lane.b32.xlu1 %v11581_v37, %s9295_s9 }
 0x6c9   :  { %5202 = vst [vmem:[#allocation4 + $0x468] sm:$0xff] %v5171_v22  ;;  %5848 = vrot.lane.b32.xlu0 %v11586_v36, %s9295_s9 }
 0x6ca   :  { %v5157_v7 = vpop.permute.xlu1 %5156 }
 0x6cb   :  { %v5172_v0 = vsel %vm1011_vm9, %v5155_v49, %v5157_v7  ;;  %5204 = vst.msk [vmem:[#allocation4 + $0x478] sm:$0xff] %vm161_vm1, %v5157_v7  ;;  %v5240_v41 = vpop.permute.xlu0 %5239  ;;  %vm13060_vm9 = vmmov %vm13059_vm8 }
 0x6cc   :  { %5203 = vst [vmem:[#allocation4 + $0x470] sm:$0xff] %v5172_v0  ;;  %5850 = vrot.lane.b32.xlu1 %v11591_v10, %s9295_s9 }
 0x6cd   :  { %5852 = vrot.lane.b32.xlu0 %v11596_v60, %s9295_s9 }
 0x6ce   :  { %v5242_v57 = vpop.permute.xlu1 %5241 }
 0x6cf   :  { %v5273_v48 = vsel %vm1127_vm10, %v5240_v41, %v5242_v57  ;;  %v5244_v31 = vpop.permute.xlu0 %5243 }
 0x6d0   :  { %v5274_v24 = vsel %vm1127_vm10, %v5242_v57, %v5244_v31  ;;  %5733 = vrot.lane.b32.xlu1 %v11576_v43, %s9294_s8  ;;  %v8749_v15 = vpack.c.bf16 %v5273_v48, %v11854_v35 }
 0x6d1   :  { %5844 = vrot.lane.b32.xlu0 %v11576_v43, %s9295_s9  ;;  %v8747_v12 = vpack.c.bf16 %v5274_v24, %v11857_v11 }
 0x6d2   :  { %v5246_v51 = vpop.permute.xlu1 %5245 }
 0x6d3   :  { %v5275_v56 = vsel %vm1127_vm10, %v5244_v31, %v5246_v51  ;;  %v5248_v9 = vpop.permute.xlu0 %5247  ;;  %8748 = vmatprep.subr.bf16.mxu0 %v8747_v12 }
 0x6d4   :  { %v5276_v47 = vsel %vm1127_vm10, %v5246_v51, %v5248_v9  ;;  %5957 = vrot.lane.b32.xlu1 %v11581_v37, %s9296_s10  ;;  %8750 = vmatpush1.bf16.msra.mxu0 %v8749_v15  ;;  %v8801_v8 = vpack.c.bf16 %v5275_v56, %v11864_v39  ;;  %v11932_v39 = vld [vmem:[#allocation3 + $0x10] sm:$0xff] }
 0x6d5   :  { %5959 = vrot.lane.b32.xlu0 %v11586_v36, %s9296_s10  ;;  %v8799_v43 = vpack.c.bf16 %v5276_v47, %v11867_v50 }
 0x6d6   :  { %v5250_v59 = vpop.permute.xlu1 %5249 }
 0x6d7   :  { %v5277_v55 = vsel %vm1127_vm10, %v5248_v9, %v5250_v59  ;;  %v5252_v35 = vpop.permute.xlu0 %5251  ;;  %8800 = vmatprep.subr.bf16.mxu1 %v8799_v43 }
 0x6d8   :  { %5309 = vst [vmem:[#allocation4 + $0x4a0] sm:$0xff] %v5277_v55  ;;  %v5278_v4 = vsel %vm1127_vm10, %v5250_v59, %v5252_v35  ;;  %5961 = vrot.lane.b32.xlu1 %v11591_v10, %s9296_s10  ;;  %8802 = vmatpush1.bf16.msra.mxu1 %v8801_v8 }
 0x6d9   :  { %5310 = vst [vmem:[#allocation4 + $0x4a8] sm:$0xff] %v5278_v4  ;;  %5963 = vrot.lane.b32.xlu0 %v11596_v60, %s9296_s10 }
 0x6da   :  { %v5254_v37 = vpop.permute.xlu1 %5253 }
 0x6db   :  { %v5279_v11 = vsel %vm1127_vm10, %v5252_v35, %v5254_v37  ;;  %v5256_v23 = vpop.permute.xlu0 %5255 }
 0x6dc   :  { %5311 = vst [vmem:[#allocation4 + $0x4b0] sm:$0xff] %v5279_v11  ;;  %v5280_v25 = vsel %vm1127_vm10, %v5254_v37, %v5256_v23  ;;  %6068 = vrot.lane.b32.xlu1 %v11932_v39, %s9297_s11 }
 0x6dd   :  { %5312 = vst [vmem:[#allocation4 + $0x4b8] sm:$0xff] %v5280_v25  ;;  %6070 = vrot.lane.b32.xlu0 %v11586_v36, %s9297_s11 }
 0x6de   :  { %v5258_v10 = vpop.permute.xlu1 %5257 }
 0x6df   :  { %v5281_v50 = vsel %vm1127_vm10, %v5256_v23, %v5258_v10  ;;  %v5260_v60 = vpop.permute.xlu0 %5259 }
 0x6e0   :  { %5313 = vst [vmem:[#allocation4 + $0x4c0] sm:$0xff] %v5281_v50  ;;  %v5282_v52 = vsel %vm1127_vm10, %v5258_v10, %v5260_v60  ;;  %6072 = vrot.lane.b32.xlu1 %v11940_v26, %s9297_s11 }
 0x6e1   :  { %5314 = vst [vmem:[#allocation4 + $0x4c8] sm:$0xff] %v5282_v52  ;;  %6074 = vrot.lane.b32.xlu0 %v11945_v13, %s9297_s11 }
 0x6e2   :  { %v5262_v17 = vpop.permute.xlu1 %5261 }
 0x6e3   :  { %v5283_v36 = vsel %vm1127_vm10, %v5260_v60, %v5262_v17  ;;  %v5264_v20 = vpop.permute.xlu0 %5263 }
 0x6e4   :  { %5315 = vst [vmem:[#allocation4 + $0x4d0] sm:$0xff] %v5283_v36  ;;  %v5284_v16 = vsel %vm1127_vm10, %v5262_v17, %v5264_v20  ;;  %5955 = vrot.lane.b32.xlu1 %v11950_v14, %s9296_s10 }
 0x6e5   :  { %5316 = vst [vmem:[#allocation4 + $0x4d8] sm:$0xff] %v5284_v16  ;;  %6066 = vrot.lane.b32.xlu0 %v11950_v14, %s9297_s11 }
 0x6e6   :  { %v5266_v32 = vpop.permute.xlu1 %5265 }
 0x6e7   :  { %v5285_v33 = vsel %vm1127_vm10, %v5264_v20, %v5266_v32  ;;  %v5268_v27 = vpop.permute.xlu0 %5267 }
 0x6e8   :  { %5317 = vst [vmem:[#allocation4 + $0x4e0] sm:$0xff] %v5285_v33  ;;  %v5286_v6 = vsel %vm1127_vm10, %v5266_v32, %v5268_v27  ;;  %6181 = vrot.lane.b32.xlu1 %v11932_v39, %s9298_s12 }
 0x6e9   :  { %5318 = vst [vmem:[#allocation4 + $0x4e8] sm:$0xff] %v5286_v6  ;;  %6183 = vrot.lane.b32.xlu0 %v11961_v45, %s9298_s12 }
 0x6ea   :  { %v5270_v62 = vpop.permute.xlu1 %5269 }
 0x6eb   :  { %v5287_v38 = vsel %vm1127_vm10, %v5268_v27, %v5270_v62  ;;  %v5272_v29 = vpop.permute.xlu0 %5271 }
 0x6ec   :  { %5319 = vst [vmem:[#allocation4 + $0x4f0] sm:$0xff] %v5287_v38  ;;  %v5288_v5 = vsel %vm1127_vm10, %v5270_v62, %v5272_v29  ;;  %6185 = vrot.lane.b32.xlu1 %v11940_v26, %s9298_s12  ;;  %vm13061_vm10 = vmmov %vm13059_vm8 }
 0x6ed   :  { %5320 = vst.msk [vmem:[#allocation4 + $0x4f8] sm:$0xff] %vm161_vm1, %v5288_v5  ;;  %6187 = vrot.lane.b32.xlu0 %v11945_v13, %s9298_s12 }
 0x6ee   :  { %v5356_v2 = vpop.permute.xlu1 %5355 }
 0x6ef   :  { %v5358_v28 = vpop.permute.xlu0 %5357 }
 0x6f0   :  { %v11973_v49 = vsel %vm1244_vm11, %v5356_v2, %v5358_v28  ;;  %6297 = vrot.lane.b32.xlu1 %v11932_v39, %s9299_s13 }
 0x6f1   :  { %6299 = vrot.lane.b32.xlu0 %v11961_v45, %s9299_s13 }
 0x6f2   :  { %v5360_v22 = vpop.permute.xlu1 %5359 }
 0x6f3   :  { %v11980_v7 = vsel %vm1244_vm11, %v5358_v28, %v5360_v22  ;;  %v5362_v0 = vpop.permute.xlu0 %5361 }
 0x6f4   :  { %v11983_v41 = vsel %vm1244_vm11, %v5360_v22, %v5362_v0  ;;  %6301 = vrot.lane.b32.xlu1 %v11940_v26, %s9299_s13 }
 0x6f5   :  { %6303 = vrot.lane.b32.xlu0 %v11945_v13, %s9299_s13 }
 0x6f6   :  { %v5364_v57 = vpop.permute.xlu1 %5363 }
 0x6f7   :  { %v11990_v48 = vsel %vm1244_vm11, %v5362_v0, %v5364_v57  ;;  %v5366_v31 = vpop.permute.xlu0 %5365 }
 0x6f8   :  { %v5393_v24 = vsel %vm1244_vm11, %v5364_v57, %v5366_v31  ;;  %6179 = vrot.lane.b32.xlu1 %v11950_v14, %s9298_s12 }
 0x6f9   :  { %5425 = vst [vmem:[#allocation4 + $0x520] sm:$0xff] %v5393_v24  ;;  %6295 = vrot.lane.b32.xlu0 %v11950_v14, %s9299_s13 }
 0x6fa   :  { %v5368_v12 = vpop.permute.xlu1 %5367 }
 0x6fb   :  { %v5394_v51 = vsel %vm1244_vm11, %v5366_v31, %v5368_v12  ;;  %v5370_v15 = vpop.permute.xlu0 %5369 }
 0x6fc   :  { %5426 = vst [vmem:[#allocation4 + $0x528] sm:$0xff] %v5394_v51  ;;  %v5395_v56 = vsel %vm1244_vm11, %v5368_v12, %v5370_v15  ;;  %6413 = vrot.lane.b32.xlu1 %v11932_v39, %s9300_s14 }
 0x6fd   :  { %5427 = vst [vmem:[#allocation4 + $0x530] sm:$0xff] %v5395_v56  ;;  %6415 = vrot.lane.b32.xlu0 %v11961_v45, %s9300_s14 }
 0x6fe   :  { %v5372_v9 = vpop.permute.xlu1 %5371 }
 0x6ff   :  { %v5396_v47 = vsel %vm1244_vm11, %v5370_v15, %v5372_v9  ;;  %v5374_v43 = vpop.permute.xlu0 %5373 }
 0x700   :  { %5428 = vst [vmem:[#allocation4 + $0x538] sm:$0xff] %v5396_v47  ;;  %v5397_v59 = vsel %vm1244_vm11, %v5372_v9, %v5374_v43  ;;  %6417 = vrot.lane.b32.xlu1 %v11940_v26, %s9300_s14 }
 0x701   :  { %5429 = vst [vmem:[#allocation4 + $0x540] sm:$0xff] %v5397_v59  ;;  %6419 = vrot.lane.b32.xlu0 %v11945_v13, %s9300_s14 }
 0x702   :  { %v5376_v8 = vpop.permute.xlu1 %5375 }
 0x703   :  { %v5398_v55 = vsel %vm1244_vm11, %v5374_v43, %v5376_v8  ;;  %v5378_v35 = vpop.permute.xlu0 %5377 }
 0x704   :  { %5430 = vst [vmem:[#allocation4 + $0x548] sm:$0xff] %v5398_v55  ;;  %v5399_v4 = vsel %vm1244_vm11, %v5376_v8, %v5378_v35  ;;  %6529 = vrot.lane.b32.xlu1 %v11932_v39, %s9301_s15 }
 0x705   :  { %5431 = vst [vmem:[#allocation4 + $0x550] sm:$0xff] %v5399_v4  ;;  %6531 = vrot.lane.b32.xlu0 %v11961_v45, %s9301_s15 }
 0x706   :  { %v5380_v37 = vpop.permute.xlu1 %5379 }
 0x707   :  { %v5400_v11 = vsel %vm1244_vm11, %v5378_v35, %v5380_v37  ;;  %v5382_v23 = vpop.permute.xlu0 %5381  ;;  %v7400_v35 = vld [vmem:[#allocation4 + $0x688] sm:$0xff] }
 0x708   :  { %5432 = vst [vmem:[#allocation4 + $0x558] sm:$0xff] %v5400_v11  ;;  %v5401_v25 = vsel %vm1244_vm11, %v5380_v37, %v5382_v23  ;;  %6533 = vrot.lane.b32.xlu1 %v11940_v26, %s9301_s15 }
 0x709   :  { %5433 = vst [vmem:[#allocation4 + $0x560] sm:$0xff] %v5401_v25  ;;  %6535 = vrot.lane.b32.xlu0 %v11945_v13, %s9301_s15 }
 0x70a   :  { %v5384_v10 = vpop.permute.xlu1 %5383 }
 0x70b   :  { %v5402_v50 = vsel %vm1244_vm11, %v5382_v23, %v5384_v10  ;;  %v5386_v60 = vpop.permute.xlu0 %5385 }
 0x70c   :  { %5434 = vst [vmem:[#allocation4 + $0x568] sm:$0xff] %v5402_v50  ;;  %v5403_v52 = vsel %vm1244_vm11, %v5384_v10, %v5386_v60  ;;  %6411 = vrot.lane.b32.xlu1 %v11950_v14, %s9300_s14  ;;  %v7402_v10 = vld [vmem:[#allocation4 + $0x698] sm:$0xff] }
 0x70d   :  { %5435 = vst [vmem:[#allocation4 + $0x570] sm:$0xff] %v5403_v52  ;;  %6527 = vrot.lane.b32.xlu0 %v11950_v14, %s9301_s15  ;;  %v7399_v52 = vld [vmem:[#allocation4 + $0x680] sm:$0xff] }
 0x70e   :  { %v5388_v17 = vpop.permute.xlu1 %5387 }
 0x70f   :  { %v5404_v36 = vsel %vm1244_vm11, %v5386_v60, %v5388_v17  ;;  %v5472_v20 = vpop.permute.xlu0 %5471  ;;  %v7401_v17 = vld [vmem:[#allocation4 + $0x690] sm:$0xff]  ;;  %vm13062_vm11 = vmmov %vm13055_vm5 }
 0x710   :  { %5436 = vst.msk [vmem:[#allocation4 + $0x578] sm:$0xff] %vm161_vm1, %v5404_v36  ;;  %6645 = vrot.lane.b32.xlu1 %v11932_v39, %s9302_s16 }
 0x711   :  { %6647 = vrot.lane.b32.xlu0 %v11961_v45, %s9302_s16 }
 0x712   :  { %v5474_v16 = vpop.permute.xlu1 %5473 }
 0x713   :  { %v5505_v32 = vsel %vm1361_vm12, %v5472_v20, %v5474_v16  ;;  %v5476_v33 = vpop.permute.xlu0 %5475 }
 0x714   :  { %v5506_v27 = vsel %vm1361_vm12, %v5474_v16, %v5476_v33  ;;  %6649 = vrot.lane.b32.xlu1 %v11940_v26, %s9302_s16  ;;  %v8753_v38 = vpack.c.bf16 %v5505_v32, %v11973_v49 }
 0x715   :  { %6651 = vrot.lane.b32.xlu0 %v11945_v13, %s9302_s16  ;;  %v8751_v6 = vpack.c.bf16 %v5506_v27, %v11980_v7 }
 0x716   :  { %v5478_v62 = vpop.permute.xlu1 %5477 }
 0x717   :  { %v5507_v29 = vsel %vm1361_vm12, %v5476_v33, %v5478_v62  ;;  %v5480_v5 = vpop.permute.xlu0 %5479  ;;  %8752 = vmatprep.subr.bf16.mxu0 %v8751_v6  ;;  %v12090_v33 = vld [vmem:[#allocation8 + $0x8] sm:$0xff] }
 0x718   :  { %v5508_v2 = vsel %vm1361_vm12, %v5478_v62, %v5480_v5  ;;  %6761 = vrot.lane.b32.xlu1 %v11932_v39, %s9303_s17  ;;  %8754 = vmatpush1.bf16.msra.mxu0 %v8753_v38  ;;  %v8805_v7 = vpack.c.bf16 %v5507_v29, %v11983_v41 }
 0x719   :  { %6763 = vrot.lane.b32.xlu0 %v11961_v45, %s9303_s17  ;;  %v8803_v28 = vpack.c.bf16 %v5508_v2, %v11990_v48  ;;  %8308 = vmatprep.mubr.msk.f32.mxu1 %vm3500_vm15, %v12090_v33 }
 0x71a   :  { %v5482_v22 = vpop.permute.xlu1 %5481  ;;  %8307 = vmatprep.mubr.msk.f32.mxu0 %vm3500_vm15, %v12090_v33 }
 0x71b   :  { %v5509_v49 = vsel %vm1361_vm12, %v5480_v5, %v5482_v22  ;;  %v5484_v0 = vpop.permute.xlu0 %5483  ;;  %8804 = vmatprep.subr.bf16.mxu1 %v8803_v28 }
 0x71c   :  { %5541 = vst [vmem:[#allocation4 + $0x5a0] sm:$0xff] %v5509_v49  ;;  %v5510_v57 = vsel %vm1361_vm12, %v5482_v22, %v5484_v0  ;;  %6765 = vrot.lane.b32.xlu1 %v11940_v26, %s9303_s17  ;;  %8806 = vmatpush1.bf16.msra.mxu1 %v8805_v7 }
 0x71d   :  { %5542 = vst [vmem:[#allocation4 + $0x5a8] sm:$0xff] %v5510_v57  ;;  %6767 = vrot.lane.b32.xlu0 %v11945_v13, %s9303_s17 }
 0x71e   :  { %v5486_v31 = vpop.permute.xlu1 %5485 }
 0x71f   :  { %v5511_v48 = vsel %vm1361_vm12, %v5484_v0, %v5486_v31  ;;  %v5488_v24 = vpop.permute.xlu0 %5487 }
 0x720   :  { %5543 = vst [vmem:[#allocation4 + $0x5b0] sm:$0xff] %v5511_v48  ;;  %v5512_v41 = vsel %vm1361_vm12, %v5486_v31, %v5488_v24  ;;  %6643 = vrot.lane.b32.xlu1 %v11950_v14, %s9302_s16 }
 0x721   :  { %5544 = vst [vmem:[#allocation4 + $0x5b8] sm:$0xff] %v5512_v41  ;;  %6759 = vrot.lane.b32.xlu0 %v11950_v14, %s9303_s17 }
 0x722   :  { %v5490_v12 = vpop.permute.xlu1 %5489 }
 0x723   :  { %v5513_v51 = vsel %vm1361_vm12, %v5488_v24, %v5490_v12  ;;  %v5492_v15 = vpop.permute.xlu0 %5491  ;;  %v12125_v24 = vld [vmem:[#allocation3 + $0x30] sm:$0xff] }
 0x724   :  { %5545 = vst [vmem:[#allocation4 + $0x5c0] sm:$0xff] %v5513_v51  ;;  %v5514_v56 = vsel %vm1361_vm12, %v5490_v12, %v5492_v15  ;;  %6877 = vrot.lane.b32.xlu1 %v11932_v39, %s13049_s5  ;;  %v12130_v12 = vld [vmem:[#allocation3 + $0x38] sm:$0xff] }
 0x725   :  { %5546 = vst [vmem:[#allocation4 + $0x5c8] sm:$0xff] %v5514_v56  ;;  %6879 = vrot.lane.b32.xlu0 %v11961_v45, %s13049_s5 }
 0x726   :  { %v12067_v9 = vpop.permute.xlu1 %5493 }
 0x727   :  { %v5515_v47 = vsel %vm1361_vm12, %v5492_v15, %v12067_v9  ;;  %v5590_v43 = vpop.permute.xlu0 %5589  ;;  %v12134_v15 = vld [vmem:[#allocation3 + $0x40] sm:$0xff] }
 0x728   :  { %5547 = vst [vmem:[#allocation4 + $0x5d0] sm:$0xff] %v5515_v47  ;;  %6881 = vrot.lane.b32.xlu1 %v11940_v26, %s13049_s5 }
 0x729   :  { %6883 = vrot.lane.b32.xlu0 %v11945_v13, %s13049_s5 }
 0x72a   :  { %v5592_v59 = vpop.permute.xlu1 %5591 }
 0x72b   :  { %v5622_v8 = vsel %vm13050_vm0, %v5590_v43, %v5592_v59  ;;  %v5594_v55 = vpop.permute.xlu0 %5593  ;;  %vm13064_vm0 = vcmask 965632  }
 0x72c   :  { %v5623_v4 = vsel %vm13051_vm2, %v5592_v59, %v5594_v55  ;;  %6993 = vrot.lane.b32.xlu1 %v11932_v39, %s13052_s20  ;;  %v8755_v37 = vpack.c.bf16 %v7400_v35, %v5622_v8  ;;  %vm13065_vm2 = vmmov %vm13064_vm0 }
 0x72d   :  { %6995 = vrot.lane.b32.xlu0 %v11961_v45, %s13052_s20  ;;  %v8809_v20 = vpack.c.bf16 %v7401_v17, %v5623_v4  ;;  %v12150_v4 = vld [vmem:[#allocation3 + $0x48] sm:$0xff] }
 0x72e   :  { %v12081_v11 = vpop.permute.xlu1 %5595  ;;  %8756 = vmatprep.subr.bf16.mxu0 %v8755_v37 }
 0x72f   :  { %v5624_v23 = vsel %vm13053_vm3, %v5594_v55, %v12081_v11  ;;  %v5588_v25 = vpop.permute.xlu0 %5587  ;;  %vm13066_vm3 = vmmov %vm13064_vm0 }
 0x730   :  { %v5621_v50 = vsel %vm13054_vm4, %v5588_v25, %v5590_v43  ;;  %6997 = vrot.lane.b32.xlu1 %v11940_v26, %s13052_s20  ;;  %v8807_v60 = vpack.c.bf16 %v7402_v10, %v5624_v23  ;;  %vm13067_vm4 = vcmask 957440  }
 0x731   :  { %6999 = vrot.lane.b32.xlu0 %v11945_v13, %s13052_s20  ;;  %v8757_v36 = vpack.c.bf16 %v7399_v52, %v5621_v50 }
 0x732   :  { %v5736_v16 = vpop.permute.xlu1 %5735  ;;  %8808 = vmatprep.subr.bf16.mxu1 %v8807_v60 }
 0x733   :  { %v5738_v32 = vpop.permute.xlu0 %5737  ;;  %8758 = vmatpush1.bf16.msra.mxu0 %v8757_v36  ;;  %8810 = vmatpush1.bf16.msra.mxu1 %v8809_v20 }
 0x734   :  { %v5766_v27 = vsel %vm13055_vm5, %v5736_v16, %v5738_v32  ;;  %6875 = vrot.lane.b32.xlu1 %v11950_v14, %s13049_s5  ;;  %vm13068_vm5 = vmmov %vm13067_vm4 }
 0x735   :  { %6991 = vrot.lane.b32.xlu0 %v11950_v14, %s13052_s20 }
 0x736   :  { %v5740_v6 = vpop.permute.xlu1 %5739 }
 0x737   :  { %v5767_v62 = vsel %vm13056_vm6, %v5738_v32, %v5740_v6  ;;  %v12102_v38 = vpop.permute.xlu0 %5741  ;;  %vm13069_vm6 = vmmov %vm13067_vm4 }
 0x738   :  { %v5768_v29 = vsel %vm13057_vm7, %v5740_v6, %v12102_v38  ;;  %7109 = vrot.lane.b32.xlu1 %v11932_v39, %s13058_s3  ;;  %vm13070_vm7 = vmmov %vm13064_vm0 }
 0x739   :  { %7111 = vrot.lane.b32.xlu0 %v11961_v45, %s13058_s3 }
 0x73a   :  { %v5847_v5 = vpop.permute.xlu1 %5846 }
 0x73b   :  { %v5849_v2 = vpop.permute.xlu0 %5848 }
 0x73c   :  { %v5877_v28 = vsel %vm13059_vm8, %v5847_v5, %v5849_v2  ;;  %7113 = vrot.lane.b32.xlu1 %v11940_v26, %s13058_s3  ;;  %vm13071_vm8 = vmmov %vm13067_vm4 }
 0x73d   :  { %7115 = vrot.lane.b32.xlu0 %v11945_v13, %s13058_s3  ;;  %v8759_v22 = vpack.c.bf16 %v5877_v28, %v5766_v27 }
 0x73e   :  { %v5851_v7 = vpop.permute.xlu1 %5850 }
 0x73f   :  { %v5878_v49 = vsel %vm13060_vm9, %v5849_v2, %v5851_v7  ;;  %v12116_v0 = vpop.permute.xlu0 %5852  ;;  %8760 = vmatprep.subr.bf16.mxu0 %v8759_v22  ;;  %vm13072_vm9 = vcmask 318464  }
 0x740   :  { %v5879_v39 = vsel %vm13061_vm10, %v5851_v7, %v12116_v0  ;;  %7107 = vrot.lane.b32.xlu1 %v11950_v14, %s13058_s3  ;;  %v8813_v57 = vpack.c.bf16 %v5878_v49, %v5767_v62  ;;  %vm13073_vm10 = vmmov %vm13072_vm9 }
 0x741   :  { %5597 = vrot.lane.b32.xlu0 %v11945_v13, %s9293_s7  ;;  %v8811_v26 = vpack.c.bf16 %v5879_v39, %v5768_v29 }
 0x742   :  { %v5734_v45 = vpop.permute.xlu1 %5733 }
 0x743   :  { %v5765_v31 = vsel %vm13062_vm11, %v5734_v45, %v5736_v16  ;;  %v5845_v48 = vpop.permute.xlu0 %5844  ;;  %8812 = vmatprep.subr.bf16.mxu1 %v8811_v26  ;;  %vm13074_vm11 = vmmov %vm13072_vm9 }
 0x744   :  { %v5876_v41 = vsel %vm13063_vm14, %v5845_v48, %v5847_v5  ;;  %5599 = vrot.lane.b32.xlu1 %v12125_v24, %s9293_s7  ;;  %8814 = vmatpush1.bf16.msra.mxu1 %v8813_v57  ;;  %vm13075_vm14 = vcmask 310272  }
 0x745   :  { %5601 = vrot.lane.b32.xlu0 %v12130_v12, %s9293_s7  ;;  %v8761_v13 = vpack.c.bf16 %v5876_v41, %v5765_v31 }
 0x746   :  { %v5958_v14 = vpop.permute.xlu1 %5957 }
 0x747   :  { %v5960_v51 = vpop.permute.xlu0 %5959  ;;  %8762 = vmatpush1.bf16.msra.mxu0 %v8761_v13 }
 0x748   :  { %v5988_v56 = vsel %vm13064_vm0, %v5958_v14, %v5960_v51  ;;  %5603 = vrot.lane.b32.xlu1 %v12134_v15, %s9293_s7  ;;  %vm13076_vm0 = vmmov %vm13075_vm14 }
 0x749   :  { %5743 = vrot.lane.b32.xlu0 %v12125_v24, %s9294_s8 }
 0x74a   :  { %v5962_v47 = vpop.permute.xlu1 %5961 }
 0x74b   :  { %v5989_v43 = vsel %vm13065_vm2, %v5960_v51, %v5962_v47  ;;  %v12142_v59 = vpop.permute.xlu0 %5963  ;;  %vm13077_vm2 = vmmov %vm13076_vm0 }
 0x74c   :  { %v5990_v8 = vsel %vm13066_vm3, %v5962_v47, %v12142_v59  ;;  %5745 = vrot.lane.b32.xlu1 %v12130_v12, %s9294_s8  ;;  %vm13078_vm3 = vmmov %vm13072_vm9 }
 0x74d   :  { %5747 = vrot.lane.b32.xlu0 %v12134_v15, %s9294_s8 }
 0x74e   :  { %v6069_v55 = vpop.permute.xlu1 %6068 }
 0x74f   :  { %v6071_v35 = vpop.permute.xlu0 %6070 }
 0x750   :  { %v6099_v37 = vsel %vm13067_vm4, %v6069_v55, %v6071_v35  ;;  %5749 = vrot.lane.b32.xlu1 %v12150_v4, %s9294_s8  ;;  %vm13079_vm4 = vmmov %vm13076_vm0 }
 0x751   :  { %5854 = vrot.lane.b32.xlu0 %v12125_v24, %s9295_s9  ;;  %v8763_v23 = vpack.c.bf16 %v6099_v37, %v5988_v56 }
 0x752   :  { %v6073_v25 = vpop.permute.xlu1 %6072 }
 0x753   :  { %v6100_v10 = vsel %vm13068_vm5, %v6071_v35, %v6073_v25  ;;  %v12158_v50 = vpop.permute.xlu0 %6074  ;;  %8764 = vmatprep.subr.bf16.mxu0 %v8763_v23  ;;  %vm13080_vm5 = vcmask 302080  }
 0x754   :  { %v6101_v60 = vsel %vm13069_vm6, %v6073_v25, %v12158_v50  ;;  %5856 = vrot.lane.b32.xlu1 %v12130_v12, %s9295_s9  ;;  %v8817_v36 = vpack.c.bf16 %v6100_v10, %v5989_v43  ;;  %vm13081_vm6 = vmmov %vm13080_vm5 }
 0x755   :  { %5858 = vrot.lane.b32.xlu0 %v12134_v15, %s9295_s9  ;;  %v8815_v52 = vpack.c.bf16 %v6101_v60, %v5990_v8 }
 0x756   :  { %v5956_v17 = vpop.permute.xlu1 %5955 }
 0x757   :  { %v5987_v20 = vsel %vm13070_vm7, %v5956_v17, %v5958_v14  ;;  %v6067_v16 = vpop.permute.xlu0 %6066  ;;  %8816 = vmatprep.subr.bf16.mxu1 %v8815_v52  ;;  %vm13082_vm7 = vmmov %vm13080_vm5 }
 0x758   :  { %v6098_v32 = vsel %vm13071_vm8, %v6067_v16, %v6069_v55  ;;  %5860 = vrot.lane.b32.xlu1 %v12150_v4, %s9295_s9  ;;  %8818 = vmatpush1.bf16.msra.mxu1 %v8817_v36  ;;  %vm13083_vm8 = vcmask 236544  }
 0x759   :  { %5965 = vrot.lane.b32.xlu0 %v12125_v24, %s9296_s10  ;;  %v8765_v27 = vpack.c.bf16 %v6098_v32, %v5987_v20 }
 0x75a   :  { %v6182_v6 = vpop.permute.xlu1 %6181 }
 0x75b   :  { %v6184_v62 = vpop.permute.xlu0 %6183  ;;  %8766 = vmatpush1.bf16.msra.mxu0 %v8765_v27 }
 0x75c   :  { %v6214_v29 = vsel %vm13072_vm9, %v6182_v6, %v6184_v62  ;;  %5967 = vrot.lane.b32.xlu1 %v12130_v12, %s9296_s10  ;;  %vm13084_vm9 = vmmov %vm13083_vm8 }
 0x75d   :  { %5969 = vrot.lane.b32.xlu0 %v12134_v15, %s9296_s10 }
 0x75e   :  { %v6186_v5 = vpop.permute.xlu1 %6185 }
 0x75f   :  { %v6215_v2 = vsel %vm13073_vm10, %v6184_v62, %v6186_v5  ;;  %v12178_v28 = vpop.permute.xlu0 %6187  ;;  %vm13085_vm10 = vmmov %vm13083_vm8 }
 0x760   :  { %v6216_v22 = vsel %vm13074_vm11, %v6186_v5, %v12178_v28  ;;  %5971 = vrot.lane.b32.xlu1 %v12150_v4, %s9296_s10  ;;  %vm13086_vm11 = vmmov %vm13080_vm5 }
 0x761   :  { %6076 = vrot.lane.b32.xlu0 %v12125_v24, %s9297_s11 }
 0x762   :  { %v6298_v7 = vpop.permute.xlu1 %6297 }
 0x763   :  { %v6300_v49 = vpop.permute.xlu0 %6299 }
 0x764   :  { %v6330_v39 = vsel %vm13075_vm14, %v6298_v7, %v6300_v49  ;;  %6078 = vrot.lane.b32.xlu1 %v12130_v12, %s9297_s11  ;;  %vm13087_vm14 = vmmov %vm13083_vm8 }
 0x765   :  { %6080 = vrot.lane.b32.xlu0 %v12134_v15, %s9297_s11  ;;  %v8767_v26 = vpack.c.bf16 %v6330_v39, %v6214_v29 }
 0x766   :  { %v6302_v45 = vpop.permute.xlu1 %6301 }
 0x767   :  { %v6331_v57 = vsel %vm13076_vm0, %v6300_v49, %v6302_v45  ;;  %v12192_v31 = vpop.permute.xlu0 %6303  ;;  %8768 = vmatprep.subr.bf16.mxu0 %v8767_v26  ;;  %vm13088_vm0 = vcmask 228352  }
 0x768   :  { %v6332_v48 = vsel %vm13077_vm2, %v6302_v45, %v12192_v31  ;;  %6082 = vrot.lane.b32.xlu1 %v12150_v4, %s9297_s11  ;;  %v8821_v14 = vpack.c.bf16 %v6331_v57, %v6215_v2  ;;  %vm13089_vm2 = vmmov %vm13088_vm0 }
 0x769   :  { %6189 = vrot.lane.b32.xlu0 %v12125_v24, %s9298_s12  ;;  %v8819_v41 = vpack.c.bf16 %v6332_v48, %v6216_v22 }
 0x76a   :  { %v6180_v13 = vpop.permute.xlu1 %6179 }
 0x76b   :  { %v6213_v51 = vsel %vm13078_vm3, %v6180_v13, %v6182_v6  ;;  %v6296_v56 = vpop.permute.xlu0 %6295  ;;  %8820 = vmatprep.subr.bf16.mxu1 %v8819_v41  ;;  %vm13090_vm3 = vmmov %vm13088_vm0 }
 0x76c   :  { %v6329_v47 = vsel %vm13079_vm4, %v6296_v56, %v6298_v7  ;;  %6191 = vrot.lane.b32.xlu1 %v12130_v12, %s9298_s12  ;;  %8822 = vmatpush1.bf16.msra.mxu1 %v8821_v14  ;;  %vm13091_vm4 = vcmask 220160  }
 0x76d   :  { %6193 = vrot.lane.b32.xlu0 %v12134_v15, %s9298_s12  ;;  %v8769_v43 = vpack.c.bf16 %v6329_v47, %v6213_v51 }
 0x76e   :  { %v6414_v8 = vpop.permute.xlu1 %6413 }
 0x76f   :  { %v6416_v55 = vpop.permute.xlu0 %6415  ;;  %8770 = vmatpush1.bf16.msra.mxu0 %v8769_v43 }
 0x770   :  { %v6446_v35 = vsel %vm13080_vm5, %v6414_v8, %v6416_v55  ;;  %6195 = vrot.lane.b32.xlu1 %v12150_v4, %s9298_s12  ;;  %vm13092_vm5 = vmmov %vm13091_vm4 }
 0x771   :  { %6305 = vrot.lane.b32.xlu0 %v12125_v24, %s9299_s13 }
 0x772   :  { %v6418_v37 = vpop.permute.xlu1 %6417 }
 0x773   :  { %v6447_v23 = vsel %vm13081_vm6, %v6416_v55, %v6418_v37  ;;  %v12212_v25 = vpop.permute.xlu0 %6419  ;;  %vm13093_vm6 = vmmov %vm13091_vm4 }
 0x774   :  { %v6448_v10 = vsel %vm13082_vm7, %v6418_v37, %v12212_v25  ;;  %6307 = vrot.lane.b32.xlu1 %v12130_v12, %s9299_s13  ;;  %vm13094_vm7 = vmmov %vm13088_vm0 }
 0x775   :  { %6309 = vrot.lane.b32.xlu0 %v12134_v15, %s9299_s13 }
 0x776   :  { %v6530_v60 = vpop.permute.xlu1 %6529 }
 0x777   :  { %v6532_v52 = vpop.permute.xlu0 %6531 }
 0x778   :  { %v6562_v17 = vsel %vm13083_vm8, %v6530_v60, %v6532_v52  ;;  %6311 = vrot.lane.b32.xlu1 %v12150_v4, %s9299_s13  ;;  %vm13095_vm8 = vmmov %vm13091_vm4 }
 0x779   :  { %6421 = vrot.lane.b32.xlu0 %v12125_v24, %s9300_s14  ;;  %v8771_v36 = vpack.c.bf16 %v6562_v17, %v6446_v35 }
 0x77a   :  { %v6534_v20 = vpop.permute.xlu1 %6533 }
 0x77b   :  { %v6563_v16 = vsel %vm13084_vm9, %v6532_v52, %v6534_v20  ;;  %v12226_v32 = vpop.permute.xlu0 %6535  ;;  %8772 = vmatprep.subr.bf16.mxu0 %v8771_v36  ;;  %vm13096_vm9 = vcmask 154624  }
 0x77c   :  { %v6564_v27 = vsel %vm13085_vm10, %v6534_v20, %v12226_v32  ;;  %6423 = vrot.lane.b32.xlu1 %v12130_v12, %s9300_s14  ;;  %v8825_v29 = vpack.c.bf16 %v6563_v16, %v6447_v23  ;;  %vm13097_vm10 = vmmov %vm13096_vm9 }
 0x77d   :  { %6425 = vrot.lane.b32.xlu0 %v12134_v15, %s9300_s14  ;;  %v8823_v6 = vpack.c.bf16 %v6564_v27, %v6448_v10 }
 0x77e   :  { %v6412_v62 = vpop.permute.xlu1 %6411 }
 0x77f   :  { %v6445_v5 = vsel %vm13086_vm11, %v6412_v62, %v6414_v8  ;;  %v6528_v2 = vpop.permute.xlu0 %6527  ;;  %8824 = vmatprep.subr.bf16.mxu1 %v8823_v6  ;;  %vm13098_vm11 = vmmov %vm13096_vm9 }
 0x780   :  { %v6561_v22 = vsel %vm13087_vm14, %v6528_v2, %v6530_v60  ;;  %6427 = vrot.lane.b32.xlu1 %v12150_v4, %s9300_s14  ;;  %8826 = vmatpush1.bf16.msra.mxu1 %v8825_v29  ;;  %vm13099_vm14 = vmmov %vm13096_vm9 }
 0x781   :  { %6537 = vrot.lane.b32.xlu0 %v12125_v24, %s9301_s15  ;;  %v8773_v7 = vpack.c.bf16 %v6561_v22, %v6445_v5 }
 0x782   :  { %v6646_v49 = vpop.permute.xlu1 %6645 }
 0x783   :  { %v6648_v39 = vpop.permute.xlu0 %6647  ;;  %8774 = vmatpush1.bf16.msra.mxu0 %v8773_v7 }
 0x784   :  { %v6678_v26 = vsel %vm13088_vm0, %v6646_v49, %v6648_v39  ;;  %6539 = vrot.lane.b32.xlu1 %v12130_v12, %s9301_s15  ;;  %vm13100_vm0 = vcmask 138240  }
 0x785   :  { %6541 = vrot.lane.b32.xlu0 %v12134_v15, %s9301_s15 }
 0x786   :  { %v6650_v45 = vpop.permute.xlu1 %6649 }
 0x787   :  { %v6679_v57 = vsel %vm13089_vm2, %v6648_v39, %v6650_v45  ;;  %v12246_v48 = vpop.permute.xlu0 %6651  ;;  %vm13101_vm2 = vmmov %vm13100_vm0 }
 0x788   :  { %v6680_v41 = vsel %vm13090_vm3, %v6650_v45, %v12246_v48  ;;  %6543 = vrot.lane.b32.xlu1 %v12150_v4, %s9301_s15  ;;  %vm13102_vm3 = vmmov %vm13100_vm0 }
 0x789   :  { %6653 = vrot.lane.b32.xlu0 %v12125_v24, %s9302_s16 }
 0x78a   :  { %v6762_v13 = vpop.permute.xlu1 %6761 }
 0x78b   :  { %v6764_v14 = vpop.permute.xlu0 %6763 }
 0x78c   :  { %v6794_v51 = vsel %vm13091_vm4, %v6762_v13, %v6764_v14  ;;  %6655 = vrot.lane.b32.xlu1 %v12130_v12, %s9302_s16  ;;  %vm13103_vm4 = vmmov %vm13100_vm0 }
 0x78d   :  { %6657 = vrot.lane.b32.xlu0 %v12134_v15, %s9302_s16  ;;  %v8775_v56 = vpack.c.bf16 %v6794_v51, %v6678_v26 }
 0x78e   :  { %v6766_v47 = vpop.permute.xlu1 %6765 }
 0x78f   :  { %v6795_v43 = vsel %vm13092_vm5, %v6764_v14, %v6766_v47  ;;  %v12260_v8 = vpop.permute.xlu0 %6767  ;;  %8776 = vmatprep.subr.bf16.mxu0 %v8775_v56  ;;  %vm13104_vm5 = vcmask 7168  }
 0x790   :  { %v6796_v55 = vsel %vm13093_vm6, %v6766_v47, %v12260_v8  ;;  %6659 = vrot.lane.b32.xlu1 %v12150_v4, %s9302_s16  ;;  %v8829_v23 = vpack.c.bf16 %v6795_v43, %v6679_v57  ;;  %vm13105_vm6 = vmmov %vm13104_vm5 }
 0x791   :  { %6769 = vrot.lane.b32.xlu0 %v12125_v24, %s9303_s17  ;;  %v8827_v35 = vpack.c.bf16 %v6796_v55, %v6680_v41 }
 0x792   :  { %v6644_v37 = vpop.permute.xlu1 %6643 }
 0x793   :  { %v6677_v10 = vsel %vm13094_vm7, %v6644_v37, %v6646_v49  ;;  %v6760_v60 = vpop.permute.xlu0 %6759  ;;  %8828 = vmatprep.subr.bf16.mxu1 %v8827_v35  ;;  %vm13106_vm7 = vmmov %vm13104_vm5 }
 0x794   :  { %v6793_v52 = vsel %vm13095_vm8, %v6760_v60, %v6762_v13  ;;  %6771 = vrot.lane.b32.xlu1 %v12130_v12, %s9303_s17  ;;  %8830 = vmatpush1.bf16.msra.mxu1 %v8829_v23  ;;  %v7214_v23 = vld [vmem:[#allocation4 + $0xb8] sm:$0xff]  ;;  %vm13107_vm8 = vmmov %vm13104_vm5 }
 0x795   :  { %6773 = vrot.lane.b32.xlu0 %v12134_v15, %s9303_s17  ;;  %v8777_v17 = vpack.c.bf16 %v6793_v52, %v6677_v10 }
 0x796   :  { %v6878_v36 = vpop.permute.xlu1 %6877 }
 0x797   :  { %v6880_v20 = vpop.permute.xlu0 %6879  ;;  %8778 = vmatpush1.bf16.msra.mxu0 %v8777_v17  ;;  %v7198_v17 = vld [vmem:[#allocation4 + $0x38] sm:$0xff] }
 0x798   :  { %v6910_v16 = vsel %vm13096_vm9, %v6878_v36, %v6880_v20  ;;  %6775 = vrot.lane.b32.xlu1 %v12150_v4, %s9303_s17  ;;  %vm13108_vm9 = vcmask 1039360  }
 0x799   :  { %6885 = vrot.lane.b32.xlu0 %v12125_v24, %s13049_s5 }
 0x79a   :  { %v6882_v27 = vpop.permute.xlu1 %6881 }
 0x79b   :  { %v6911_v6 = vsel %vm13097_vm10, %v6880_v20, %v6882_v27  ;;  %v12280_v62 = vpop.permute.xlu0 %6883  ;;  %v7212_v20 = vld [vmem:[#allocation4 + $0xa8] sm:$0xff]  ;;  %vm13109_vm10 = vmmov %vm13108_vm9 }
 0x79c   :  { %v6912_v29 = vsel %vm13098_vm11, %v6882_v27, %v12280_v62  ;;  %6887 = vrot.lane.b32.xlu1 %v12130_v12, %s13049_s5  ;;  %vm13110_vm11 = vmmov %vm13108_vm9 }
 0x79d   :  { %6889 = vrot.lane.b32.xlu0 %v12134_v15, %s13049_s5 }
 0x79e   :  { %v6994_v5 = vpop.permute.xlu1 %6993 }
 0x79f   :  { %v6996_v2 = vpop.permute.xlu0 %6995 }
 0x7a0   :  { %v7026_v22 = vsel %vm2894_vm13, %v6994_v5, %v6996_v2  ;;  %6891 = vrot.lane.b32.xlu1 %v12150_v4, %s13049_s5 }
 0x7a1   :  { %7001 = vrot.lane.b32.xlu0 %v12125_v24, %s13052_s20  ;;  %v8779_v7 = vpack.c.bf16 %v7026_v22, %v6910_v16  ;;  %v7246_v16 = vld [vmem:[#allocation4 + $0x1b8] sm:$0xff]  ;;  %v7196_v22 = vld [vmem:[#allocation4 + $0x28] sm:$0xff] }
 0x7a2   :  { %v6998_v49 = vpop.permute.xlu1 %6997 }
 0x7a3   :  { %v7027_v39 = vsel %vm2894_vm13, %v6996_v2, %v6998_v49  ;;  %v12294_v26 = vpop.permute.xlu0 %6999  ;;  %8780 = vmatprep.subr.bf16.mxu0 %v8779_v7  ;;  %v7230_v7 = vld [vmem:[#allocation4 + $0x138] sm:$0xff] }
 0x7a4   :  { %v7028_v45 = vsel %vm2894_vm13, %v6998_v49, %v12294_v26  ;;  %7003 = vrot.lane.b32.xlu1 %v12130_v12, %s13052_s20  ;;  %v8833_v13 = vpack.c.bf16 %v7027_v39, %v6911_v6  ;;  %v7197_v6 = vld [vmem:[#allocation4 + $0x30] sm:$0xff]  ;;  %v7211_v49 = vld [vmem:[#allocation4 + $0xa0] sm:$0xff] }
 0x7a5   :  { %7005 = vrot.lane.b32.xlu0 %v12134_v15, %s13052_s20  ;;  %v8831_v57 = vpack.c.bf16 %v7028_v45, %v6912_v29  ;;  %v12334_v45 = vld [vmem:[#allocation3 + $0x50] sm:$0xff] }
 0x7a6   :  { %v6876_v41 = vpop.permute.xlu1 %6875 }
 0x7a7   :  { %v6909_v14 = vsel %vm13099_vm14, %v6876_v41, %v6878_v36  ;;  %v6992_v51 = vpop.permute.xlu0 %6991  ;;  %8832 = vmatprep.subr.bf16.mxu1 %v8831_v57  ;;  %v7213_v36 = vld [vmem:[#allocation4 + $0xb0] sm:$0xff]  ;;  %v8835_v57 = vpack.c.bf16 %v7212_v20, %v7196_v22  ;;  %v8891_v41 = vpack.c.bf16 %v7246_v16, %v7230_v7  ;;  %v7227_v16 = vld [vmem:[#allocation4 + $0x120] sm:$0xff]  ;;  %vm13111_vm14 = vmmov %vm13108_vm9 }
 0x7a8   :  { %v7025_v56 = vsel %vm2894_vm13, %v6992_v51, %v6994_v5  ;;  %7007 = vrot.lane.b32.xlu1 %v12150_v4, %s13052_s20  ;;  %8834 = vmatpush1.bf16.msra.mxu1 %v8833_v13  ;;  %v8889_v2 = vpack.c.bf16 %v7213_v36, %v7197_v6  ;;  %v7244_v13 = vld [vmem:[#allocation4 + $0x1a8] sm:$0xff]  ;;  %v7245_v51 = vld [vmem:[#allocation4 + $0x1b0] sm:$0xff]  ;;  %v7262_v36 = vld [vmem:[#allocation4 + $0x238] sm:$0xff] }
 0x7a9   :  { %7117 = vrot.lane.b32.xlu0 %v12125_v24, %s13058_s3  ;;  %v8781_v47 = vpack.c.bf16 %v7025_v56, %v6909_v14  ;;  %v12316_v24 = vld [vmem:[#allocation3 + $0x60] sm:$0xff]  ;;  %v7195_v14 = vld [vmem:[#allocation4 + $0x20] sm:$0xff] }
 0x7aa   :  { %v7110_v43 = vpop.permute.xlu1 %7109 }
 0x7ab   :  { %v7112_v55 = vpop.permute.xlu0 %7111  ;;  %8782 = vmatpush1.bf16.msra.mxu0 %v8781_v47  ;;  %v7228_v47 = vld [vmem:[#allocation4 + $0x128] sm:$0xff] }
 0x7ac   :  { %v7142_v35 = vsel %vm13100_vm0, %v7110_v43, %v7112_v55  ;;  %7119 = vrot.lane.b32.xlu1 %v12130_v12, %s13058_s3  ;;  %v12322_v12 = vld [vmem:[#allocation8] sm:$0xff]  ;;  %vm13112_vm0 = vcmask 973824  }
 0x7ad   :  { %7121 = vrot.lane.b32.xlu0 %v12134_v15, %s13058_s3  ;;  %7684 = vmatprep.subr.mxu0 %v7142_v35  ;;  %v8887_v15 = vpack.c.bf16 %v7214_v23, %v7198_v17  ;;  %v12341_v35 = vld [vmem:[#allocation3 + $0x58] sm:$0xff]  ;;  %v7229_v23 = vld [vmem:[#allocation4 + $0x130] sm:$0xff] }
 0x7ae   :  { %v7114_v37 = vpop.permute.xlu1 %7113  ;;  %v8893_v17 = vpack.c.bf16 %v7245_v51, %v7229_v23  ;;  %v7294_v51 = vld [vmem:[#allocation4 + $0x338] sm:$0xff] }
 0x7af   :  { %v7143_v10 = vsel %vm13101_vm2, %v7112_v55, %v7114_v37  ;;  %v12314_v60 = vpop.permute.xlu0 %7115  ;;  %vm13113_vm2 = vmmov %vm13112_vm0 }
 0x7b0   :  { %v7144_v52 = vsel %vm13102_vm3, %v7114_v37, %v12314_v60  ;;  %7123 = vrot.lane.b32.xlu1 %v12150_v4, %s13058_s3  ;;  %v8839_v37 = vpack.c.bf16 %v7244_v13, %v7228_v47  ;;  %v7309_v47 = vld [vmem:[#allocation4 + $0x3b0] sm:$0xff]  ;;  %vm13114_vm3 = vmmov %vm13112_vm0 }
 0x7b1   :  { %5495 = vrot.lane.b32.xlu0 %v12316_v24, %s9292_s30  ;;  %7755 = vmatprep.subr.mxu1 %v7144_v52 }
 0x7b2   :  { %v7108_v27 = vpop.permute.xlu1 %7107  ;;  %7756 = vmatpush1.msra.mxu1 %v7143_v10  ;;  %v7243_v10 = vld [vmem:[#allocation4 + $0x1a0] sm:$0xff] }
 0x7b3   :  { %v7141_v29 = vsel %vm13103_vm4, %v7108_v27, %v7110_v43  ;;  %v5598_v5 = vpop.permute.xlu0 %5597  ;;  %8888 = vmatprep.subr.bf16.mxu1 %v8887_v15  ;;  %7768 = vmatmul.mubr.f32.vlgmr.msra.gmra.mrb[8].mxu1 %v12322_v12  ;;  %v7278_v43 = vld [vmem:[#allocation4 + $0x2b8] sm:$0xff]  ;;  %v7276_v15 = vld [vmem:[#allocation4 + $0x2a8] sm:$0xff]  ;;  %v7277_v27 = vld [vmem:[#allocation4 + $0x2b0] sm:$0xff] }
 0x7b4   :  { %v12330_v39 = vsel %vm13104_vm5, %v12081_v11, %v5598_v5  ;;  %5605 = vrot.lane.b32.xlu1 %v12150_v4, %s9293_s7  ;;  %7685 = vmatpush1.msra.mxu0 %v7141_v29  ;;  %v8837_v11 = vpack.c.bf16 %v7211_v49, %v7195_v14  ;;  %v8895_v20 = vpack.c.bf16 %v7278_v43, %v7262_v36  ;;  %v7293_v36 = vld [vmem:[#allocation4 + $0x330] sm:$0xff]  ;;  %vm13115_vm4 = vmmov %vm13112_vm0  ;;  %vm13116_vm5 = vcmask 965632  }
 0x7b5   :  { %5607 = vrot.lane.b32.xlu0 %v12334_v45, %s9293_s7  ;;  %8890 = vmatpush1.bf16.msra.mxu1 %v8889_v2  ;;  %v8841_v29 = vpack.c.bf16 %v7243_v10, %v7227_v16  ;;  %v7310_v2 = vld [vmem:[#allocation4 + $0x3b8] sm:$0xff] }
 0x7b6   :  { %v5600_v56 = vpop.permute.xlu1 %5599  ;;  %8836 = vmatprep.subr.bf16.mxu0 %v8835_v57  ;;  %8892 = vmatprep.subr.bf16.mxu1 %v8891_v41  ;;  %v7261_v57 = vld [vmem:[#allocation4 + $0x230] sm:$0xff]  ;;  %v7275_v41 = vld [vmem:[#allocation4 + $0x2a0] sm:$0xff]  ;;  %v12377_v16 = vld [vmem:[#allocation3 + $0x68] sm:$0xff] }
 0x7b7   :  { %v12339_v4 = vsel %vm13105_vm6, %v5598_v5, %v5600_v56  ;;  %v5602_v55 = vpop.permute.xlu0 %5601  ;;  %7697 = vmatmul.mubr.f32.vlgmr.msra.gmra.mrb[8].mxu0 %v12322_v12  ;;  %8310 = vmatprep.mubr.msk.f32.mxu1 %vm3500_vm15, %v12090_v33  ;;  %v7260_v5 = vld [vmem:[#allocation4 + $0x228] sm:$0xff]  ;;  %v8897_v14 = vpack.c.bf16 %v7277_v27, %v7261_v57  ;;  %v8901_v27 = vpack.c.bf16 %v7309_v47, %v7293_v36  ;;  %v7325_v47 = vld [vmem:[#allocation4 + $0x430] sm:$0xff]  ;;  %v7323_v36 = vld [vmem:[#allocation4 + $0x420] sm:$0xff] }
 0x7b8   :  { %v12347_v52 = vsel %vm13106_vm7, %v5600_v56, %v5602_v55  ;;  %5609 = vrot.lane.b32.xlu1 %v12341_v35, %s9293_s7  ;;  %8838 = vmatpush1.bf16.msra.mxu0 %v8837_v11  ;;  %v8843_v49 = vpack.c.bf16 %v7276_v15, %v7260_v5  ;;  %v8899_v56 = vpack.c.bf16 %v7310_v2, %v7294_v51  ;;  %v7259_v11 = vld [vmem:[#allocation4 + $0x220] sm:$0xff]  ;;  %v7340_v5 = vld [vmem:[#allocation4 + $0x4a8] sm:$0xff]  ;;  %v7374_v51 = vld [vmem:[#allocation4 + $0x5b8] sm:$0xff] }
 0x7b9   :  { %5611 = vrot.lane.b32.xlu0 %v12316_v24, %s9293_s7  ;;  %8840 = vmatprep.subr.bf16.mxu0 %v8839_v37  ;;  %v7292_v37 = vld [vmem:[#allocation4 + $0x328] sm:$0xff]  ;;  %v7307_v15 = vld [vmem:[#allocation4 + $0x3a0] sm:$0xff]  ;;  %vm13117_vm6 = vmmov %vm13116_vm5 }
 0x7ba   :  { %v12353_v6 = vpop.permute.xlu1 %5603  ;;  %8894 = vmatpush1.bf16.msra.mxu1 %v8893_v17  ;;  %8309 = vmatprep.mubr.msk.f32.mxu0 %vm3500_vm15, %v12090_v33  ;;  %v7308_v33 = vld [vmem:[#allocation4 + $0x3a8] sm:$0xff]  ;;  %vm13118_vm7 = vmmov %vm13116_vm5 }
 0x7bb   :  { %v12359_v22 = vsel %vm13107_vm8, %v5602_v55, %v12353_v6  ;;  %v5744_v7 = vpop.permute.xlu0 %5743  ;;  %8896 = vmatprep.subr.bf16.mxu1 %v8895_v20  ;;  %v8845_v55 = vpack.c.bf16 %v7275_v41, %v7259_v11  ;;  %v8847_v17 = vpack.c.bf16 %v7308_v33, %v7292_v37  ;;  %vm13119_vm8 = vmmov %vm13116_vm5 }
 0x7bc   :  { %v12363_v13 = vsel %vm13108_vm9, %v12102_v38, %v5744_v7  ;;  %5751 = vrot.lane.b32.xlu1 %v12334_v45, %s9294_s8  ;;  %8842 = vmatpush1.bf16.msra.mxu0 %v8841_v29  ;;  %v7342_v38 = vld [vmem:[#allocation4 + $0x4b8] sm:$0xff]  ;;  %vm13120_vm9 = vcmask 957440  }
 0x7bd   :  { %5753 = vrot.lane.b32.xlu0 %v12341_v35, %s9294_s8  ;;  %8844 = vmatprep.subr.bf16.mxu0 %v8843_v49  ;;  %v7326_v29 = vld [vmem:[#allocation4 + $0x438] sm:$0xff]  ;;  %v7341_v49 = vld [vmem:[#allocation4 + $0x4b0] sm:$0xff] }
 0x7be   :  { %v5746_v43 = vpop.permute.xlu1 %5745  ;;  %8898 = vmatpush1.bf16.msra.mxu1 %v8897_v14  ;;  %v8903_v2 = vpack.c.bf16 %v7342_v38, %v7326_v29  ;;  %v7324_v14 = vld [vmem:[#allocation4 + $0x428] sm:$0xff]  ;;  %v8905_v37 = vpack.c.bf16 %v7341_v49, %v7325_v47  ;;  %v7358_v38 = vld [vmem:[#allocation4 + $0x538] sm:$0xff]  ;;  %v7371_v49 = vld [vmem:[#allocation4 + $0x5a0] sm:$0xff] }
 0x7bf   :  { %v12370_v23 = vsel %vm13109_vm10, %v5744_v7, %v5746_v43  ;;  %v5748_v10 = vpop.permute.xlu0 %5747  ;;  %8900 = vmatprep.subr.bf16.mxu1 %v8899_v56  ;;  %v7291_v7 = vld [vmem:[#allocation4 + $0x320] sm:$0xff]  ;;  %v8851_v11 = vpack.c.bf16 %v7340_v5, %v7324_v14  ;;  %v7356_v5 = vld [vmem:[#allocation4 + $0x528] sm:$0xff]  ;;  %vm13121_vm10 = vmmov %vm13120_vm9 }
 0x7c0   :  { %v12373_v20 = vsel %vm13110_vm11, %v5746_v43, %v5748_v10  ;;  %5755 = vrot.lane.b32.xlu1 %v12316_v24, %s9294_s8  ;;  %8846 = vmatpush1.bf16.msra.mxu0 %v8845_v55  ;;  %v8849_v41 = vpack.c.bf16 %v7307_v15, %v7291_v7  ;;  %v7339_v43 = vld [vmem:[#allocation4 + $0x4a0] sm:$0xff]  ;;  %v7373_v15 = vld [vmem:[#allocation4 + $0x5b0] sm:$0xff]  ;;  %vm13122_vm11 = vmmov %vm13120_vm9 }
 0x7c1   :  { %5757 = vrot.lane.b32.xlu0 %v12377_v16, %s9294_s8  ;;  %8848 = vmatprep.subr.bf16.mxu0 %v8847_v17  ;;  %v7372_v17 = vld [vmem:[#allocation4 + $0x5a8] sm:$0xff]  ;;  %v8853_v29 = vpack.c.bf16 %v7339_v43, %v7323_v36 }
 0x7c2   :  { %v12381_v57 = vpop.permute.xlu1 %5749  ;;  %8902 = vmatpush1.bf16.msra.mxu1 %v8901_v27  ;;  %v8855_v7 = vpack.c.bf16 %v7372_v17, %v7356_v5  ;;  %v7403_v5 = vld [vmem:[#allocation4 + $0x6a0] sm:$0xff] }
 0x7c3   :  { %v5772_v33 = vsel %vm13111_vm14, %v5748_v10, %v12381_v57  ;;  %v5855_v56 = vpop.permute.xlu0 %5854  ;;  %8904 = vmatprep.subr.bf16.mxu1 %v8903_v2  ;;  %v8907_v10 = vpack.c.bf16 %v7374_v51, %v7358_v38  ;;  %v7404_v38 = vld [vmem:[#allocation4 + $0x6a8] sm:$0xff]  ;;  %vm13123_vm14 = vmmov %vm13120_vm9 }
 0x7c4   :  { %v12387_v55 = vsel %vm13112_vm0, %v12116_v0, %v5855_v56  ;;  %5862 = vrot.lane.b32.xlu1 %v12334_v45, %s9295_s9  ;;  %8850 = vmatpush1.bf16.msra.mxu0 %v8849_v41  ;;  %v7357_v41 = vld [vmem:[#allocation4 + $0x530] sm:$0xff]  ;;  %v8859_v36 = vpack.c.bf16 %v7404_v38, %v12339_v4  ;;  %v8861_v4 = vpack.c.bf16 %v7403_v5, %v12330_v39  ;;  %vm13124_vm0 = vcmask 318464  }
 0x7c5   :  { %5864 = vrot.lane.b32.xlu0 %v12341_v35, %s9295_s9  ;;  %8852 = vmatprep.subr.bf16.mxu0 %v8851_v11  ;;  %v8909_v51 = vpack.c.bf16 %v7373_v15, %v7357_v41  ;;  %v7406_v11 = vld [vmem:[#allocation4 + $0x6b8] sm:$0xff]  ;;  %v7405_v15 = vld [vmem:[#allocation4 + $0x6b0] sm:$0xff]  ;;  %v8865_v39 = vpack.c.bf16 %v12387_v55, %v12363_v13 }
 0x7c6   :  { %v5857_v27 = vpop.permute.xlu1 %5856  ;;  %8906 = vmatpush1.bf16.msra.mxu1 %v8905_v37  ;;  %v8911_v47 = vpack.c.bf16 %v7406_v11, %v12359_v22  ;;  %v8913_v22 = vpack.c.bf16 %v7405_v15, %v12347_v52 }
 0x7c7   :  { %v5881_v0 = vsel %vm13113_vm2, %v5855_v56, %v5857_v27  ;;  %v5859_v2 = vpop.permute.xlu0 %5858  ;;  %8908 = vmatprep.subr.bf16.mxu1 %v8907_v10  ;;  %v7355_v56 = vld [vmem:[#allocation4 + $0x520] sm:$0xff]  ;;  %vm13125_vm2 = vmmov %vm13124_vm0 }
 0x7c8   :  { %v5882_v14 = vsel %vm13114_vm3, %v5857_v27, %v5859_v2  ;;  %5866 = vrot.lane.b32.xlu1 %v12316_v24, %s9295_s9  ;;  %8854 = vmatpush1.bf16.msra.mxu0 %v8853_v29  ;;  %v8857_v37 = vpack.c.bf16 %v7371_v49, %v7355_v56  ;;  %vm13126_vm3 = vmmov %vm13124_vm0 }
 0x7c9   :  { %5868 = vrot.lane.b32.xlu0 %v12377_v16, %s9295_s9  ;;  %8856 = vmatprep.subr.bf16.mxu0 %v8855_v7  ;;  %v8917_v52 = vpack.c.bf16 %v5882_v14, %v12373_v20 }
 0x7ca   :  { %v12400_v43 = vpop.permute.xlu1 %5860  ;;  %8910 = vmatpush1.bf16.msra.mxu1 %v8909_v51 }
 0x7cb   :  { %v5883_v17 = vsel %vm13115_vm4, %v5859_v2, %v12400_v43  ;;  %v5966_v10 = vpop.permute.xlu0 %5965  ;;  %8912 = vmatprep.subr.bf16.mxu1 %v8911_v47  ;;  %vm13127_vm4 = vmmov %vm13124_vm0 }
 0x7cc   :  { %v5991_v27 = vsel %vm13116_vm5, %v12142_v59, %v5966_v10  ;;  %5973 = vrot.lane.b32.xlu1 %v12334_v45, %s9296_s10  ;;  %8858 = vmatpush1.bf16.msra.mxu0 %v8857_v37  ;;  %v8915_v29 = vpack.c.bf16 %v5883_v17, %v5772_v33  ;;  %v8863_v59 = vpack.c.bf16 %v5881_v0, %v12370_v23  ;;  %vm13128_vm5 = vcmask 310272  }
 0x7cd   :  { %5975 = vrot.lane.b32.xlu0 %v12341_v35, %s9296_s10  ;;  %8860 = vmatprep.subr.bf16.mxu0 %v8859_v36 }
 0x7ce   :  { %v5968_v2 = vpop.permute.xlu1 %5967  ;;  %8914 = vmatpush1.bf16.msra.mxu1 %v8913_v22 }
 0x7cf   :  { %v5992_v7 = vsel %vm13117_vm6, %v5966_v10, %v5968_v2  ;;  %v5970_v41 = vpop.permute.xlu0 %5969  ;;  %8916 = vmatprep.subr.bf16.mxu1 %v8915_v29  ;;  %vm13129_vm6 = vmmov %vm13128_vm5 }
 0x7d0   :  { %v5993_v49 = vsel %vm13118_vm7, %v5968_v2, %v5970_v41  ;;  %5977 = vrot.lane.b32.xlu1 %v12316_v24, %s9296_s10  ;;  %8862 = vmatpush1.bf16.msra.mxu0 %v8861_v4  ;;  %vm13130_vm7 = vmmov %vm13128_vm5 }
 0x7d1   :  { %5979 = vrot.lane.b32.xlu0 %v12377_v16, %s9296_s10  ;;  %8864 = vmatprep.subr.bf16.mxu0 %v8863_v59 }
 0x7d2   :  { %v12421_v33 = vpop.permute.xlu1 %5971  ;;  %8918 = vmatpush1.bf16.msra.mxu1 %v8917_v52 }
 0x7d3   :  { %v5994_v23 = vsel %vm13119_vm8, %v5970_v41, %v12421_v33  ;;  %v6077_v0 = vpop.permute.xlu0 %6076  ;;  %vm13131_vm8 = vmmov %vm13128_vm5 }
 0x7d4   :  { %v6102_v51 = vsel %vm13120_vm9, %v12158_v50, %v6077_v0  ;;  %6084 = vrot.lane.b32.xlu1 %v12334_v45, %s9297_s11  ;;  %8866 = vmatpush1.bf16.msra.mxu0 %v8865_v39  ;;  %vm13132_vm9 = vcmask 302080  }
 0x7d5   :  { %6086 = vrot.lane.b32.xlu0 %v12341_v35, %s9297_s11  ;;  %v8869_v50 = vpack.c.bf16 %v6102_v51, %v5991_v27 }
 0x7d6   :  { %v6079_v20 = vpop.permute.xlu1 %6078 }
 0x7d7   :  { %v6103_v14 = vsel %vm13121_vm10, %v6077_v0, %v6079_v20  ;;  %v6081_v11 = vpop.permute.xlu0 %6080  ;;  %vm13133_vm10 = vmmov %vm13132_vm9 }
 0x7d8   :  { %v6104_v13 = vsel %vm13122_vm11, %v6079_v20, %v6081_v11  ;;  %6088 = vrot.lane.b32.xlu1 %v12316_v24, %s9297_s11  ;;  %v8867_v55 = vpack.c.bf16 %v6103_v14, %v5992_v7  ;;  %vm13134_vm11 = vmmov %vm13132_vm9 }
 0x7d9   :  { %6090 = vrot.lane.b32.xlu0 %v12377_v16, %s9297_s11  ;;  %v8921_v10 = vpack.c.bf16 %v6104_v13, %v5993_v49 }
 0x7da   :  { %v12439_v47 = vpop.permute.xlu1 %6082  ;;  %8868 = vmatprep.subr.bf16.mxu0 %v8867_v55 }
 0x7db   :  { %v6105_v56 = vsel %vm13123_vm14, %v6081_v11, %v12439_v47  ;;  %v6190_v37 = vpop.permute.xlu0 %6189  ;;  %8870 = vmatpush1.bf16.msra.mxu0 %v8869_v50  ;;  %vm13135_vm14 = vmmov %vm13132_vm9 }
 0x7dc   :  { %v6217_v38 = vsel %vm13124_vm0, %v12178_v28, %v6190_v37  ;;  %6197 = vrot.lane.b32.xlu1 %v12334_v45, %s9298_s12  ;;  %v8919_v17 = vpack.c.bf16 %v6105_v56, %v5994_v23  ;;  %vm13136_vm0 = vcmask 236544  }
 0x7dd   :  { %6199 = vrot.lane.b32.xlu0 %v12341_v35, %s9298_s12 }
 0x7de   :  { %v6192_v36 = vpop.permute.xlu1 %6191  ;;  %8920 = vmatprep.subr.bf16.mxu1 %v8919_v17 }
 0x7df   :  { %v6218_v15 = vsel %vm13125_vm2, %v6190_v37, %v6192_v36  ;;  %v6194_v27 = vpop.permute.xlu0 %6193  ;;  %8922 = vmatpush1.bf16.msra.mxu1 %v8921_v10  ;;  %vm13137_vm2 = vmmov %vm13136_vm0 }
 0x7e0   :  { %v6219_v22 = vsel %vm13126_vm3, %v6192_v36, %v6194_v27  ;;  %6201 = vrot.lane.b32.xlu1 %v12316_v24, %s9298_s12  ;;  %vm13138_vm3 = vmmov %vm13136_vm0 }
 0x7e1   :  { %6203 = vrot.lane.b32.xlu0 %v12377_v16, %s9298_s12 }
 0x7e2   :  { %v12455_v28 = vpop.permute.xlu1 %6195 }
 0x7e3   :  { %v6220_v29 = vsel %vm13127_vm4, %v6194_v27, %v12455_v28  ;;  %v6306_v5 = vpop.permute.xlu0 %6305  ;;  %vm13139_vm4 = vmmov %vm13136_vm0 }
 0x7e4   :  { %v6333_v2 = vsel %vm13128_vm5, %v12192_v31, %v6306_v5  ;;  %6313 = vrot.lane.b32.xlu1 %v12334_v45, %s9299_s13  ;;  %vm13140_vm5 = vcmask 228352  }
 0x7e5   :  { %6315 = vrot.lane.b32.xlu0 %v12341_v35, %s9299_s13  ;;  %v8873_v31 = vpack.c.bf16 %v6333_v2, %v6217_v38 }
 0x7e6   :  { %v6308_v4 = vpop.permute.xlu1 %6307 }
 0x7e7   :  { %v6334_v7 = vsel %vm13129_vm6, %v6306_v5, %v6308_v4  ;;  %v6310_v41 = vpop.permute.xlu0 %6309  ;;  %vm13141_vm6 = vmmov %vm13140_vm5 }
 0x7e8   :  { %v6335_v59 = vsel %vm13130_vm7, %v6308_v4, %v6310_v41  ;;  %6317 = vrot.lane.b32.xlu1 %v12316_v24, %s9299_s13  ;;  %v8871_v49 = vpack.c.bf16 %v6334_v7, %v6218_v15  ;;  %vm13142_vm7 = vmmov %vm13140_vm5 }
 0x7e9   :  { %6319 = vrot.lane.b32.xlu0 %v12377_v16, %s9299_s13  ;;  %v8925_v20 = vpack.c.bf16 %v6335_v59, %v6219_v22 }
 0x7ea   :  { %v12471_v52 = vpop.permute.xlu1 %6311  ;;  %8872 = vmatprep.subr.bf16.mxu0 %v8871_v49 }
 0x7eb   :  { %v6336_v39 = vsel %vm13131_vm8, %v6310_v41, %v12471_v52  ;;  %v6422_v23 = vpop.permute.xlu0 %6421  ;;  %8874 = vmatpush1.bf16.msra.mxu0 %v8873_v31  ;;  %vm13143_vm8 = vmmov %vm13140_vm5 }
 0x7ec   :  { %v6449_v0 = vsel %vm13132_vm9, %v12212_v25, %v6422_v23  ;;  %6429 = vrot.lane.b32.xlu1 %v12334_v45, %s9300_s14  ;;  %v8923_v51 = vpack.c.bf16 %v6336_v39, %v6220_v29  ;;  %vm13144_vm9 = vcmask 220160  }
 0x7ed   :  { %6431 = vrot.lane.b32.xlu0 %v12341_v35, %s9300_s14 }
 0x7ee   :  { %v6424_v14 = vpop.permute.xlu1 %6423  ;;  %8924 = vmatprep.subr.bf16.mxu1 %v8923_v51 }
 0x7ef   :  { %v6450_v11 = vsel %vm13133_vm10, %v6422_v23, %v6424_v14  ;;  %v6426_v13 = vpop.permute.xlu0 %6425  ;;  %8926 = vmatpush1.bf16.msra.mxu1 %v8925_v20  ;;  %vm13145_vm10 = vmmov %vm13144_vm9 }
 0x7f0   :  { %v6451_v55 = vsel %vm13134_vm11, %v6424_v14, %v6426_v13  ;;  %6433 = vrot.lane.b32.xlu1 %v12316_v24, %s9300_s14  ;;  %vm13146_vm11 = vmmov %vm13144_vm9 }
 0x7f1   :  { %6435 = vrot.lane.b32.xlu0 %v12377_v16, %s9300_s14 }
 0x7f2   :  { %v12487_v25 = vpop.permute.xlu1 %6427 }
 0x7f3   :  { %v6452_v50 = vsel %vm13135_vm14, %v6426_v13, %v12487_v25  ;;  %v6538_v56 = vpop.permute.xlu0 %6537  ;;  %vm13147_vm14 = vmmov %vm13144_vm9 }
 0x7f4   :  { %v6565_v37 = vsel %vm13136_vm0, %v12226_v32, %v6538_v56  ;;  %6545 = vrot.lane.b32.xlu1 %v12334_v45, %s9301_s15  ;;  %vm13148_vm0 = vcmask 154624  }
 0x7f5   :  { %6547 = vrot.lane.b32.xlu0 %v12341_v35, %s9301_s15  ;;  %v8877_v32 = vpack.c.bf16 %v6565_v37, %v6449_v0 }
 0x7f6   :  { %v6540_v38 = vpop.permute.xlu1 %6539 }
 0x7f7   :  { %v6566_v17 = vsel %vm13137_vm2, %v6538_v56, %v6540_v38  ;;  %v6542_v10 = vpop.permute.xlu0 %6541  ;;  %vm13149_vm2 = vmmov %vm13148_vm0 }
 0x7f8   :  { %v6567_v36 = vsel %vm13138_vm3, %v6540_v38, %v6542_v10  ;;  %6549 = vrot.lane.b32.xlu1 %v12316_v24, %s9301_s15  ;;  %v8875_v15 = vpack.c.bf16 %v6566_v17, %v6450_v11  ;;  %vm13150_vm3 = vmmov %vm13148_vm0 }
 0x7f9   :  { %6551 = vrot.lane.b32.xlu0 %v12377_v16, %s9301_s15  ;;  %v8929_v4 = vpack.c.bf16 %v6567_v36, %v6451_v55 }
 0x7fa   :  { %v12503_v27 = vpop.permute.xlu1 %6543  ;;  %8876 = vmatprep.subr.bf16.mxu0 %v8875_v15 }
 0x7fb   :  { %v6568_v22 = vsel %vm13139_vm4, %v6542_v10, %v12503_v27  ;;  %v6654_v29 = vpop.permute.xlu0 %6653  ;;  %8878 = vmatpush1.bf16.msra.mxu0 %v8877_v32  ;;  %vm13151_vm4 = vmmov %vm13148_vm0 }
 0x7fc   :  { %v6681_v5 = vsel %vm13140_vm5, %v12246_v48, %v6654_v29  ;;  %6661 = vrot.lane.b32.xlu1 %v12334_v45, %s9302_s16  ;;  %v8927_v2 = vpack.c.bf16 %v6568_v22, %v6452_v50  ;;  %vm13152_vm5 = vcmask 138240  }
 0x7fd   :  { %6663 = vrot.lane.b32.xlu0 %v12341_v35, %s9302_s16 }
 0x7fe   :  { %v6656_v7 = vpop.permute.xlu1 %6655  ;;  %8928 = vmatprep.subr.bf16.mxu1 %v8927_v2 }
 0x7ff   :  { %v6682_v41 = vsel %vm13141_vm6, %v6654_v29, %v6656_v7  ;;  %v6658_v59 = vpop.permute.xlu0 %6657  ;;  %8930 = vmatpush1.bf16.msra.mxu1 %v8929_v4  ;;  %vm13153_vm6 = vmmov %vm13152_vm5 }
 0x800   :  { %v6683_v49 = vsel %vm13142_vm7, %v6656_v7, %v6658_v59  ;;  %6665 = vrot.lane.b32.xlu1 %v12316_v24, %s9302_s16  ;;  %vm13154_vm7 = vmmov %vm13152_vm5 }
 0x801   :  { %6667 = vrot.lane.b32.xlu0 %v12377_v16, %s9302_s16 }
 0x802   :  { %v12519_v48 = vpop.permute.xlu1 %6659 }
 0x803   :  { %v6684_v31 = vsel %vm13143_vm8, %v6658_v59, %v12519_v48  ;;  %v6770_v39 = vpop.permute.xlu0 %6769  ;;  %vm13155_vm8 = vmmov %vm13152_vm5 }
 0x804   :  { %v6797_v23 = vsel %vm13144_vm9, %v12260_v8, %v6770_v39  ;;  %6777 = vrot.lane.b32.xlu1 %v12334_v45, %s9303_s17  ;;  %vm13156_vm9 = vcmask 7168  }
 0x805   :  { %6779 = vrot.lane.b32.xlu0 %v12341_v35, %s9303_s17  ;;  %v8881_v8 = vpack.c.bf16 %v6797_v23, %v6681_v5 }
 0x806   :  { %v6772_v0 = vpop.permute.xlu1 %6771 }
 0x807   :  { %v6798_v51 = vsel %vm13145_vm10, %v6770_v39, %v6772_v0  ;;  %v6774_v20 = vpop.permute.xlu0 %6773  ;;  %vm13157_vm10 = vmmov %vm13156_vm9 }
 0x808   :  { %v6799_v14 = vsel %vm13146_vm11, %v6772_v0, %v6774_v20  ;;  %6781 = vrot.lane.b32.xlu1 %v12316_v24, %s9303_s17  ;;  %v8879_v11 = vpack.c.bf16 %v6798_v51, %v6682_v41  ;;  %v7216_v51 = vld [vmem:[#allocation4 + $0xc8] sm:$0xff]  ;;  %vm13158_vm11 = vmmov %vm13156_vm9 }
 0x809   :  { %6783 = vrot.lane.b32.xlu0 %v12377_v16, %s9303_s17  ;;  %v8933_v38 = vpack.c.bf16 %v6799_v14, %v6683_v49  ;;  %v7215_v14 = vld [vmem:[#allocation4 + $0xc0] sm:$0xff] }
 0x80a   :  { %v12535_v13 = vpop.permute.xlu1 %6775  ;;  %8880 = vmatprep.subr.bf16.mxu0 %v8879_v11 }
 0x80b   :  { %v6800_v55 = vsel %vm13147_vm14, %v6774_v20, %v12535_v13  ;;  %v6886_v50 = vpop.permute.xlu0 %6885  ;;  %8882 = vmatpush1.bf16.msra.mxu0 %v8881_v8  ;;  %vm13159_vm14 = vmmov %vm13156_vm9 }
 0x80c   :  { %v6913_v56 = vsel %vm13148_vm0, %v12280_v62, %v6886_v50  ;;  %6893 = vrot.lane.b32.xlu1 %v12334_v45, %s13049_s5  ;;  %v8931_v37 = vpack.c.bf16 %v6800_v55, %v6684_v31  ;;  %v7200_v55 = vld [vmem:[#allocation4 + $0x48] sm:$0xff]  ;;  %vm13160_vm0 = vcmask 1039360  }
 0x80d   :  { %6895 = vrot.lane.b32.xlu0 %v12341_v35, %s13049_s5 }
 0x80e   :  { %v6888_v17 = vpop.permute.xlu1 %6887  ;;  %8932 = vmatprep.subr.bf16.mxu1 %v8931_v37 }
 0x80f   :  { %v6914_v10 = vsel %vm13149_vm2, %v6886_v50, %v6888_v17  ;;  %v6890_v36 = vpop.permute.xlu0 %6889  ;;  %8934 = vmatpush1.bf16.msra.mxu1 %v8933_v38  ;;  %v7232_v38 = vld [vmem:[#allocation4 + $0x148] sm:$0xff]  ;;  %vm13161_vm2 = vmmov %vm13160_vm0 }
 0x810   :  { %v6915_v15 = vsel %vm13150_vm3, %v6888_v17, %v6890_v36  ;;  %6897 = vrot.lane.b32.xlu1 %v12316_v24, %s13049_s5  ;;  %v7218_v17 = vld [vmem:[#allocation4 + $0xd8] sm:$0xff]  ;;  %vm13162_vm3 = vmmov %vm13160_vm0 }
 0x811   :  { %6899 = vrot.lane.b32.xlu0 %v12377_v16, %s13049_s5 }
 0x812   :  { %v12551_v62 = vpop.permute.xlu1 %6891 }
 0x813   :  { %v6916_v32 = vsel %vm13151_vm4, %v6890_v36, %v12551_v62  ;;  %v7002_v22 = vpop.permute.xlu0 %7001  ;;  %vm13163_vm4 = vmmov %vm13160_vm0 }
 0x814   :  { %v7029_v29 = vsel %vm2894_vm13, %v12294_v26, %v7002_v22  ;;  %7009 = vrot.lane.b32.xlu1 %v12334_v45, %s13052_s20 }
 0x815   :  { %7011 = vrot.lane.b32.xlu0 %v12341_v35, %s13052_s20  ;;  %v8885_v26 = vpack.c.bf16 %v7029_v29, %v6913_v56  ;;  %v7248_v56 = vld [vmem:[#allocation4 + $0x1c8] sm:$0xff]  ;;  %v12601_v29 = vld [vmem:[#allocation3 + $0x70] sm:$0xff] }
 0x816   :  { %v7004_v5 = vpop.permute.xlu1 %7003  ;;  %v8943_v36 = vpack.c.bf16 %v7248_v56, %v7232_v38  ;;  %v7282_v56 = vld [vmem:[#allocation4 + $0x2d8] sm:$0xff] }
 0x817   :  { %v7030_v2 = vsel %vm2894_vm13, %v7002_v22, %v7004_v5  ;;  %v7006_v4 = vpop.permute.xlu0 %7005 }
 0x818   :  { %v7031_v7 = vsel %vm2894_vm13, %v7004_v5, %v7006_v4  ;;  %7013 = vrot.lane.b32.xlu1 %v12316_v24, %s13052_s20  ;;  %v8883_v41 = vpack.c.bf16 %v7030_v2, %v6914_v10  ;;  %v7202_v5 = vld [vmem:[#allocation4 + $0x58] sm:$0xff]  ;;  %v7217_v2 = vld [vmem:[#allocation4 + $0xd0] sm:$0xff] }
 0x819   :  { %7015 = vrot.lane.b32.xlu0 %v12377_v16, %s13052_s20  ;;  %v8937_v0 = vpack.c.bf16 %v7031_v7, %v6915_v15  ;;  %v7247_v15 = vld [vmem:[#allocation4 + $0x1c0] sm:$0xff] }
 0x81a   :  { %v12567_v59 = vpop.permute.xlu1 %7007  ;;  %8884 = vmatprep.subr.bf16.mxu0 %v8883_v41  ;;  %v7231_v7 = vld [vmem:[#allocation4 + $0x140] sm:$0xff]  ;;  %v7280_v41 = vld [vmem:[#allocation4 + $0x2c8] sm:$0xff] }
 0x81b   :  { %v7032_v49 = vsel %vm2894_vm13, %v7006_v4, %v12567_v59  ;;  %v7118_v31 = vpop.permute.xlu0 %7117  ;;  %8886 = vmatpush1.bf16.msra.mxu0 %v8885_v26  ;;  %v8991_v4 = vpack.c.bf16 %v7218_v17, %v7202_v5  ;;  %v7250_v26 = vld [vmem:[#allocation4 + $0x1d8] sm:$0xff]  ;;  %v7233_v17 = vld [vmem:[#allocation4 + $0x150] sm:$0xff]  ;;  %v7296_v5 = vld [vmem:[#allocation4 + $0x348] sm:$0xff] }
 0x81c   :  { %v7145_v39 = vsel %vm13152_vm5, %v12314_v60, %v7118_v31  ;;  %7125 = vrot.lane.b32.xlu1 %v12334_v45, %s13058_s3  ;;  %v8935_v23 = vpack.c.bf16 %v7032_v49, %v6916_v32  ;;  %v8939_v60 = vpack.c.bf16 %v7216_v51, %v7200_v55  ;;  %v7199_v45 = vld [vmem:[#allocation4 + $0x40] sm:$0xff]  ;;  %v12590_v32 = vld [vmem:[#allocation8 + $0x8] sm:$0xff]  ;;  %v12617_v55 = vld [vmem:[#allocation3 + $0x80] sm:$0xff]  ;;  %vm13164_vm5 = vcmask 973824  }
 0x81d   :  { %7127 = vrot.lane.b32.xlu0 %v12341_v35, %s13058_s3  ;;  %v8941_v35 = vpack.c.bf16 %v7215_v14, %v7199_v45  ;;  %v7234_v14 = vld [vmem:[#allocation4 + $0x158] sm:$0xff]  ;;  %v7312_v45 = vld [vmem:[#allocation4 + $0x3c8] sm:$0xff] }
 0x81e   :  { %v7120_v20 = vpop.permute.xlu1 %7119  ;;  %8936 = vmatprep.subr.bf16.mxu1 %v8935_v23 }
 0x81f   :  { %v7146_v11 = vsel %vm13153_vm6, %v7118_v31, %v7120_v20  ;;  %v7122_v8 = vpop.permute.xlu0 %7121  ;;  %8938 = vmatpush1.bf16.msra.mxu1 %v8937_v0  ;;  %v12605_v31 = vld [vmem:[#allocation3 + $0x78] sm:$0xff]  ;;  %vm13165_vm6 = vmmov %vm13164_vm5 }
 0x820   :  { %v7147_v50 = vsel %vm13154_vm7, %v7120_v20, %v7122_v8  ;;  %7129 = vrot.lane.b32.xlu1 %v12316_v24, %s13058_s3  ;;  %7826 = vmatprep.subr.mxu0 %v7146_v11  ;;  %v7264_v20 = vld [vmem:[#allocation4 + $0x248] sm:$0xff]  ;;  %v7279_v11 = vld [vmem:[#allocation4 + $0x2c0] sm:$0xff]  ;;  %vm13166_vm7 = vmmov %vm13164_vm5 }
 0x821   :  { %7131 = vrot.lane.b32.xlu0 %v12377_v16, %s13058_s3  ;;  %7827 = vmatpush1.msra.mxu0 %v7145_v39  ;;  %v7201_v39 = vld [vmem:[#allocation4 + $0x50] sm:$0xff] }
 0x822   :  { %v12583_v37 = vpop.permute.xlu1 %7123  ;;  %8940 = vmatprep.subr.bf16.mxu0 %v8939_v60  ;;  %7839 = vmatmul.mubr.f32.vlgmr.msra.gmra.mrb[10].mxu0 %v12322_v12  ;;  %v8993_v51 = vpack.c.bf16 %v7217_v2, %v7201_v39  ;;  %v7249_v60 = vld [vmem:[#allocation4 + $0x1d0] sm:$0xff]  ;;  %v7266_v2 = vld [vmem:[#allocation4 + $0x258] sm:$0xff]  ;;  %v7344_v39 = vld [vmem:[#allocation4 + $0x4c8] sm:$0xff] }
 0x823   :  { %v7148_v10 = vsel %vm13155_vm8, %v7122_v8, %v12583_v37  ;;  %v12588_v24 = vpop.permute.xlu0 %5495  ;;  %8942 = vmatpush1.bf16.msra.mxu0 %v8941_v35  ;;  %8311 = vmatprep.mubr.msk.f32.mxu0 %vm3500_vm15, %v12590_v32  ;;  %vm13167_vm8 = vmmov %vm13164_vm5 }
 0x824   :  { %v12597_v22 = vsel %vm1361_vm12, %v12067_v9, %v12588_v24  ;;  %5497 = vrot.lane.b32.xlu1 %v12377_v16, %s9292_s30  ;;  %7897 = vmatprep.subr.mxu1 %v7148_v10  ;;  %v8945_v9 = vpack.c.bf16 %v7247_v15, %v7231_v7  ;;  %v8997_v15 = vpack.c.bf16 %v7249_v60, %v7233_v17  ;;  %v7298_v60 = vld [vmem:[#allocation4 + $0x358] sm:$0xff]  ;;  %v7376_v17 = vld [vmem:[#allocation4 + $0x5c8] sm:$0xff] }
 0x825   :  { %5499 = vrot.lane.b32.xlu0 %v12601_v29, %s9292_s30  ;;  %8944 = vmatprep.subr.bf16.mxu0 %v8943_v36 }
 0x826   :  { %v5606_v49 = vpop.permute.xlu1 %5605  ;;  %7898 = vmatpush1.msra.mxu1 %v7147_v50  ;;  %v8947_v50 = vpack.c.bf16 %v7280_v41, %v7264_v20  ;;  %v8951_v41 = vpack.c.bf16 %v7312_v45, %v7296_v5 }
 0x827   :  { %v12609_v23 = vsel %vm13156_vm9, %v12353_v6, %v5606_v49  ;;  %v5608_v0 = vpop.permute.xlu0 %5607  ;;  %8992 = vmatprep.subr.bf16.mxu1 %v8991_v4  ;;  %7910 = vmatmul.mubr.f32.vlgmr.msra.gmra.mrb[10].mxu1 %v12322_v12  ;;  %v8995_v6 = vpack.c.bf16 %v7250_v26, %v7234_v14  ;;  %v7263_v12 = vld [vmem:[#allocation4 + $0x240] sm:$0xff]  ;;  %v8999_v26 = vpack.c.bf16 %v7282_v56, %v7266_v2  ;;  %v7265_v14 = vld [vmem:[#allocation4 + $0x250] sm:$0xff]  ;;  %vm13168_vm9 = vcmask 965632  }
 0x828   :  { %v12613_v8 = vsel %vm13157_vm10, %v5606_v49, %v5608_v0  ;;  %5501 = vrot.lane.b32.xlu1 %v12605_v31, %s9292_s30  ;;  %8946 = vmatpush1.bf16.msra.mxu0 %v8945_v9  ;;  %v8949_v38 = vpack.c.bf16 %v7279_v11, %v7263_v12  ;;  %v7311_v4 = vld [vmem:[#allocation4 + $0x3c0] sm:$0xff]  ;;  %v7281_v49 = vld [vmem:[#allocation4 + $0x2d0] sm:$0xff]  ;;  %vm13169_vm10 = vmmov %vm13168_vm9 }
 0x829   :  { %5503 = vrot.lane.b32.xlu0 %v12617_v55, %s9292_s30  ;;  %8994 = vmatpush1.bf16.msra.mxu1 %v8993_v51  ;;  %v7295_v9 = vld [vmem:[#allocation4 + $0x340] sm:$0xff] }
 0x82a   :  { %v5610_v35 = vpop.permute.xlu1 %5609  ;;  %8948 = vmatprep.subr.bf16.mxu0 %v8947_v50  ;;  %8996 = vmatprep.subr.bf16.mxu1 %v8995_v6  ;;  %v8953_v20 = vpack.c.bf16 %v7311_v4, %v7295_v9  ;;  %v9001_v50 = vpack.c.bf16 %v7281_v49, %v7265_v14  ;;  %v7328_v6 = vld [vmem:[#allocation4 + $0x448] sm:$0xff]  ;;  %v7343_v12 = vld [vmem:[#allocation4 + $0x4c0] sm:$0xff]  ;;  %v7297_v4 = vld [vmem:[#allocation4 + $0x350] sm:$0xff] }
 0x82b   :  { %v12622_v10 = vsel %vm13158_vm11, %v5608_v0, %v5610_v35  ;;  %v12624_v36 = vpop.permute.xlu0 %5611  ;;  %8312 = vmatprep.mubr.msk.f32.mxu1 %vm3500_vm15, %v12590_v32  ;;  %v7314_v0 = vld [vmem:[#allocation4 + $0x3d8] sm:$0xff]  ;;  %v8955_v56 = vpack.c.bf16 %v7344_v39, %v7328_v6  ;;  %v7360_v9 = vld [vmem:[#allocation4 + $0x548] sm:$0xff]  ;;  %vm13170_vm11 = vmmov %vm13168_vm9 }
 0x82c   :  { %v12630_v7 = vsel %vm13159_vm14, %v5610_v35, %v12624_v36  ;;  %5613 = vrot.lane.b32.xlu1 %v12377_v16, %s9293_s7  ;;  %8950 = vmatpush1.bf16.msra.mxu0 %v8949_v38  ;;  %v9003_v35 = vpack.c.bf16 %v7314_v0, %v7298_v60  ;;  %v7313_v38 = vld [vmem:[#allocation4 + $0x3d0] sm:$0xff]  ;;  %v7330_v39 = vld [vmem:[#allocation4 + $0x458] sm:$0xff]  ;;  %v7375_v0 = vld [vmem:[#allocation4 + $0x5c0] sm:$0xff] }
 0x82d   :  { %5615 = vrot.lane.b32.xlu0 %v12601_v29, %s9293_s7  ;;  %8998 = vmatpush1.bf16.msra.mxu1 %v8997_v15  ;;  %v7346_v15 = vld [vmem:[#allocation4 + $0x4d8] sm:$0xff]  ;;  %v9005_v49 = vpack.c.bf16 %v7313_v38, %v7297_v4  ;;  %v7377_v4 = vld [vmem:[#allocation4 + $0x5d0] sm:$0xff]  ;;  %vm13171_vm14 = vmmov %vm13168_vm9 }
 0x82e   :  { %v5752_v51 = vpop.permute.xlu1 %5751  ;;  %8952 = vmatprep.subr.bf16.mxu0 %v8951_v41  ;;  %9000 = vmatprep.subr.bf16.mxu1 %v8999_v26  ;;  %v9007_v14 = vpack.c.bf16 %v7346_v15, %v7330_v39  ;;  %v7361_v39 = vld [vmem:[#allocation4 + $0x550] sm:$0xff] }
 0x82f   :  { %v12638_v11 = vsel %vm13160_vm0, %v12381_v57, %v5752_v51  ;;  %v5754_v16 = vpop.permute.xlu0 %5753  ;;  %v7327_v57 = vld [vmem:[#allocation4 + $0x440] sm:$0xff]  ;;  %vm13172_vm0 = vcmask 957440  }
 0x830   :  { %v12641_v45 = vsel %vm13161_vm2, %v5752_v51, %v5754_v16  ;;  %5617 = vrot.lane.b32.xlu1 %v12605_v31, %s9293_s7  ;;  %8954 = vmatpush1.bf16.msra.mxu0 %v8953_v20  ;;  %v8957_v2 = vpack.c.bf16 %v7343_v12, %v7327_v57  ;;  %v8959_v20 = vpack.c.bf16 %v7376_v17, %v7360_v9  ;;  %v7329_v12 = vld [vmem:[#allocation4 + $0x450] sm:$0xff]  ;;  %v7408_v57 = vld [vmem:[#allocation4 + $0x6c8] sm:$0xff]  ;;  %vm13173_vm2 = vmmov %vm13172_vm0 }
 0x831   :  { %5619 = vrot.lane.b32.xlu0 %v12617_v55, %s9293_s7  ;;  %9002 = vmatpush1.bf16.msra.mxu1 %v9001_v50  ;;  %v7345_v50 = vld [vmem:[#allocation4 + $0x4d0] sm:$0xff]  ;;  %v8963_v15 = vpack.c.bf16 %v7408_v57, %v12613_v8  ;;  %v9013_v8 = vpack.c.bf16 %v7377_v4, %v7361_v39 }
 0x832   :  { %v5756_v5 = vpop.permute.xlu1 %5755  ;;  %8956 = vmatprep.subr.bf16.mxu0 %v8955_v56  ;;  %9004 = vmatprep.subr.bf16.mxu1 %v9003_v35  ;;  %v9009_v38 = vpack.c.bf16 %v7345_v50, %v7329_v12 }
 0x833   :  { %v12648_v41 = vsel %vm13162_vm3, %v5754_v16, %v5756_v5  ;;  %v12650_v26 = vpop.permute.xlu0 %5757  ;;  %v7359_v16 = vld [vmem:[#allocation4 + $0x540] sm:$0xff]  ;;  %vm13174_vm3 = vmmov %vm13172_vm0 }
 0x834   :  { %v5776_v51 = vsel %vm13163_vm4, %v5756_v5, %v12650_v26  ;;  %5759 = vrot.lane.b32.xlu1 %v12601_v29, %s9294_s8  ;;  %8958 = vmatpush1.bf16.msra.mxu0 %v8957_v2  ;;  %v8961_v60 = vpack.c.bf16 %v7375_v0, %v7359_v16  ;;  %v7362_v5 = vld [vmem:[#allocation4 + $0x558] sm:$0xff]  ;;  %vm13175_vm4 = vmmov %vm13172_vm0 }
 0x835   :  { %5761 = vrot.lane.b32.xlu0 %v12605_v31, %s9294_s8  ;;  %9006 = vmatpush1.bf16.msra.mxu1 %v9005_v49  ;;  %v9011_v2 = vpack.c.bf16 %v12597_v22, %v7362_v5  ;;  %v7410_v22 = vld [vmem:[#allocation4 + $0x6d8] sm:$0xff] }
 0x836   :  { %v5863_v6 = vpop.permute.xlu1 %5862  ;;  %8960 = vmatprep.subr.bf16.mxu0 %v8959_v20  ;;  %9008 = vmatprep.subr.bf16.mxu1 %v9007_v14  ;;  %v9015_v16 = vpack.c.bf16 %v7410_v22, %v12630_v7 }
 0x837   :  { %v5884_v56 = vsel %vm13164_vm5, %v12400_v43, %v5863_v6  ;;  %v5865_v35 = vpop.permute.xlu0 %5864  ;;  %v7407_v43 = vld [vmem:[#allocation4 + $0x6c0] sm:$0xff]  ;;  %vm13176_vm5 = vcmask 318464  }
 0x838   :  { %v5885_v17 = vsel %vm13165_vm6, %v5863_v6, %v5865_v35  ;;  %5870 = vrot.lane.b32.xlu1 %v12601_v29, %s9295_s9  ;;  %8962 = vmatpush1.bf16.msra.mxu0 %v8961_v60  ;;  %v8965_v9 = vpack.c.bf16 %v7407_v43, %v12609_v23  ;;  %v7409_v6 = vld [vmem:[#allocation4 + $0x6d0] sm:$0xff]  ;;  %vm13177_vm6 = vmmov %vm13176_vm5 }
 0x839   :  { %5872 = vrot.lane.b32.xlu0 %v12605_v31, %s9295_s9  ;;  %9010 = vmatpush1.bf16.msra.mxu1 %v9009_v38  ;;  %v8967_v0 = vpack.c.bf16 %v5885_v17, %v12641_v45  ;;  %v8969_v45 = vpack.c.bf16 %v5884_v56, %v12638_v11  ;;  %v9017_v38 = vpack.c.bf16 %v7409_v6, %v12622_v10 }
 0x83a   :  { %v5867_v49 = vpop.permute.xlu1 %5866  ;;  %8964 = vmatprep.subr.bf16.mxu0 %v8963_v15  ;;  %9012 = vmatprep.subr.bf16.mxu1 %v9011_v2 }
 0x83b   :  { %v5886_v20 = vsel %vm13166_vm7, %v5865_v35, %v5867_v49  ;;  %v12670_v14 = vpop.permute.xlu0 %5868  ;;  %vm13178_vm7 = vmmov %vm13176_vm5 }
 0x83c   :  { %v5887_v50 = vsel %vm13167_vm8, %v5867_v49, %v12670_v14  ;;  %5763 = vrot.lane.b32.xlu1 %v12617_v55, %s9294_s8  ;;  %8966 = vmatpush1.bf16.msra.mxu0 %v8965_v9  ;;  %vm13179_vm8 = vmmov %vm13176_vm5 }
 0x83d   :  { %5874 = vrot.lane.b32.xlu0 %v12617_v55, %s9295_s9  ;;  %9014 = vmatpush1.bf16.msra.mxu1 %v9013_v8  ;;  %v9019_v60 = vpack.c.bf16 %v5887_v50, %v5776_v51 }
 0x83e   :  { %v5974_v23 = vpop.permute.xlu1 %5973  ;;  %8968 = vmatprep.subr.bf16.mxu0 %v8967_v0  ;;  %9016 = vmatprep.subr.bf16.mxu1 %v9015_v16  ;;  %v12714_v0 = vld [vmem:[#allocation3 + $0x88] sm:$0xff] }
 0x83f   :  { %v5995_v12 = vsel %vm13168_vm9, %v12421_v33, %v5974_v23  ;;  %v5976_v35 = vpop.permute.xlu0 %5975  ;;  %v9021_v33 = vpack.c.bf16 %v5886_v20, %v12648_v41  ;;  %vm13180_vm9 = vcmask 310272  }
 0x840   :  { %v5996_v57 = vsel %vm13169_vm10, %v5974_v23, %v5976_v35  ;;  %5981 = vrot.lane.b32.xlu1 %v12601_v29, %s9296_s10  ;;  %8970 = vmatpush1.bf16.msra.mxu0 %v8969_v45  ;;  %vm13181_vm10 = vmmov %vm13180_vm9 }
 0x841   :  { %5983 = vrot.lane.b32.xlu0 %v12605_v31, %s9296_s10  ;;  %9018 = vmatpush1.bf16.msra.mxu1 %v9017_v38 }
 0x842   :  { %v5978_v7 = vpop.permute.xlu1 %5977  ;;  %9020 = vmatprep.subr.bf16.mxu1 %v9019_v60 }
 0x843   :  { %v5997_v11 = vsel %vm13170_vm11, %v5976_v35, %v5978_v7  ;;  %v12689_v51 = vpop.permute.xlu0 %5979  ;;  %vm13182_vm11 = vmmov %vm13180_vm9 }
 0x844   :  { %v5998_v10 = vsel %vm13171_vm14, %v5978_v7, %v12689_v51  ;;  %6092 = vrot.lane.b32.xlu1 %v12601_v29, %s9297_s11  ;;  %vm13183_vm14 = vmmov %vm13180_vm9 }
 0x845   :  { %6094 = vrot.lane.b32.xlu0 %v12605_v31, %s9297_s11  ;;  %9022 = vmatpush1.bf16.msra.mxu1 %v9021_v33 }
 0x846   :  { %v6085_v56 = vpop.permute.xlu1 %6084 }
 0x847   :  { %v6106_v5 = vsel %vm13172_vm0, %v12439_v47, %v6085_v56  ;;  %v6087_v17 = vpop.permute.xlu0 %6086  ;;  %vm13184_vm0 = vcmask 302080  }
 0x848   :  { %v6107_v15 = vsel %vm13173_vm2, %v6085_v56, %v6087_v17  ;;  %5985 = vrot.lane.b32.xlu1 %v12617_v55, %s9296_s10  ;;  %v8973_v4 = vpack.c.bf16 %v6106_v5, %v5995_v12  ;;  %vm13185_vm2 = vmmov %vm13184_vm0 }
 0x849   :  { %6096 = vrot.lane.b32.xlu0 %v12617_v55, %s9297_s11  ;;  %v8971_v41 = vpack.c.bf16 %v6107_v15, %v5996_v57 }
 0x84a   :  { %v6089_v2 = vpop.permute.xlu1 %6088 }
 0x84b   :  { %v6108_v43 = vsel %vm13174_vm3, %v6087_v17, %v6089_v2  ;;  %v12706_v49 = vpop.permute.xlu0 %6090  ;;  %8972 = vmatprep.subr.bf16.mxu0 %v8971_v41  ;;  %vm13186_vm3 = vmmov %vm13184_vm0 }
 0x84c   :  { %v6109_v47 = vsel %vm13175_vm4, %v6089_v2, %v12706_v49  ;;  %6205 = vrot.lane.b32.xlu1 %v12601_v29, %s9298_s12  ;;  %8974 = vmatpush1.bf16.msra.mxu0 %v8973_v4  ;;  %v9025_v20 = vpack.c.bf16 %v6108_v43, %v5997_v11  ;;  %vm13187_vm4 = vmmov %vm13184_vm0 }
 0x84d   :  { %6207 = vrot.lane.b32.xlu0 %v12605_v31, %s9298_s12  ;;  %v9023_v9 = vpack.c.bf16 %v6109_v47, %v5998_v10 }
 0x84e   :  { %v6198_v39 = vpop.permute.xlu1 %6197 }
 0x84f   :  { %v6221_v8 = vsel %vm13176_vm5, %v12455_v28, %v6198_v39  ;;  %v6200_v22 = vpop.permute.xlu0 %6199  ;;  %9024 = vmatprep.subr.bf16.mxu1 %v9023_v9  ;;  %vm13188_vm5 = vcmask 236544  }
 0x850   :  { %v6222_v50 = vsel %vm13177_vm6, %v6198_v39, %v6200_v22  ;;  %6209 = vrot.lane.b32.xlu1 %v12617_v55, %s9298_s12  ;;  %9026 = vmatpush1.bf16.msra.mxu1 %v9025_v20  ;;  %vm13189_vm6 = vmmov %vm13188_vm5 }
 0x851   :  { %6211 = vrot.lane.b32.xlu0 %v12714_v0, %s9298_s12 }
 0x852   :  { %v6202_v16 = vpop.permute.xlu1 %6201 }
 0x853   :  { %v6223_v23 = vsel %vm13178_vm7, %v6200_v22, %v6202_v16  ;;  %v12724_v45 = vpop.permute.xlu0 %6203  ;;  %vm13190_vm7 = vmmov %vm13188_vm5 }
 0x854   :  { %v6224_v6 = vsel %vm13179_vm8, %v6202_v16, %v12724_v45  ;;  %6321 = vrot.lane.b32.xlu1 %v12601_v29, %s9299_s13  ;;  %vm13191_vm8 = vmmov %vm13188_vm5 }
 0x855   :  { %6323 = vrot.lane.b32.xlu0 %v12605_v31, %s9299_s13 }
 0x856   :  { %v6314_v28 = vpop.permute.xlu1 %6313 }
 0x857   :  { %v6337_v60 = vsel %vm13180_vm9, %v12471_v52, %v6314_v28  ;;  %v6316_v12 = vpop.permute.xlu0 %6315  ;;  %vm13192_vm9 = vcmask 228352  }
 0x858   :  { %v6338_v35 = vsel %vm13181_vm10, %v6314_v28, %v6316_v12  ;;  %6325 = vrot.lane.b32.xlu1 %v12617_v55, %s9299_s13  ;;  %v8977_v7 = vpack.c.bf16 %v6337_v60, %v6221_v8  ;;  %vm13193_vm10 = vmmov %vm13192_vm9 }
 0x859   :  { %6327 = vrot.lane.b32.xlu0 %v12714_v0, %s9299_s13  ;;  %v8975_v38 = vpack.c.bf16 %v6338_v35, %v6222_v50 }
 0x85a   :  { %v6318_v57 = vpop.permute.xlu1 %6317 }
 0x85b   :  { %v6339_v11 = vsel %vm13182_vm11, %v6316_v12, %v6318_v57  ;;  %v12740_v33 = vpop.permute.xlu0 %6319  ;;  %8976 = vmatprep.subr.bf16.mxu0 %v8975_v38  ;;  %vm13194_vm11 = vmmov %vm13192_vm9 }
 0x85c   :  { %v6340_v52 = vsel %vm13183_vm14, %v6318_v57, %v12740_v33  ;;  %6437 = vrot.lane.b32.xlu1 %v12601_v29, %s9300_s14  ;;  %8978 = vmatpush1.bf16.msra.mxu0 %v8977_v7  ;;  %v9029_v5 = vpack.c.bf16 %v6339_v11, %v6223_v23  ;;  %vm13195_vm14 = vmmov %vm13192_vm9 }
 0x85d   :  { %6439 = vrot.lane.b32.xlu0 %v12605_v31, %s9300_s14  ;;  %v9027_v10 = vpack.c.bf16 %v6340_v52, %v6224_v6 }
 0x85e   :  { %v6430_v56 = vpop.permute.xlu1 %6429 }
 0x85f   :  { %v6453_v17 = vsel %vm13184_vm0, %v12487_v25, %v6430_v56  ;;  %v6432_v15 = vpop.permute.xlu0 %6431  ;;  %9028 = vmatprep.subr.bf16.mxu1 %v9027_v10  ;;  %vm13196_vm0 = vcmask 220160  }
 0x860   :  { %v6454_v41 = vsel %vm13185_vm2, %v6430_v56, %v6432_v15  ;;  %6441 = vrot.lane.b32.xlu1 %v12617_v55, %s9300_s14  ;;  %9030 = vmatpush1.bf16.msra.mxu1 %v9029_v5  ;;  %vm13197_vm2 = vmmov %vm13196_vm0 }
 0x861   :  { %6443 = vrot.lane.b32.xlu0 %v12714_v0, %s9300_s14 }
 0x862   :  { %v6434_v2 = vpop.permute.xlu1 %6433 }
 0x863   :  { %v6455_v4 = vsel %vm13186_vm3, %v6432_v15, %v6434_v2  ;;  %v12756_v43 = vpop.permute.xlu0 %6435  ;;  %vm13198_vm3 = vmmov %vm13196_vm0 }
 0x864   :  { %v6456_v47 = vsel %vm13187_vm4, %v6434_v2, %v12756_v43  ;;  %6553 = vrot.lane.b32.xlu1 %v12601_v29, %s9301_s15  ;;  %vm13199_vm4 = vmmov %vm13196_vm0 }
 0x865   :  { %6555 = vrot.lane.b32.xlu0 %v12605_v31, %s9301_s15 }
 0x866   :  { %v6546_v25 = vpop.permute.xlu1 %6545 }
 0x867   :  { %v6569_v9 = vsel %vm13188_vm5, %v12503_v27, %v6546_v25  ;;  %v6548_v39 = vpop.permute.xlu0 %6547  ;;  %vm13200_vm5 = vcmask 154624  }
 0x868   :  { %v6570_v20 = vsel %vm13189_vm6, %v6546_v25, %v6548_v39  ;;  %6557 = vrot.lane.b32.xlu1 %v12617_v55, %s9301_s15  ;;  %v8981_v50 = vpack.c.bf16 %v6569_v9, %v6453_v17  ;;  %vm13201_vm6 = vmmov %vm13200_vm5 }
 0x869   :  { %6559 = vrot.lane.b32.xlu0 %v12714_v0, %s9301_s15  ;;  %v8979_v8 = vpack.c.bf16 %v6570_v20, %v6454_v41 }
 0x86a   :  { %v6550_v22 = vpop.permute.xlu1 %6549 }
 0x86b   :  { %v6571_v16 = vsel %vm13190_vm7, %v6548_v39, %v6550_v22  ;;  %v12772_v23 = vpop.permute.xlu0 %6551  ;;  %8980 = vmatprep.subr.bf16.mxu0 %v8979_v8  ;;  %vm13202_vm7 = vmmov %vm13200_vm5 }
 0x86c   :  { %v6572_v27 = vsel %vm13191_vm8, %v6550_v22, %v12772_v23  ;;  %6669 = vrot.lane.b32.xlu1 %v12601_v29, %s9302_s16  ;;  %8982 = vmatpush1.bf16.msra.mxu0 %v8981_v50  ;;  %v9033_v60 = vpack.c.bf16 %v6571_v16, %v6455_v4  ;;  %vm13203_vm8 = vmmov %vm13200_vm5 }
 0x86d   :  { %6671 = vrot.lane.b32.xlu0 %v12605_v31, %s9302_s16  ;;  %v9031_v6 = vpack.c.bf16 %v6572_v27, %v6456_v47 }
 0x86e   :  { %v6662_v28 = vpop.permute.xlu1 %6661 }
 0x86f   :  { %v6685_v12 = vsel %vm13192_vm9, %v12519_v48, %v6662_v28  ;;  %v6664_v35 = vpop.permute.xlu0 %6663  ;;  %9032 = vmatprep.subr.bf16.mxu1 %v9031_v6  ;;  %vm13204_vm9 = vcmask 138240  }
 0x870   :  { %v6686_v38 = vsel %vm13193_vm10, %v6662_v28, %v6664_v35  ;;  %6673 = vrot.lane.b32.xlu1 %v12617_v55, %s9302_s16  ;;  %9034 = vmatpush1.bf16.msra.mxu1 %v9033_v60  ;;  %vm13205_vm10 = vmmov %vm13204_vm9 }
 0x871   :  { %6675 = vrot.lane.b32.xlu0 %v12714_v0, %s9302_s16 }
 0x872   :  { %v6666_v57 = vpop.permute.xlu1 %6665 }
 0x873   :  { %v6687_v7 = vsel %vm13194_vm11, %v6664_v35, %v6666_v57  ;;  %v12788_v11 = vpop.permute.xlu0 %6667  ;;  %vm13206_vm11 = vmmov %vm13204_vm9 }
 0x874   :  { %v6688_v52 = vsel %vm13195_vm14, %v6666_v57, %v12788_v11  ;;  %6785 = vrot.lane.b32.xlu1 %v12601_v29, %s9303_s17  ;;  %vm13207_vm14 = vmmov %vm13204_vm9 }
 0x875   :  { %6787 = vrot.lane.b32.xlu0 %v12605_v31, %s9303_s17 }
 0x876   :  { %v6778_v48 = vpop.permute.xlu1 %6777 }
 0x877   :  { %v6801_v10 = vsel %vm13196_vm0, %v12535_v13, %v6778_v48  ;;  %v6780_v56 = vpop.permute.xlu0 %6779 }
 0x878   :  { %v6802_v5 = vsel %vm13197_vm2, %v6778_v48, %v6780_v56  ;;  %6789 = vrot.lane.b32.xlu1 %v12617_v55, %s9303_s17  ;;  %v8985_v41 = vpack.c.bf16 %v6801_v10, %v6685_v12 }
 0x879   :  { %6791 = vrot.lane.b32.xlu0 %v12714_v0, %s9303_s17  ;;  %v8983_v17 = vpack.c.bf16 %v6802_v5, %v6686_v38 }
 0x87a   :  { %v6782_v15 = vpop.permute.xlu1 %6781 }
 0x87b   :  { %v6803_v2 = vsel %vm13198_vm3, %v6780_v56, %v6782_v15  ;;  %v12804_v4 = vpop.permute.xlu0 %6783  ;;  %8984 = vmatprep.subr.bf16.mxu0 %v8983_v17  ;;  %v7220_v56 = vld [vmem:[#allocation4 + $0xe8] sm:$0xff]  ;;  %vm13212_vm3 = vcmask 1039360  }
 0x87c   :  { %v6804_v13 = vsel %vm13199_vm4, %v6782_v15, %v12804_v4  ;;  %6901 = vrot.lane.b32.xlu1 %v12601_v29, %s13049_s5  ;;  %8986 = vmatpush1.bf16.msra.mxu0 %v8985_v41  ;;  %v9037_v9 = vpack.c.bf16 %v6803_v2, %v6687_v7  ;;  %v7219_v15 = vld [vmem:[#allocation4 + $0xe0] sm:$0xff]  ;;  %vm13213_vm4 = vmmov %vm13212_vm3 }
 0x87d   :  { %6903 = vrot.lane.b32.xlu0 %v12605_v31, %s13049_s5  ;;  %v9035_v47 = vpack.c.bf16 %v6804_v13, %v6688_v52 }
 0x87e   :  { %v6894_v25 = vpop.permute.xlu1 %6893 }
 0x87f   :  { %v6917_v39 = vsel %vm13200_vm5, %v12551_v62, %v6894_v25  ;;  %v6896_v20 = vpop.permute.xlu0 %6895  ;;  %9036 = vmatprep.subr.bf16.mxu1 %v9035_v47  ;;  %vm13214_vm5 = vcmask 973824  }
 0x880   :  { %v6918_v8 = vsel %vm13201_vm6, %v6894_v25, %v6896_v20  ;;  %6905 = vrot.lane.b32.xlu1 %v12617_v55, %s13049_s5  ;;  %9038 = vmatpush1.bf16.msra.mxu1 %v9037_v9  ;;  %v7203_v9 = vld [vmem:[#allocation4 + $0x60] sm:$0xff]  ;;  %vm13215_vm6 = vmmov %vm13214_vm5 }
 0x881   :  { %6907 = vrot.lane.b32.xlu0 %v12714_v0, %s13049_s5 }
 0x882   :  { %v6898_v22 = vpop.permute.xlu1 %6897 }
 0x883   :  { %v6919_v50 = vsel %vm13202_vm7, %v6896_v20, %v6898_v22  ;;  %v12820_v16 = vpop.permute.xlu0 %6899  ;;  %v9045_v20 = vpack.c.bf16 %v7219_v15, %v7203_v9  ;;  %vm13216_vm7 = vmmov %vm13212_vm3 }
 0x884   :  { %v6920_v27 = vsel %vm13203_vm8, %v6898_v22, %v12820_v16  ;;  %7017 = vrot.lane.b32.xlu1 %v12601_v29, %s13052_s20  ;;  %v7222_v22 = vld [vmem:[#allocation4 + $0xf8] sm:$0xff]  ;;  %vm13217_vm8 = vmmov %vm13214_vm5 }
 0x885   :  { %7019 = vrot.lane.b32.xlu0 %v12605_v31, %s13052_s20 }
 0x886   :  { %v7010_v62 = vpop.permute.xlu1 %7009  ;;  %v12851_v13 = vpop.f32.mrb[8].mxu1 }
 0x887   :  { %v7033_v6 = vsel %vm2894_vm13, %v12567_v59, %v7010_v62  ;;  %v7012_v28 = vpop.permute.xlu0 %7011 }
 0x888   :  { %v7034_v60 = vsel %vm2894_vm13, %v7010_v62, %v7012_v28  ;;  %7021 = vrot.lane.b32.xlu1 %v12617_v55, %s13052_s20  ;;  %v8989_v38 = vpack.c.bf16 %v7033_v6, %v6917_v39  ;;  %v12860_v39 = vpop.f32.mrb[9].mxu1  ;;  %v12865_v62 = vld [vmem:[#allocation8] sm:$0xff]  ;;  %v7251_v6 = vld [vmem:[#allocation4 + $0x1e0] sm:$0xff] }
 0x889   :  { %7023 = vrot.lane.b32.xlu0 %v12714_v0, %s13052_s20  ;;  %v8987_v12 = vpack.c.bf16 %v7034_v60, %v6918_v8  ;;  %v7236_v8 = vld [vmem:[#allocation4 + $0x168] sm:$0xff] }
 0x88a   :  { %v7014_v35 = vpop.permute.xlu1 %7013  ;;  %v12846_v41 = vpop.f32.mrb[8].mxu0 }
 0x88b   :  { %v7035_v57 = vsel %vm2894_vm13, %v7012_v28, %v7014_v35  ;;  %v12836_v7 = vpop.permute.xlu0 %7015  ;;  %8988 = vmatprep.subr.bf16.mxu0 %v8987_v12  ;;  %v12853_v47 = vpop.f32.mrb[9].mxu0  ;;  %v7221_v28 = vld [vmem:[#allocation4 + $0xf0] sm:$0xff]  ;;  %v7206_v12 = vld [vmem:[#allocation4 + $0x78] sm:$0xff] }
 0x88c   :  { %v7036_v59 = vsel %vm2894_vm13, %v7014_v35, %v12836_v7  ;;  %7133 = vrot.lane.b32.xlu1 %v12601_v29, %s13058_s3  ;;  %8990 = vmatpush1.bf16.msra.mxu0 %v8989_v38  ;;  %v9041_v10 = vpack.c.bf16 %v7035_v57, %v6919_v50  ;;  %v7204_v29 = vld [vmem:[#allocation4 + $0x68] sm:$0xff]  ;;  %v7254_v38 = vld [vmem:[#allocation4 + $0x1f8] sm:$0xff]  ;;  %v9095_v57 = vpack.c.bf16 %v7222_v22, %v7206_v12 }
 0x88d   :  { %7135 = vrot.lane.b32.xlu0 %v12605_v31, %s13058_s3  ;;  %v9039_v52 = vpack.c.bf16 %v7036_v59, %v6920_v27  ;;  %v7252_v31 = vld [vmem:[#allocation4 + $0x1e8] sm:$0xff]  ;;  %v9043_v25 = vpack.c.bf16 %v7220_v56, %v7204_v29  ;;  %v7235_v59 = vld [vmem:[#allocation4 + $0x160] sm:$0xff] }
 0x88e   :  { %v7126_v48 = vpop.permute.xlu1 %7125  ;;  %v7284_v35 = vld [vmem:[#allocation4 + $0x2e8] sm:$0xff] }
 0x88f   :  { %v7149_v5 = vsel %vm13204_vm9, %v12583_v37, %v7126_v48  ;;  %v7128_v17 = vpop.permute.xlu0 %7127  ;;  %9040 = vmatprep.subr.bf16.mxu1 %v9039_v52  ;;  %v7623_v37 = vld [vmem:[%s13027_s4] sm:$0xff]  ;;  %vm13218_vm9 = vcmask 965632   ;;  %s9309_s4 = smov [#allocation10]  }
 0x890   :  { %v7150_v2 = vsel %vm13205_vm10, %v7126_v48, %v7128_v17  ;;  %7137 = vrot.lane.b32.xlu1 %v12617_v55, %s13058_s3  ;;  %9042 = vmatpush1.bf16.msra.mxu1 %v9041_v10  ;;  %v7205_v52 = vld [vmem:[#allocation4 + $0x70] sm:$0xff]  ;;  %v9049_v10 = vpack.c.bf16 %v7251_v6, %v7235_v59  ;;  %v7300_v6 = vld [vmem:[#allocation4 + $0x368] sm:$0xff]  ;;  %vm13219_vm10 = vmmov %vm13218_vm9  ;;  %s8289_s23 = sshll.u32 %s9309_s4, 4  ;;  %s8290_s23 = int_to_ptr.vmem [resolvable:$true] %s8289_s23 }
 0x891   :  { %7139 = vrot.lane.b32.xlu0 %v12714_v0, %s13058_s3  ;;  %7968 = vmatprep.subr.mxu0 %v7150_v2  ;;  %v9047_v0 = vpack.c.bf16 %v7252_v31, %v7236_v8  ;;  %v9097_v56 = vpack.c.bf16 %v7221_v28, %v7205_v52  ;;  %v7267_v8 = vld [vmem:[#allocation4 + $0x260] sm:$0xff]  ;;  %v7270_v28 = vld [vmem:[#allocation4 + $0x278] sm:$0xff]  ;;  %v7285_v59 = vld [vmem:[#allocation4 + $0x2f0] sm:$0xff]  ;;  %s9251_s24 = scalar_lea.vmem %s8290_s23, 2304  ;;  %p9256_p3 = scmp.lt.s32.totalorder %s8290_s23, %s8290_s23 }
 0x892   :  { %v7130_v55 = vpop.permute.xlu1 %7129  ;;  %7969 = vmatpush1.msra.mxu0 %v7149_v5  ;;  %v7268_v5 = vld [vmem:[#allocation4 + $0x268] sm:$0xff]  ;;  %p9252_p2 = scmp.ne.s32.totalorder %s8290_s23, %s9251_s24  ;;  %p9257_p4 = scmp.lt.s32.totalorder %s9251_s24, %s9251_s24 }
 0x893   :  { %v7151_v50 = vsel %vm13206_vm11, %v7128_v17, %v7130_v55  ;;  %v12863_v27 = vpop.permute.xlu0 %7131  ;;  %7981 = vmatmul.mubr.f32.vlgmr.msra.gmra.mrb[12].mxu0 %v12865_v62  ;;  %9044 = vmatprep.subr.bf16.mxu0 %v9043_v25  ;;  %v7238_v17 = vld [vmem:[#allocation4 + $0x178] sm:$0xff]  ;;  %v9051_v29 = vpack.c.bf16 %v7284_v35, %v7268_v5  ;;  %v7253_v25 = vld [vmem:[#allocation4 + $0x1f0] sm:$0xff]  ;;  %vm13220_vm11 = vcmask 957440  }
 0x894   :  { %v7152_v60 = vsel %vm13207_vm14, %v7130_v55, %v12863_v27  ;;  %7626 = vperm.xlu1 %9178, %v7623_v37   ;;  %9046 = vmatpush1.bf16.msra.mxu0 %v9045_v20  ;;  %v9099_v31 = vpack.c.bf16 %v7254_v38, %v7238_v17  ;;  %v7283_v37 = vld [vmem:[#allocation4 + $0x2e0] sm:$0xff]  ;;  %v7316_v55 = vld [vmem:[#allocation4 + $0x3e8] sm:$0xff]  ;;  %v7286_v20 = vld [vmem:[#allocation4 + $0x2f8] sm:$0xff]  ;;  %p9258_p5 = por %p9257_p4, %p9256_p3 }
 0x895   :  { %8039 = vmatprep.subr.mxu1 %v7152_v60  ;;  %9048 = vmatprep.subr.bf16.mxu0 %v9047_v0  ;;  %v9055_v35 = vpack.c.bf16 %v7316_v55, %v7300_v6  ;;  %v9103_v38 = vpack.c.bf16 %v7286_v20, %v7270_v28  ;;  %v7301_v6 = vld [vmem:[#allocation4 + $0x370] sm:$0xff]  ;;  %vm13221_vm14 = vmmov %vm13220_vm11 }
 0x896   :  { %v5498_v48 = vpop.permute.xlu1 %5497  ;;  %8040 = vmatpush1.msra.mxu1 %v7151_v50  ;;  %8313 = vmatprep.mubr.msk.f32.mxu0 %vm3500_vm15, %v12590_v32  ;;  %v9053_v50 = vpack.c.bf16 %v7283_v37, %v7267_v8  ;;  %v7347_v8 = vld [vmem:[#allocation4 + $0x4e0] sm:$0xff]  ;;  %p9259_p6 = pnand %p9258_p5, %p9252_p2 }
 0x897   :  { %v12874_v15 = vsel %vm1361_vm12, %v12588_v24, %v5498_v48  ;;  %v5500_v2 = vpop.permute.xlu0 %5499  ;;  %8052 = vmatmul.mubr.f32.vlgmr.msra.gmra.mrb[12].mxu1 %v12865_v62  ;;  %9096 = vmatprep.subr.bf16.mxu1 %v9095_v57  ;;  %v7237_v24 = vld [vmem:[#allocation4 + $0x170] sm:$0xff]  ;;  %v7315_v57 = vld [vmem:[#allocation4 + $0x3e0] sm:$0xff] }
 0x898   :  { %v12878_v9 = vsel %vm1361_vm12, %v5498_v48, %v5500_v2  ;;  %9050 = vmatpush1.bf16.msra.mxu0 %v9049_v10  ;;  %9098 = vmatpush1.bf16.msra.mxu1 %v9097_v56  ;;  %v9101_v0 = vpack.c.bf16 %v7253_v25, %v7237_v24  ;;  %v7348_v48 = vld [vmem:[#allocation4 + $0x4e8] sm:$0xff]  ;;  %v7318_v10 = vld [vmem:[#allocation4 + $0x3f8] sm:$0xff]  ;;  %v7299_v56 = vld [vmem:[#allocation4 + $0x360] sm:$0xff] }
 0x899   :  { %9052 = vmatprep.subr.bf16.mxu0 %v9051_v29  ;;  %9100 = vmatprep.subr.bf16.mxu1 %v9099_v31  ;;  %v9057_v17 = vpack.c.bf16 %v7315_v57, %v7299_v56  ;;  %v7332_v29 = vld [vmem:[#allocation4 + $0x468] sm:$0xff]  ;;  %v7302_v31 = vld [vmem:[#allocation4 + $0x378] sm:$0xff]  ;;  %v7317_v24 = vld [vmem:[#allocation4 + $0x3f0] sm:$0xff] }
 0x89a   :  { %v5502_v22 = vpop.permute.xlu1 %5501  ;;  %8314 = vmatprep.mubr.msk.f32.mxu1 %vm3500_vm15, %v12590_v32  ;;  %v7269_v32 = vld [vmem:[#allocation4 + $0x270] sm:$0xff]  ;;  %vm13208_vm15 = vcmask 7168   ;;  %v9059_v55 = vpack.c.bf16 %v7348_v48, %v7332_v29  ;;  %v9107_v20 = vpack.c.bf16 %v7318_v10, %v7302_v31  ;;  %v7334_v57 = vld [vmem:[#allocation4 + $0x478] sm:$0xff] }
 0x89b   :  { %v12883_v60 = vsel %vm1361_vm12, %v5500_v2, %v5502_v22  ;;  %v5504_v12 = vpop.permute.xlu0 %5503  ;;  %v9105_v2 = vpack.c.bf16 %v7285_v59, %v7269_v32  ;;  %v7349_v10 = vld [vmem:[#allocation4 + $0x4f0] sm:$0xff] }
 0x89c   :  { %v5520_v52 = vsel %vm1361_vm12, %v5502_v22, %v5504_v12  ;;  %9054 = vmatpush1.bf16.msra.mxu0 %v9053_v50  ;;  %9102 = vmatpush1.bf16.msra.mxu1 %v9101_v0  ;;  %vm13209_vm12 = vmmov %vm13208_vm15  ;;  %v7350_v50 = vld [vmem:[#allocation4 + $0x4f8] sm:$0xff]  ;;  %v7331_v0 = vld [vmem:[#allocation4 + $0x460] sm:$0xff] }
 0x89d   :  { %5552 = vst.msk [vmem:[#allocation4 + $0x5f8] sm:$0xff] %vm161_vm1, %v5520_v52  ;;  %9056 = vmatprep.subr.bf16.mxu0 %v9055_v35  ;;  %9104 = vmatprep.subr.bf16.mxu1 %v9103_v38  ;;  %v9061_v12 = vpack.c.bf16 %v7347_v8, %v7331_v0  ;;  %v9109_v35 = vpack.c.bf16 %v7317_v24, %v7301_v6  ;;  %v7364_v38 = vld [vmem:[#allocation4 + $0x568] sm:$0xff]  ;;  %vm13210_vm0 = vmmov %vm13209_vm12  ;;  %v7411_v0 = vld [vmem:[#allocation4 + $0x6e0] sm:$0xff] }
 0x89e   :  { %v5614_v5 = vpop.permute.xlu1 %5613  ;;  %v9063_v52 = vpack.c.bf16 %v12878_v9, %v7364_v38  ;;  %v9111_v48 = vpack.c.bf16 %v7350_v50, %v7334_v57  ;;  %vm13211_vm2 = vmmov %vm13210_vm0  ;;  %v7365_v6 = vld [vmem:[#allocation4 + $0x570] sm:$0xff]  ;;  %v7414_v57 = vld [vmem:[#allocation4 + $0x6f8] sm:$0xff] }
 0x89f   :  { %v5633_v37 = vsel %vm13208_vm15, %v12624_v36, %v5614_v5  ;;  %v5616_v25 = vpop.permute.xlu0 %5615  ;;  %vm13222_vm15 = vmmov %vm13218_vm9 }
 0x8a0   :  { %v5634_v22 = vsel %vm13209_vm12, %v5614_v5, %v5616_v25  ;;  %9058 = vmatpush1.bf16.msra.mxu0 %v9057_v17  ;;  %9106 = vmatpush1.bf16.msra.mxu1 %v9105_v2  ;;  %v7363_v5 = vld [vmem:[#allocation4 + $0x560] sm:$0xff]  ;;  %v7333_v17 = vld [vmem:[#allocation4 + $0x470] sm:$0xff]  ;;  %vm13223_vm12 = vmmov %vm13220_vm11 }
 0x8a1   :  { %9060 = vmatprep.subr.bf16.mxu0 %v9059_v55  ;;  %9108 = vmatprep.subr.bf16.mxu1 %v9107_v20  ;;  %v9065_v29 = vpack.c.bf16 %v12874_v15, %v7363_v5  ;;  %v9113_v31 = vpack.c.bf16 %v7349_v10, %v7333_v17  ;;  %v7366_v55 = vld [vmem:[#allocation4 + $0x578] sm:$0xff]  ;;  %v9117_v15 = vpack.c.bf16 %v12883_v60, %v7365_v6 }
 0x8a2   :  { %v5618_v28 = vpop.permute.xlu1 %5617 }
 0x8a3   :  { %v5635_v36 = vsel %vm13210_vm0, %v5616_v25, %v5618_v28  ;;  %v5620_v59 = vpop.permute.xlu0 %5619  ;;  %v7412_v25 = vld [vmem:[#allocation4 + $0x6e8] sm:$0xff]  ;;  %vm13224_vm0 = vcmask 318464  }
 0x8a4   :  { %v5636_v56 = vsel %vm13211_vm2, %v5618_v28, %v5620_v59  ;;  %9062 = vmatpush1.bf16.msra.mxu0 %v9061_v12  ;;  %9110 = vmatpush1.bf16.msra.mxu1 %v9109_v35  ;;  %v7382_v32 = vld [vmem:[#allocation4 + $0x5f8] sm:$0xff]  ;;  %v9067_v8 = vpack.c.bf16 %v7412_v25, %v5634_v22  ;;  %v9069_v12 = vpack.c.bf16 %v7411_v0, %v5633_v37  ;;  %vm13225_vm2 = vmmov %vm13224_vm0 }
 0x8a5   :  { %5668 = vst.msk [vmem:[#allocation4 + $0x678] sm:$0xff] %vm161_vm1, %v5636_v56  ;;  %9064 = vmatprep.subr.bf16.mxu0 %v9063_v52  ;;  %9112 = vmatprep.subr.bf16.mxu1 %v9111_v48  ;;  %v9115_v24 = vpack.c.bf16 %v7382_v32, %v7366_v55  ;;  %v7413_v48 = vld [vmem:[#allocation4 + $0x6f0] sm:$0xff] }
 0x8a6   :  { %v5760_v2 = vpop.permute.xlu1 %5759  ;;  %v9121_v32 = vpack.c.bf16 %v7413_v48, %v5635_v36 }
 0x8a7   :  { %v5777_v9 = vsel %vm13212_vm3, %v12650_v26, %v5760_v2  ;;  %v5762_v20 = vpop.permute.xlu0 %5761  ;;  %vm13226_vm3 = vmmov %vm13224_vm0 }
 0x8a8   :  { %v5778_v50 = vsel %vm13213_vm4, %v5760_v2, %v5762_v20  ;;  %9066 = vmatpush1.bf16.msra.mxu0 %v9065_v29  ;;  %9114 = vmatpush1.bf16.msra.mxu1 %v9113_v31  ;;  %vm13227_vm4 = vmmov %vm13224_vm0 }
 0x8a9   :  { %9068 = vmatprep.subr.bf16.mxu0 %v9067_v8  ;;  %9116 = vmatprep.subr.bf16.mxu1 %v9115_v24 }
 0x8aa   :  { %v5871_v28 = vpop.permute.xlu1 %5870 }
 0x8ab   :  { %v5888_v35 = vsel %vm13214_vm5, %v12670_v14, %v5871_v28  ;;  %v5873_v38 = vpop.permute.xlu0 %5872  ;;  %vm13228_vm5 = vcmask 310272  }
 0x8ac   :  { %v5889_v26 = vsel %vm13215_vm6, %v5871_v28, %v5873_v38  ;;  %9070 = vmatpush1.bf16.msra.mxu0 %v9069_v12  ;;  %9118 = vmatpush1.bf16.msra.mxu1 %v9117_v15  ;;  %v7398_v22 = vld [vmem:[#allocation4 + $0x678] sm:$0xff]  ;;  %v9073_v56 = vpack.c.bf16 %v5888_v35, %v5777_v9  ;;  %vm13229_vm6 = vmmov %vm13228_vm5 }
 0x8ad   :  { %v9119_v59 = vpack.c.bf16 %v7414_v57, %v7398_v22  ;;  %v9071_v52 = vpack.c.bf16 %v5889_v26, %v5778_v50 }
 0x8ae   :  { %v5764_v10 = vpop.permute.xlu1 %5763 }
 0x8af   :  { %v5779_v37 = vsel %vm13216_vm7, %v5762_v20, %v5764_v10  ;;  %5811 = vst.msk [vmem:[#allocation4 + $0x778] sm:$0xff] %vm161_vm1, %v5764_v10  ;;  %v5875_v60 = vpop.permute.xlu0 %5874  ;;  %9120 = vmatprep.subr.bf16.mxu1 %v9119_v59  ;;  %9072 = vmatprep.subr.bf16.mxu0 %v9071_v52  ;;  %vm13230_vm7 = vmmov %vm13228_vm5 }
 0x8b0   :  { %v5890_v14 = vsel %vm13217_vm8, %v5873_v38, %v5875_v60  ;;  %5922 = vst.msk [vmem:[#allocation4 + $0x7f8] sm:$0xff] %vm161_vm1, %v5875_v60  ;;  %9074 = vmatpush1.bf16.msra.mxu0 %v9073_v56  ;;  %9122 = vmatpush1.bf16.msra.mxu1 %v9121_v32  ;;  %vm13231_vm8 = vmmov %vm13228_vm5 }
 0x8b1   :  { %v9125_v24 = vpack.c.bf16 %v5890_v14, %v5779_v37 }
 0x8b2   :  { %v5982_v5 = vpop.permute.xlu1 %5981 }
 0x8b3   :  { %v5999_v17 = vsel %vm13218_vm9, %v12689_v51, %v5982_v5  ;;  %v5984_v2 = vpop.permute.xlu0 %5983  ;;  %vm13232_vm9 = vcmask 302080  }
 0x8b4   :  { %v6000_v36 = vsel %vm13219_vm10, %v5982_v5, %v5984_v2  ;;  %vm13233_vm10 = vmmov %vm13232_vm9 }
 0x8b6   :  { %v6093_v29 = vpop.permute.xlu1 %6092  ;;  %v7430_v31 = vld [vmem:[#allocation4 + $0x778] sm:$0xff] }
 0x8b7   :  { %v6110_v25 = vsel %vm13220_vm11, %v12706_v49, %v6093_v29  ;;  %v6095_v55 = vpop.permute.xlu0 %6094  ;;  %v7446_v9 = vld [vmem:[#allocation4 + $0x7f8] sm:$0xff]  ;;  %vm13234_vm11 = vmmov %vm13232_vm9 }
 0x8b8   :  { %v6111_v20 = vsel %vm13221_vm14, %v6093_v29, %v6095_v55  ;;  %v9123_v8 = vpack.c.bf16 %v7446_v9, %v7430_v31  ;;  %v9077_v6 = vpack.c.bf16 %v6110_v25, %v5999_v17  ;;  %vm13235_vm14 = vmmov %vm13232_vm9 }
 0x8b9   :  { %v9075_v50 = vpack.c.bf16 %v6111_v20, %v6000_v36 }
 0x8ba   :  { %9124 = vmatprep.subr.bf16.mxu1 %v9123_v8  ;;  %v5986_v0 = vpop.permute.xlu1 %5985 }
 0x8bb   :  { %v6001_v51 = vsel %vm13222_vm15, %v5984_v2, %v5986_v0  ;;  %6033 = vst.msk [vmem:[#allocation4 + $0x878] sm:$0xff] %vm161_vm1, %v5986_v0  ;;  %v6097_v28 = vpop.permute.xlu0 %6096  ;;  %9126 = vmatpush1.bf16.msra.mxu1 %v9125_v24  ;;  %9076 = vmatprep.subr.bf16.mxu0 %v9075_v50  ;;  %vm13236_vm15 = vcmask 236544  }
 0x8bc   :  { %v6112_v12 = vsel %vm13223_vm12, %v6095_v55, %v6097_v28  ;;  %6144 = vst.msk [vmem:[#allocation4 + $0x8f8] sm:$0xff] %vm161_vm1, %v6097_v28  ;;  %9078 = vmatpush1.bf16.msra.mxu0 %v9077_v6  ;;  %vm13237_vm12 = vmmov %vm13236_vm15 }
 0x8bd   :  { %v9129_v56 = vpack.c.bf16 %v6112_v12, %v6001_v51 }
 0x8be   :  { %v6206_v49 = vpop.permute.xlu1 %6205 }
 0x8bf   :  { %v6225_v15 = vsel %vm13224_vm0, %v12724_v45, %v6206_v49  ;;  %v6208_v35 = vpop.permute.xlu0 %6207  ;;  %vm13238_vm0 = vmmov %vm13237_vm12 }
 0x8c0   :  { %v6226_v38 = vsel %vm13225_vm2, %v6206_v49, %v6208_v35  ;;  %vm13239_vm2 = vmmov %vm13238_vm0 }
 0x8c2   :  { %v6210_v26 = vpop.permute.xlu1 %6209  ;;  %v7462_v22 = vld [vmem:[#allocation4 + $0x878] sm:$0xff] }
 0x8c3   :  { %v6227_v57 = vsel %vm13226_vm3, %v6208_v35, %v6210_v26  ;;  %v6212_v59 = vpop.permute.xlu0 %6211  ;;  %v7478_v52 = vld [vmem:[#allocation4 + $0x8f8] sm:$0xff]  ;;  %vm13240_vm3 = vcmask 228352  }
 0x8c4   :  { %v6228_v48 = vsel %vm13227_vm4, %v6210_v26, %v6212_v59  ;;  %v9127_v10 = vpack.c.bf16 %v7478_v52, %v7462_v22  ;;  %vm13241_vm4 = vmmov %vm13240_vm3 }
 0x8c5   :  { %6260 = vst.msk [vmem:[#allocation4 + $0x978] sm:$0xff] %vm161_vm1, %v6228_v48 }
 0x8c6   :  { %9128 = vmatprep.subr.bf16.mxu1 %v9127_v10  ;;  %v6322_v32 = vpop.permute.xlu1 %6321 }
 0x8c7   :  { %v6341_v45 = vsel %vm13228_vm5, %v12740_v33, %v6322_v32  ;;  %v6324_v37 = vpop.permute.xlu0 %6323  ;;  %9130 = vmatpush1.bf16.msra.mxu1 %v9129_v56  ;;  %vm13242_vm5 = vmmov %vm13240_vm3 }
 0x8c8   :  { %v6342_v60 = vsel %vm13229_vm6, %v6322_v32, %v6324_v37  ;;  %v9081_v17 = vpack.c.bf16 %v6341_v45, %v6225_v15  ;;  %vm13243_vm6 = vmmov %vm13240_vm3 }
 0x8c9   :  { %v9079_v14 = vpack.c.bf16 %v6342_v60, %v6226_v38 }
 0x8ca   :  { %v6326_v5 = vpop.permute.xlu1 %6325 }
 0x8cb   :  { %v6343_v2 = vsel %vm13230_vm7, %v6324_v37, %v6326_v5  ;;  %v6328_v36 = vpop.permute.xlu0 %6327  ;;  %9080 = vmatprep.subr.bf16.mxu0 %v9079_v14  ;;  %vm13244_vm7 = vcmask 220160  }
 0x8cc   :  { %v6344_v29 = vsel %vm13231_vm8, %v6326_v5, %v6328_v36  ;;  %9082 = vmatpush1.bf16.msra.mxu0 %v9081_v17  ;;  %v7494_v50 = vld [vmem:[#allocation4 + $0x978] sm:$0xff]  ;;  %v9133_v28 = vpack.c.bf16 %v6343_v2, %v6227_v57  ;;  %vm13245_vm8 = vmmov %vm13244_vm7 }
 0x8cd   :  { %6376 = vst.msk [vmem:[#allocation4 + $0x9f8] sm:$0xff] %vm161_vm1, %v6344_v29 }
 0x8ce   :  { %v6438_v31 = vpop.permute.xlu1 %6437 }
 0x8cf   :  { %v6457_v33 = vsel %vm13232_vm9, %v12756_v43, %v6438_v31  ;;  %v6440_v25 = vpop.permute.xlu0 %6439  ;;  %vm13246_vm9 = vmmov %vm13244_vm7 }
 0x8d0   :  { %v6458_v55 = vsel %vm13233_vm10, %v6438_v31, %v6440_v25  ;;  %vm13247_vm10 = vmmov %vm13244_vm7 }
 0x8d2   :  { %v6442_v9 = vpop.permute.xlu1 %6441 }
 0x8d3   :  { %v6459_v20 = vsel %vm13234_vm11, %v6440_v25, %v6442_v9  ;;  %v6444_v8 = vpop.permute.xlu0 %6443  ;;  %vm13248_vm11 = vcmask 154624  }
 0x8d4   :  { %v6460_v24 = vsel %vm13235_vm14, %v6442_v9, %v6444_v8  ;;  %v7510_v0 = vld [vmem:[#allocation4 + $0x9f8] sm:$0xff]  ;;  %vm13249_vm14 = vmmov %vm13248_vm11 }
 0x8d5   :  { %6492 = vst.msk [vmem:[#allocation4 + $0xa78] sm:$0xff] %vm161_vm1, %v6460_v24  ;;  %v9131_v6 = vpack.c.bf16 %v7510_v0, %v7494_v50 }
 0x8d6   :  { %v6554_v51 = vpop.permute.xlu1 %6553 }
 0x8d7   :  { %v6573_v12 = vsel %vm13236_vm15, %v12772_v23, %v6554_v51  ;;  %v6556_v43 = vpop.permute.xlu0 %6555  ;;  %9132 = vmatprep.subr.bf16.mxu1 %v9131_v6  ;;  %vm13250_vm15 = vmmov %vm13248_vm11 }
 0x8d8   :  { %v6574_v49 = vsel %vm13237_vm12, %v6554_v51, %v6556_v43  ;;  %9134 = vmatpush1.bf16.msra.mxu1 %v9133_v28  ;;  %v9085_v38 = vpack.c.bf16 %v6573_v12, %v6457_v33  ;;  %vm13251_vm12 = vmmov %vm13248_vm11 }
 0x8d9   :  { %v9083_v15 = vpack.c.bf16 %v6574_v49, %v6458_v55 }
 0x8da   :  { %v6558_v35 = vpop.permute.xlu1 %6557 }
 0x8db   :  { %v6575_v26 = vsel %vm13238_vm0, %v6556_v43, %v6558_v35  ;;  %v6560_v22 = vpop.permute.xlu0 %6559  ;;  %9084 = vmatprep.subr.bf16.mxu0 %v9083_v15  ;;  %vm13252_vm0 = vcmask 138240  }
 0x8dc   :  { %v6576_v59 = vsel %vm13239_vm2, %v6558_v35, %v6560_v22  ;;  %9086 = vmatpush1.bf16.msra.mxu0 %v9085_v38  ;;  %v7526_v37 = vld [vmem:[#allocation4 + $0xa78] sm:$0xff]  ;;  %v9137_v17 = vpack.c.bf16 %v6575_v26, %v6459_v20  ;;  %vm13253_vm2 = vmmov %vm13252_vm0 }
 0x8dd   :  { %6608 = vst.msk [vmem:[#allocation4 + $0xaf8] sm:$0xff] %vm161_vm1, %v6576_v59 }
 0x8de   :  { %v6670_v57 = vpop.permute.xlu1 %6669 }
 0x8df   :  { %v6689_v23 = vsel %vm13240_vm3, %v12788_v11, %v6670_v57  ;;  %v6672_v52 = vpop.permute.xlu0 %6671  ;;  %vm13254_vm3 = vmmov %vm13252_vm0 }
 0x8e0   :  { %v6690_v48 = vsel %vm13241_vm4, %v6670_v57, %v6672_v52  ;;  %vm13255_vm4 = vmmov %vm13252_vm0 }
 0x8e2   :  { %v6674_v10 = vpop.permute.xlu1 %6673 }
 0x8e3   :  { %v6691_v56 = vsel %vm13242_vm5, %v6672_v52, %v6674_v10  ;;  %v6676_v32 = vpop.permute.xlu0 %6675 }
 0x8e4   :  { %v6692_v45 = vsel %vm13243_vm6, %v6674_v10, %v6676_v32  ;;  %v7542_v60 = vld [vmem:[#allocation4 + $0xaf8] sm:$0xff] }
 0x8e5   :  { %6724 = vst.msk [vmem:[#allocation4 + $0xb78] sm:$0xff] %vm161_vm1, %v6692_v45  ;;  %v9135_v14 = vpack.c.bf16 %v7542_v60, %v7526_v37 }
 0x8e6   :  { %v6786_v5 = vpop.permute.xlu1 %6785 }
 0x8e7   :  { %v6805_v2 = vsel %vm13244_vm7, %v12804_v4, %v6786_v5  ;;  %v6788_v11 = vpop.permute.xlu0 %6787  ;;  %9136 = vmatprep.subr.bf16.mxu1 %v9135_v14 }
 0x8e8   :  { %v6806_v36 = vsel %vm13245_vm8, %v6786_v5, %v6788_v11  ;;  %9138 = vmatpush1.bf16.msra.mxu1 %v9137_v17  ;;  %v9089_v33 = vpack.c.bf16 %v6805_v2, %v6689_v23 }
 0x8e9   :  { %v9087_v29 = vpack.c.bf16 %v6806_v36, %v6690_v48 }
 0x8ea   :  { %v6790_v31 = vpop.permute.xlu1 %6789 }
 0x8eb   :  { %v6807_v25 = vsel %vm13246_vm9, %v6788_v11, %v6790_v31  ;;  %v6792_v55 = vpop.permute.xlu0 %6791  ;;  %9088 = vmatprep.subr.bf16.mxu0 %v9087_v29 }
 0x8ec   :  { %v6808_v9 = vsel %vm13247_vm10, %v6790_v31, %v6792_v55  ;;  %9090 = vmatpush1.bf16.msra.mxu0 %v9089_v33  ;;  %v7558_v28 = vld [vmem:[#allocation4 + $0xb78] sm:$0xff]  ;;  %v9141_v35 = vpack.c.bf16 %v6807_v25, %v6691_v56  ;;  %v8200_v33 = vld [vmem:[#allocation5 + $0x8] sm:$0xff]  ;;  %v8201_v25 = vld [vmem:[#allocation5 + $0x10] sm:$0xff] }
 0x8ed   :  { %6840 = vst.msk [vmem:[#allocation4 + $0xbf8] sm:$0xff] %vm161_vm1, %v6808_v9  ;;  %v8202_v55 = vld [vmem:[#allocation5 + $0x18] sm:$0xff]  ;;  %v8203_v9 = vld [vmem:[#allocation5 + $0x20] sm:$0xff] }
 0x8ee   :  { %v6902_v20 = vpop.permute.xlu1 %6901 }
 0x8ef   :  { %v6921_v4 = vsel %vm13248_vm11, %v12820_v16, %v6902_v20  ;;  %v6904_v8 = vpop.permute.xlu0 %6903 }
 0x8f0   :  { %v6922_v24 = vsel %vm13249_vm14, %v6902_v20, %v6904_v8  ;;  %v8204_v20 = vld [vmem:[#allocation5 + $0x28] sm:$0xff] }
 0x8f2   :  { %v6906_v50 = vpop.permute.xlu1 %6905 }
 0x8f3   :  { %v6923_v0 = vsel %vm13250_vm15, %v6904_v8, %v6906_v50  ;;  %v6908_v6 = vpop.permute.xlu0 %6907  ;;  %v8205_v8 = vld [vmem:[#allocation5 + $0x30] sm:$0xff] }
 0x8f4   :  { %v6924_v51 = vsel %vm13251_vm12, %v6906_v50, %v6908_v6  ;;  %v7574_v12 = vld [vmem:[#allocation4 + $0xbf8] sm:$0xff]  ;;  %v8207_v50 = vld [vmem:[#allocation5 + $0x40] sm:$0xff] }
 0x8f5   :  { %6956 = vst.msk [vmem:[#allocation4 + $0xc78] sm:$0xff] %vm161_vm1, %v6924_v51  ;;  %v9139_v43 = vpack.c.bf16 %v7574_v12, %v7558_v28  ;;  %v7840_v49 = vpop.f32.mrb[10].mxu0 }
 0x8f6   :  { %v7018_v15 = vpop.permute.xlu1 %7017  ;;  %v7842_v38 = vpop.f32.mrb[11].mxu0 }
 0x8f7   :  { %v7037_v16 = vsel %vm2894_vm13, %v12836_v7, %v7018_v15  ;;  %v7020_v26 = vpop.permute.xlu0 %7019  ;;  %9140 = vmatprep.subr.bf16.mxu1 %v9139_v43 }
 0x8f8   :  { %v7038_v22 = vsel %vm2894_vm13, %v7018_v15, %v7020_v26  ;;  %9142 = vmatpush1.bf16.msra.mxu1 %v9141_v35  ;;  %v9093_v23 = vpack.c.bf16 %v7037_v16, %v6921_v4 }
 0x8f9   :  { %v9091_v59 = vpack.c.bf16 %v7038_v22, %v6922_v24  ;;  %v8206_v24 = vld [vmem:[#allocation5 + $0x38] sm:$0xff] }
 0x8fa   :  { %v7022_v57 = vpop.permute.xlu1 %7021  ;;  %v7911_v52 = vpop.f32.mrb[10].mxu1 }
 0x8fb   :  { %v7039_v48 = vsel %vm2894_vm13, %v7020_v26, %v7022_v57  ;;  %v7024_v10 = vpop.permute.xlu0 %7023  ;;  %9092 = vmatprep.subr.bf16.mxu0 %v9091_v59  ;;  %v7913_v32 = vpop.f32.mrb[11].mxu1 }
 0x8fc   :  { %v7040_v56 = vsel %vm2894_vm13, %v7022_v57, %v7024_v10  ;;  %9094 = vmatpush1.bf16.msra.mxu0 %v9093_v23  ;;  %v7590_v11 = vld [vmem:[#allocation4 + $0xc78] sm:$0xff]  ;;  %v9145_v31 = vpack.c.bf16 %v7039_v48, %v6923_v0 }
 0x8fd   :  { %7072 = vst.msk [vmem:[#allocation4 + $0xcf8] sm:$0xff] %vm161_vm1, %v7040_v56 }
 0x8fe   :  { %v7134_v7 = vpop.permute.xlu1 %7133 }
 0x8ff   :  { %v7153_v45 = vsel %vm13252_vm0, %v12863_v27, %v7134_v7  ;;  %v7136_v37 = vpop.permute.xlu0 %7135 }
 0x900   :  { %v7154_v60 = vsel %vm13253_vm2, %v7134_v7, %v7136_v37 }
 0x901   :  { %8110 = vmatprep.subr.mxu0 %v7154_v60 }
 0x902   :  { %v7138_v14 = vpop.permute.xlu1 %7137  ;;  %8111 = vmatpush1.msra.mxu0 %v7153_v45 }
 0x903   :  { %v7155_v5 = vsel %vm13254_vm3, %v7136_v37, %v7138_v14  ;;  %v7140_v17 = vpop.permute.xlu0 %7139  ;;  %8123 = vmatmul.mubr.f32.vlgmr.msra.gmra.mrb[14].mxu0 %v12865_v62 }
 0x904   :  { %v7156_v2 = vsel %vm13255_vm4, %v7138_v14, %v7140_v17  ;;  %v7606_v36 = vld [vmem:[#allocation4 + $0xcf8] sm:$0xff] }
 0x905   :  { %7188 = vst.msk [vmem:[#allocation4 + $0xd78] sm:$0xff] %vm161_vm1, %v7156_v2  ;;  %v9143_v29 = vpack.c.bf16 %v7606_v36, %v7590_v11 }
 0x907   :  { %9144 = vmatprep.subr.bf16.mxu1 %v9143_v29 }
 0x908   :  { %9146 = vmatpush1.bf16.msra.mxu1 %v9145_v31  ;;  %v8211_v31 = vld [vmem:[#allocation5 + $0x60] sm:$0xff] }
 0x90c   :  { %v7622_v27 = vld [vmem:[#allocation4 + $0xd78] sm:$0xff] }
 0x90d   :  { %8181 = vmatprep.subr.mxu1 %v7622_v27 }
 0x90e   :  { %8182 = vmatpush1.msra.mxu1 %v7155_v5 }
 0x90f   :  { %8194 = vmatmul.mubr.f32.vlgmr.msra.gmra.mrb[14].mxu1 %v12865_v62 }
 0x913   :  { %v12972_v4 = vpop.permute.xlu1 %7626 }
 0x914   :  { %v7699_v0 = vadd.f32 %v12846_v41, %v12972_v4  ;;  %v7701_v6 = vadd.f32 %v12853_v47, %v12972_v4  ;;  %v7770_v51 = vadd.f32 %v12851_v13, %v12972_v4  ;;  %v7772_v62 = vadd.f32 %v12860_v39, %v12972_v4 }
 0x915   :  { %v7841_v28 = vadd.f32 %v7840_v49, %v12972_v4  ;;  %v7843_v12 = vadd.f32 %v7842_v38, %v12972_v4  ;;  %v7912_v43 = vadd.f32 %v7911_v52, %v12972_v4  ;;  %v7914_v15 = vadd.f32 %v7913_v32, %v12972_v4 }
 0x916   :  { %v8216_v35 = vadd.f32 %v8200_v33, %v7699_v0  ;;  %v8217_v16 = vadd.f32 %v8201_v25, %v7701_v6  ;;  %v8218_v41 = vadd.f32 %v8202_v55, %v7770_v51  ;;  %v8219_v26 = vadd.f32 %v8203_v9, %v7772_v62  ;;  %v8212_v51 = vld [vmem:[#allocation5 + $0x68] sm:$0xff] }
 0x917   :  { %v8220_v22 = vadd.f32 %v8204_v20, %v7841_v28  ;;  %v8221_v47 = vadd.f32 %v8205_v8, %v7843_v12  ;;  %v8222_v59 = vadd.f32 %v8206_v24, %v7912_v43  ;;  %v8223_v57 = vadd.f32 %v8207_v50, %v7914_v15 }
 0x918   :  { %v8232_v13 = vmax.f32 %v8216_v35, 0.0  ;;  %v8233_v23 = vmax.f32 %v8217_v16, 0.0  ;;  %v8234_v48 = vmax.f32 %v8218_v41, 0.0  ;;  %v8235_v39 = vmax.f32 %v8219_v26, 0.0  ;;  %v8214_v41 = vld [vmem:[#allocation5 + $0x78] sm:$0xff] }
 0x919   :  { %v8236_v10 = vmax.f32 %v8220_v22, 0.0  ;;  %v8237_v49 = vmax.f32 %v8221_v47, 0.0  ;;  %v8238_v56 = vmax.f32 %v8222_v59, 0.0  ;;  %v8239_v38 = vmax.f32 %v8223_v57, 0.0  ;;  %v8215_v47 = vld [vmem:[#allocation5 + $0x80] sm:$0xff] }
 0x91a   :  { %v8248_v52 = vmul.f32 %v8232_v13, %v11105_v19  ;;  %v8249_v32 = vmul.f32 %v8233_v23, %v11111_v63  ;;  %v8250_v7 = vmul.f32 %v8234_v48, %v11120_v40  ;;  %v8251_v45 = vmul.f32 %v8235_v39, %v11128_v54  ;;  %v8208_v63 = vld [vmem:[#allocation5 + $0x48] sm:$0xff] }
 0x91b   :  { %v8252_v37 = vmul.f32 %v8236_v10, %v11159_v34  ;;  %v8253_v60 = vmul.f32 %v8237_v49, %v11165_v53  ;;  %v8254_v14 = vmul.f32 %v8238_v56, %v11174_v46  ;;  %v8255_v5 = vmul.f32 %v8239_v38, %v11182_v30  ;;  %v8209_v34 = vld [vmem:[#allocation5 + $0x50] sm:$0xff]  ;;  %v8210_v30 = vld [vmem:[#allocation5 + $0x58] sm:$0xff] }
 0x91c   :  { %8267 = vst [vmem:[#allocation10 + $0x8] sm:$0xff] %v8248_v52  ;;  %8268 = vst [vmem:[#allocation10 + $0x10] sm:$0xff] %v8249_v32 }
 0x91d   :  { %8269 = vst [vmem:[#allocation10 + $0x18] sm:$0xff] %v8250_v7  ;;  %8270 = vst [vmem:[#allocation10 + $0x20] sm:$0xff] %v8251_v45 }
 0x91e   :  { %8271 = vst [vmem:[#allocation10 + $0x28] sm:$0xff] %v8252_v37  ;;  %8272 = vst [vmem:[#allocation10 + $0x30] sm:$0xff] %v8253_v60 }
 0x91f   :  { %8273 = vst [vmem:[#allocation10 + $0x38] sm:$0xff] %v8254_v14  ;;  %8274 = vst [vmem:[#allocation10 + $0x40] sm:$0xff] %v8255_v5 }
 0x966   :  { %v7982_v19 = vpop.f32.mrb[12].mxu0 }
 0x967   :  { %v7983_v40 = vadd.f32 %v7982_v19, %v12972_v4  ;;  %v7984_v54 = vpop.f32.mrb[13].mxu0 }
 0x968   :  { %v7985_v53 = vadd.f32 %v7984_v54, %v12972_v4 }
 0x969   :  { %v8224_v17 = vadd.f32 %v8208_v63, %v7983_v40 }
 0x96a   :  { %v8225_v46 = vadd.f32 %v8209_v34, %v7985_v53  ;;  %v8053_v2 = vpop.f32.mrb[12].mxu1 }
 0x96b   :  { %v8240_v11 = vmax.f32 %v8224_v17, 0.0  ;;  %v8054_v36 = vadd.f32 %v8053_v2, %v12972_v4  ;;  %v8055_v29 = vpop.f32.mrb[13].mxu1 }
 0x96c   :  { %v8241_v27 = vmax.f32 %v8225_v46, 0.0  ;;  %v8056_v33 = vadd.f32 %v8055_v29, %v12972_v4 }
 0x96d   :  { %v8256_v25 = vmul.f32 %v8240_v11, %v11212_v58  ;;  %v8226_v55 = vadd.f32 %v8210_v30, %v8054_v36  ;;  %v8213_v58 = vld [vmem:[#allocation5 + $0x70] sm:$0xff] }
 0x96e   :  { %v8257_v9 = vmul.f32 %v8241_v27, %v11217_v44  ;;  %v8227_v20 = vadd.f32 %v8211_v31, %v8056_v33 }
 0x96f   :  { %8275 = vst [vmem:[#allocation10 + $0x48] sm:$0xff] %v8256_v25  ;;  %v8242_v8 = vmax.f32 %v8226_v55, 0.0 }
 0x970   :  { %8276 = vst [vmem:[#allocation10 + $0x50] sm:$0xff] %v8257_v9  ;;  %v8243_v24 = vmax.f32 %v8227_v20, 0.0 }
 0x971   :  { %v8258_v50 = vmul.f32 %v8242_v8, %v11225_v21 }
 0x972   :  { %v8259_v0 = vmul.f32 %v8243_v24, %v11233_v61 }
 0x973   :  { %8277 = vst [vmem:[#allocation10 + $0x58] sm:$0xff] %v8258_v50 }
 0x974   :  { %8278 = vst [vmem:[#allocation10 + $0x60] sm:$0xff] %v8259_v0 }
 0x9d6   :  { %v8124_v6 = vpop.f32.mrb[14].mxu0 }
 0x9d7   :  { %v8125_v62 = vadd.f32 %v8124_v6, %v12972_v4  ;;  %v8126_v28 = vpop.f32.mrb[15].mxu0 }
 0x9d8   :  { %v8127_v12 = vadd.f32 %v8126_v28, %v12972_v4 }
 0x9d9   :  { %v8228_v44 = vadd.f32 %v8212_v51, %v8125_v62 }
 0x9da   :  { %v8229_v43 = vadd.f32 %v8213_v58, %v8127_v12 }
 0x9db   :  { %v8244_v15 = vmax.f32 %v8228_v44, 0.0 }
 0x9dc   :  { %v8245_v35 = vmax.f32 %v8229_v43, 0.0 }
 0x9dd   :  { %v8260_v16 = vmul.f32 %v8244_v15, %v11272_v1 }
 0x9de   :  { %v8261_v21 = vmul.f32 %v8245_v35, %v11277_v42 }
 0x9df   :  { %8279 = vst [vmem:[#allocation10 + $0x68] sm:$0xff] %v8260_v16 }
 0x9e0   :  { %8280 = vst [vmem:[#allocation10 + $0x70] sm:$0xff] %v8261_v21 }
 0x9e2   :  { %v8195_v61 = vpop.f32.mrb[14].mxu1 }
 0x9e3   :  { %v8196_v26 = vadd.f32 %v8195_v61, %v12972_v4  ;;  %v8197_v22 = vpop.f32.mrb[15].mxu1 }
 0x9e4   :  { %v8198_v59 = vadd.f32 %v8197_v22, %v12972_v4 }
 0x9e5   :  { %v8230_v57 = vadd.f32 %v8214_v41, %v8196_v26 }
 0x9e6   :  { %v8231_v13 = vadd.f32 %v8215_v47, %v8198_v59 }
 0x9e7   :  { %v8246_v23 = vmax.f32 %v8230_v57, 0.0 }
 0x9e8   :  { %v8247_v48 = vmax.f32 %v8231_v13, 0.0 }
 0x9e9   :  { %v8262_v1 = vmul.f32 %v8246_v23, %v11285_v3 }
 0x9ea   :  { %v8263_v42 = vmul.f32 %v8247_v48, %v11293_v18 }
 0x9eb   :  { %8281 = vst [vmem:[#allocation10 + $0x78] sm:$0xff] %v8262_v1 }
 0x9ec   :  { %8282 = vst.msk [vmem:[#allocation10 + $0x80] sm:$0xff] %vm161_vm1, %v8263_v42 }
 0x9ed   :  { %9262 = shalt.err (!%p9259_p6)
}
 0x9ee   :  { %s9263_s27 = scalar_lea.hbm %s13029_s6, 2304 }
 0x9ef   :  { %p9264_p7 = scmp.ne.s32.totalorder %s13029_s6, %s9263_s27  ;;  %p9267_p8 = scmp.lt.u32.totalorder %s9263_s27, %s13029_s6 }
 0x9f1   :  { %p9269_p9 = pnand %p9267_p8, %p9264_p7 }
 0x9f3   :  { %9272 = shalt.err (!%p9269_p9)
}
 0x9f4   :  { %8292 = dma.vmem_to_hbm [thread:$0]  %s8290_s23, 2304, %s13029_s6, [#allocation7]  }
 0x9f5   :  { %9277 = dma.done.wait [#allocation7], 2304  }
 0x9f6   :  { %9278 = vsyncadd [#allocation7], 4294964992 }
 0x9f7   :  { %8296 = vsyncpa [#allocation6], 1 }
 0x9f8   :  { %8297 = vsyncpa [#allocation9], 1 }
 0x9f9   :  { %8298 = vsyncpa [#allocation7], 1 }

</bundles_post_ra>
